<compile_context>
chip_gen: v7x
topology: tpu7x:2x2x1
jax: 0.10.0
libtpu: 0.0.40
codegen_flags: <defaults>
</compile_context>

<pallas_src>
import functools
import math

import jax
import jax.numpy as jnp
from jax.experimental import pallas as pl
from jax.experimental.pallas import tpu as pltpu


# ---------------------------------------------------------------------------
# Pallas kernels
# ---------------------------------------------------------------------------
def _conv_band_kernel(x_ref, w_ref, b_ref, a_ref, o_ref, *, KH, KW, TB, Wo,
                      apply_prelu):
    """Fused in-kernel im2col conv over one row band.

    x_ref: (TB+KH-1, Wo+KW-1, Cin) bf16  padded input band (halo included)
    w_ref: (KH*KW, Cin, Cout)      bf16  per-tap weight matrices
    b_ref, a_ref: (1, Cout)        f32   bias / PReLU slope
    o_ref: (TB, Wo, Cout)
    """
    Cin = x_ref.shape[-1]
    Cout = o_ref.shape[-1]
    acc = jnp.zeros((TB * Wo, Cout), jnp.float32)
    for di in range(KH):
        for dj in range(KW):
            tap = x_ref[pl.ds(di, TB), pl.ds(dj, Wo), :]
            acc = acc + jnp.dot(tap.reshape(TB * Wo, Cin),
                                w_ref[di * KW + dj],
                                preferred_element_type=jnp.float32)
    acc = acc + b_ref[0]
    if apply_prelu:
        acc = jnp.where(acc >= 0.0, acc, acc * a_ref[0])
    o_ref[...] = acc.reshape(TB, Wo, Cout).astype(o_ref.dtype)


def _deconv_band_kernel(x_ref, w_ref, b_ref, a_ref, o_ref, *, TB, Wo):
    """ConvTranspose2d(k=4,s=2,p=1) band: both row phases, interleaved store.

    x_ref: (TB+2, Wo+2, Cin) bf16   (1-padded input band)
    w_ref: (12, Cin, 2*Cout) bf16   taps indexed (ry, di, col_off)
    b_ref, a_ref: (1, 2*Cout) f32   bias / slope tiled over the rx phase
    o_ref: (TB, 2, Wo, 2*Cout)      last dim is (rx, Cout)
    """
    Cin = x_ref.shape[-1]
    C2 = o_ref.shape[-1]
    for ry in range(2):
        acc = jnp.zeros((TB * Wo, C2), jnp.float32)
        for di in range(2):
            for co in range(3):
                tap = x_ref[pl.ds(ry + di, TB), pl.ds(co, Wo), :]
                acc = acc + jnp.dot(tap.reshape(TB * Wo, Cin),
                                    w_ref[(ry * 2 + di) * 3 + co],
                                    preferred_element_type=jnp.float32)
        acc = acc + b_ref[0]
        acc = jnp.where(acc >= 0.0, acc, acc * a_ref[0])
        o_ref[:, ry, :, :] = acc.reshape(TB, Wo, C2).astype(o_ref.dtype)


def _refine_band_kernel(x_ref, w_ref, b_ref, coarse_ref, o_ref, *, TB, Wo):
    """refine_pred 3x3 conv + sigmoid fusion with coarse_res, one band.

    x_ref: (TB+2, Wo+2, C) bf16   w_ref: (9, C, 4) bf16   b_ref: (1, 4) f32
    coarse_ref: (TB, Wo, 3) f32   o_ref: (TB, Wo, 3) f32
    """
    Cin = x_ref.shape[-1]
    acc = jnp.zeros((TB * Wo, 4), jnp.float32)
    for di in range(3):
        for dj in range(3):
            tap = x_ref[pl.ds(di, TB), pl.ds(dj, Wo), :]
            acc = acc + jnp.dot(tap.reshape(TB * Wo, Cin), w_ref[di * 3 + dj],
                                preferred_element_type=jnp.float32)
    acc = acc + b_ref[0]
    res = jax.nn.sigmoid(acc[:, 0:3]) * 2.0 - 1.0
    mask = jax.nn.sigmoid(acc[:, 3:4])
    coarse = coarse_ref[...].reshape(TB * Wo, 3).astype(jnp.float32)
    out = coarse * mask + res * (1.0 - mask)
    o_ref[...] = out.reshape(TB, Wo, 3).astype(o_ref.dtype)


# ---------------------------------------------------------------------------
# Banding helpers
# ---------------------------------------------------------------------------
def _choose_band_rows(Ho, Wo, Wp, Cin, KH, target_rows=2048,
                      max_band_bytes=6 * 1024 * 1024):
    """Output rows per band: ~target_rows flattened matmul rows, VMEM-capped."""
    tb = max(1, min(Ho, max(1, target_rows // max(Wo, 1))))
    row_bytes = Wp * Cin * 2  # bf16
    while tb > 1 and (tb + KH - 1) * row_bytes > max_band_bytes:
        tb = max(1, tb // 2)
    return tb


def _build_bands(xp, TB, KH, nb):
    """xp: (N, Hp, Wp, C) -> overlapped row bands (N*nb, TB+KH-1, Wp, C)."""
    N, Hp, Wp, C = xp.shape
    TBin = TB + KH - 1
    need = nb * TB + KH - 1
    if need > Hp:
        xp = jnp.pad(xp, ((0, 0), (0, need - Hp), (0, 0), (0, 0)))
    if nb == 1:
        xb = xp[:, :TBin][:, None]
    else:
        xb = jnp.stack([xp[:, i * TB:i * TB + TBin] for i in range(nb)], axis=1)
    return xb.reshape(N * nb, TBin, Wp, C)


def _run_band_conv(xp, w_taps, b, slope, *, KH, KW, prelu, out_dtype):
    """Stride-1 KHxKW conv on a pre-padded bf16 NHWC tensor via band kernel."""
    N, Hp, Wp, Cin = xp.shape
    Ho = Hp - KH + 1
    Wo = Wp - KW + 1
    Cout = w_taps.shape[-1]

    TB = _choose_band_rows(Ho, Wo, Wp, Cin, KH)
    nb = -(-Ho // TB)
    xb = _build_bands(xp, TB, KH, nb)
    G = N * nb
    TBin = TB + KH - 1

    kernel = functools.partial(_conv_band_kernel, KH=KH, KW=KW, TB=TB, Wo=Wo,
                               apply_prelu=prelu)
    out = pl.pallas_call(
        kernel,
        out_shape=jax.ShapeDtypeStruct((G, TB, Wo, Cout), out_dtype),
        grid=(G,),
        in_specs=[
            pl.BlockSpec((None, TBin, Wp, Cin), lambda g: (g, 0, 0, 0)),
            pl.BlockSpec((KH * KW, Cin, Cout), lambda g: (0, 0, 0)),
            pl.BlockSpec((1, Cout), lambda g: (0, 0)),
            pl.BlockSpec((1, Cout), lambda g: (0, 0)),
        ],
        out_specs=pl.BlockSpec((None, TB, Wo, Cout), lambda g: (g, 0, 0, 0)),
        compiler_params=pltpu.CompilerParams(
            dimension_semantics=("parallel",)),
    )(xb, w_taps.astype(jnp.bfloat16),
      b.reshape(1, Cout).astype(jnp.float32),
      slope.reshape(1, Cout).astype(jnp.float32))

    return out.reshape(N, nb * TB, Wo, Cout)[:, :Ho]


# ---------------------------------------------------------------------------
# Conv / deconv wrappers
# ---------------------------------------------------------------------------
def conv2d_s1(x, w, b, slope, *, pad_mode="zero", prelu=True,
              out_dtype=jnp.bfloat16):
    """3x3 stride-1 conv, padding 1.  w: (3, 3, Cin, Cout)."""
    x = x.astype(jnp.bfloat16)
    mode = "edge" if pad_mode == "replicate" else "constant"
    xp = jnp.pad(x, ((0, 0), (1, 1), (1, 1), (0, 0)), mode=mode)
    KH, KW, Cin, Cout = w.shape
    return _run_band_conv(xp, w.reshape(KH * KW, Cin, Cout), b, slope,
                          KH=3, KW=3, prelu=prelu, out_dtype=out_dtype)


def conv2d_s2(x, w, b, slope, *, prelu=True, out_dtype=jnp.bfloat16):
    """3x3 stride-2 conv, padding 1 (zeros), as a 2x2 stride-1 conv over a
    space-to-depth input (so the kernel only touches kept outputs and needs
    no strided loads)."""
    x = x.astype(jnp.bfloat16)
    N, H, W, Cin = x.shape
    assert H % 2 == 0 and W % 2 == 0
    Cout = w.shape[-1]
    xp = jnp.pad(x, ((0, 0), (1, 1), (1, 1), (0, 0)))
    Hp, Wp = H + 2, W + 2
    # space-to-depth: channel index = pi*2*Cin + pj*Cin + c
    xs = xp.reshape(N, Hp // 2, 2, Wp // 2, 2, Cin)
    xs = xs.transpose(0, 1, 3, 2, 4, 5).reshape(N, Hp // 2, Wp // 2, 4 * Cin)
    # fold the 3x3 stride-2 weight into a 2x2 stride-1 weight over xs
    wf = jnp.zeros((2, 2, 4 * Cin, Cout), w.dtype)
    for DI in range(2):
        for DJ in range(2):
            for pi in range(2):
                for pj in range(2):
                    ki, kj = 2 * DI + pi, 2 * DJ + pj
                    if ki < 3 and kj < 3:
                        c0 = pi * 2 * Cin + pj * Cin
                        wf = wf.at[DI, DJ, c0:c0 + Cin, :].set(w[ki, kj])
    return _run_band_conv(xs, wf.reshape(4, 4 * Cin, Cout), b, slope,
                          KH=2, KW=2, prelu=prelu, out_dtype=out_dtype)


def conv_transpose2d(x, w_t, b, slope, *, out_dtype=jnp.bfloat16):
    """ConvTranspose2d(k=4, s=2, p=1) + PReLU via the 4-phase decomposition.
    The kernel writes both row phases into an (.., TB, 2, Wo, 2*Cout) block so
    the final pixel shuffle is a free contiguous reshape (no XLA transpose)."""
    x = x.astype(jnp.bfloat16)
    N, H, W, Cin = x.shape
    Cout = w_t.shape[1]
    xp = jnp.pad(x, ((0, 0), (1, 1), (1, 1), (0, 0)))
    Wp = W + 2

    # folded per-(row-phase, tap) weights; columns ordered (rx, cout)
    wd = jnp.zeros((2, 2, 3, Cin, 2 * Cout), w_t.dtype)
    for ry in range(2):
        for di in range(2):
            for co in range(3):
                for rx in range(2):
                    dj = co - rx
                    if 0 <= dj <= 1:
                        wd = wd.at[ry, di, co, :,
                                   rx * Cout:(rx + 1) * Cout].set(
                            w_t[:, :, 3 - ry - 2 * di, 3 - rx - 2 * dj])
    wd = wd.reshape(12, Cin, 2 * Cout)
    b2 = jnp.tile(b.reshape(-1), 2)
    a2 = jnp.tile(slope.reshape(-1), 2)

    Ho, Wo = H, W
    TB = _choose_band_rows(Ho, Wo, Wp, Cin, 3)
    nb = -(-Ho // TB)
    xb = _build_bands(xp, TB, 3, nb)
    G = N * nb
    TBin = TB + 2

    kernel = functools.partial(_deconv_band_kernel, TB=TB, Wo=Wo)
    out = pl.pallas_call(
        kernel,
        out_shape=jax.ShapeDtypeStruct((G, TB, 2, Wo, 2 * Cout), out_dtype),
        grid=(G,),
        in_specs=[
            pl.BlockSpec((None, TBin, Wp, Cin), lambda g: (g, 0, 0, 0)),
            pl.BlockSpec((12, Cin, 2 * Cout), lambda g: (0, 0, 0)),
            pl.BlockSpec((1, 2 * Cout), lambda g: (0, 0)),
            pl.BlockSpec((1, 2 * Cout), lambda g: (0, 0)),
        ],
        out_specs=pl.BlockSpec((None, TB, 2, Wo, 2 * Cout),
                               lambda g: (g, 0, 0, 0, 0)),
        compiler_params=pltpu.CompilerParams(
            dimension_semantics=("parallel",)),
    )(xb, wd.astype(jnp.bfloat16),
      b2.reshape(1, 2 * Cout).astype(jnp.float32),
      a2.reshape(1, 2 * Cout).astype(jnp.float32))

    # (N*nb, TB, 2, Wo, 2*Cout) -> (N, 2*Ho_pad, 2*Wo, Cout): contiguous regroup
    out = out.reshape(N, nb * TB * 2, Wo * 2, Cout)[:, :2 * H]
    return out


def refine_and_fuse(x, w, b, coarse):
    """refine_pred conv (3x3, replicate pad) fused with the sigmoid/coarse mix."""
    x = x.astype(jnp.bfloat16)
    N, H, W, C = x.shape
    xp = jnp.pad(x, ((0, 0), (1, 1), (1, 1), (0, 0)), mode="edge")
    Wp = W + 2
    Ho, Wo = H, W
    TB = _choose_band_rows(Ho, Wo, Wp, C, 3)
    nb = -(-Ho // TB)
    xb = _build_bands(xp, TB, 3, nb)
    TBin = TB + 2
    G = N * nb

    coarse = coarse.astype(jnp.float32)
    if nb * TB > Ho:
        coarse = jnp.pad(coarse, ((0, 0), (0, nb * TB - Ho), (0, 0), (0, 0)))
    cb = coarse.reshape(G, TB, Wo, 3)

    kernel = functools.partial(_refine_band_kernel, TB=TB, Wo=Wo)
    out = pl.pallas_call(
        kernel,
        out_shape=jax.ShapeDtypeStruct((G, TB, Wo, 3), jnp.float32),
        grid=(G,),
        in_specs=[
            pl.BlockSpec((None, TBin, Wp, C), lambda g: (g, 0, 0, 0)),
            pl.BlockSpec((9, C, 4), lambda g: (0, 0, 0)),
            pl.BlockSpec((1, 4), lambda g: (0, 0)),
            pl.BlockSpec((None, TB, Wo, 3), lambda g: (g, 0, 0, 0)),
        ],
        out_specs=pl.BlockSpec((None, TB, Wo, 3), lambda g: (g, 0, 0, 0)),
        compiler_params=pltpu.CompilerParams(
            dimension_semantics=("parallel",)),
    )(xb, w.reshape(9, C, 4).astype(jnp.bfloat16),
      b.reshape(1, 4).astype(jnp.float32), cb)
    return out.reshape(N, nb * TB, Wo, 3)[:, :Ho]


# ---------------------------------------------------------------------------
# JAX glue: softsplat (average forward-warp) and bilinear 0.5x flow resize
# ---------------------------------------------------------------------------
def softsplat_average(x, flow):
    """softsplat.FunctionSoftsplat(strType='average'); x NHWC, flow NHW2."""
    # TODO(synk): the data-dependent forward-warp scatter-add stays in XLA; a
    # Pallas equivalent needs a manual-DMA gather/scatter kernel.
    N, H, W, C = x.shape
    xf = x.astype(jnp.float32)
    inp = jnp.concatenate([xf, jnp.ones((N, H, W, 1), jnp.float32)], axis=-1)
    gx = jnp.arange(W, dtype=jnp.float32)[None, None, :] + flow[..., 0]
    gy = jnp.arange(H, dtype=jnp.float32)[None, :, None] + flow[..., 1]
    x0, y0 = jnp.floor(gx), jnp.floor(gy)
    x1, y1 = x0 + 1.0, y0 + 1.0
    corners = [
        (x0, y0, (x1 - gx) * (y1 - gy)),
        (x1, y0, (gx - x0) * (y1 - gy)),
        (x0, y1, (x1 - gx) * (gy - y0)),
        (x1, y1, (gx - x0) * (gy - y0)),
    ]
    bidx = jnp.arange(N, dtype=jnp.int32)[:, None, None] * (H * W)
    all_idx, all_upd = [], []
    for cx, cy, wgt in corners:
        ix = cx.astype(jnp.int32)
        iy = cy.astype(jnp.int32)
        valid = (ix >= 0) & (ix < W) & (iy >= 0) & (iy < H)
        wgt = jnp.where(valid, wgt, 0.0)
        idx = bidx + jnp.clip(iy, 0, H - 1) * W + jnp.clip(ix, 0, W - 1)
        all_idx.append(idx.reshape(-1))
        all_upd.append((inp * wgt[..., None]).reshape(-1, C + 1))
    idx = jnp.concatenate(all_idx, axis=0)
    upd = jnp.concatenate(all_upd, axis=0)
    out = jnp.zeros((N * H * W, C + 1), jnp.float32).at[idx].add(upd)
    out = out.reshape(N, H, W, C + 1)
    norm = out[..., C:C + 1]
    norm = jnp.where(norm == 0.0, 1.0, norm)
    return (out[..., :C] / norm).astype(x.dtype)


def downsample_flow(flow):
    """F.interpolate(scale=0.5, bilinear, align_corners=False) * 0.5."""
    N, H, W, C = flow.shape
    f = flow.reshape(N, H // 2, 2, W // 2, 2, C).mean(axis=(2, 4))
    return f * 0.5


# ---------------------------------------------------------------------------
# Parameter initialization (deterministic, synthetic)
# ---------------------------------------------------------------------------
def init_params(key, c=4):
    keys = list(jax.random.split(key, 64))
    key_iter = iter(keys)

    def conv_p(cin, cout, k=3):
        kk = next(key_iter)
        k1, k2 = jax.random.split(kk)
        bound = 1.0 / math.sqrt(cin * k * k)
        return {
            "w": jax.random.uniform(k1, (k, k, cin, cout), jnp.float32, -bound, bound),
            "b": jax.random.uniform(k2, (cout,), jnp.float32, -bound, bound),
            "a": jnp.full((cout,), 0.25, jnp.float32),     # PReLU default
        }

    def deconv_p(cin, cout, k=4):
        kk = next(key_iter)
        k1, k2 = jax.random.split(kk)
        bound = 1.0 / math.sqrt(cin * k * k)
        return {
            "w_t": jax.random.uniform(k1, (cin, cout, k, k), jnp.float32, -bound, bound),
            "b": jax.random.uniform(k2, (cout,), jnp.float32, -bound, bound),
            "a": jnp.full((cout,), 0.25, jnp.float32),
        }

    def conv2_p(cin, cout):
        return {"c0": conv_p(cin, cout, 3), "c1": conv_p(cout, cout, 3)}

    return {
        "contextnet": {
            "conv1": conv2_p(3, c),
            "conv2": conv2_p(c, 2 * c),
            "conv3": conv2_p(2 * c, 4 * c),
            "conv4": conv2_p(4 * c, 8 * c),
        },
        # TODO(synk): repo-local helpers conv4/deconv3 are not provided; modeled
        # with conv2 / deconv semantics (consistent with the /2 down, x2 up
        # shape constraints of the forward pass).
        "down1": conv2_p(7, 2 * c),
        "down2": conv2_p(4 * c, 4 * c),
        "down3": conv2_p(8 * c, 8 * c),
        "down4": conv2_p(16 * c, 16 * c),
        "up1": deconv_p(32 * c, 8 * c),
        "up2": deconv_p(16 * c, 4 * c),
        "up3": deconv_p(8 * c, 2 * c),
        "up4": deconv_p(4 * c, c),
        "refine_pred": conv_p(c, 4, 3),
        "init_res": conv_p(3, 3, 3),
    }


# ---------------------------------------------------------------------------
# Module application
# ---------------------------------------------------------------------------
def apply_conv2_block(x, p):
    x = conv2d_s2(x, p["c0"]["w"], p["c0"]["b"], p["c0"]["a"])
    x = conv2d_s1(x, p["c1"]["w"], p["c1"]["b"], p["c1"]["a"])
    return x


def apply_contextnet(params, img, flow):
    feat_pyramid = []
    feat = img
    for name in ("conv1", "conv2", "conv3", "conv4"):
        feat = apply_conv2_block(feat, params[name])
        flow = downsample_flow(flow)
        feat_pyramid.append(softsplat_average(feat, flow))
    return feat_pyramid


def fusion_net_forward(params, img0, img1, bi_flow, time_period=0.5):
    """Inputs NCHW (PyTorch convention); outputs NCHW."""
    img0 = jnp.transpose(img0, (0, 2, 3, 1)).astype(jnp.float32)
    img1 = jnp.transpose(img1, (0, 2, 3, 1)).astype(jnp.float32)
    bi_flow = jnp.transpose(bi_flow, (0, 2, 3, 1)).astype(jnp.float32)
    N = img0.shape[0]

    flow_0t = bi_flow[..., 0:2] * time_period
    flow_1t = bi_flow[..., 2:4] * (1.0 - time_period)
    flow_0t_1t = jnp.concatenate([flow_0t, flow_1t], axis=-1)

    # batch both image warps through one softsplat
    warped = softsplat_average(jnp.concatenate([img0, img1], axis=0),
                               jnp.concatenate([flow_0t, flow_1t], axis=0))
    warped_img0, warped_img1 = warped[:N], warped[N:]

    # batch the two contextnet passes along N
    ctx_in = jnp.concatenate([warped_img0 - img1, warped_img1 - img0], axis=0)
    ctx_flow = jnp.concatenate([flow_0t, flow_1t], axis=0)
    pyr = apply_contextnet(params["contextnet"],
                           ctx_in.astype(jnp.bfloat16), ctx_flow)
    c0 = [f[:N] for f in pyr]
    c1 = [f[N:] for f in pyr]

    pr = params["init_res"]
    coarse_res = conv2d_s1(warped_img1 - warped_img0, pr["w"], pr["b"], pr["a"],
                           pad_mode="replicate", prelu=False,
                           out_dtype=jnp.float32)

    d1_in = jnp.concatenate([coarse_res.astype(jnp.bfloat16),
                             flow_0t_1t.astype(jnp.bfloat16)], -1)
    s0 = apply_conv2_block(d1_in, params["down1"])
    s1 = apply_conv2_block(jnp.concatenate([s0, c0[0], c1[0]], -1),
                           params["down2"])
    s2 = apply_conv2_block(jnp.concatenate([s1, c0[1], c1[1]], -1),
                           params["down3"])
    s3 = apply_conv2_block(jnp.concatenate([s2, c0[2], c1[2]], -1),
                           params["down4"])

    def up(x, p):
        return conv_transpose2d(x, p["w_t"], p["b"], p["a"])

    x = up(jnp.concatenate([s3, c0[3], c1[3]], -1), params["up1"])
    x = up(jnp.concatenate([x, s2], -1), params["up2"])
    x = up(jnp.concatenate([x, s1], -1), params["up3"])
    x = up(jnp.concatenate([x, s0], -1), params["up4"])

    pp = params["refine_pred"]
    pred_hf = refine_and_fuse(x, pp["w"], pp["b"], coarse_res)

    # high_synthesis=False path (downsample_image / downsample_mask unused).
    to_nchw = lambda t: jnp.transpose(t, (0, 3, 1, 2))
    return to_nchw(pred_hf), to_nchw(warped_img1), to_nchw(warped_img0)


# ---------------------------------------------------------------------------
if __name__ == "__main__":
    key = jax.random.PRNGKey(0)
    kp, k0, k1, kf = jax.random.split(key, 4)

    params = init_params(kp, c=4)

    N, H, W = 2, 16, 16
    img0 = jax.random.uniform(k0, (N, 3, H, W), jnp.float32)
    img1 = jax.random.uniform(k1, (N, 3, H, W), jnp.float32)
    bi_flow = jax.random.normal(kf, (N, 4, H, W), jnp.float32) * 2.0

    fwd = jax.jit(fusion_net_forward)
    pred_hf, warped_img1, warped_img0 = fwd(params, img0, img1, bi_flow)
    jax.block_until_ready((pred_hf, warped_img1, warped_img0))

    assert pred_hf.shape == (N, 3, H, W)
    assert warped_img1.shape == (N, 3, H, W)
    assert warped_img0.shape == (N, 3, H, W)
    assert bool(jnp.all(jnp.isfinite(pred_hf)))
    print("KERNEL_OK")
</pallas_src>

<mosaic_0001>
module attributes {stable_mosaic.version = 11 : i64} {
  func.func @_conv_band_kernel(%arg0: i32, %arg1: memref<1x18x18x3xbf16, #tpu.memory_space<vmem>>, %arg2: memref<9x3x3xbf16, #tpu.memory_space<vmem>>, %arg3: memref<1x3xf32, #tpu.memory_space<vmem>>, %arg4: memref<1x3xf32, #tpu.memory_space<vmem>>, %arg5: memref<1x16x16x3xf32, #tpu.memory_space<vmem>>) attributes {dimension_semantics = [#tpu.dimension_semantics<parallel>], iteration_bounds = array<i64: 2>, scalar_prefetch = 0 : i64, scratch_operands = 0 : i64, tpu.core_type = #tpu.core_type<tc>, window_params = [{transform_indices = @transform_0, window_bounds = array<i64: 1, 18, 18, 3>}, {pipeline_mode = #tpu.pipeline_mode<synchronous>, transform_indices = @transform_1, window_bounds = array<i64: 9, 3, 3>}, {pipeline_mode = #tpu.pipeline_mode<synchronous>, transform_indices = @transform_2, window_bounds = array<i64: 1, 3>}, {pipeline_mode = #tpu.pipeline_mode<synchronous>, transform_indices = @transform_3, window_bounds = array<i64: 1, 3>}, {transform_indices = @transform_4, window_bounds = array<i64: 1, 16, 16, 3>}]} {
    %cst = arith.constant 0.000000e+00 : f32
    %0 = vector.broadcast %cst : f32 to vector<256x3xf32>
    %c0 = arith.constant 0 : index
    %c0_0 = arith.constant 0 : index
    %c0_1 = arith.constant 0 : index
    %c0_2 = arith.constant 0 : index
    %1 = vector.load %arg1[%c0, %c0_0, %c0_1, %c0_2] : memref<1x18x18x3xbf16, #tpu.memory_space<vmem>>, vector<1x16x16x3xbf16>
    %2 = vector.shape_cast %1 : vector<1x16x16x3xbf16> to vector<16x16x3xbf16>
    %3 = vector.shape_cast %2 : vector<16x16x3xbf16> to vector<256x3xbf16>
    %c0_3 = arith.constant 0 : index
    %c0_4 = arith.constant 0 : index
    %c0_5 = arith.constant 0 : index
    %4 = vector.load %arg2[%c0_3, %c0_4, %c0_5] : memref<9x3x3xbf16, #tpu.memory_space<vmem>>, vector<1x3x3xbf16>
    %5 = vector.shape_cast %4 : vector<1x3x3xbf16> to vector<3x3xbf16>
    %cst_6 = arith.constant dense<0.000000e+00> : vector<256x3xf32>
    %6 = tpu.matmul %3, %5, %cst_6 {dimension_numbers = #tpu.dot_dimension_numbers<[1], [0], [0], [1], [0, 0, 1, 1], [], []>} : vector<256x3xbf16>, vector<3x3xbf16>, vector<256x3xf32> -> vector<256x3xf32>
    %7 = arith.addf %0, %6 : vector<256x3xf32>
    %c0_7 = arith.constant 0 : index
    %c0_8 = arith.constant 0 : index
    %c1 = arith.constant 1 : index
    %c0_9 = arith.constant 0 : index
    %8 = vector.load %arg1[%c0_7, %c0_8, %c1, %c0_9] : memref<1x18x18x3xbf16, #tpu.memory_space<vmem>>, vector<1x16x16x3xbf16>
    %9 = vector.shape_cast %8 : vector<1x16x16x3xbf16> to vector<16x16x3xbf16>
    %10 = vector.shape_cast %9 : vector<16x16x3xbf16> to vector<256x3xbf16>
    %c1_10 = arith.constant 1 : index
    %c0_11 = arith.constant 0 : index
    %c0_12 = arith.constant 0 : index
    %11 = vector.load %arg2[%c1_10, %c0_11, %c0_12] : memref<9x3x3xbf16, #tpu.memory_space<vmem>>, vector<1x3x3xbf16>
    %12 = vector.shape_cast %11 : vector<1x3x3xbf16> to vector<3x3xbf16>
    %cst_13 = arith.constant dense<0.000000e+00> : vector<256x3xf32>
    %13 = tpu.matmul %10, %12, %cst_13 {dimension_numbers = #tpu.dot_dimension_numbers<[1], [0], [0], [1], [0, 0, 1, 1], [], []>} : vector<256x3xbf16>, vector<3x3xbf16>, vector<256x3xf32> -> vector<256x3xf32>
    %14 = arith.addf %7, %13 : vector<256x3xf32>
    %c0_14 = arith.constant 0 : index
    %c0_15 = arith.constant 0 : index
    %c2 = arith.constant 2 : index
    %c0_16 = arith.constant 0 : index
    %15 = vector.load %arg1[%c0_14, %c0_15, %c2, %c0_16] : memref<1x18x18x3xbf16, #tpu.memory_space<vmem>>, vector<1x16x16x3xbf16>
    %16 = vector.shape_cast %15 : vector<1x16x16x3xbf16> to vector<16x16x3xbf16>
    %17 = vector.shape_cast %16 : vector<16x16x3xbf16> to vector<256x3xbf16>
    %c2_17 = arith.constant 2 : index
    %c0_18 = arith.constant 0 : index
    %c0_19 = arith.constant 0 : index
    %18 = vector.load %arg2[%c2_17, %c0_18, %c0_19] : memref<9x3x3xbf16, #tpu.memory_space<vmem>>, vector<1x3x3xbf16>
    %19 = vector.shape_cast %18 : vector<1x3x3xbf16> to vector<3x3xbf16>
    %cst_20 = arith.constant dense<0.000000e+00> : vector<256x3xf32>
    %20 = tpu.matmul %17, %19, %cst_20 {dimension_numbers = #tpu.dot_dimension_numbers<[1], [0], [0], [1], [0, 0, 1, 1], [], []>} : vector<256x3xbf16>, vector<3x3xbf16>, vector<256x3xf32> -> vector<256x3xf32>
    %21 = arith.addf %14, %20 : vector<256x3xf32>
    %c0_21 = arith.constant 0 : index
    %c1_22 = arith.constant 1 : index
    %c0_23 = arith.constant 0 : index
    %c0_24 = arith.constant 0 : index
    %22 = vector.load %arg1[%c0_21, %c1_22, %c0_23, %c0_24] : memref<1x18x18x3xbf16, #tpu.memory_space<vmem>>, vector<1x16x16x3xbf16>
    %23 = vector.shape_cast %22 : vector<1x16x16x3xbf16> to vector<16x16x3xbf16>
    %24 = vector.shape_cast %23 : vector<16x16x3xbf16> to vector<256x3xbf16>
    %c3 = arith.constant 3 : index
    %c0_25 = arith.constant 0 : index
    %c0_26 = arith.constant 0 : index
    %25 = vector.load %arg2[%c3, %c0_25, %c0_26] : memref<9x3x3xbf16, #tpu.memory_space<vmem>>, vector<1x3x3xbf16>
    %26 = vector.shape_cast %25 : vector<1x3x3xbf16> to vector<3x3xbf16>
    %cst_27 = arith.constant dense<0.000000e+00> : vector<256x3xf32>
    %27 = tpu.matmul %24, %26, %cst_27 {dimension_numbers = #tpu.dot_dimension_numbers<[1], [0], [0], [1], [0, 0, 1, 1], [], []>} : vector<256x3xbf16>, vector<3x3xbf16>, vector<256x3xf32> -> vector<256x3xf32>
    %28 = arith.addf %21, %27 : vector<256x3xf32>
    %c0_28 = arith.constant 0 : index
    %c1_29 = arith.constant 1 : index
    %c1_30 = arith.constant 1 : index
    %c0_31 = arith.constant 0 : index
    %29 = vector.load %arg1[%c0_28, %c1_29, %c1_30, %c0_31] : memref<1x18x18x3xbf16, #tpu.memory_space<vmem>>, vector<1x16x16x3xbf16>
    %30 = vector.shape_cast %29 : vector<1x16x16x3xbf16> to vector<16x16x3xbf16>
    %31 = vector.shape_cast %30 : vector<16x16x3xbf16> to vector<256x3xbf16>
    %c4 = arith.constant 4 : index
    %c0_32 = arith.constant 0 : index
    %c0_33 = arith.constant 0 : index
    %32 = vector.load %arg2[%c4, %c0_32, %c0_33] : memref<9x3x3xbf16, #tpu.memory_space<vmem>>, vector<1x3x3xbf16>
    %33 = vector.shape_cast %32 : vector<1x3x3xbf16> to vector<3x3xbf16>
    %cst_34 = arith.constant dense<0.000000e+00> : vector<256x3xf32>
    %34 = tpu.matmul %31, %33, %cst_34 {dimension_numbers = #tpu.dot_dimension_numbers<[1], [0], [0], [1], [0, 0, 1, 1], [], []>} : vector<256x3xbf16>, vector<3x3xbf16>, vector<256x3xf32> -> vector<256x3xf32>
    %35 = arith.addf %28, %34 : vector<256x3xf32>
    %c0_35 = arith.constant 0 : index
    %c1_36 = arith.constant 1 : index
    %c2_37 = arith.constant 2 : index
    %c0_38 = arith.constant 0 : index
    %36 = vector.load %arg1[%c0_35, %c1_36, %c2_37, %c0_38] : memref<1x18x18x3xbf16, #tpu.memory_space<vmem>>, vector<1x16x16x3xbf16>
    %37 = vector.shape_cast %36 : vector<1x16x16x3xbf16> to vector<16x16x3xbf16>
    %38 = vector.shape_cast %37 : vector<16x16x3xbf16> to vector<256x3xbf16>
    %c5 = arith.constant 5 : index
    %c0_39 = arith.constant 0 : index
    %c0_40 = arith.constant 0 : index
    %39 = vector.load %arg2[%c5, %c0_39, %c0_40] : memref<9x3x3xbf16, #tpu.memory_space<vmem>>, vector<1x3x3xbf16>
    %40 = vector.shape_cast %39 : vector<1x3x3xbf16> to vector<3x3xbf16>
    %cst_41 = arith.constant dense<0.000000e+00> : vector<256x3xf32>
    %41 = tpu.matmul %38, %40, %cst_41 {dimension_numbers = #tpu.dot_dimension_numbers<[1], [0], [0], [1], [0, 0, 1, 1], [], []>} : vector<256x3xbf16>, vector<3x3xbf16>, vector<256x3xf32> -> vector<256x3xf32>
    %42 = arith.addf %35, %41 : vector<256x3xf32>
    %c0_42 = arith.constant 0 : index
    %c2_43 = arith.constant 2 : index
    %c0_44 = arith.constant 0 : index
    %c0_45 = arith.constant 0 : index
    %43 = vector.load %arg1[%c0_42, %c2_43, %c0_44, %c0_45] : memref<1x18x18x3xbf16, #tpu.memory_space<vmem>>, vector<1x16x16x3xbf16>
    %44 = vector.shape_cast %43 : vector<1x16x16x3xbf16> to vector<16x16x3xbf16>
    %45 = vector.shape_cast %44 : vector<16x16x3xbf16> to vector<256x3xbf16>
    %c6 = arith.constant 6 : index
    %c0_46 = arith.constant 0 : index
    %c0_47 = arith.constant 0 : index
    %46 = vector.load %arg2[%c6, %c0_46, %c0_47] : memref<9x3x3xbf16, #tpu.memory_space<vmem>>, vector<1x3x3xbf16>
    %47 = vector.shape_cast %46 : vector<1x3x3xbf16> to vector<3x3xbf16>
    %cst_48 = arith.constant dense<0.000000e+00> : vector<256x3xf32>
    %48 = tpu.matmul %45, %47, %cst_48 {dimension_numbers = #tpu.dot_dimension_numbers<[1], [0], [0], [1], [0, 0, 1, 1], [], []>} : vector<256x3xbf16>, vector<3x3xbf16>, vector<256x3xf32> -> vector<256x3xf32>
    %49 = arith.addf %42, %48 : vector<256x3xf32>
    %c0_49 = arith.constant 0 : index
    %c2_50 = arith.constant 2 : index
    %c1_51 = arith.constant 1 : index
    %c0_52 = arith.constant 0 : index
    %50 = vector.load %arg1[%c0_49, %c2_50, %c1_51, %c0_52] : memref<1x18x18x3xbf16, #tpu.memory_space<vmem>>, vector<1x16x16x3xbf16>
    %51 = vector.shape_cast %50 : vector<1x16x16x3xbf16> to vector<16x16x3xbf16>
    %52 = vector.shape_cast %51 : vector<16x16x3xbf16> to vector<256x3xbf16>
    %c7 = arith.constant 7 : index
    %c0_53 = arith.constant 0 : index
    %c0_54 = arith.constant 0 : index
    %53 = vector.load %arg2[%c7, %c0_53, %c0_54] : memref<9x3x3xbf16, #tpu.memory_space<vmem>>, vector<1x3x3xbf16>
    %54 = vector.shape_cast %53 : vector<1x3x3xbf16> to vector<3x3xbf16>
    %cst_55 = arith.constant dense<0.000000e+00> : vector<256x3xf32>
    %55 = tpu.matmul %52, %54, %cst_55 {dimension_numbers = #tpu.dot_dimension_numbers<[1], [0], [0], [1], [0, 0, 1, 1], [], []>} : vector<256x3xbf16>, vector<3x3xbf16>, vector<256x3xf32> -> vector<256x3xf32>
    %56 = arith.addf %49, %55 : vector<256x3xf32>
    %c0_56 = arith.constant 0 : index
    %c2_57 = arith.constant 2 : index
    %c2_58 = arith.constant 2 : index
    %c0_59 = arith.constant 0 : index
    %57 = vector.load %arg1[%c0_56, %c2_57, %c2_58, %c0_59] : memref<1x18x18x3xbf16, #tpu.memory_space<vmem>>, vector<1x16x16x3xbf16>
    %58 = vector.shape_cast %57 : vector<1x16x16x3xbf16> to vector<16x16x3xbf16>
    %59 = vector.shape_cast %58 : vector<16x16x3xbf16> to vector<256x3xbf16>
    %c8 = arith.constant 8 : index
    %c0_60 = arith.constant 0 : index
    %c0_61 = arith.constant 0 : index
    %60 = vector.load %arg2[%c8, %c0_60, %c0_61] : memref<9x3x3xbf16, #tpu.memory_space<vmem>>, vector<1x3x3xbf16>
    %61 = vector.shape_cast %60 : vector<1x3x3xbf16> to vector<3x3xbf16>
    %cst_62 = arith.constant dense<0.000000e+00> : vector<256x3xf32>
    %62 = tpu.matmul %59, %61, %cst_62 {dimension_numbers = #tpu.dot_dimension_numbers<[1], [0], [0], [1], [0, 0, 1, 1], [], []>} : vector<256x3xbf16>, vector<3x3xbf16>, vector<256x3xf32> -> vector<256x3xf32>
    %63 = arith.addf %56, %62 : vector<256x3xf32>
    %c0_63 = arith.constant 0 : index
    %c0_64 = arith.constant 0 : index
    %64 = vector.load %arg3[%c0_63, %c0_64] : memref<1x3xf32, #tpu.memory_space<vmem>>, vector<1x3xf32>
    %65 = vector.shape_cast %64 : vector<1x3xf32> to vector<3xf32>
    %66 = vector.shape_cast %65 : vector<3xf32> to vector<1x3xf32>
    %67 = vector.broadcast %66 : vector<1x3xf32> to vector<256x3xf32>
    %68 = arith.addf %63, %67 : vector<256x3xf32>
    %69 = vector.shape_cast %68 : vector<256x3xf32> to vector<16x16x3xf32>
    %c0_65 = arith.constant 0 : index
    %c0_66 = arith.constant 0 : index
    %c0_67 = arith.constant 0 : index
    %c0_68 = arith.constant 0 : index
    %70 = vector.load %arg5[%c0_65, %c0_66, %c0_67, %c0_68] : memref<1x16x16x3xf32, #tpu.memory_space<vmem>>, vector<1x16x16x3xf32>
    %71 = vector.shape_cast %70 : vector<1x16x16x3xf32> to vector<16x16x3xf32>
    %72 = vector.shape_cast %69 : vector<16x16x3xf32> to vector<1x16x16x3xf32>
    tpu.vector_store %arg5[%c0_65, %c0_66, %c0_67, %c0_68], %72 {strides = array<i32>} : memref<1x16x16x3xf32, #tpu.memory_space<vmem>>, vector<1x16x16x3xf32>,
    return
  }
  func.func @transform_0(%arg0: i32) -> (i32, i32, i32, i32) {
    %c0_i32 = arith.constant 0 : i32
    %c0_i32_0 = arith.constant 0 : i32
    %c0_i32_1 = arith.constant 0 : i32
    %c0_i32_2 = arith.constant 0 : i32
    return %arg0, %c0_i32, %c0_i32_0, %c0_i32_1 : i32, i32, i32, i32
  }
  func.func @transform_1(%arg0: i32) -> (i32, i32, i32) {
    %c0_i32 = arith.constant 0 : i32
    %c0_i32_0 = arith.constant 0 : i32
    %c0_i32_1 = arith.constant 0 : i32
    %c0_i32_2 = arith.constant 0 : i32
    return %c0_i32, %c0_i32_0, %c0_i32_1 : i32, i32, i32
  }
  func.func @transform_2(%arg0: i32) -> (i32, i32) {
    %c0_i32 = arith.constant 0 : i32
    %c0_i32_0 = arith.constant 0 : i32
    %c0_i32_1 = arith.constant 0 : i32
    return %c0_i32, %c0_i32_0 : i32, i32
  }
  func.func @transform_3(%arg0: i32) -> (i32, i32) {
    %c0_i32 = arith.constant 0 : i32
    %c0_i32_0 = arith.constant 0 : i32
    %c0_i32_1 = arith.constant 0 : i32
    return %c0_i32, %c0_i32_0 : i32, i32
  }
  func.func @transform_4(%arg0: i32) -> (i32, i32, i32, i32) {
    %c0_i32 = arith.constant 0 : i32
    %c0_i32_0 = arith.constant 0 : i32
    %c0_i32_1 = arith.constant 0 : i32
    %c0_i32_2 = arith.constant 0 : i32
    return %arg0, %c0_i32, %c0_i32_0, %c0_i32_1 : i32, i32, i32, i32
  }
}

module attributes {stable_mosaic.version = 11 : i64} {
  func.func @_conv_band_kernel(%arg0: i32, %arg1: memref<1x9x9x28xbf16, #tpu.memory_space<vmem>>, %arg2: memref<4x28x8xbf16, #tpu.memory_space<vmem>>, %arg3: memref<1x8xf32, #tpu.memory_space<vmem>>, %arg4: memref<1x8xf32, #tpu.memory_space<vmem>>, %arg5: memref<1x8x8x8xbf16, #tpu.memory_space<vmem>>) attributes {dimension_semantics = [#tpu.dimension_semantics<parallel>], iteration_bounds = array<i64: 2>, scalar_prefetch = 0 : i64, scratch_operands = 0 : i64, tpu.core_type = #tpu.core_type<tc>, window_params = [{transform_indices = @transform_0, window_bounds = array<i64: 1, 9, 9, 28>}, {pipeline_mode = #tpu.pipeline_mode<synchronous>, transform_indices = @transform_1, window_bounds = array<i64: 4, 28, 8>}, {pipeline_mode = #tpu.pipeline_mode<synchronous>, transform_indices = @transform_2, window_bounds = array<i64: 1, 8>}, {pipeline_mode = #tpu.pipeline_mode<synchronous>, transform_indices = @transform_3, window_bounds = array<i64: 1, 8>}, {transform_indices = @transform_4, window_bounds = array<i64: 1, 8, 8, 8>}]} {
    %cst = arith.constant 0.000000e+00 : f32
    %0 = vector.broadcast %cst : f32 to vector<64x8xf32>
    %c0 = arith.constant 0 : index
    %c0_0 = arith.constant 0 : index
    %c0_1 = arith.constant 0 : index
    %c0_2 = arith.constant 0 : index
    %1 = vector.load %arg1[%c0, %c0_0, %c0_1, %c0_2] : memref<1x9x9x28xbf16, #tpu.memory_space<vmem>>, vector<1x8x8x28xbf16>
    %2 = vector.shape_cast %1 : vector<1x8x8x28xbf16> to vector<8x8x28xbf16>
    %3 = vector.shape_cast %2 : vector<8x8x28xbf16> to vector<64x28xbf16>
    %c0_3 = arith.constant 0 : index
    %c0_4 = arith.constant 0 : index
    %c0_5 = arith.constant 0 : index
    %4 = vector.load %arg2[%c0_3, %c0_4, %c0_5] : memref<4x28x8xbf16, #tpu.memory_space<vmem>>, vector<1x28x8xbf16>
    %5 = vector.shape_cast %4 : vector<1x28x8xbf16> to vector<28x8xbf16>
    %cst_6 = arith.constant dense<0.000000e+00> : vector<64x8xf32>
    %6 = tpu.matmul %3, %5, %cst_6 {dimension_numbers = #tpu.dot_dimension_numbers<[1], [0], [0], [1], [0, 0, 1, 1], [], []>} : vector<64x28xbf16>, vector<28x8xbf16>, vector<64x8xf32> -> vector<64x8xf32>
    %7 = arith.addf %0, %6 : vector<64x8xf32>
    %c0_7 = arith.constant 0 : index
    %c0_8 = arith.constant 0 : index
    %c1 = arith.constant 1 : index
    %c0_9 = arith.constant 0 : index
    %8 = vector.load %arg1[%c0_7, %c0_8, %c1, %c0_9] : memref<1x9x9x28xbf16, #tpu.memory_space<vmem>>, vector<1x8x8x28xbf16>
    %9 = vector.shape_cast %8 : vector<1x8x8x28xbf16> to vector<8x8x28xbf16>
    %10 = vector.shape_cast %9 : vector<8x8x28xbf16> to vector<64x28xbf16>
    %c1_10 = arith.constant 1 : index
    %c0_11 = arith.constant 0 : index
    %c0_12 = arith.constant 0 : index
    %11 = vector.load %arg2[%c1_10, %c0_11, %c0_12] : memref<4x28x8xbf16, #tpu.memory_space<vmem>>, vector<1x28x8xbf16>
    %12 = vector.shape_cast %11 : vector<1x28x8xbf16> to vector<28x8xbf16>
    %cst_13 = arith.constant dense<0.000000e+00> : vector<64x8xf32>
    %13 = tpu.matmul %10, %12, %cst_13 {dimension_numbers = #tpu.dot_dimension_numbers<[1], [0], [0], [1], [0, 0, 1, 1], [], []>} : vector<64x28xbf16>, vector<28x8xbf16>, vector<64x8xf32> -> vector<64x8xf32>
    %14 = arith.addf %7, %13 : vector<64x8xf32>
    %c0_14 = arith.constant 0 : index
    %c1_15 = arith.constant 1 : index
    %c0_16 = arith.constant 0 : index
    %c0_17 = arith.constant 0 : index
    %15 = vector.load %arg1[%c0_14, %c1_15, %c0_16, %c0_17] : memref<1x9x9x28xbf16, #tpu.memory_space<vmem>>, vector<1x8x8x28xbf16>
    %16 = vector.shape_cast %15 : vector<1x8x8x28xbf16> to vector<8x8x28xbf16>
    %17 = vector.shape_cast %16 : vector<8x8x28xbf16> to vector<64x28xbf16>
    %c2 = arith.constant 2 : index
    %c0_18 = arith.constant 0 : index
    %c0_19 = arith.constant 0 : index
    %18 = vector.load %arg2[%c2, %c0_18, %c0_19] : memref<4x28x8xbf16, #tpu.memory_space<vmem>>, vector<1x28x8xbf16>
    %19 = vector.shape_cast %18 : vector<1x28x8xbf16> to vector<28x8xbf16>
    %cst_20 = arith.constant dense<0.000000e+00> : vector<64x8xf32>
    %20 = tpu.matmul %17, %19, %cst_20 {dimension_numbers = #tpu.dot_dimension_numbers<[1], [0], [0], [1], [0, 0, 1, 1], [], []>} : vector<64x28xbf16>, vector<28x8xbf16>, vector<64x8xf32> -> vector<64x8xf32>
    %21 = arith.addf %14, %20 : vector<64x8xf32>
    %c0_21 = arith.constant 0 : index
    %c1_22 = arith.constant 1 : index
    %c1_23 = arith.constant 1 : index
    %c0_24 = arith.constant 0 : index
    %22 = vector.load %arg1[%c0_21, %c1_22, %c1_23, %c0_24] : memref<1x9x9x28xbf16, #tpu.memory_space<vmem>>, vector<1x8x8x28xbf16>
    %23 = vector.shape_cast %22 : vector<1x8x8x28xbf16> to vector<8x8x28xbf16>
    %24 = vector.shape_cast %23 : vector<8x8x28xbf16> to vector<64x28xbf16>
    %c3 = arith.constant 3 : index
    %c0_25 = arith.constant 0 : index
    %c0_26 = arith.constant 0 : index
    %25 = vector.load %arg2[%c3, %c0_25, %c0_26] : memref<4x28x8xbf16, #tpu.memory_space<vmem>>, vector<1x28x8xbf16>
    %26 = vector.shape_cast %25 : vector<1x28x8xbf16> to vector<28x8xbf16>
    %cst_27 = arith.constant dense<0.000000e+00> : vector<64x8xf32>
    %27 = tpu.matmul %24, %26, %cst_27 {dimension_numbers = #tpu.dot_dimension_numbers<[1], [0], [0], [1], [0, 0, 1, 1], [], []>} : vector<64x28xbf16>, vector<28x8xbf16>, vector<64x8xf32> -> vector<64x8xf32>
    %28 = arith.addf %21, %27 : vector<64x8xf32>
    %c0_28 = arith.constant 0 : index
    %c0_29 = arith.constant 0 : index
    %29 = vector.load %arg3[%c0_28, %c0_29] : memref<1x8xf32, #tpu.memory_space<vmem>>, vector<1x8xf32>
    %30 = vector.shape_cast %29 : vector<1x8xf32> to vector<8xf32>
    %31 = vector.shape_cast %30 : vector<8xf32> to vector<1x8xf32>
    %32 = vector.broadcast %31 : vector<1x8xf32> to vector<64x8xf32>
    %33 = arith.addf %28, %32 : vector<64x8xf32>
    %cst_30 = arith.constant 0.000000e+00 : f32
    %34 = vector.broadcast %cst_30 : f32 to vector<64x8xf32>
    %35 = arith.cmpf oge, %33, %34 : vector<64x8xf32>
    %c0_31 = arith.constant 0 : index
    %c0_32 = arith.constant 0 : index
    %36 = vector.load %arg4[%c0_31, %c0_32] : memref<1x8xf32, #tpu.memory_space<vmem>>, vector<1x8xf32>
    %37 = vector.shape_cast %36 : vector<1x8xf32> to vector<8xf32>
    %38 = vector.shape_cast %37 : vector<8xf32> to vector<1x8xf32>
    %39 = vector.broadcast %38 : vector<1x8xf32> to vector<64x8xf32>
    %40 = arith.mulf %33, %39 : vector<64x8xf32>
    %41 = arith.select %35, %33, %40 : vector<64x8xi1>, vector<64x8xf32>
    %42 = vector.shape_cast %41 : vector<64x8xf32> to vector<8x8x8xf32>
    %43 = arith.truncf %42 : vector<8x8x8xf32> to vector<8x8x8xbf16>
    %c0_33 = arith.constant 0 : index
    %c0_34 = arith.constant 0 : index
    %c0_35 = arith.constant 0 : index
    %c0_36 = arith.constant 0 : index
    %44 = vector.load %arg5[%c0_33, %c0_34, %c0_35, %c0_36] : memref<1x8x8x8xbf16, #tpu.memory_space<vmem>>, vector<1x8x8x8xbf16>
    %45 = vector.shape_cast %44 : vector<1x8x8x8xbf16> to vector<8x8x8xbf16>
    %46 = vector.shape_cast %43 : vector<8x8x8xbf16> to vector<1x8x8x8xbf16>
    tpu.vector_store %arg5[%c0_33, %c0_34, %c0_35, %c0_36], %46 {strides = array<i32>} : memref<1x8x8x8xbf16, #tpu.memory_space<vmem>>, vector<1x8x8x8xbf16>,
    return
  }
  func.func @transform_0(%arg0: i32) -> (i32, i32, i32, i32) {
    %c0_i32 = arith.constant 0 : i32
    %c0_i32_0 = arith.constant 0 : i32
    %c0_i32_1 = arith.constant 0 : i32
    %c0_i32_2 = arith.constant 0 : i32
    return %arg0, %c0_i32, %c0_i32_0, %c0_i32_1 : i32, i32, i32, i32
  }
  func.func @transform_1(%arg0: i32) -> (i32, i32, i32) {
    %c0_i32 = arith.constant 0 : i32
    %c0_i32_0 = arith.constant 0 : i32
    %c0_i32_1 = arith.constant 0 : i32
    %c0_i32_2 = arith.constant 0 : i32
    return %c0_i32, %c0_i32_0, %c0_i32_1 : i32, i32, i32
  }
  func.func @transform_2(%arg0: i32) -> (i32, i32) {
    %c0_i32 = arith.constant 0 : i32
    %c0_i32_0 = arith.constant 0 : i32
    %c0_i32_1 = arith.constant 0 : i32
    return %c0_i32, %c0_i32_0 : i32, i32
  }
  func.func @transform_3(%arg0: i32) -> (i32, i32) {
    %c0_i32 = arith.constant 0 : i32
    %c0_i32_0 = arith.constant 0 : i32
    %c0_i32_1 = arith.constant 0 : i32
    return %c0_i32, %c0_i32_0 : i32, i32
  }
  func.func @transform_4(%arg0: i32) -> (i32, i32, i32, i32) {
    %c0_i32 = arith.constant 0 : i32
    %c0_i32_0 = arith.constant 0 : i32
    %c0_i32_1 = arith.constant 0 : i32
    %c0_i32_2 = arith.constant 0 : i32
    return %arg0, %c0_i32, %c0_i32_0, %c0_i32_1 : i32, i32, i32, i32
  }
}

module attributes {stable_mosaic.version = 11 : i64} {
  func.func @_conv_band_kernel(%arg0: i32, %arg1: memref<1x10x10x8xbf16, #tpu.memory_space<vmem>>, %arg2: memref<9x8x8xbf16, #tpu.memory_space<vmem>>, %arg3: memref<1x8xf32, #tpu.memory_space<vmem>>, %arg4: memref<1x8xf32, #tpu.memory_space<vmem>>, %arg5: memref<1x8x8x8xbf16, #tpu.memory_space<vmem>>) attributes {dimension_semantics = [#tpu.dimension_semantics<parallel>], iteration_bounds = array<i64: 2>, scalar_prefetch = 0 : i64, scratch_operands = 0 : i64, tpu.core_type = #tpu.core_type<tc>, window_params = [{transform_indices = @transform_0, window_bounds = array<i64: 1, 10, 10, 8>}, {pipeline_mode = #tpu.pipeline_mode<synchronous>, transform_indices = @transform_1, window_bounds = array<i64: 9, 8, 8>}, {pipeline_mode = #tpu.pipeline_mode<synchronous>, transform_indices = @transform_2, window_bounds = array<i64: 1, 8>}, {pipeline_mode = #tpu.pipeline_mode<synchronous>, transform_indices = @transform_3, window_bounds = array<i64: 1, 8>}, {transform_indices = @transform_4, window_bounds = array<i64: 1, 8, 8, 8>}]} {
    %cst = arith.constant 0.000000e+00 : f32
    %0 = vector.broadcast %cst : f32 to vector<64x8xf32>
    %c0 = arith.constant 0 : index
    %c0_0 = arith.constant 0 : index
    %c0_1 = arith.constant 0 : index
    %c0_2 = arith.constant 0 : index
    %1 = vector.load %arg1[%c0, %c0_0, %c0_1, %c0_2] : memref<1x10x10x8xbf16, #tpu.memory_space<vmem>>, vector<1x8x8x8xbf16>
    %2 = vector.shape_cast %1 : vector<1x8x8x8xbf16> to vector<8x8x8xbf16>
    %3 = vector.shape_cast %2 : vector<8x8x8xbf16> to vector<64x8xbf16>
    %c0_3 = arith.constant 0 : index
    %c0_4 = arith.constant 0 : index
    %c0_5 = arith.constant 0 : index
    %4 = vector.load %arg2[%c0_3, %c0_4, %c0_5] : memref<9x8x8xbf16, #tpu.memory_space<vmem>>, vector<1x8x8xbf16>
    %5 = vector.shape_cast %4 : vector<1x8x8xbf16> to vector<8x8xbf16>
    %cst_6 = arith.constant dense<0.000000e+00> : vector<64x8xf32>
    %6 = tpu.matmul %3, %5, %cst_6 {dimension_numbers = #tpu.dot_dimension_numbers<[1], [0], [0], [1], [0, 0, 1, 1], [], []>} : vector<64x8xbf16>, vector<8x8xbf16>, vector<64x8xf32> -> vector<64x8xf32>
    %7 = arith.addf %0, %6 : vector<64x8xf32>
    %c0_7 = arith.constant 0 : index
    %c0_8 = arith.constant 0 : index
    %c1 = arith.constant 1 : index
    %c0_9 = arith.constant 0 : index
    %8 = vector.load %arg1[%c0_7, %c0_8, %c1, %c0_9] : memref<1x10x10x8xbf16, #tpu.memory_space<vmem>>, vector<1x8x8x8xbf16>
    %9 = vector.shape_cast %8 : vector<1x8x8x8xbf16> to vector<8x8x8xbf16>
    %10 = vector.shape_cast %9 : vector<8x8x8xbf16> to vector<64x8xbf16>
    %c1_10 = arith.constant 1 : index
    %c0_11 = arith.constant 0 : index
    %c0_12 = arith.constant 0 : index
    %11 = vector.load %arg2[%c1_10, %c0_11, %c0_12] : memref<9x8x8xbf16, #tpu.memory_space<vmem>>, vector<1x8x8xbf16>
    %12 = vector.shape_cast %11 : vector<1x8x8xbf16> to vector<8x8xbf16>
    %cst_13 = arith.constant dense<0.000000e+00> : vector<64x8xf32>
    %13 = tpu.matmul %10, %12, %cst_13 {dimension_numbers = #tpu.dot_dimension_numbers<[1], [0], [0], [1], [0, 0, 1, 1], [], []>} : vector<64x8xbf16>, vector<8x8xbf16>, vector<64x8xf32> -> vector<64x8xf32>
    %14 = arith.addf %7, %13 : vector<64x8xf32>
    %c0_14 = arith.constant 0 : index
    %c0_15 = arith.constant 0 : index
    %c2 = arith.constant 2 : index
    %c0_16 = arith.constant 0 : index
    %15 = vector.load %arg1[%c0_14, %c0_15, %c2, %c0_16] : memref<1x10x10x8xbf16, #tpu.memory_space<vmem>>, vector<1x8x8x8xbf16>
    %16 = vector.shape_cast %15 : vector<1x8x8x8xbf16> to vector<8x8x8xbf16>
    %17 = vector.shape_cast %16 : vector<8x8x8xbf16> to vector<64x8xbf16>
    %c2_17 = arith.constant 2 : index
    %c0_18 = arith.constant 0 : index
    %c0_19 = arith.constant 0 : index
    %18 = vector.load %arg2[%c2_17, %c0_18, %c0_19] : memref<9x8x8xbf16, #tpu.memory_space<vmem>>, vector<1x8x8xbf16>
    %19 = vector.shape_cast %18 : vector<1x8x8xbf16> to vector<8x8xbf16>
    %cst_20 = arith.constant dense<0.000000e+00> : vector<64x8xf32>
    %20 = tpu.matmul %17, %19, %cst_20 {dimension_numbers = #tpu.dot_dimension_numbers<[1], [0], [0], [1], [0, 0, 1, 1], [], []>} : vector<64x8xbf16>, vector<8x8xbf16>, vector<64x8xf32> -> vector<64x8xf32>
    %21 = arith.addf %14, %20 : vector<64x8xf32>
    %c0_21 = arith.constant 0 : index
    %c1_22 = arith.constant 1 : index
    %c0_23 = arith.constant 0 : index
    %c0_24 = arith.constant 0 : index
    %22 = vector.load %arg1[%c0_21, %c1_22, %c0_23, %c0_24] : memref<1x10x10x8xbf16, #tpu.memory_space<vmem>>, vector<1x8x8x8xbf16>
    %23 = vector.shape_cast %22 : vector<1x8x8x8xbf16> to vector<8x8x8xbf16>
    %24 = vector.shape_cast %23 : vector<8x8x8xbf16> to vector<64x8xbf16>
    %c3 = arith.constant 3 : index
    %c0_25 = arith.constant 0 : index
    %c0_26 = arith.constant 0 : index
    %25 = vector.load %arg2[%c3, %c0_25, %c0_26] : memref<9x8x8xbf16, #tpu.memory_space<vmem>>, vector<1x8x8xbf16>
    %26 = vector.shape_cast %25 : vector<1x8x8xbf16> to vector<8x8xbf16>
    %cst_27 = arith.constant dense<0.000000e+00> : vector<64x8xf32>
    %27 = tpu.matmul %24, %26, %cst_27 {dimension_numbers = #tpu.dot_dimension_numbers<[1], [0], [0], [1], [0, 0, 1, 1], [], []>} : vector<64x8xbf16>, vector<8x8xbf16>, vector<64x8xf32> -> vector<64x8xf32>
    %28 = arith.addf %21, %27 : vector<64x8xf32>
    %c0_28 = arith.constant 0 : index
    %c1_29 = arith.constant 1 : index
    %c1_30 = arith.constant 1 : index
    %c0_31 = arith.constant 0 : index
    %29 = vector.load %arg1[%c0_28, %c1_29, %c1_30, %c0_31] : memref<1x10x10x8xbf16, #tpu.memory_space<vmem>>, vector<1x8x8x8xbf16>
    %30 = vector.shape_cast %29 : vector<1x8x8x8xbf16> to vector<8x8x8xbf16>
    %31 = vector.shape_cast %30 : vector<8x8x8xbf16> to vector<64x8xbf16>
    %c4 = arith.constant 4 : index
    %c0_32 = arith.constant 0 : index
    %c0_33 = arith.constant 0 : index
    %32 = vector.load %arg2[%c4, %c0_32, %c0_33] : memref<9x8x8xbf16, #tpu.memory_space<vmem>>, vector<1x8x8xbf16>
    %33 = vector.shape_cast %32 : vector<1x8x8xbf16> to vector<8x8xbf16>
    %cst_34 = arith.constant dense<0.000000e+00> : vector<64x8xf32>
    %34 = tpu.matmul %31, %33, %cst_34 {dimension_numbers = #tpu.dot_dimension_numbers<[1], [0], [0], [1], [0, 0, 1, 1], [], []>} : vector<64x8xbf16>, vector<8x8xbf16>, vector<64x8xf32> -> vector<64x8xf32>
    %35 = arith.addf %28, %34 : vector<64x8xf32>
    %c0_35 = arith.constant 0 : index
    %c1_36 = arith.constant 1 : index
    %c2_37 = arith.constant 2 : index
    %c0_38 = arith.constant 0 : index
    %36 = vector.load %arg1[%c0_35, %c1_36, %c2_37, %c0_38] : memref<1x10x10x8xbf16, #tpu.memory_space<vmem>>, vector<1x8x8x8xbf16>
    %37 = vector.shape_cast %36 : vector<1x8x8x8xbf16> to vector<8x8x8xbf16>
    %38 = vector.shape_cast %37 : vector<8x8x8xbf16> to vector<64x8xbf16>
    %c5 = arith.constant 5 : index
    %c0_39 = arith.constant 0 : index
    %c0_40 = arith.constant 0 : index
    %39 = vector.load %arg2[%c5, %c0_39, %c0_40] : memref<9x8x8xbf16, #tpu.memory_space<vmem>>, vector<1x8x8xbf16>
    %40 = vector.shape_cast %39 : vector<1x8x8xbf16> to vector<8x8xbf16>
    %cst_41 = arith.constant dense<0.000000e+00> : vector<64x8xf32>
    %41 = tpu.matmul %38, %40, %cst_41 {dimension_numbers = #tpu.dot_dimension_numbers<[1], [0], [0], [1], [0, 0, 1, 1], [], []>} : vector<64x8xbf16>, vector<8x8xbf16>, vector<64x8xf32> -> vector<64x8xf32>
    %42 = arith.addf %35, %41 : vector<64x8xf32>
    %c0_42 = arith.constant 0 : index
    %c2_43 = arith.constant 2 : index
    %c0_44 = arith.constant 0 : index
    %c0_45 = arith.constant 0 : index
    %43 = vector.load %arg1[%c0_42, %c2_43, %c0_44, %c0_45] : memref<1x10x10x8xbf16, #tpu.memory_space<vmem>>, vector<1x8x8x8xbf16>
    %44 = vector.shape_cast %43 : vector<1x8x8x8xbf16> to vector<8x8x8xbf16>
    %45 = vector.shape_cast %44 : vector<8x8x8xbf16> to vector<64x8xbf16>
    %c6 = arith.constant 6 : index
    %c0_46 = arith.constant 0 : index
    %c0_47 = arith.constant 0 : index
    %46 = vector.load %arg2[%c6, %c0_46, %c0_47] : memref<9x8x8xbf16, #tpu.memory_space<vmem>>, vector<1x8x8xbf16>
    %47 = vector.shape_cast %46 : vector<1x8x8xbf16> to vector<8x8xbf16>
    %cst_48 = arith.constant dense<0.000000e+00> : vector<64x8xf32>
    %48 = tpu.matmul %45, %47, %cst_48 {dimension_numbers = #tpu.dot_dimension_numbers<[1], [0], [0], [1], [0, 0, 1, 1], [], []>} : vector<64x8xbf16>, vector<8x8xbf16>, vector<64x8xf32> -> vector<64x8xf32>
    %49 = arith.addf %42, %48 : vector<64x8xf32>
    %c0_49 = arith.constant 0 : index
    %c2_50 = arith.constant 2 : index
    %c1_51 = arith.constant 1 : index
    %c0_52 = arith.constant 0 : index
    %50 = vector.load %arg1[%c0_49, %c2_50, %c1_51, %c0_52] : memref<1x10x10x8xbf16, #tpu.memory_space<vmem>>, vector<1x8x8x8xbf16>
    %51 = vector.shape_cast %50 : vector<1x8x8x8xbf16> to vector<8x8x8xbf16>
    %52 = vector.shape_cast %51 : vector<8x8x8xbf16> to vector<64x8xbf16>
    %c7 = arith.constant 7 : index
    %c0_53 = arith.constant 0 : index
    %c0_54 = arith.constant 0 : index
    %53 = vector.load %arg2[%c7, %c0_53, %c0_54] : memref<9x8x8xbf16, #tpu.memory_space<vmem>>, vector<1x8x8xbf16>
    %54 = vector.shape_cast %53 : vector<1x8x8xbf16> to vector<8x8xbf16>
    %cst_55 = arith.constant dense<0.000000e+00> : vector<64x8xf32>
    %55 = tpu.matmul %52, %54, %cst_55 {dimension_numbers = #tpu.dot_dimension_numbers<[1], [0], [0], [1], [0, 0, 1, 1], [], []>} : vector<64x8xbf16>, vector<8x8xbf16>, vector<64x8xf32> -> vector<64x8xf32>
    %56 = arith.addf %49, %55 : vector<64x8xf32>
    %c0_56 = arith.constant 0 : index
    %c2_57 = arith.constant 2 : index
    %c2_58 = arith.constant 2 : index
    %c0_59 = arith.constant 0 : index
    %57 = vector.load %arg1[%c0_56, %c2_57, %c2_58, %c0_59] : memref<1x10x10x8xbf16, #tpu.memory_space<vmem>>, vector<1x8x8x8xbf16>
    %58 = vector.shape_cast %57 : vector<1x8x8x8xbf16> to vector<8x8x8xbf16>
    %59 = vector.shape_cast %58 : vector<8x8x8xbf16> to vector<64x8xbf16>
    %c8 = arith.constant 8 : index
    %c0_60 = arith.constant 0 : index
    %c0_61 = arith.constant 0 : index
    %60 = vector.load %arg2[%c8, %c0_60, %c0_61] : memref<9x8x8xbf16, #tpu.memory_space<vmem>>, vector<1x8x8xbf16>
    %61 = vector.shape_cast %60 : vector<1x8x8xbf16> to vector<8x8xbf16>
    %cst_62 = arith.constant dense<0.000000e+00> : vector<64x8xf32>
    %62 = tpu.matmul %59, %61, %cst_62 {dimension_numbers = #tpu.dot_dimension_numbers<[1], [0], [0], [1], [0, 0, 1, 1], [], []>} : vector<64x8xbf16>, vector<8x8xbf16>, vector<64x8xf32> -> vector<64x8xf32>
    %63 = arith.addf %56, %62 : vector<64x8xf32>
    %c0_63 = arith.constant 0 : index
    %c0_64 = arith.constant 0 : index
    %64 = vector.load %arg3[%c0_63, %c0_64] : memref<1x8xf32, #tpu.memory_space<vmem>>, vector<1x8xf32>
    %65 = vector.shape_cast %64 : vector<1x8xf32> to vector<8xf32>
    %66 = vector.shape_cast %65 : vector<8xf32> to vector<1x8xf32>
    %67 = vector.broadcast %66 : vector<1x8xf32> to vector<64x8xf32>
    %68 = arith.addf %63, %67 : vector<64x8xf32>
    %cst_65 = arith.constant 0.000000e+00 : f32
    %69 = vector.broadcast %cst_65 : f32 to vector<64x8xf32>
    %70 = arith.cmpf oge, %68, %69 : vector<64x8xf32>
    %c0_66 = arith.constant 0 : index
    %c0_67 = arith.constant 0 : index
    %71 = vector.load %arg4[%c0_66, %c0_67] : memref<1x8xf32, #tpu.memory_space<vmem>>, vector<1x8xf32>
    %72 = vector.shape_cast %71 : vector<1x8xf32> to vector<8xf32>
    %73 = vector.shape_cast %72 : vector<8xf32> to vector<1x8xf32>
    %74 = vector.broadcast %73 : vector<1x8xf32> to vector<64x8xf32>
    %75 = arith.mulf %68, %74 : vector<64x8xf32>
    %76 = arith.select %70, %68, %75 : vector<64x8xi1>, vector<64x8xf32>
    %77 = vector.shape_cast %76 : vector<64x8xf32> to vector<8x8x8xf32>
    %78 = arith.truncf %77 : vector<8x8x8xf32> to vector<8x8x8xbf16>
    %c0_68 = arith.constant 0 : index
    %c0_69 = arith.constant 0 : index
    %c0_70 = arith.constant 0 : index
    %c0_71 = arith.constant 0 : index
    %79 = vector.load %arg5[%c0_68, %c0_69, %c0_70, %c0_71] : memref<1x8x8x8xbf16, #tpu.memory_space<vmem>>, vector<1x8x8x8xbf16>
    %80 = vector.shape_cast %79 : vector<1x8x8x8xbf16> to vector<8x8x8xbf16>
    %81 = vector.shape_cast %78 : vector<8x8x8xbf16> to vector<1x8x8x8xbf16>
    tpu.vector_store %arg5[%c0_68, %c0_69, %c0_70, %c0_71], %81 {strides = array<i32>} : memref<1x8x8x8xbf16, #tpu.memory_space<vmem>>, vector<1x8x8x8xbf16>,
    return
  }
  func.func @transform_0(%arg0: i32) -> (i32, i32, i32, i32) {
    %c0_i32 = arith.constant 0 : i32
    %c0_i32_0 = arith.constant 0 : i32
    %c0_i32_1 = arith.constant 0 : i32
    %c0_i32_2 = arith.constant 0 : i32
    return %arg0, %c0_i32, %c0_i32_0, %c0_i32_1 : i32, i32, i32, i32
  }
  func.func @transform_1(%arg0: i32) -> (i32, i32, i32) {
    %c0_i32 = arith.constant 0 : i32
    %c0_i32_0 = arith.constant 0 : i32
    %c0_i32_1 = arith.constant 0 : i32
    %c0_i32_2 = arith.constant 0 : i32
    return %c0_i32, %c0_i32_0, %c0_i32_1 : i32, i32, i32
  }
  func.func @transform_2(%arg0: i32) -> (i32, i32) {
    %c0_i32 = arith.constant 0 : i32
    %c0_i32_0 = arith.constant 0 : i32
    %c0_i32_1 = arith.constant 0 : i32
    return %c0_i32, %c0_i32_0 : i32, i32
  }
  func.func @transform_3(%arg0: i32) -> (i32, i32) {
    %c0_i32 = arith.constant 0 : i32
    %c0_i32_0 = arith.constant 0 : i32
    %c0_i32_1 = arith.constant 0 : i32
    return %c0_i32, %c0_i32_0 : i32, i32
  }
  func.func @transform_4(%arg0: i32) -> (i32, i32, i32, i32) {
    %c0_i32 = arith.constant 0 : i32
    %c0_i32_0 = arith.constant 0 : i32
    %c0_i32_1 = arith.constant 0 : i32
    %c0_i32_2 = arith.constant 0 : i32
    return %arg0, %c0_i32, %c0_i32_0, %c0_i32_1 : i32, i32, i32, i32
  }
}

module attributes {stable_mosaic.version = 11 : i64} {
  func.func @_conv_band_kernel(%arg0: i32, %arg1: memref<1x9x9x12xbf16, #tpu.memory_space<vmem>>, %arg2: memref<4x12x4xbf16, #tpu.memory_space<vmem>>, %arg3: memref<1x4xf32, #tpu.memory_space<vmem>>, %arg4: memref<1x4xf32, #tpu.memory_space<vmem>>, %arg5: memref<1x8x8x4xbf16, #tpu.memory_space<vmem>>) attributes {dimension_semantics = [#tpu.dimension_semantics<parallel>], iteration_bounds = array<i64: 4>, scalar_prefetch = 0 : i64, scratch_operands = 0 : i64, tpu.core_type = #tpu.core_type<tc>, window_params = [{transform_indices = @transform_0, window_bounds = array<i64: 1, 9, 9, 12>}, {pipeline_mode = #tpu.pipeline_mode<synchronous>, transform_indices = @transform_1, window_bounds = array<i64: 4, 12, 4>}, {pipeline_mode = #tpu.pipeline_mode<synchronous>, transform_indices = @transform_2, window_bounds = array<i64: 1, 4>}, {pipeline_mode = #tpu.pipeline_mode<synchronous>, transform_indices = @transform_3, window_bounds = array<i64: 1, 4>}, {transform_indices = @transform_4, window_bounds = array<i64: 1, 8, 8, 4>}]} {
    %cst = arith.constant 0.000000e+00 : f32
    %0 = vector.broadcast %cst : f32 to vector<64x4xf32>
    %c0 = arith.constant 0 : index
    %c0_0 = arith.constant 0 : index
    %c0_1 = arith.constant 0 : index
    %c0_2 = arith.constant 0 : index
    %1 = vector.load %arg1[%c0, %c0_0, %c0_1, %c0_2] : memref<1x9x9x12xbf16, #tpu.memory_space<vmem>>, vector<1x8x8x12xbf16>
    %2 = vector.shape_cast %1 : vector<1x8x8x12xbf16> to vector<8x8x12xbf16>
    %3 = vector.shape_cast %2 : vector<8x8x12xbf16> to vector<64x12xbf16>
    %c0_3 = arith.constant 0 : index
    %c0_4 = arith.constant 0 : index
    %c0_5 = arith.constant 0 : index
    %4 = vector.load %arg2[%c0_3, %c0_4, %c0_5] : memref<4x12x4xbf16, #tpu.memory_space<vmem>>, vector<1x12x4xbf16>
    %5 = vector.shape_cast %4 : vector<1x12x4xbf16> to vector<12x4xbf16>
    %cst_6 = arith.constant dense<0.000000e+00> : vector<64x4xf32>
    %6 = tpu.matmul %3, %5, %cst_6 {dimension_numbers = #tpu.dot_dimension_numbers<[1], [0], [0], [1], [0, 0, 1, 1], [], []>} : vector<64x12xbf16>, vector<12x4xbf16>, vector<64x4xf32> -> vector<64x4xf32>
    %7 = arith.addf %0, %6 : vector<64x4xf32>
    %c0_7 = arith.constant 0 : index
    %c0_8 = arith.constant 0 : index
    %c1 = arith.constant 1 : index
    %c0_9 = arith.constant 0 : index
    %8 = vector.load %arg1[%c0_7, %c0_8, %c1, %c0_9] : memref<1x9x9x12xbf16, #tpu.memory_space<vmem>>, vector<1x8x8x12xbf16>
    %9 = vector.shape_cast %8 : vector<1x8x8x12xbf16> to vector<8x8x12xbf16>
    %10 = vector.shape_cast %9 : vector<8x8x12xbf16> to vector<64x12xbf16>
    %c1_10 = arith.constant 1 : index
    %c0_11 = arith.constant 0 : index
    %c0_12 = arith.constant 0 : index
    %11 = vector.load %arg2[%c1_10, %c0_11, %c0_12] : memref<4x12x4xbf16, #tpu.memory_space<vmem>>, vector<1x12x4xbf16>
    %12 = vector.shape_cast %11 : vector<1x12x4xbf16> to vector<12x4xbf16>
    %cst_13 = arith.constant dense<0.000000e+00> : vector<64x4xf32>
    %13 = tpu.matmul %10, %12, %cst_13 {dimension_numbers = #tpu.dot_dimension_numbers<[1], [0], [0], [1], [0, 0, 1, 1], [], []>} : vector<64x12xbf16>, vector<12x4xbf16>, vector<64x4xf32> -> vector<64x4xf32>
    %14 = arith.addf %7, %13 : vector<64x4xf32>
    %c0_14 = arith.constant 0 : index
    %c1_15 = arith.constant 1 : index
    %c0_16 = arith.constant 0 : index
    %c0_17 = arith.constant 0 : index
    %15 = vector.load %arg1[%c0_14, %c1_15, %c0_16, %c0_17] : memref<1x9x9x12xbf16, #tpu.memory_space<vmem>>, vector<1x8x8x12xbf16>
    %16 = vector.shape_cast %15 : vector<1x8x8x12xbf16> to vector<8x8x12xbf16>
    %17 = vector.shape_cast %16 : vector<8x8x12xbf16> to vector<64x12xbf16>
    %c2 = arith.constant 2 : index
    %c0_18 = arith.constant 0 : index
    %c0_19 = arith.constant 0 : index
    %18 = vector.load %arg2[%c2, %c0_18, %c0_19] : memref<4x12x4xbf16, #tpu.memory_space<vmem>>, vector<1x12x4xbf16>
    %19 = vector.shape_cast %18 : vector<1x12x4xbf16> to vector<12x4xbf16>
    %cst_20 = arith.constant dense<0.000000e+00> : vector<64x4xf32>
    %20 = tpu.matmul %17, %19, %cst_20 {dimension_numbers = #tpu.dot_dimension_numbers<[1], [0], [0], [1], [0, 0, 1, 1], [], []>} : vector<64x12xbf16>, vector<12x4xbf16>, vector<64x4xf32> -> vector<64x4xf32>
    %21 = arith.addf %14, %20 : vector<64x4xf32>
    %c0_21 = arith.constant 0 : index
    %c1_22 = arith.constant 1 : index
    %c1_23 = arith.constant 1 : index
    %c0_24 = arith.constant 0 : index
    %22 = vector.load %arg1[%c0_21, %c1_22, %c1_23, %c0_24] : memref<1x9x9x12xbf16, #tpu.memory_space<vmem>>, vector<1x8x8x12xbf16>
    %23 = vector.shape_cast %22 : vector<1x8x8x12xbf16> to vector<8x8x12xbf16>
    %24 = vector.shape_cast %23 : vector<8x8x12xbf16> to vector<64x12xbf16>
    %c3 = arith.constant 3 : index
    %c0_25 = arith.constant 0 : index
    %c0_26 = arith.constant 0 : index
    %25 = vector.load %arg2[%c3, %c0_25, %c0_26] : memref<4x12x4xbf16, #tpu.memory_space<vmem>>, vector<1x12x4xbf16>
    %26 = vector.shape_cast %25 : vector<1x12x4xbf16> to vector<12x4xbf16>
    %cst_27 = arith.constant dense<0.000000e+00> : vector<64x4xf32>
    %27 = tpu.matmul %24, %26, %cst_27 {dimension_numbers = #tpu.dot_dimension_numbers<[1], [0], [0], [1], [0, 0, 1, 1], [], []>} : vector<64x12xbf16>, vector<12x4xbf16>, vector<64x4xf32> -> vector<64x4xf32>
    %28 = arith.addf %21, %27 : vector<64x4xf32>
    %c0_28 = arith.constant 0 : index
    %c0_29 = arith.constant 0 : index
    %29 = vector.load %arg3[%c0_28, %c0_29] : memref<1x4xf32, #tpu.memory_space<vmem>>, vector<1x4xf32>
    %30 = vector.shape_cast %29 : vector<1x4xf32> to vector<4xf32>
    %31 = vector.shape_cast %30 : vector<4xf32> to vector<1x4xf32>
    %32 = vector.broadcast %31 : vector<1x4xf32> to vector<64x4xf32>
    %33 = arith.addf %28, %32 : vector<64x4xf32>
    %cst_30 = arith.constant 0.000000e+00 : f32
    %34 = vector.broadcast %cst_30 : f32 to vector<64x4xf32>
    %35 = arith.cmpf oge, %33, %34 : vector<64x4xf32>
    %c0_31 = arith.constant 0 : index
    %c0_32 = arith.constant 0 : index
    %36 = vector.load %arg4[%c0_31, %c0_32] : memref<1x4xf32, #tpu.memory_space<vmem>>, vector<1x4xf32>
    %37 = vector.shape_cast %36 : vector<1x4xf32> to vector<4xf32>
    %38 = vector.shape_cast %37 : vector<4xf32> to vector<1x4xf32>
    %39 = vector.broadcast %38 : vector<1x4xf32> to vector<64x4xf32>
    %40 = arith.mulf %33, %39 : vector<64x4xf32>
    %41 = arith.select %35, %33, %40 : vector<64x4xi1>, vector<64x4xf32>
    %42 = vector.shape_cast %41 : vector<64x4xf32> to vector<8x8x4xf32>
    %43 = arith.truncf %42 : vector<8x8x4xf32> to vector<8x8x4xbf16>
    %c0_33 = arith.constant 0 : index
    %c0_34 = arith.constant 0 : index
    %c0_35 = arith.constant 0 : index
    %c0_36 = arith.constant 0 : index
    %44 = vector.load %arg5[%c0_33, %c0_34, %c0_35, %c0_36] : memref<1x8x8x4xbf16, #tpu.memory_space<vmem>>, vector<1x8x8x4xbf16>
    %45 = vector.shape_cast %44 : vector<1x8x8x4xbf16> to vector<8x8x4xbf16>
    %46 = vector.shape_cast %43 : vector<8x8x4xbf16> to vector<1x8x8x4xbf16>
    tpu.vector_store %arg5[%c0_33, %c0_34, %c0_35, %c0_36], %46 {strides = array<i32>} : memref<1x8x8x4xbf16, #tpu.memory_space<vmem>>, vector<1x8x8x4xbf16>,
    return
  }
  func.func @transform_0(%arg0: i32) -> (i32, i32, i32, i32) {
    %c0_i32 = arith.constant 0 : i32
    %c0_i32_0 = arith.constant 0 : i32
    %c0_i32_1 = arith.constant 0 : i32
    %c0_i32_2 = arith.constant 0 : i32
    return %arg0, %c0_i32, %c0_i32_0, %c0_i32_1 : i32, i32, i32, i32
  }
  func.func @transform_1(%arg0: i32) -> (i32, i32, i32) {
    %c0_i32 = arith.constant 0 : i32
    %c0_i32_0 = arith.constant 0 : i32
    %c0_i32_1 = arith.constant 0 : i32
    %c0_i32_2 = arith.constant 0 : i32
    return %c0_i32, %c0_i32_0, %c0_i32_1 : i32, i32, i32
  }
  func.func @transform_2(%arg0: i32) -> (i32, i32) {
    %c0_i32 = arith.constant 0 : i32
    %c0_i32_0 = arith.constant 0 : i32
    %c0_i32_1 = arith.constant 0 : i32
    return %c0_i32, %c0_i32_0 : i32, i32
  }
  func.func @transform_3(%arg0: i32) -> (i32, i32) {
    %c0_i32 = arith.constant 0 : i32
    %c0_i32_0 = arith.constant 0 : i32
    %c0_i32_1 = arith.constant 0 : i32
    return %c0_i32, %c0_i32_0 : i32, i32
  }
  func.func @transform_4(%arg0: i32) -> (i32, i32, i32, i32) {
    %c0_i32 = arith.constant 0 : i32
    %c0_i32_0 = arith.constant 0 : i32
    %c0_i32_1 = arith.constant 0 : i32
    %c0_i32_2 = arith.constant 0 : i32
    return %arg0, %c0_i32, %c0_i32_0, %c0_i32_1 : i32, i32, i32, i32
  }
}

module attributes {stable_mosaic.version = 11 : i64} {
  func.func @_conv_band_kernel(%arg0: i32, %arg1: memref<1x10x10x4xbf16, #tpu.memory_space<vmem>>, %arg2: memref<9x4x4xbf16, #tpu.memory_space<vmem>>, %arg3: memref<1x4xf32, #tpu.memory_space<vmem>>, %arg4: memref<1x4xf32, #tpu.memory_space<vmem>>, %arg5: memref<1x8x8x4xbf16, #tpu.memory_space<vmem>>) attributes {dimension_semantics = [#tpu.dimension_semantics<parallel>], iteration_bounds = array<i64: 4>, scalar_prefetch = 0 : i64, scratch_operands = 0 : i64, tpu.core_type = #tpu.core_type<tc>, window_params = [{transform_indices = @transform_0, window_bounds = array<i64: 1, 10, 10, 4>}, {pipeline_mode = #tpu.pipeline_mode<synchronous>, transform_indices = @transform_1, window_bounds = array<i64: 9, 4, 4>}, {pipeline_mode = #tpu.pipeline_mode<synchronous>, transform_indices = @transform_2, window_bounds = array<i64: 1, 4>}, {pipeline_mode = #tpu.pipeline_mode<synchronous>, transform_indices = @transform_3, window_bounds = array<i64: 1, 4>}, {transform_indices = @transform_4, window_bounds = array<i64: 1, 8, 8, 4>}]} {
    %cst = arith.constant 0.000000e+00 : f32
    %0 = vector.broadcast %cst : f32 to vector<64x4xf32>
    %c0 = arith.constant 0 : index
    %c0_0 = arith.constant 0 : index
    %c0_1 = arith.constant 0 : index
    %c0_2 = arith.constant 0 : index
    %1 = vector.load %arg1[%c0, %c0_0, %c0_1, %c0_2] : memref<1x10x10x4xbf16, #tpu.memory_space<vmem>>, vector<1x8x8x4xbf16>
    %2 = vector.shape_cast %1 : vector<1x8x8x4xbf16> to vector<8x8x4xbf16>
    %3 = vector.shape_cast %2 : vector<8x8x4xbf16> to vector<64x4xbf16>
    %c0_3 = arith.constant 0 : index
    %c0_4 = arith.constant 0 : index
    %c0_5 = arith.constant 0 : index
    %4 = vector.load %arg2[%c0_3, %c0_4, %c0_5] : memref<9x4x4xbf16, #tpu.memory_space<vmem>>, vector<1x4x4xbf16>
    %5 = vector.shape_cast %4 : vector<1x4x4xbf16> to vector<4x4xbf16>
    %cst_6 = arith.constant dense<0.000000e+00> : vector<64x4xf32>
    %6 = tpu.matmul %3, %5, %cst_6 {dimension_numbers = #tpu.dot_dimension_numbers<[1], [0], [0], [1], [0, 0, 1, 1], [], []>} : vector<64x4xbf16>, vector<4x4xbf16>, vector<64x4xf32> -> vector<64x4xf32>
    %7 = arith.addf %0, %6 : vector<64x4xf32>
    %c0_7 = arith.constant 0 : index
    %c0_8 = arith.constant 0 : index
    %c1 = arith.constant 1 : index
    %c0_9 = arith.constant 0 : index
    %8 = vector.load %arg1[%c0_7, %c0_8, %c1, %c0_9] : memref<1x10x10x4xbf16, #tpu.memory_space<vmem>>, vector<1x8x8x4xbf16>
    %9 = vector.shape_cast %8 : vector<1x8x8x4xbf16> to vector<8x8x4xbf16>
    %10 = vector.shape_cast %9 : vector<8x8x4xbf16> to vector<64x4xbf16>
    %c1_10 = arith.constant 1 : index
    %c0_11 = arith.constant 0 : index
    %c0_12 = arith.constant 0 : index
    %11 = vector.load %arg2[%c1_10, %c0_11, %c0_12] : memref<9x4x4xbf16, #tpu.memory_space<vmem>>, vector<1x4x4xbf16>
    %12 = vector.shape_cast %11 : vector<1x4x4xbf16> to vector<4x4xbf16>
    %cst_13 = arith.constant dense<0.000000e+00> : vector<64x4xf32>
    %13 = tpu.matmul %10, %12, %cst_13 {dimension_numbers = #tpu.dot_dimension_numbers<[1], [0], [0], [1], [0, 0, 1, 1], [], []>} : vector<64x4xbf16>, vector<4x4xbf16>, vector<64x4xf32> -> vector<64x4xf32>
    %14 = arith.addf %7, %13 : vector<64x4xf32>
    %c0_14 = arith.constant 0 : index
    %c0_15 = arith.constant 0 : index
    %c2 = arith.constant 2 : index
    %c0_16 = arith.constant 0 : index
    %15 = vector.load %arg1[%c0_14, %c0_15, %c2, %c0_16] : memref<1x10x10x4xbf16, #tpu.memory_space<vmem>>, vector<1x8x8x4xbf16>
    %16 = vector.shape_cast %15 : vector<1x8x8x4xbf16> to vector<8x8x4xbf16>
    %17 = vector.shape_cast %16 : vector<8x8x4xbf16> to vector<64x4xbf16>
    %c2_17 = arith.constant 2 : index
    %c0_18 = arith.constant 0 : index
    %c0_19 = arith.constant 0 : index
    %18 = vector.load %arg2[%c2_17, %c0_18, %c0_19] : memref<9x4x4xbf16, #tpu.memory_space<vmem>>, vector<1x4x4xbf16>
    %19 = vector.shape_cast %18 : vector<1x4x4xbf16> to vector<4x4xbf16>
    %cst_20 = arith.constant dense<0.000000e+00> : vector<64x4xf32>
    %20 = tpu.matmul %17, %19, %cst_20 {dimension_numbers = #tpu.dot_dimension_numbers<[1], [0], [0], [1], [0, 0, 1, 1], [], []>} : vector<64x4xbf16>, vector<4x4xbf16>, vector<64x4xf32> -> vector<64x4xf32>
    %21 = arith.addf %14, %20 : vector<64x4xf32>
    %c0_21 = arith.constant 0 : index
    %c1_22 = arith.constant 1 : index
    %c0_23 = arith.constant 0 : index
    %c0_24 = arith.constant 0 : index
    %22 = vector.load %arg1[%c0_21, %c1_22, %c0_23, %c0_24] : memref<1x10x10x4xbf16, #tpu.memory_space<vmem>>, vector<1x8x8x4xbf16>
    %23 = vector.shape_cast %22 : vector<1x8x8x4xbf16> to vector<8x8x4xbf16>
    %24 = vector.shape_cast %23 : vector<8x8x4xbf16> to vector<64x4xbf16>
    %c3 = arith.constant 3 : index
    %c0_25 = arith.constant 0 : index
    %c0_26 = arith.constant 0 : index
    %25 = vector.load %arg2[%c3, %c0_25, %c0_26] : memref<9x4x4xbf16, #tpu.memory_space<vmem>>, vector<1x4x4xbf16>
    %26 = vector.shape_cast %25 : vector<1x4x4xbf16> to vector<4x4xbf16>
    %cst_27 = arith.constant dense<0.000000e+00> : vector<64x4xf32>
    %27 = tpu.matmul %24, %26, %cst_27 {dimension_numbers = #tpu.dot_dimension_numbers<[1], [0], [0], [1], [0, 0, 1, 1], [], []>} : vector<64x4xbf16>, vector<4x4xbf16>, vector<64x4xf32> -> vector<64x4xf32>
    %28 = arith.addf %21, %27 : vector<64x4xf32>
    %c0_28 = arith.constant 0 : index
    %c1_29 = arith.constant 1 : index
    %c1_30 = arith.constant 1 : index
    %c0_31 = arith.constant 0 : index
    %29 = vector.load %arg1[%c0_28, %c1_29, %c1_30, %c0_31] : memref<1x10x10x4xbf16, #tpu.memory_space<vmem>>, vector<1x8x8x4xbf16>
    %30 = vector.shape_cast %29 : vector<1x8x8x4xbf16> to vector<8x8x4xbf16>
    %31 = vector.shape_cast %30 : vector<8x8x4xbf16> to vector<64x4xbf16>
    %c4 = arith.constant 4 : index
    %c0_32 = arith.constant 0 : index
    %c0_33 = arith.constant 0 : index
    %32 = vector.load %arg2[%c4, %c0_32, %c0_33] : memref<9x4x4xbf16, #tpu.memory_space<vmem>>, vector<1x4x4xbf16>
    %33 = vector.shape_cast %32 : vector<1x4x4xbf16> to vector<4x4xbf16>
    %cst_34 = arith.constant dense<0.000000e+00> : vector<64x4xf32>
    %34 = tpu.matmul %31, %33, %cst_34 {dimension_numbers = #tpu.dot_dimension_numbers<[1], [0], [0], [1], [0, 0, 1, 1], [], []>} : vector<64x4xbf16>, vector<4x4xbf16>, vector<64x4xf32> -> vector<64x4xf32>
    %35 = arith.addf %28, %34 : vector<64x4xf32>
    %c0_35 = arith.constant 0 : index
    %c1_36 = arith.constant 1 : index
    %c2_37 = arith.constant 2 : index
    %c0_38 = arith.constant 0 : index
    %36 = vector.load %arg1[%c0_35, %c1_36, %c2_37, %c0_38] : memref<1x10x10x4xbf16, #tpu.memory_space<vmem>>, vector<1x8x8x4xbf16>
    %37 = vector.shape_cast %36 : vector<1x8x8x4xbf16> to vector<8x8x4xbf16>
    %38 = vector.shape_cast %37 : vector<8x8x4xbf16> to vector<64x4xbf16>
    %c5 = arith.constant 5 : index
    %c0_39 = arith.constant 0 : index
    %c0_40 = arith.constant 0 : index
    %39 = vector.load %arg2[%c5, %c0_39, %c0_40] : memref<9x4x4xbf16, #tpu.memory_space<vmem>>, vector<1x4x4xbf16>
    %40 = vector.shape_cast %39 : vector<1x4x4xbf16> to vector<4x4xbf16>
    %cst_41 = arith.constant dense<0.000000e+00> : vector<64x4xf32>
    %41 = tpu.matmul %38, %40, %cst_41 {dimension_numbers = #tpu.dot_dimension_numbers<[1], [0], [0], [1], [0, 0, 1, 1], [], []>} : vector<64x4xbf16>, vector<4x4xbf16>, vector<64x4xf32> -> vector<64x4xf32>
    %42 = arith.addf %35, %41 : vector<64x4xf32>
    %c0_42 = arith.constant 0 : index
    %c2_43 = arith.constant 2 : index
    %c0_44 = arith.constant 0 : index
    %c0_45 = arith.constant 0 : index
    %43 = vector.load %arg1[%c0_42, %c2_43, %c0_44, %c0_45] : memref<1x10x10x4xbf16, #tpu.memory_space<vmem>>, vector<1x8x8x4xbf16>
    %44 = vector.shape_cast %43 : vector<1x8x8x4xbf16> to vector<8x8x4xbf16>
    %45 = vector.shape_cast %44 : vector<8x8x4xbf16> to vector<64x4xbf16>
    %c6 = arith.constant 6 : index
    %c0_46 = arith.constant 0 : index
    %c0_47 = arith.constant 0 : index
    %46 = vector.load %arg2[%c6, %c0_46, %c0_47] : memref<9x4x4xbf16, #tpu.memory_space<vmem>>, vector<1x4x4xbf16>
    %47 = vector.shape_cast %46 : vector<1x4x4xbf16> to vector<4x4xbf16>
    %cst_48 = arith.constant dense<0.000000e+00> : vector<64x4xf32>
    %48 = tpu.matmul %45, %47, %cst_48 {dimension_numbers = #tpu.dot_dimension_numbers<[1], [0], [0], [1], [0, 0, 1, 1], [], []>} : vector<64x4xbf16>, vector<4x4xbf16>, vector<64x4xf32> -> vector<64x4xf32>
    %49 = arith.addf %42, %48 : vector<64x4xf32>
    %c0_49 = arith.constant 0 : index
    %c2_50 = arith.constant 2 : index
    %c1_51 = arith.constant 1 : index
    %c0_52 = arith.constant 0 : index
    %50 = vector.load %arg1[%c0_49, %c2_50, %c1_51, %c0_52] : memref<1x10x10x4xbf16, #tpu.memory_space<vmem>>, vector<1x8x8x4xbf16>
    %51 = vector.shape_cast %50 : vector<1x8x8x4xbf16> to vector<8x8x4xbf16>
    %52 = vector.shape_cast %51 : vector<8x8x4xbf16> to vector<64x4xbf16>
    %c7 = arith.constant 7 : index
    %c0_53 = arith.constant 0 : index
    %c0_54 = arith.constant 0 : index
    %53 = vector.load %arg2[%c7, %c0_53, %c0_54] : memref<9x4x4xbf16, #tpu.memory_space<vmem>>, vector<1x4x4xbf16>
    %54 = vector.shape_cast %53 : vector<1x4x4xbf16> to vector<4x4xbf16>
    %cst_55 = arith.constant dense<0.000000e+00> : vector<64x4xf32>
    %55 = tpu.matmul %52, %54, %cst_55 {dimension_numbers = #tpu.dot_dimension_numbers<[1], [0], [0], [1], [0, 0, 1, 1], [], []>} : vector<64x4xbf16>, vector<4x4xbf16>, vector<64x4xf32> -> vector<64x4xf32>
    %56 = arith.addf %49, %55 : vector<64x4xf32>
    %c0_56 = arith.constant 0 : index
    %c2_57 = arith.constant 2 : index
    %c2_58 = arith.constant 2 : index
    %c0_59 = arith.constant 0 : index
    %57 = vector.load %arg1[%c0_56, %c2_57, %c2_58, %c0_59] : memref<1x10x10x4xbf16, #tpu.memory_space<vmem>>, vector<1x8x8x4xbf16>
    %58 = vector.shape_cast %57 : vector<1x8x8x4xbf16> to vector<8x8x4xbf16>
    %59 = vector.shape_cast %58 : vector<8x8x4xbf16> to vector<64x4xbf16>
    %c8 = arith.constant 8 : index
    %c0_60 = arith.constant 0 : index
    %c0_61 = arith.constant 0 : index
    %60 = vector.load %arg2[%c8, %c0_60, %c0_61] : memref<9x4x4xbf16, #tpu.memory_space<vmem>>, vector<1x4x4xbf16>
    %61 = vector.shape_cast %60 : vector<1x4x4xbf16> to vector<4x4xbf16>
    %cst_62 = arith.constant dense<0.000000e+00> : vector<64x4xf32>
    %62 = tpu.matmul %59, %61, %cst_62 {dimension_numbers = #tpu.dot_dimension_numbers<[1], [0], [0], [1], [0, 0, 1, 1], [], []>} : vector<64x4xbf16>, vector<4x4xbf16>, vector<64x4xf32> -> vector<64x4xf32>
    %63 = arith.addf %56, %62 : vector<64x4xf32>
    %c0_63 = arith.constant 0 : index
    %c0_64 = arith.constant 0 : index
    %64 = vector.load %arg3[%c0_63, %c0_64] : memref<1x4xf32, #tpu.memory_space<vmem>>, vector<1x4xf32>
    %65 = vector.shape_cast %64 : vector<1x4xf32> to vector<4xf32>
    %66 = vector.shape_cast %65 : vector<4xf32> to vector<1x4xf32>
    %67 = vector.broadcast %66 : vector<1x4xf32> to vector<64x4xf32>
    %68 = arith.addf %63, %67 : vector<64x4xf32>
    %cst_65 = arith.constant 0.000000e+00 : f32
    %69 = vector.broadcast %cst_65 : f32 to vector<64x4xf32>
    %70 = arith.cmpf oge, %68, %69 : vector<64x4xf32>
    %c0_66 = arith.constant 0 : index
    %c0_67 = arith.constant 0 : index
    %71 = vector.load %arg4[%c0_66, %c0_67] : memref<1x4xf32, #tpu.memory_space<vmem>>, vector<1x4xf32>
    %72 = vector.shape_cast %71 : vector<1x4xf32> to vector<4xf32>
    %73 = vector.shape_cast %72 : vector<4xf32> to vector<1x4xf32>
    %74 = vector.broadcast %73 : vector<1x4xf32> to vector<64x4xf32>
    %75 = arith.mulf %68, %74 : vector<64x4xf32>
    %76 = arith.select %70, %68, %75 : vector<64x4xi1>, vector<64x4xf32>
    %77 = vector.shape_cast %76 : vector<64x4xf32> to vector<8x8x4xf32>
    %78 = arith.truncf %77 : vector<8x8x4xf32> to vector<8x8x4xbf16>
    %c0_68 = arith.constant 0 : index
    %c0_69 = arith.constant 0 : index
    %c0_70 = arith.constant 0 : index
    %c0_71 = arith.constant 0 : index
    %79 = vector.load %arg5[%c0_68, %c0_69, %c0_70, %c0_71] : memref<1x8x8x4xbf16, #tpu.memory_space<vmem>>, vector<1x8x8x4xbf16>
    %80 = vector.shape_cast %79 : vector<1x8x8x4xbf16> to vector<8x8x4xbf16>
    %81 = vector.shape_cast %78 : vector<8x8x4xbf16> to vector<1x8x8x4xbf16>
    tpu.vector_store %arg5[%c0_68, %c0_69, %c0_70, %c0_71], %81 {strides = array<i32>} : memref<1x8x8x4xbf16, #tpu.memory_space<vmem>>, vector<1x8x8x4xbf16>,
    return
  }
  func.func @transform_0(%arg0: i32) -> (i32, i32, i32, i32) {
    %c0_i32 = arith.constant 0 : i32
    %c0_i32_0 = arith.constant 0 : i32
    %c0_i32_1 = arith.constant 0 : i32
    %c0_i32_2 = arith.constant 0 : i32
    return %arg0, %c0_i32, %c0_i32_0, %c0_i32_1 : i32, i32, i32, i32
  }
  func.func @transform_1(%arg0: i32) -> (i32, i32, i32) {
    %c0_i32 = arith.constant 0 : i32
    %c0_i32_0 = arith.constant 0 : i32
    %c0_i32_1 = arith.constant 0 : i32
    %c0_i32_2 = arith.constant 0 : i32
    return %c0_i32, %c0_i32_0, %c0_i32_1 : i32, i32, i32
  }
  func.func @transform_2(%arg0: i32) -> (i32, i32) {
    %c0_i32 = arith.constant 0 : i32
    %c0_i32_0 = arith.constant 0 : i32
    %c0_i32_1 = arith.constant 0 : i32
    return %c0_i32, %c0_i32_0 : i32, i32
  }
  func.func @transform_3(%arg0: i32) -> (i32, i32) {
    %c0_i32 = arith.constant 0 : i32
    %c0_i32_0 = arith.constant 0 : i32
    %c0_i32_1 = arith.constant 0 : i32
    return %c0_i32, %c0_i32_0 : i32, i32
  }
  func.func @transform_4(%arg0: i32) -> (i32, i32, i32, i32) {
    %c0_i32 = arith.constant 0 : i32
    %c0_i32_0 = arith.constant 0 : i32
    %c0_i32_1 = arith.constant 0 : i32
    %c0_i32_2 = arith.constant 0 : i32
    return %arg0, %c0_i32, %c0_i32_0, %c0_i32_1 : i32, i32, i32, i32
  }
}

module attributes {stable_mosaic.version = 11 : i64} {
  func.func @_conv_band_kernel(%arg0: i32, %arg1: memref<1x5x5x64xbf16, #tpu.memory_space<vmem>>, %arg2: memref<4x64x16xbf16, #tpu.memory_space<vmem>>, %arg3: memref<1x16xf32, #tpu.memory_space<vmem>>, %arg4: memref<1x16xf32, #tpu.memory_space<vmem>>, %arg5: memref<1x4x4x16xbf16, #tpu.memory_space<vmem>>) attributes {dimension_semantics = [#tpu.dimension_semantics<parallel>], iteration_bounds = array<i64: 2>, scalar_prefetch = 0 : i64, scratch_operands = 0 : i64, tpu.core_type = #tpu.core_type<tc>, window_params = [{transform_indices = @transform_0, window_bounds = array<i64: 1, 5, 5, 64>}, {pipeline_mode = #tpu.pipeline_mode<synchronous>, transform_indices = @transform_1, window_bounds = array<i64: 4, 64, 16>}, {pipeline_mode = #tpu.pipeline_mode<synchronous>, transform_indices = @transform_2, window_bounds = array<i64: 1, 16>}, {pipeline_mode = #tpu.pipeline_mode<synchronous>, transform_indices = @transform_3, window_bounds = array<i64: 1, 16>}, {transform_indices = @transform_4, window_bounds = array<i64: 1, 4, 4, 16>}]} {
    %cst = arith.constant 0.000000e+00 : f32
    %0 = vector.broadcast %cst : f32 to vector<16x16xf32>
    %c0 = arith.constant 0 : index
    %c0_0 = arith.constant 0 : index
    %c0_1 = arith.constant 0 : index
    %c0_2 = arith.constant 0 : index
    %1 = vector.load %arg1[%c0, %c0_0, %c0_1, %c0_2] : memref<1x5x5x64xbf16, #tpu.memory_space<vmem>>, vector<1x4x4x64xbf16>
    %2 = vector.shape_cast %1 : vector<1x4x4x64xbf16> to vector<4x4x64xbf16>
    %3 = vector.shape_cast %2 : vector<4x4x64xbf16> to vector<16x64xbf16>
    %c0_3 = arith.constant 0 : index
    %c0_4 = arith.constant 0 : index
    %c0_5 = arith.constant 0 : index
    %4 = vector.load %arg2[%c0_3, %c0_4, %c0_5] : memref<4x64x16xbf16, #tpu.memory_space<vmem>>, vector<1x64x16xbf16>
    %5 = vector.shape_cast %4 : vector<1x64x16xbf16> to vector<64x16xbf16>
    %cst_6 = arith.constant dense<0.000000e+00> : vector<16x16xf32>
    %6 = tpu.matmul %3, %5, %cst_6 {dimension_numbers = #tpu.dot_dimension_numbers<[1], [0], [0], [1], [0, 0, 1, 1], [], []>} : vector<16x64xbf16>, vector<64x16xbf16>, vector<16x16xf32> -> vector<16x16xf32>
    %7 = arith.addf %0, %6 : vector<16x16xf32>
    %c0_7 = arith.constant 0 : index
    %c0_8 = arith.constant 0 : index
    %c1 = arith.constant 1 : index
    %c0_9 = arith.constant 0 : index
    %8 = vector.load %arg1[%c0_7, %c0_8, %c1, %c0_9] : memref<1x5x5x64xbf16, #tpu.memory_space<vmem>>, vector<1x4x4x64xbf16>
    %9 = vector.shape_cast %8 : vector<1x4x4x64xbf16> to vector<4x4x64xbf16>
    %10 = vector.shape_cast %9 : vector<4x4x64xbf16> to vector<16x64xbf16>
    %c1_10 = arith.constant 1 : index
    %c0_11 = arith.constant 0 : index
    %c0_12 = arith.constant 0 : index
    %11 = vector.load %arg2[%c1_10, %c0_11, %c0_12] : memref<4x64x16xbf16, #tpu.memory_space<vmem>>, vector<1x64x16xbf16>
    %12 = vector.shape_cast %11 : vector<1x64x16xbf16> to vector<64x16xbf16>
    %cst_13 = arith.constant dense<0.000000e+00> : vector<16x16xf32>
    %13 = tpu.matmul %10, %12, %cst_13 {dimension_numbers = #tpu.dot_dimension_numbers<[1], [0], [0], [1], [0, 0, 1, 1], [], []>} : vector<16x64xbf16>, vector<64x16xbf16>, vector<16x16xf32> -> vector<16x16xf32>
    %14 = arith.addf %7, %13 : vector<16x16xf32>
    %c0_14 = arith.constant 0 : index
    %c1_15 = arith.constant 1 : index
    %c0_16 = arith.constant 0 : index
    %c0_17 = arith.constant 0 : index
    %15 = vector.load %arg1[%c0_14, %c1_15, %c0_16, %c0_17] : memref<1x5x5x64xbf16, #tpu.memory_space<vmem>>, vector<1x4x4x64xbf16>
    %16 = vector.shape_cast %15 : vector<1x4x4x64xbf16> to vector<4x4x64xbf16>
    %17 = vector.shape_cast %16 : vector<4x4x64xbf16> to vector<16x64xbf16>
    %c2 = arith.constant 2 : index
    %c0_18 = arith.constant 0 : index
    %c0_19 = arith.constant 0 : index
    %18 = vector.load %arg2[%c2, %c0_18, %c0_19] : memref<4x64x16xbf16, #tpu.memory_space<vmem>>, vector<1x64x16xbf16>
    %19 = vector.shape_cast %18 : vector<1x64x16xbf16> to vector<64x16xbf16>
    %cst_20 = arith.constant dense<0.000000e+00> : vector<16x16xf32>
    %20 = tpu.matmul %17, %19, %cst_20 {dimension_numbers = #tpu.dot_dimension_numbers<[1], [0], [0], [1], [0, 0, 1, 1], [], []>} : vector<16x64xbf16>, vector<64x16xbf16>, vector<16x16xf32> -> vector<16x16xf32>
    %21 = arith.addf %14, %20 : vector<16x16xf32>
    %c0_21 = arith.constant 0 : index
    %c1_22 = arith.constant 1 : index
    %c1_23 = arith.constant 1 : index
    %c0_24 = arith.constant 0 : index
    %22 = vector.load %arg1[%c0_21, %c1_22, %c1_23, %c0_24] : memref<1x5x5x64xbf16, #tpu.memory_space<vmem>>, vector<1x4x4x64xbf16>
    %23 = vector.shape_cast %22 : vector<1x4x4x64xbf16> to vector<4x4x64xbf16>
    %24 = vector.shape_cast %23 : vector<4x4x64xbf16> to vector<16x64xbf16>
    %c3 = arith.constant 3 : index
    %c0_25 = arith.constant 0 : index
    %c0_26 = arith.constant 0 : index
    %25 = vector.load %arg2[%c3, %c0_25, %c0_26] : memref<4x64x16xbf16, #tpu.memory_space<vmem>>, vector<1x64x16xbf16>
    %26 = vector.shape_cast %25 : vector<1x64x16xbf16> to vector<64x16xbf16>
    %cst_27 = arith.constant dense<0.000000e+00> : vector<16x16xf32>
    %27 = tpu.matmul %24, %26, %cst_27 {dimension_numbers = #tpu.dot_dimension_numbers<[1], [0], [0], [1], [0, 0, 1, 1], [], []>} : vector<16x64xbf16>, vector<64x16xbf16>, vector<16x16xf32> -> vector<16x16xf32>
    %28 = arith.addf %21, %27 : vector<16x16xf32>
    %c0_28 = arith.constant 0 : index
    %c0_29 = arith.constant 0 : index
    %29 = vector.load %arg3[%c0_28, %c0_29] : memref<1x16xf32, #tpu.memory_space<vmem>>, vector<1x16xf32>
    %30 = vector.shape_cast %29 : vector<1x16xf32> to vector<16xf32>
    %31 = vector.shape_cast %30 : vector<16xf32> to vector<1x16xf32>
    %32 = vector.broadcast %31 : vector<1x16xf32> to vector<16x16xf32>
    %33 = arith.addf %28, %32 : vector<16x16xf32>
    %cst_30 = arith.constant 0.000000e+00 : f32
    %34 = vector.broadcast %cst_30 : f32 to vector<16x16xf32>
    %35 = arith.cmpf oge, %33, %34 : vector<16x16xf32>
    %c0_31 = arith.constant 0 : index
    %c0_32 = arith.constant 0 : index
    %36 = vector.load %arg4[%c0_31, %c0_32] : memref<1x16xf32, #tpu.memory_space<vmem>>, vector<1x16xf32>
    %37 = vector.shape_cast %36 : vector<1x16xf32> to vector<16xf32>
    %38 = vector.shape_cast %37 : vector<16xf32> to vector<1x16xf32>
    %39 = vector.broadcast %38 : vector<1x16xf32> to vector<16x16xf32>
    %40 = arith.mulf %33, %39 : vector<16x16xf32>
    %41 = arith.select %35, %33, %40 : vector<16x16xi1>, vector<16x16xf32>
    %42 = vector.shape_cast %41 : vector<16x16xf32> to vector<4x4x16xf32>
    %43 = arith.truncf %42 : vector<4x4x16xf32> to vector<4x4x16xbf16>
    %c0_33 = arith.constant 0 : index
    %c0_34 = arith.constant 0 : index
    %c0_35 = arith.constant 0 : index
    %c0_36 = arith.constant 0 : index
    %44 = vector.load %arg5[%c0_33, %c0_34, %c0_35, %c0_36] : memref<1x4x4x16xbf16, #tpu.memory_space<vmem>>, vector<1x4x4x16xbf16>
    %45 = vector.shape_cast %44 : vector<1x4x4x16xbf16> to vector<4x4x16xbf16>
    %46 = vector.shape_cast %43 : vector<4x4x16xbf16> to vector<1x4x4x16xbf16>
    tpu.vector_store %arg5[%c0_33, %c0_34, %c0_35, %c0_36], %46 {strides = array<i32>} : memref<1x4x4x16xbf16, #tpu.memory_space<vmem>>, vector<1x4x4x16xbf16>,
    return
  }
  func.func @transform_0(%arg0: i32) -> (i32, i32, i32, i32) {
    %c0_i32 = arith.constant 0 : i32
    %c0_i32_0 = arith.constant 0 : i32
    %c0_i32_1 = arith.constant 0 : i32
    %c0_i32_2 = arith.constant 0 : i32
    return %arg0, %c0_i32, %c0_i32_0, %c0_i32_1 : i32, i32, i32, i32
  }
  func.func @transform_1(%arg0: i32) -> (i32, i32, i32) {
    %c0_i32 = arith.constant 0 : i32
    %c0_i32_0 = arith.constant 0 : i32
    %c0_i32_1 = arith.constant 0 : i32
    %c0_i32_2 = arith.constant 0 : i32
    return %c0_i32, %c0_i32_0, %c0_i32_1 : i32, i32, i32
  }
  func.func @transform_2(%arg0: i32) -> (i32, i32) {
    %c0_i32 = arith.constant 0 : i32
    %c0_i32_0 = arith.constant 0 : i32
    %c0_i32_1 = arith.constant 0 : i32
    return %c0_i32, %c0_i32_0 : i32, i32
  }
  func.func @transform_3(%arg0: i32) -> (i32, i32) {
    %c0_i32 = arith.constant 0 : i32
    %c0_i32_0 = arith.constant 0 : i32
    %c0_i32_1 = arith.constant 0 : i32
    return %c0_i32, %c0_i32_0 : i32, i32
  }
  func.func @transform_4(%arg0: i32) -> (i32, i32, i32, i32) {
    %c0_i32 = arith.constant 0 : i32
    %c0_i32_0 = arith.constant 0 : i32
    %c0_i32_1 = arith.constant 0 : i32
    %c0_i32_2 = arith.constant 0 : i32
    return %arg0, %c0_i32, %c0_i32_0, %c0_i32_1 : i32, i32, i32, i32
  }
}

module attributes {stable_mosaic.version = 11 : i64} {
  func.func @_conv_band_kernel(%arg0: i32, %arg1: memref<1x6x6x16xbf16, #tpu.memory_space<vmem>>, %arg2: memref<9x16x16xbf16, #tpu.memory_space<vmem>>, %arg3: memref<1x16xf32, #tpu.memory_space<vmem>>, %arg4: memref<1x16xf32, #tpu.memory_space<vmem>>, %arg5: memref<1x4x4x16xbf16, #tpu.memory_space<vmem>>) attributes {dimension_semantics = [#tpu.dimension_semantics<parallel>], iteration_bounds = array<i64: 2>, scalar_prefetch = 0 : i64, scratch_operands = 0 : i64, tpu.core_type = #tpu.core_type<tc>, window_params = [{transform_indices = @transform_0, window_bounds = array<i64: 1, 6, 6, 16>}, {pipeline_mode = #tpu.pipeline_mode<synchronous>, transform_indices = @transform_1, window_bounds = array<i64: 9, 16, 16>}, {pipeline_mode = #tpu.pipeline_mode<synchronous>, transform_indices = @transform_2, window_bounds = array<i64: 1, 16>}, {pipeline_mode = #tpu.pipeline_mode<synchronous>, transform_indices = @transform_3, window_bounds = array<i64: 1, 16>}, {transform_indices = @transform_4, window_bounds = array<i64: 1, 4, 4, 16>}]} {
    %cst = arith.constant 0.000000e+00 : f32
    %0 = vector.broadcast %cst : f32 to vector<16x16xf32>
    %c0 = arith.constant 0 : index
    %c0_0 = arith.constant 0 : index
    %c0_1 = arith.constant 0 : index
    %c0_2 = arith.constant 0 : index
    %1 = vector.load %arg1[%c0, %c0_0, %c0_1, %c0_2] : memref<1x6x6x16xbf16, #tpu.memory_space<vmem>>, vector<1x4x4x16xbf16>
    %2 = vector.shape_cast %1 : vector<1x4x4x16xbf16> to vector<4x4x16xbf16>
    %3 = vector.shape_cast %2 : vector<4x4x16xbf16> to vector<16x16xbf16>
    %c0_3 = arith.constant 0 : index
    %c0_4 = arith.constant 0 : index
    %c0_5 = arith.constant 0 : index
    %4 = vector.load %arg2[%c0_3, %c0_4, %c0_5] : memref<9x16x16xbf16, #tpu.memory_space<vmem>>, vector<1x16x16xbf16>
    %5 = vector.shape_cast %4 : vector<1x16x16xbf16> to vector<16x16xbf16>
    %cst_6 = arith.constant dense<0.000000e+00> : vector<16x16xf32>
    %6 = tpu.matmul %3, %5, %cst_6 {dimension_numbers = #tpu.dot_dimension_numbers<[1], [0], [0], [1], [0, 0, 1, 1], [], []>} : vector<16x16xbf16>, vector<16x16xbf16>, vector<16x16xf32> -> vector<16x16xf32>
    %7 = arith.addf %0, %6 : vector<16x16xf32>
    %c0_7 = arith.constant 0 : index
    %c0_8 = arith.constant 0 : index
    %c1 = arith.constant 1 : index
    %c0_9 = arith.constant 0 : index
    %8 = vector.load %arg1[%c0_7, %c0_8, %c1, %c0_9] : memref<1x6x6x16xbf16, #tpu.memory_space<vmem>>, vector<1x4x4x16xbf16>
    %9 = vector.shape_cast %8 : vector<1x4x4x16xbf16> to vector<4x4x16xbf16>
    %10 = vector.shape_cast %9 : vector<4x4x16xbf16> to vector<16x16xbf16>
    %c1_10 = arith.constant 1 : index
    %c0_11 = arith.constant 0 : index
    %c0_12 = arith.constant 0 : index
    %11 = vector.load %arg2[%c1_10, %c0_11, %c0_12] : memref<9x16x16xbf16, #tpu.memory_space<vmem>>, vector<1x16x16xbf16>
    %12 = vector.shape_cast %11 : vector<1x16x16xbf16> to vector<16x16xbf16>
    %cst_13 = arith.constant dense<0.000000e+00> : vector<16x16xf32>
    %13 = tpu.matmul %10, %12, %cst_13 {dimension_numbers = #tpu.dot_dimension_numbers<[1], [0], [0], [1], [0, 0, 1, 1], [], []>} : vector<16x16xbf16>, vector<16x16xbf16>, vector<16x16xf32> -> vector<16x16xf32>
    %14 = arith.addf %7, %13 : vector<16x16xf32>
    %c0_14 = arith.constant 0 : index
    %c0_15 = arith.constant 0 : index
    %c2 = arith.constant 2 : index
    %c0_16 = arith.constant 0 : index
    %15 = vector.load %arg1[%c0_14, %c0_15, %c2, %c0_16] : memref<1x6x6x16xbf16, #tpu.memory_space<vmem>>, vector<1x4x4x16xbf16>
    %16 = vector.shape_cast %15 : vector<1x4x4x16xbf16> to vector<4x4x16xbf16>
    %17 = vector.shape_cast %16 : vector<4x4x16xbf16> to vector<16x16xbf16>
    %c2_17 = arith.constant 2 : index
    %c0_18 = arith.constant 0 : index
    %c0_19 = arith.constant 0 : index
    %18 = vector.load %arg2[%c2_17, %c0_18, %c0_19] : memref<9x16x16xbf16, #tpu.memory_space<vmem>>, vector<1x16x16xbf16>
    %19 = vector.shape_cast %18 : vector<1x16x16xbf16> to vector<16x16xbf16>
    %cst_20 = arith.constant dense<0.000000e+00> : vector<16x16xf32>
    %20 = tpu.matmul %17, %19, %cst_20 {dimension_numbers = #tpu.dot_dimension_numbers<[1], [0], [0], [1], [0, 0, 1, 1], [], []>} : vector<16x16xbf16>, vector<16x16xbf16>, vector<16x16xf32> -> vector<16x16xf32>
    %21 = arith.addf %14, %20 : vector<16x16xf32>
    %c0_21 = arith.constant 0 : index
    %c1_22 = arith.constant 1 : index
    %c0_23 = arith.constant 0 : index
    %c0_24 = arith.constant 0 : index
    %22 = vector.load %arg1[%c0_21, %c1_22, %c0_23, %c0_24] : memref<1x6x6x16xbf16, #tpu.memory_space<vmem>>, vector<1x4x4x16xbf16>
    %23 = vector.shape_cast %22 : vector<1x4x4x16xbf16> to vector<4x4x16xbf16>
    %24 = vector.shape_cast %23 : vector<4x4x16xbf16> to vector<16x16xbf16>
    %c3 = arith.constant 3 : index
    %c0_25 = arith.constant 0 : index
    %c0_26 = arith.constant 0 : index
    %25 = vector.load %arg2[%c3, %c0_25, %c0_26] : memref<9x16x16xbf16, #tpu.memory_space<vmem>>, vector<1x16x16xbf16>
    %26 = vector.shape_cast %25 : vector<1x16x16xbf16> to vector<16x16xbf16>
    %cst_27 = arith.constant dense<0.000000e+00> : vector<16x16xf32>
    %27 = tpu.matmul %24, %26, %cst_27 {dimension_numbers = #tpu.dot_dimension_numbers<[1], [0], [0], [1], [0, 0, 1, 1], [], []>} : vector<16x16xbf16>, vector<16x16xbf16>, vector<16x16xf32> -> vector<16x16xf32>
    %28 = arith.addf %21, %27 : vector<16x16xf32>
    %c0_28 = arith.constant 0 : index
    %c1_29 = arith.constant 1 : index
    %c1_30 = arith.constant 1 : index
    %c0_31 = arith.constant 0 : index
    %29 = vector.load %arg1[%c0_28, %c1_29, %c1_30, %c0_31] : memref<1x6x6x16xbf16, #tpu.memory_space<vmem>>, vector<1x4x4x16xbf16>
    %30 = vector.shape_cast %29 : vector<1x4x4x16xbf16> to vector<4x4x16xbf16>
    %31 = vector.shape_cast %30 : vector<4x4x16xbf16> to vector<16x16xbf16>
    %c4 = arith.constant 4 : index
    %c0_32 = arith.constant 0 : index
    %c0_33 = arith.constant 0 : index
    %32 = vector.load %arg2[%c4, %c0_32, %c0_33] : memref<9x16x16xbf16, #tpu.memory_space<vmem>>, vector<1x16x16xbf16>
    %33 = vector.shape_cast %32 : vector<1x16x16xbf16> to vector<16x16xbf16>
    %cst_34 = arith.constant dense<0.000000e+00> : vector<16x16xf32>
    %34 = tpu.matmul %31, %33, %cst_34 {dimension_numbers = #tpu.dot_dimension_numbers<[1], [0], [0], [1], [0, 0, 1, 1], [], []>} : vector<16x16xbf16>, vector<16x16xbf16>, vector<16x16xf32> -> vector<16x16xf32>
    %35 = arith.addf %28, %34 : vector<16x16xf32>
    %c0_35 = arith.constant 0 : index
    %c1_36 = arith.constant 1 : index
    %c2_37 = arith.constant 2 : index
    %c0_38 = arith.constant 0 : index
    %36 = vector.load %arg1[%c0_35, %c1_36, %c2_37, %c0_38] : memref<1x6x6x16xbf16, #tpu.memory_space<vmem>>, vector<1x4x4x16xbf16>
    %37 = vector.shape_cast %36 : vector<1x4x4x16xbf16> to vector<4x4x16xbf16>
    %38 = vector.shape_cast %37 : vector<4x4x16xbf16> to vector<16x16xbf16>
    %c5 = arith.constant 5 : index
    %c0_39 = arith.constant 0 : index
    %c0_40 = arith.constant 0 : index
    %39 = vector.load %arg2[%c5, %c0_39, %c0_40] : memref<9x16x16xbf16, #tpu.memory_space<vmem>>, vector<1x16x16xbf16>
    %40 = vector.shape_cast %39 : vector<1x16x16xbf16> to vector<16x16xbf16>
    %cst_41 = arith.constant dense<0.000000e+00> : vector<16x16xf32>
    %41 = tpu.matmul %38, %40, %cst_41 {dimension_numbers = #tpu.dot_dimension_numbers<[1], [0], [0], [1], [0, 0, 1, 1], [], []>} : vector<16x16xbf16>, vector<16x16xbf16>, vector<16x16xf32> -> vector<16x16xf32>
    %42 = arith.addf %35, %41 : vector<16x16xf32>
    %c0_42 = arith.constant 0 : index
    %c2_43 = arith.constant 2 : index
    %c0_44 = arith.constant 0 : index
    %c0_45 = arith.constant 0 : index
    %43 = vector.load %arg1[%c0_42, %c2_43, %c0_44, %c0_45] : memref<1x6x6x16xbf16, #tpu.memory_space<vmem>>, vector<1x4x4x16xbf16>
    %44 = vector.shape_cast %43 : vector<1x4x4x16xbf16> to vector<4x4x16xbf16>
    %45 = vector.shape_cast %44 : vector<4x4x16xbf16> to vector<16x16xbf16>
    %c6 = arith.constant 6 : index
    %c0_46 = arith.constant 0 : index
    %c0_47 = arith.constant 0 : index
    %46 = vector.load %arg2[%c6, %c0_46, %c0_47] : memref<9x16x16xbf16, #tpu.memory_space<vmem>>, vector<1x16x16xbf16>
    %47 = vector.shape_cast %46 : vector<1x16x16xbf16> to vector<16x16xbf16>
    %cst_48 = arith.constant dense<0.000000e+00> : vector<16x16xf32>
    %48 = tpu.matmul %45, %47, %cst_48 {dimension_numbers = #tpu.dot_dimension_numbers<[1], [0], [0], [1], [0, 0, 1, 1], [], []>} : vector<16x16xbf16>, vector<16x16xbf16>, vector<16x16xf32> -> vector<16x16xf32>
    %49 = arith.addf %42, %48 : vector<16x16xf32>
    %c0_49 = arith.constant 0 : index
    %c2_50 = arith.constant 2 : index
    %c1_51 = arith.constant 1 : index
    %c0_52 = arith.constant 0 : index
    %50 = vector.load %arg1[%c0_49, %c2_50, %c1_51, %c0_52] : memref<1x6x6x16xbf16, #tpu.memory_space<vmem>>, vector<1x4x4x16xbf16>
    %51 = vector.shape_cast %50 : vector<1x4x4x16xbf16> to vector<4x4x16xbf16>
    %52 = vector.shape_cast %51 : vector<4x4x16xbf16> to vector<16x16xbf16>
    %c7 = arith.constant 7 : index
    %c0_53 = arith.constant 0 : index
    %c0_54 = arith.constant 0 : index
    %53 = vector.load %arg2[%c7, %c0_53, %c0_54] : memref<9x16x16xbf16, #tpu.memory_space<vmem>>, vector<1x16x16xbf16>
    %54 = vector.shape_cast %53 : vector<1x16x16xbf16> to vector<16x16xbf16>
    %cst_55 = arith.constant dense<0.000000e+00> : vector<16x16xf32>
    %55 = tpu.matmul %52, %54, %cst_55 {dimension_numbers = #tpu.dot_dimension_numbers<[1], [0], [0], [1], [0, 0, 1, 1], [], []>} : vector<16x16xbf16>, vector<16x16xbf16>, vector<16x16xf32> -> vector<16x16xf32>
    %56 = arith.addf %49, %55 : vector<16x16xf32>
    %c0_56 = arith.constant 0 : index
    %c2_57 = arith.constant 2 : index
    %c2_58 = arith.constant 2 : index
    %c0_59 = arith.constant 0 : index
    %57 = vector.load %arg1[%c0_56, %c2_57, %c2_58, %c0_59] : memref<1x6x6x16xbf16, #tpu.memory_space<vmem>>, vector<1x4x4x16xbf16>
    %58 = vector.shape_cast %57 : vector<1x4x4x16xbf16> to vector<4x4x16xbf16>
    %59 = vector.shape_cast %58 : vector<4x4x16xbf16> to vector<16x16xbf16>
    %c8 = arith.constant 8 : index
    %c0_60 = arith.constant 0 : index
    %c0_61 = arith.constant 0 : index
    %60 = vector.load %arg2[%c8, %c0_60, %c0_61] : memref<9x16x16xbf16, #tpu.memory_space<vmem>>, vector<1x16x16xbf16>
    %61 = vector.shape_cast %60 : vector<1x16x16xbf16> to vector<16x16xbf16>
    %cst_62 = arith.constant dense<0.000000e+00> : vector<16x16xf32>
    %62 = tpu.matmul %59, %61, %cst_62 {dimension_numbers = #tpu.dot_dimension_numbers<[1], [0], [0], [1], [0, 0, 1, 1], [], []>} : vector<16x16xbf16>, vector<16x16xbf16>, vector<16x16xf32> -> vector<16x16xf32>
    %63 = arith.addf %56, %62 : vector<16x16xf32>
    %c0_63 = arith.constant 0 : index
    %c0_64 = arith.constant 0 : index
    %64 = vector.load %arg3[%c0_63, %c0_64] : memref<1x16xf32, #tpu.memory_space<vmem>>, vector<1x16xf32>
    %65 = vector.shape_cast %64 : vector<1x16xf32> to vector<16xf32>
    %66 = vector.shape_cast %65 : vector<16xf32> to vector<1x16xf32>
    %67 = vector.broadcast %66 : vector<1x16xf32> to vector<16x16xf32>
    %68 = arith.addf %63, %67 : vector<16x16xf32>
    %cst_65 = arith.constant 0.000000e+00 : f32
    %69 = vector.broadcast %cst_65 : f32 to vector<16x16xf32>
    %70 = arith.cmpf oge, %68, %69 : vector<16x16xf32>
    %c0_66 = arith.constant 0 : index
    %c0_67 = arith.constant 0 : index
    %71 = vector.load %arg4[%c0_66, %c0_67] : memref<1x16xf32, #tpu.memory_space<vmem>>, vector<1x16xf32>
    %72 = vector.shape_cast %71 : vector<1x16xf32> to vector<16xf32>
    %73 = vector.shape_cast %72 : vector<16xf32> to vector<1x16xf32>
    %74 = vector.broadcast %73 : vector<1x16xf32> to vector<16x16xf32>
    %75 = arith.mulf %68, %74 : vector<16x16xf32>
    %76 = arith.select %70, %68, %75 : vector<16x16xi1>, vector<16x16xf32>
    %77 = vector.shape_cast %76 : vector<16x16xf32> to vector<4x4x16xf32>
    %78 = arith.truncf %77 : vector<4x4x16xf32> to vector<4x4x16xbf16>
    %c0_68 = arith.constant 0 : index
    %c0_69 = arith.constant 0 : index
    %c0_70 = arith.constant 0 : index
    %c0_71 = arith.constant 0 : index
    %79 = vector.load %arg5[%c0_68, %c0_69, %c0_70, %c0_71] : memref<1x4x4x16xbf16, #tpu.memory_space<vmem>>, vector<1x4x4x16xbf16>
    %80 = vector.shape_cast %79 : vector<1x4x4x16xbf16> to vector<4x4x16xbf16>
    %81 = vector.shape_cast %78 : vector<4x4x16xbf16> to vector<1x4x4x16xbf16>
    tpu.vector_store %arg5[%c0_68, %c0_69, %c0_70, %c0_71], %81 {strides = array<i32>} : memref<1x4x4x16xbf16, #tpu.memory_space<vmem>>, vector<1x4x4x16xbf16>,
    return
  }
  func.func @transform_0(%arg0: i32) -> (i32, i32, i32, i32) {
    %c0_i32 = arith.constant 0 : i32
    %c0_i32_0 = arith.constant 0 : i32
    %c0_i32_1 = arith.constant 0 : i32
    %c0_i32_2 = arith.constant 0 : i32
    return %arg0, %c0_i32, %c0_i32_0, %c0_i32_1 : i32, i32, i32, i32
  }
  func.func @transform_1(%arg0: i32) -> (i32, i32, i32) {
    %c0_i32 = arith.constant 0 : i32
    %c0_i32_0 = arith.constant 0 : i32
    %c0_i32_1 = arith.constant 0 : i32
    %c0_i32_2 = arith.constant 0 : i32
    return %c0_i32, %c0_i32_0, %c0_i32_1 : i32, i32, i32
  }
  func.func @transform_2(%arg0: i32) -> (i32, i32) {
    %c0_i32 = arith.constant 0 : i32
    %c0_i32_0 = arith.constant 0 : i32
    %c0_i32_1 = arith.constant 0 : i32
    return %c0_i32, %c0_i32_0 : i32, i32
  }
  func.func @transform_3(%arg0: i32) -> (i32, i32) {
    %c0_i32 = arith.constant 0 : i32
    %c0_i32_0 = arith.constant 0 : i32
    %c0_i32_1 = arith.constant 0 : i32
    return %c0_i32, %c0_i32_0 : i32, i32
  }
  func.func @transform_4(%arg0: i32) -> (i32, i32, i32, i32) {
    %c0_i32 = arith.constant 0 : i32
    %c0_i32_0 = arith.constant 0 : i32
    %c0_i32_1 = arith.constant 0 : i32
    %c0_i32_2 = arith.constant 0 : i32
    return %arg0, %c0_i32, %c0_i32_0, %c0_i32_1 : i32, i32, i32, i32
  }
}

module attributes {stable_mosaic.version = 11 : i64} {
  func.func @_conv_band_kernel(%arg0: i32, %arg1: memref<1x5x5x16xbf16, #tpu.memory_space<vmem>>, %arg2: memref<4x16x8xbf16, #tpu.memory_space<vmem>>, %arg3: memref<1x8xf32, #tpu.memory_space<vmem>>, %arg4: memref<1x8xf32, #tpu.memory_space<vmem>>, %arg5: memref<1x4x4x8xbf16, #tpu.memory_space<vmem>>) attributes {dimension_semantics = [#tpu.dimension_semantics<parallel>], iteration_bounds = array<i64: 4>, scalar_prefetch = 0 : i64, scratch_operands = 0 : i64, tpu.core_type = #tpu.core_type<tc>, window_params = [{transform_indices = @transform_0, window_bounds = array<i64: 1, 5, 5, 16>}, {pipeline_mode = #tpu.pipeline_mode<synchronous>, transform_indices = @transform_1, window_bounds = array<i64: 4, 16, 8>}, {pipeline_mode = #tpu.pipeline_mode<synchronous>, transform_indices = @transform_2, window_bounds = array<i64: 1, 8>}, {pipeline_mode = #tpu.pipeline_mode<synchronous>, transform_indices = @transform_3, window_bounds = array<i64: 1, 8>}, {transform_indices = @transform_4, window_bounds = array<i64: 1, 4, 4, 8>}]} {
    %cst = arith.constant 0.000000e+00 : f32
    %0 = vector.broadcast %cst : f32 to vector<16x8xf32>
    %c0 = arith.constant 0 : index
    %c0_0 = arith.constant 0 : index
    %c0_1 = arith.constant 0 : index
    %c0_2 = arith.constant 0 : index
    %1 = vector.load %arg1[%c0, %c0_0, %c0_1, %c0_2] : memref<1x5x5x16xbf16, #tpu.memory_space<vmem>>, vector<1x4x4x16xbf16>
    %2 = vector.shape_cast %1 : vector<1x4x4x16xbf16> to vector<4x4x16xbf16>
    %3 = vector.shape_cast %2 : vector<4x4x16xbf16> to vector<16x16xbf16>
    %c0_3 = arith.constant 0 : index
    %c0_4 = arith.constant 0 : index
    %c0_5 = arith.constant 0 : index
    %4 = vector.load %arg2[%c0_3, %c0_4, %c0_5] : memref<4x16x8xbf16, #tpu.memory_space<vmem>>, vector<1x16x8xbf16>
    %5 = vector.shape_cast %4 : vector<1x16x8xbf16> to vector<16x8xbf16>
    %cst_6 = arith.constant dense<0.000000e+00> : vector<16x8xf32>
    %6 = tpu.matmul %3, %5, %cst_6 {dimension_numbers = #tpu.dot_dimension_numbers<[1], [0], [0], [1], [0, 0, 1, 1], [], []>} : vector<16x16xbf16>, vector<16x8xbf16>, vector<16x8xf32> -> vector<16x8xf32>
    %7 = arith.addf %0, %6 : vector<16x8xf32>
    %c0_7 = arith.constant 0 : index
    %c0_8 = arith.constant 0 : index
    %c1 = arith.constant 1 : index
    %c0_9 = arith.constant 0 : index
    %8 = vector.load %arg1[%c0_7, %c0_8, %c1, %c0_9] : memref<1x5x5x16xbf16, #tpu.memory_space<vmem>>, vector<1x4x4x16xbf16>
    %9 = vector.shape_cast %8 : vector<1x4x4x16xbf16> to vector<4x4x16xbf16>
    %10 = vector.shape_cast %9 : vector<4x4x16xbf16> to vector<16x16xbf16>
    %c1_10 = arith.constant 1 : index
    %c0_11 = arith.constant 0 : index
    %c0_12 = arith.constant 0 : index
    %11 = vector.load %arg2[%c1_10, %c0_11, %c0_12] : memref<4x16x8xbf16, #tpu.memory_space<vmem>>, vector<1x16x8xbf16>
    %12 = vector.shape_cast %11 : vector<1x16x8xbf16> to vector<16x8xbf16>
    %cst_13 = arith.constant dense<0.000000e+00> : vector<16x8xf32>
    %13 = tpu.matmul %10, %12, %cst_13 {dimension_numbers = #tpu.dot_dimension_numbers<[1], [0], [0], [1], [0, 0, 1, 1], [], []>} : vector<16x16xbf16>, vector<16x8xbf16>, vector<16x8xf32> -> vector<16x8xf32>
    %14 = arith.addf %7, %13 : vector<16x8xf32>
    %c0_14 = arith.constant 0 : index
    %c1_15 = arith.constant 1 : index
    %c0_16 = arith.constant 0 : index
    %c0_17 = arith.constant 0 : index
    %15 = vector.load %arg1[%c0_14, %c1_15, %c0_16, %c0_17] : memref<1x5x5x16xbf16, #tpu.memory_space<vmem>>, vector<1x4x4x16xbf16>
    %16 = vector.shape_cast %15 : vector<1x4x4x16xbf16> to vector<4x4x16xbf16>
    %17 = vector.shape_cast %16 : vector<4x4x16xbf16> to vector<16x16xbf16>
    %c2 = arith.constant 2 : index
    %c0_18 = arith.constant 0 : index
    %c0_19 = arith.constant 0 : index
    %18 = vector.load %arg2[%c2, %c0_18, %c0_19] : memref<4x16x8xbf16, #tpu.memory_space<vmem>>, vector<1x16x8xbf16>
    %19 = vector.shape_cast %18 : vector<1x16x8xbf16> to vector<16x8xbf16>
    %cst_20 = arith.constant dense<0.000000e+00> : vector<16x8xf32>
    %20 = tpu.matmul %17, %19, %cst_20 {dimension_numbers = #tpu.dot_dimension_numbers<[1], [0], [0], [1], [0, 0, 1, 1], [], []>} : vector<16x16xbf16>, vector<16x8xbf16>, vector<16x8xf32> -> vector<16x8xf32>
    %21 = arith.addf %14, %20 : vector<16x8xf32>
    %c0_21 = arith.constant 0 : index
    %c1_22 = arith.constant 1 : index
    %c1_23 = arith.constant 1 : index
    %c0_24 = arith.constant 0 : index
    %22 = vector.load %arg1[%c0_21, %c1_22, %c1_23, %c0_24] : memref<1x5x5x16xbf16, #tpu.memory_space<vmem>>, vector<1x4x4x16xbf16>
    %23 = vector.shape_cast %22 : vector<1x4x4x16xbf16> to vector<4x4x16xbf16>
    %24 = vector.shape_cast %23 : vector<4x4x16xbf16> to vector<16x16xbf16>
    %c3 = arith.constant 3 : index
    %c0_25 = arith.constant 0 : index
    %c0_26 = arith.constant 0 : index
    %25 = vector.load %arg2[%c3, %c0_25, %c0_26] : memref<4x16x8xbf16, #tpu.memory_space<vmem>>, vector<1x16x8xbf16>
    %26 = vector.shape_cast %25 : vector<1x16x8xbf16> to vector<16x8xbf16>
    %cst_27 = arith.constant dense<0.000000e+00> : vector<16x8xf32>
    %27 = tpu.matmul %24, %26, %cst_27 {dimension_numbers = #tpu.dot_dimension_numbers<[1], [0], [0], [1], [0, 0, 1, 1], [], []>} : vector<16x16xbf16>, vector<16x8xbf16>, vector<16x8xf32> -> vector<16x8xf32>
    %28 = arith.addf %21, %27 : vector<16x8xf32>
    %c0_28 = arith.constant 0 : index
    %c0_29 = arith.constant 0 : index
    %29 = vector.load %arg3[%c0_28, %c0_29] : memref<1x8xf32, #tpu.memory_space<vmem>>, vector<1x8xf32>
    %30 = vector.shape_cast %29 : vector<1x8xf32> to vector<8xf32>
    %31 = vector.shape_cast %30 : vector<8xf32> to vector<1x8xf32>
    %32 = vector.broadcast %31 : vector<1x8xf32> to vector<16x8xf32>
    %33 = arith.addf %28, %32 : vector<16x8xf32>
    %cst_30 = arith.constant 0.000000e+00 : f32
    %34 = vector.broadcast %cst_30 : f32 to vector<16x8xf32>
    %35 = arith.cmpf oge, %33, %34 : vector<16x8xf32>
    %c0_31 = arith.constant 0 : index
    %c0_32 = arith.constant 0 : index
    %36 = vector.load %arg4[%c0_31, %c0_32] : memref<1x8xf32, #tpu.memory_space<vmem>>, vector<1x8xf32>
    %37 = vector.shape_cast %36 : vector<1x8xf32> to vector<8xf32>
    %38 = vector.shape_cast %37 : vector<8xf32> to vector<1x8xf32>
    %39 = vector.broadcast %38 : vector<1x8xf32> to vector<16x8xf32>
    %40 = arith.mulf %33, %39 : vector<16x8xf32>
    %41 = arith.select %35, %33, %40 : vector<16x8xi1>, vector<16x8xf32>
    %42 = vector.shape_cast %41 : vector<16x8xf32> to vector<4x4x8xf32>
    %43 = arith.truncf %42 : vector<4x4x8xf32> to vector<4x4x8xbf16>
    %c0_33 = arith.constant 0 : index
    %c0_34 = arith.constant 0 : index
    %c0_35 = arith.constant 0 : index
    %c0_36 = arith.constant 0 : index
    %44 = vector.load %arg5[%c0_33, %c0_34, %c0_35, %c0_36] : memref<1x4x4x8xbf16, #tpu.memory_space<vmem>>, vector<1x4x4x8xbf16>
    %45 = vector.shape_cast %44 : vector<1x4x4x8xbf16> to vector<4x4x8xbf16>
    %46 = vector.shape_cast %43 : vector<4x4x8xbf16> to vector<1x4x4x8xbf16>
    tpu.vector_store %arg5[%c0_33, %c0_34, %c0_35, %c0_36], %46 {strides = array<i32>} : memref<1x4x4x8xbf16, #tpu.memory_space<vmem>>, vector<1x4x4x8xbf16>,
    return
  }
  func.func @transform_0(%arg0: i32) -> (i32, i32, i32, i32) {
    %c0_i32 = arith.constant 0 : i32
    %c0_i32_0 = arith.constant 0 : i32
    %c0_i32_1 = arith.constant 0 : i32
    %c0_i32_2 = arith.constant 0 : i32
    return %arg0, %c0_i32, %c0_i32_0, %c0_i32_1 : i32, i32, i32, i32
  }
  func.func @transform_1(%arg0: i32) -> (i32, i32, i32) {
    %c0_i32 = arith.constant 0 : i32
    %c0_i32_0 = arith.constant 0 : i32
    %c0_i32_1 = arith.constant 0 : i32
    %c0_i32_2 = arith.constant 0 : i32
    return %c0_i32, %c0_i32_0, %c0_i32_1 : i32, i32, i32
  }
  func.func @transform_2(%arg0: i32) -> (i32, i32) {
    %c0_i32 = arith.constant 0 : i32
    %c0_i32_0 = arith.constant 0 : i32
    %c0_i32_1 = arith.constant 0 : i32
    return %c0_i32, %c0_i32_0 : i32, i32
  }
  func.func @transform_3(%arg0: i32) -> (i32, i32) {
    %c0_i32 = arith.constant 0 : i32
    %c0_i32_0 = arith.constant 0 : i32
    %c0_i32_1 = arith.constant 0 : i32
    return %c0_i32, %c0_i32_0 : i32, i32
  }
  func.func @transform_4(%arg0: i32) -> (i32, i32, i32, i32) {
    %c0_i32 = arith.constant 0 : i32
    %c0_i32_0 = arith.constant 0 : i32
    %c0_i32_1 = arith.constant 0 : i32
    %c0_i32_2 = arith.constant 0 : i32
    return %arg0, %c0_i32, %c0_i32_0, %c0_i32_1 : i32, i32, i32, i32
  }
}

module attributes {stable_mosaic.version = 11 : i64} {
  func.func @_conv_band_kernel(%arg0: i32, %arg1: memref<1x6x6x8xbf16, #tpu.memory_space<vmem>>, %arg2: memref<9x8x8xbf16, #tpu.memory_space<vmem>>, %arg3: memref<1x8xf32, #tpu.memory_space<vmem>>, %arg4: memref<1x8xf32, #tpu.memory_space<vmem>>, %arg5: memref<1x4x4x8xbf16, #tpu.memory_space<vmem>>) attributes {dimension_semantics = [#tpu.dimension_semantics<parallel>], iteration_bounds = array<i64: 4>, scalar_prefetch = 0 : i64, scratch_operands = 0 : i64, tpu.core_type = #tpu.core_type<tc>, window_params = [{transform_indices = @transform_0, window_bounds = array<i64: 1, 6, 6, 8>}, {pipeline_mode = #tpu.pipeline_mode<synchronous>, transform_indices = @transform_1, window_bounds = array<i64: 9, 8, 8>}, {pipeline_mode = #tpu.pipeline_mode<synchronous>, transform_indices = @transform_2, window_bounds = array<i64: 1, 8>}, {pipeline_mode = #tpu.pipeline_mode<synchronous>, transform_indices = @transform_3, window_bounds = array<i64: 1, 8>}, {transform_indices = @transform_4, window_bounds = array<i64: 1, 4, 4, 8>}]} {
    %cst = arith.constant 0.000000e+00 : f32
    %0 = vector.broadcast %cst : f32 to vector<16x8xf32>
    %c0 = arith.constant 0 : index
    %c0_0 = arith.constant 0 : index
    %c0_1 = arith.constant 0 : index
    %c0_2 = arith.constant 0 : index
    %1 = vector.load %arg1[%c0, %c0_0, %c0_1, %c0_2] : memref<1x6x6x8xbf16, #tpu.memory_space<vmem>>, vector<1x4x4x8xbf16>
    %2 = vector.shape_cast %1 : vector<1x4x4x8xbf16> to vector<4x4x8xbf16>
    %3 = vector.shape_cast %2 : vector<4x4x8xbf16> to vector<16x8xbf16>
    %c0_3 = arith.constant 0 : index
    %c0_4 = arith.constant 0 : index
    %c0_5 = arith.constant 0 : index
    %4 = vector.load %arg2[%c0_3, %c0_4, %c0_5] : memref<9x8x8xbf16, #tpu.memory_space<vmem>>, vector<1x8x8xbf16>
    %5 = vector.shape_cast %4 : vector<1x8x8xbf16> to vector<8x8xbf16>
    %cst_6 = arith.constant dense<0.000000e+00> : vector<16x8xf32>
    %6 = tpu.matmul %3, %5, %cst_6 {dimension_numbers = #tpu.dot_dimension_numbers<[1], [0], [0], [1], [0, 0, 1, 1], [], []>} : vector<16x8xbf16>, vector<8x8xbf16>, vector<16x8xf32> -> vector<16x8xf32>
    %7 = arith.addf %0, %6 : vector<16x8xf32>
    %c0_7 = arith.constant 0 : index
    %c0_8 = arith.constant 0 : index
    %c1 = arith.constant 1 : index
    %c0_9 = arith.constant 0 : index
    %8 = vector.load %arg1[%c0_7, %c0_8, %c1, %c0_9] : memref<1x6x6x8xbf16, #tpu.memory_space<vmem>>, vector<1x4x4x8xbf16>
    %9 = vector.shape_cast %8 : vector<1x4x4x8xbf16> to vector<4x4x8xbf16>
    %10 = vector.shape_cast %9 : vector<4x4x8xbf16> to vector<16x8xbf16>
    %c1_10 = arith.constant 1 : index
    %c0_11 = arith.constant 0 : index
    %c0_12 = arith.constant 0 : index
    %11 = vector.load %arg2[%c1_10, %c0_11, %c0_12] : memref<9x8x8xbf16, #tpu.memory_space<vmem>>, vector<1x8x8xbf16>
    %12 = vector.shape_cast %11 : vector<1x8x8xbf16> to vector<8x8xbf16>
    %cst_13 = arith.constant dense<0.000000e+00> : vector<16x8xf32>
    %13 = tpu.matmul %10, %12, %cst_13 {dimension_numbers = #tpu.dot_dimension_numbers<[1], [0], [0], [1], [0, 0, 1, 1], [], []>} : vector<16x8xbf16>, vector<8x8xbf16>, vector<16x8xf32> -> vector<16x8xf32>
    %14 = arith.addf %7, %13 : vector<16x8xf32>
    %c0_14 = arith.constant 0 : index
    %c0_15 = arith.constant 0 : index
    %c2 = arith.constant 2 : index
    %c0_16 = arith.constant 0 : index
    %15 = vector.load %arg1[%c0_14, %c0_15, %c2, %c0_16] : memref<1x6x6x8xbf16, #tpu.memory_space<vmem>>, vector<1x4x4x8xbf16>
    %16 = vector.shape_cast %15 : vector<1x4x4x8xbf16> to vector<4x4x8xbf16>
    %17 = vector.shape_cast %16 : vector<4x4x8xbf16> to vector<16x8xbf16>
    %c2_17 = arith.constant 2 : index
    %c0_18 = arith.constant 0 : index
    %c0_19 = arith.constant 0 : index
    %18 = vector.load %arg2[%c2_17, %c0_18, %c0_19] : memref<9x8x8xbf16, #tpu.memory_space<vmem>>, vector<1x8x8xbf16>
    %19 = vector.shape_cast %18 : vector<1x8x8xbf16> to vector<8x8xbf16>
    %cst_20 = arith.constant dense<0.000000e+00> : vector<16x8xf32>
    %20 = tpu.matmul %17, %19, %cst_20 {dimension_numbers = #tpu.dot_dimension_numbers<[1], [0], [0], [1], [0, 0, 1, 1], [], []>} : vector<16x8xbf16>, vector<8x8xbf16>, vector<16x8xf32> -> vector<16x8xf32>
    %21 = arith.addf %14, %20 : vector<16x8xf32>
    %c0_21 = arith.constant 0 : index
    %c1_22 = arith.constant 1 : index
    %c0_23 = arith.constant 0 : index
    %c0_24 = arith.constant 0 : index
    %22 = vector.load %arg1[%c0_21, %c1_22, %c0_23, %c0_24] : memref<1x6x6x8xbf16, #tpu.memory_space<vmem>>, vector<1x4x4x8xbf16>
    %23 = vector.shape_cast %22 : vector<1x4x4x8xbf16> to vector<4x4x8xbf16>
    %24 = vector.shape_cast %23 : vector<4x4x8xbf16> to vector<16x8xbf16>
    %c3 = arith.constant 3 : index
    %c0_25 = arith.constant 0 : index
    %c0_26 = arith.constant 0 : index
    %25 = vector.load %arg2[%c3, %c0_25, %c0_26] : memref<9x8x8xbf16, #tpu.memory_space<vmem>>, vector<1x8x8xbf16>
    %26 = vector.shape_cast %25 : vector<1x8x8xbf16> to vector<8x8xbf16>
    %cst_27 = arith.constant dense<0.000000e+00> : vector<16x8xf32>
    %27 = tpu.matmul %24, %26, %cst_27 {dimension_numbers = #tpu.dot_dimension_numbers<[1], [0], [0], [1], [0, 0, 1, 1], [], []>} : vector<16x8xbf16>, vector<8x8xbf16>, vector<16x8xf32> -> vector<16x8xf32>
    %28 = arith.addf %21, %27 : vector<16x8xf32>
    %c0_28 = arith.constant 0 : index
    %c1_29 = arith.constant 1 : index
    %c1_30 = arith.constant 1 : index
    %c0_31 = arith.constant 0 : index
    %29 = vector.load %arg1[%c0_28, %c1_29, %c1_30, %c0_31] : memref<1x6x6x8xbf16, #tpu.memory_space<vmem>>, vector<1x4x4x8xbf16>
    %30 = vector.shape_cast %29 : vector<1x4x4x8xbf16> to vector<4x4x8xbf16>
    %31 = vector.shape_cast %30 : vector<4x4x8xbf16> to vector<16x8xbf16>
    %c4 = arith.constant 4 : index
    %c0_32 = arith.constant 0 : index
    %c0_33 = arith.constant 0 : index
    %32 = vector.load %arg2[%c4, %c0_32, %c0_33] : memref<9x8x8xbf16, #tpu.memory_space<vmem>>, vector<1x8x8xbf16>
    %33 = vector.shape_cast %32 : vector<1x8x8xbf16> to vector<8x8xbf16>
    %cst_34 = arith.constant dense<0.000000e+00> : vector<16x8xf32>
    %34 = tpu.matmul %31, %33, %cst_34 {dimension_numbers = #tpu.dot_dimension_numbers<[1], [0], [0], [1], [0, 0, 1, 1], [], []>} : vector<16x8xbf16>, vector<8x8xbf16>, vector<16x8xf32> -> vector<16x8xf32>
    %35 = arith.addf %28, %34 : vector<16x8xf32>
    %c0_35 = arith.constant 0 : index
    %c1_36 = arith.constant 1 : index
    %c2_37 = arith.constant 2 : index
    %c0_38 = arith.constant 0 : index
    %36 = vector.load %arg1[%c0_35, %c1_36, %c2_37, %c0_38] : memref<1x6x6x8xbf16, #tpu.memory_space<vmem>>, vector<1x4x4x8xbf16>
    %37 = vector.shape_cast %36 : vector<1x4x4x8xbf16> to vector<4x4x8xbf16>
    %38 = vector.shape_cast %37 : vector<4x4x8xbf16> to vector<16x8xbf16>
    %c5 = arith.constant 5 : index
    %c0_39 = arith.constant 0 : index
    %c0_40 = arith.constant 0 : index
    %39 = vector.load %arg2[%c5, %c0_39, %c0_40] : memref<9x8x8xbf16, #tpu.memory_space<vmem>>, vector<1x8x8xbf16>
    %40 = vector.shape_cast %39 : vector<1x8x8xbf16> to vector<8x8xbf16>
    %cst_41 = arith.constant dense<0.000000e+00> : vector<16x8xf32>
    %41 = tpu.matmul %38, %40, %cst_41 {dimension_numbers = #tpu.dot_dimension_numbers<[1], [0], [0], [1], [0, 0, 1, 1], [], []>} : vector<16x8xbf16>, vector<8x8xbf16>, vector<16x8xf32> -> vector<16x8xf32>
    %42 = arith.addf %35, %41 : vector<16x8xf32>
    %c0_42 = arith.constant 0 : index
    %c2_43 = arith.constant 2 : index
    %c0_44 = arith.constant 0 : index
    %c0_45 = arith.constant 0 : index
    %43 = vector.load %arg1[%c0_42, %c2_43, %c0_44, %c0_45] : memref<1x6x6x8xbf16, #tpu.memory_space<vmem>>, vector<1x4x4x8xbf16>
    %44 = vector.shape_cast %43 : vector<1x4x4x8xbf16> to vector<4x4x8xbf16>
    %45 = vector.shape_cast %44 : vector<4x4x8xbf16> to vector<16x8xbf16>
    %c6 = arith.constant 6 : index
    %c0_46 = arith.constant 0 : index
    %c0_47 = arith.constant 0 : index
    %46 = vector.load %arg2[%c6, %c0_46, %c0_47] : memref<9x8x8xbf16, #tpu.memory_space<vmem>>, vector<1x8x8xbf16>
    %47 = vector.shape_cast %46 : vector<1x8x8xbf16> to vector<8x8xbf16>
    %cst_48 = arith.constant dense<0.000000e+00> : vector<16x8xf32>
    %48 = tpu.matmul %45, %47, %cst_48 {dimension_numbers = #tpu.dot_dimension_numbers<[1], [0], [0], [1], [0, 0, 1, 1], [], []>} : vector<16x8xbf16>, vector<8x8xbf16>, vector<16x8xf32> -> vector<16x8xf32>
    %49 = arith.addf %42, %48 : vector<16x8xf32>
    %c0_49 = arith.constant 0 : index
    %c2_50 = arith.constant 2 : index
    %c1_51 = arith.constant 1 : index
    %c0_52 = arith.constant 0 : index
    %50 = vector.load %arg1[%c0_49, %c2_50, %c1_51, %c0_52] : memref<1x6x6x8xbf16, #tpu.memory_space<vmem>>, vector<1x4x4x8xbf16>
    %51 = vector.shape_cast %50 : vector<1x4x4x8xbf16> to vector<4x4x8xbf16>
    %52 = vector.shape_cast %51 : vector<4x4x8xbf16> to vector<16x8xbf16>
    %c7 = arith.constant 7 : index
    %c0_53 = arith.constant 0 : index
    %c0_54 = arith.constant 0 : index
    %53 = vector.load %arg2[%c7, %c0_53, %c0_54] : memref<9x8x8xbf16, #tpu.memory_space<vmem>>, vector<1x8x8xbf16>
    %54 = vector.shape_cast %53 : vector<1x8x8xbf16> to vector<8x8xbf16>
    %cst_55 = arith.constant dense<0.000000e+00> : vector<16x8xf32>
    %55 = tpu.matmul %52, %54, %cst_55 {dimension_numbers = #tpu.dot_dimension_numbers<[1], [0], [0], [1], [0, 0, 1, 1], [], []>} : vector<16x8xbf16>, vector<8x8xbf16>, vector<16x8xf32> -> vector<16x8xf32>
    %56 = arith.addf %49, %55 : vector<16x8xf32>
    %c0_56 = arith.constant 0 : index
    %c2_57 = arith.constant 2 : index
    %c2_58 = arith.constant 2 : index
    %c0_59 = arith.constant 0 : index
    %57 = vector.load %arg1[%c0_56, %c2_57, %c2_58, %c0_59] : memref<1x6x6x8xbf16, #tpu.memory_space<vmem>>, vector<1x4x4x8xbf16>
    %58 = vector.shape_cast %57 : vector<1x4x4x8xbf16> to vector<4x4x8xbf16>
    %59 = vector.shape_cast %58 : vector<4x4x8xbf16> to vector<16x8xbf16>
    %c8 = arith.constant 8 : index
    %c0_60 = arith.constant 0 : index
    %c0_61 = arith.constant 0 : index
    %60 = vector.load %arg2[%c8, %c0_60, %c0_61] : memref<9x8x8xbf16, #tpu.memory_space<vmem>>, vector<1x8x8xbf16>
    %61 = vector.shape_cast %60 : vector<1x8x8xbf16> to vector<8x8xbf16>
    %cst_62 = arith.constant dense<0.000000e+00> : vector<16x8xf32>
    %62 = tpu.matmul %59, %61, %cst_62 {dimension_numbers = #tpu.dot_dimension_numbers<[1], [0], [0], [1], [0, 0, 1, 1], [], []>} : vector<16x8xbf16>, vector<8x8xbf16>, vector<16x8xf32> -> vector<16x8xf32>
    %63 = arith.addf %56, %62 : vector<16x8xf32>
    %c0_63 = arith.constant 0 : index
    %c0_64 = arith.constant 0 : index
    %64 = vector.load %arg3[%c0_63, %c0_64] : memref<1x8xf32, #tpu.memory_space<vmem>>, vector<1x8xf32>
    %65 = vector.shape_cast %64 : vector<1x8xf32> to vector<8xf32>
    %66 = vector.shape_cast %65 : vector<8xf32> to vector<1x8xf32>
    %67 = vector.broadcast %66 : vector<1x8xf32> to vector<16x8xf32>
    %68 = arith.addf %63, %67 : vector<16x8xf32>
    %cst_65 = arith.constant 0.000000e+00 : f32
    %69 = vector.broadcast %cst_65 : f32 to vector<16x8xf32>
    %70 = arith.cmpf oge, %68, %69 : vector<16x8xf32>
    %c0_66 = arith.constant 0 : index
    %c0_67 = arith.constant 0 : index
    %71 = vector.load %arg4[%c0_66, %c0_67] : memref<1x8xf32, #tpu.memory_space<vmem>>, vector<1x8xf32>
    %72 = vector.shape_cast %71 : vector<1x8xf32> to vector<8xf32>
    %73 = vector.shape_cast %72 : vector<8xf32> to vector<1x8xf32>
    %74 = vector.broadcast %73 : vector<1x8xf32> to vector<16x8xf32>
    %75 = arith.mulf %68, %74 : vector<16x8xf32>
    %76 = arith.select %70, %68, %75 : vector<16x8xi1>, vector<16x8xf32>
    %77 = vector.shape_cast %76 : vector<16x8xf32> to vector<4x4x8xf32>
    %78 = arith.truncf %77 : vector<4x4x8xf32> to vector<4x4x8xbf16>
    %c0_68 = arith.constant 0 : index
    %c0_69 = arith.constant 0 : index
    %c0_70 = arith.constant 0 : index
    %c0_71 = arith.constant 0 : index
    %79 = vector.load %arg5[%c0_68, %c0_69, %c0_70, %c0_71] : memref<1x4x4x8xbf16, #tpu.memory_space<vmem>>, vector<1x4x4x8xbf16>
    %80 = vector.shape_cast %79 : vector<1x4x4x8xbf16> to vector<4x4x8xbf16>
    %81 = vector.shape_cast %78 : vector<4x4x8xbf16> to vector<1x4x4x8xbf16>
    tpu.vector_store %arg5[%c0_68, %c0_69, %c0_70, %c0_71], %81 {strides = array<i32>} : memref<1x4x4x8xbf16, #tpu.memory_space<vmem>>, vector<1x4x4x8xbf16>,
    return
  }
  func.func @transform_0(%arg0: i32) -> (i32, i32, i32, i32) {
    %c0_i32 = arith.constant 0 : i32
    %c0_i32_0 = arith.constant 0 : i32
    %c0_i32_1 = arith.constant 0 : i32
    %c0_i32_2 = arith.constant 0 : i32
    return %arg0, %c0_i32, %c0_i32_0, %c0_i32_1 : i32, i32, i32, i32
  }
  func.func @transform_1(%arg0: i32) -> (i32, i32, i32) {
    %c0_i32 = arith.constant 0 : i32
    %c0_i32_0 = arith.constant 0 : i32
    %c0_i32_1 = arith.constant 0 : i32
    %c0_i32_2 = arith.constant 0 : i32
    return %c0_i32, %c0_i32_0, %c0_i32_1 : i32, i32, i32
  }
  func.func @transform_2(%arg0: i32) -> (i32, i32) {
    %c0_i32 = arith.constant 0 : i32
    %c0_i32_0 = arith.constant 0 : i32
    %c0_i32_1 = arith.constant 0 : i32
    return %c0_i32, %c0_i32_0 : i32, i32
  }
  func.func @transform_3(%arg0: i32) -> (i32, i32) {
    %c0_i32 = arith.constant 0 : i32
    %c0_i32_0 = arith.constant 0 : i32
    %c0_i32_1 = arith.constant 0 : i32
    return %c0_i32, %c0_i32_0 : i32, i32
  }
  func.func @transform_4(%arg0: i32) -> (i32, i32, i32, i32) {
    %c0_i32 = arith.constant 0 : i32
    %c0_i32_0 = arith.constant 0 : i32
    %c0_i32_1 = arith.constant 0 : i32
    %c0_i32_2 = arith.constant 0 : i32
    return %arg0, %c0_i32, %c0_i32_0, %c0_i32_1 : i32, i32, i32, i32
  }
}

module attributes {stable_mosaic.version = 11 : i64} {
  func.func @_conv_band_kernel(%arg0: i32, %arg1: memref<1x3x3x128xbf16, #tpu.memory_space<vmem>>, %arg2: memref<4x128x32xbf16, #tpu.memory_space<vmem>>, %arg3: memref<1x32xf32, #tpu.memory_space<vmem>>, %arg4: memref<1x32xf32, #tpu.memory_space<vmem>>, %arg5: memref<1x2x2x32xbf16, #tpu.memory_space<vmem>>) attributes {dimension_semantics = [#tpu.dimension_semantics<parallel>], iteration_bounds = array<i64: 2>, scalar_prefetch = 0 : i64, scratch_operands = 0 : i64, tpu.core_type = #tpu.core_type<tc>, window_params = [{transform_indices = @transform_0, window_bounds = array<i64: 1, 3, 3, 128>}, {pipeline_mode = #tpu.pipeline_mode<synchronous>, transform_indices = @transform_1, window_bounds = array<i64: 4, 128, 32>}, {pipeline_mode = #tpu.pipeline_mode<synchronous>, transform_indices = @transform_2, window_bounds = array<i64: 1, 32>}, {pipeline_mode = #tpu.pipeline_mode<synchronous>, transform_indices = @transform_3, window_bounds = array<i64: 1, 32>}, {transform_indices = @transform_4, window_bounds = array<i64: 1, 2, 2, 32>}]} {
    %cst = arith.constant 0.000000e+00 : f32
    %0 = vector.broadcast %cst : f32 to vector<4x32xf32>
    %c0 = arith.constant 0 : index
    %c0_0 = arith.constant 0 : index
    %c0_1 = arith.constant 0 : index
    %c0_2 = arith.constant 0 : index
    %1 = vector.load %arg1[%c0, %c0_0, %c0_1, %c0_2] : memref<1x3x3x128xbf16, #tpu.memory_space<vmem>>, vector<1x2x2x128xbf16>
    %2 = vector.shape_cast %1 : vector<1x2x2x128xbf16> to vector<2x2x128xbf16>
    %3 = vector.shape_cast %2 : vector<2x2x128xbf16> to vector<4x128xbf16>
    %c0_3 = arith.constant 0 : index
    %c0_4 = arith.constant 0 : index
    %c0_5 = arith.constant 0 : index
    %4 = vector.load %arg2[%c0_3, %c0_4, %c0_5] : memref<4x128x32xbf16, #tpu.memory_space<vmem>>, vector<1x128x32xbf16>
    %5 = vector.shape_cast %4 : vector<1x128x32xbf16> to vector<128x32xbf16>
    %cst_6 = arith.constant dense<0.000000e+00> : vector<4x32xf32>
    %6 = tpu.matmul %3, %5, %cst_6 {dimension_numbers = #tpu.dot_dimension_numbers<[1], [0], [0], [1], [0, 0, 1, 1], [], []>} : vector<4x128xbf16>, vector<128x32xbf16>, vector<4x32xf32> -> vector<4x32xf32>
    %7 = arith.addf %0, %6 : vector<4x32xf32>
    %c0_7 = arith.constant 0 : index
    %c0_8 = arith.constant 0 : index
    %c1 = arith.constant 1 : index
    %c0_9 = arith.constant 0 : index
    %8 = vector.load %arg1[%c0_7, %c0_8, %c1, %c0_9] : memref<1x3x3x128xbf16, #tpu.memory_space<vmem>>, vector<1x2x2x128xbf16>
    %9 = vector.shape_cast %8 : vector<1x2x2x128xbf16> to vector<2x2x128xbf16>
    %10 = vector.shape_cast %9 : vector<2x2x128xbf16> to vector<4x128xbf16>
    %c1_10 = arith.constant 1 : index
    %c0_11 = arith.constant 0 : index
    %c0_12 = arith.constant 0 : index
    %11 = vector.load %arg2[%c1_10, %c0_11, %c0_12] : memref<4x128x32xbf16, #tpu.memory_space<vmem>>, vector<1x128x32xbf16>
    %12 = vector.shape_cast %11 : vector<1x128x32xbf16> to vector<128x32xbf16>
    %cst_13 = arith.constant dense<0.000000e+00> : vector<4x32xf32>
    %13 = tpu.matmul %10, %12, %cst_13 {dimension_numbers = #tpu.dot_dimension_numbers<[1], [0], [0], [1], [0, 0, 1, 1], [], []>} : vector<4x128xbf16>, vector<128x32xbf16>, vector<4x32xf32> -> vector<4x32xf32>
    %14 = arith.addf %7, %13 : vector<4x32xf32>
    %c0_14 = arith.constant 0 : index
    %c1_15 = arith.constant 1 : index
    %c0_16 = arith.constant 0 : index
    %c0_17 = arith.constant 0 : index
    %15 = vector.load %arg1[%c0_14, %c1_15, %c0_16, %c0_17] : memref<1x3x3x128xbf16, #tpu.memory_space<vmem>>, vector<1x2x2x128xbf16>
    %16 = vector.shape_cast %15 : vector<1x2x2x128xbf16> to vector<2x2x128xbf16>
    %17 = vector.shape_cast %16 : vector<2x2x128xbf16> to vector<4x128xbf16>
    %c2 = arith.constant 2 : index
    %c0_18 = arith.constant 0 : index
    %c0_19 = arith.constant 0 : index
    %18 = vector.load %arg2[%c2, %c0_18, %c0_19] : memref<4x128x32xbf16, #tpu.memory_space<vmem>>, vector<1x128x32xbf16>
    %19 = vector.shape_cast %18 : vector<1x128x32xbf16> to vector<128x32xbf16>
    %cst_20 = arith.constant dense<0.000000e+00> : vector<4x32xf32>
    %20 = tpu.matmul %17, %19, %cst_20 {dimension_numbers = #tpu.dot_dimension_numbers<[1], [0], [0], [1], [0, 0, 1, 1], [], []>} : vector<4x128xbf16>, vector<128x32xbf16>, vector<4x32xf32> -> vector<4x32xf32>
    %21 = arith.addf %14, %20 : vector<4x32xf32>
    %c0_21 = arith.constant 0 : index
    %c1_22 = arith.constant 1 : index
    %c1_23 = arith.constant 1 : index
    %c0_24 = arith.constant 0 : index
    %22 = vector.load %arg1[%c0_21, %c1_22, %c1_23, %c0_24] : memref<1x3x3x128xbf16, #tpu.memory_space<vmem>>, vector<1x2x2x128xbf16>
    %23 = vector.shape_cast %22 : vector<1x2x2x128xbf16> to vector<2x2x128xbf16>
    %24 = vector.shape_cast %23 : vector<2x2x128xbf16> to vector<4x128xbf16>
    %c3 = arith.constant 3 : index
    %c0_25 = arith.constant 0 : index
    %c0_26 = arith.constant 0 : index
    %25 = vector.load %arg2[%c3, %c0_25, %c0_26] : memref<4x128x32xbf16, #tpu.memory_space<vmem>>, vector<1x128x32xbf16>
    %26 = vector.shape_cast %25 : vector<1x128x32xbf16> to vector<128x32xbf16>
    %cst_27 = arith.constant dense<0.000000e+00> : vector<4x32xf32>
    %27 = tpu.matmul %24, %26, %cst_27 {dimension_numbers = #tpu.dot_dimension_numbers<[1], [0], [0], [1], [0, 0, 1, 1], [], []>} : vector<4x128xbf16>, vector<128x32xbf16>, vector<4x32xf32> -> vector<4x32xf32>
    %28 = arith.addf %21, %27 : vector<4x32xf32>
    %c0_28 = arith.constant 0 : index
    %c0_29 = arith.constant 0 : index
    %29 = vector.load %arg3[%c0_28, %c0_29] : memref<1x32xf32, #tpu.memory_space<vmem>>, vector<1x32xf32>
    %30 = vector.shape_cast %29 : vector<1x32xf32> to vector<32xf32>
    %31 = vector.shape_cast %30 : vector<32xf32> to vector<1x32xf32>
    %32 = vector.broadcast %31 : vector<1x32xf32> to vector<4x32xf32>
    %33 = arith.addf %28, %32 : vector<4x32xf32>
    %cst_30 = arith.constant 0.000000e+00 : f32
    %34 = vector.broadcast %cst_30 : f32 to vector<4x32xf32>
    %35 = arith.cmpf oge, %33, %34 : vector<4x32xf32>
    %c0_31 = arith.constant 0 : index
    %c0_32 = arith.constant 0 : index
    %36 = vector.load %arg4[%c0_31, %c0_32] : memref<1x32xf32, #tpu.memory_space<vmem>>, vector<1x32xf32>
    %37 = vector.shape_cast %36 : vector<1x32xf32> to vector<32xf32>
    %38 = vector.shape_cast %37 : vector<32xf32> to vector<1x32xf32>
    %39 = vector.broadcast %38 : vector<1x32xf32> to vector<4x32xf32>
    %40 = arith.mulf %33, %39 : vector<4x32xf32>
    %41 = arith.select %35, %33, %40 : vector<4x32xi1>, vector<4x32xf32>
    %42 = vector.shape_cast %41 : vector<4x32xf32> to vector<2x2x32xf32>
    %43 = arith.truncf %42 : vector<2x2x32xf32> to vector<2x2x32xbf16>
    %c0_33 = arith.constant 0 : index
    %c0_34 = arith.constant 0 : index
    %c0_35 = arith.constant 0 : index
    %c0_36 = arith.constant 0 : index
    %44 = vector.load %arg5[%c0_33, %c0_34, %c0_35, %c0_36] : memref<1x2x2x32xbf16, #tpu.memory_space<vmem>>, vector<1x2x2x32xbf16>
    %45 = vector.shape_cast %44 : vector<1x2x2x32xbf16> to vector<2x2x32xbf16>
    %46 = vector.shape_cast %43 : vector<2x2x32xbf16> to vector<1x2x2x32xbf16>
    tpu.vector_store %arg5[%c0_33, %c0_34, %c0_35, %c0_36], %46 {strides = array<i32>} : memref<1x2x2x32xbf16, #tpu.memory_space<vmem>>, vector<1x2x2x32xbf16>,
    return
  }
  func.func @transform_0(%arg0: i32) -> (i32, i32, i32, i32) {
    %c0_i32 = arith.constant 0 : i32
    %c0_i32_0 = arith.constant 0 : i32
    %c0_i32_1 = arith.constant 0 : i32
    %c0_i32_2 = arith.constant 0 : i32
    return %arg0, %c0_i32, %c0_i32_0, %c0_i32_1 : i32, i32, i32, i32
  }
  func.func @transform_1(%arg0: i32) -> (i32, i32, i32) {
    %c0_i32 = arith.constant 0 : i32
    %c0_i32_0 = arith.constant 0 : i32
    %c0_i32_1 = arith.constant 0 : i32
    %c0_i32_2 = arith.constant 0 : i32
    return %c0_i32, %c0_i32_0, %c0_i32_1 : i32, i32, i32
  }
  func.func @transform_2(%arg0: i32) -> (i32, i32) {
    %c0_i32 = arith.constant 0 : i32
    %c0_i32_0 = arith.constant 0 : i32
    %c0_i32_1 = arith.constant 0 : i32
    return %c0_i32, %c0_i32_0 : i32, i32
  }
  func.func @transform_3(%arg0: i32) -> (i32, i32) {
    %c0_i32 = arith.constant 0 : i32
    %c0_i32_0 = arith.constant 0 : i32
    %c0_i32_1 = arith.constant 0 : i32
    return %c0_i32, %c0_i32_0 : i32, i32
  }
  func.func @transform_4(%arg0: i32) -> (i32, i32, i32, i32) {
    %c0_i32 = arith.constant 0 : i32
    %c0_i32_0 = arith.constant 0 : i32
    %c0_i32_1 = arith.constant 0 : i32
    %c0_i32_2 = arith.constant 0 : i32
    return %arg0, %c0_i32, %c0_i32_0, %c0_i32_1 : i32, i32, i32, i32
  }
}

module attributes {stable_mosaic.version = 11 : i64} {
  func.func @_conv_band_kernel(%arg0: i32, %arg1: memref<1x4x4x32xbf16, #tpu.memory_space<vmem>>, %arg2: memref<9x32x32xbf16, #tpu.memory_space<vmem>>, %arg3: memref<1x32xf32, #tpu.memory_space<vmem>>, %arg4: memref<1x32xf32, #tpu.memory_space<vmem>>, %arg5: memref<1x2x2x32xbf16, #tpu.memory_space<vmem>>) attributes {dimension_semantics = [#tpu.dimension_semantics<parallel>], iteration_bounds = array<i64: 2>, scalar_prefetch = 0 : i64, scratch_operands = 0 : i64, tpu.core_type = #tpu.core_type<tc>, window_params = [{transform_indices = @transform_0, window_bounds = array<i64: 1, 4, 4, 32>}, {pipeline_mode = #tpu.pipeline_mode<synchronous>, transform_indices = @transform_1, window_bounds = array<i64: 9, 32, 32>}, {pipeline_mode = #tpu.pipeline_mode<synchronous>, transform_indices = @transform_2, window_bounds = array<i64: 1, 32>}, {pipeline_mode = #tpu.pipeline_mode<synchronous>, transform_indices = @transform_3, window_bounds = array<i64: 1, 32>}, {transform_indices = @transform_4, window_bounds = array<i64: 1, 2, 2, 32>}]} {
    %cst = arith.constant 0.000000e+00 : f32
    %0 = vector.broadcast %cst : f32 to vector<4x32xf32>
    %c0 = arith.constant 0 : index
    %c0_0 = arith.constant 0 : index
    %c0_1 = arith.constant 0 : index
    %c0_2 = arith.constant 0 : index
    %1 = vector.load %arg1[%c0, %c0_0, %c0_1, %c0_2] : memref<1x4x4x32xbf16, #tpu.memory_space<vmem>>, vector<1x2x2x32xbf16>
    %2 = vector.shape_cast %1 : vector<1x2x2x32xbf16> to vector<2x2x32xbf16>
    %3 = vector.shape_cast %2 : vector<2x2x32xbf16> to vector<4x32xbf16>
    %c0_3 = arith.constant 0 : index
    %c0_4 = arith.constant 0 : index
    %c0_5 = arith.constant 0 : index
    %4 = vector.load %arg2[%c0_3, %c0_4, %c0_5] : memref<9x32x32xbf16, #tpu.memory_space<vmem>>, vector<1x32x32xbf16>
    %5 = vector.shape_cast %4 : vector<1x32x32xbf16> to vector<32x32xbf16>
    %cst_6 = arith.constant dense<0.000000e+00> : vector<4x32xf32>
    %6 = tpu.matmul %3, %5, %cst_6 {dimension_numbers = #tpu.dot_dimension_numbers<[1], [0], [0], [1], [0, 0, 1, 1], [], []>} : vector<4x32xbf16>, vector<32x32xbf16>, vector<4x32xf32> -> vector<4x32xf32>
    %7 = arith.addf %0, %6 : vector<4x32xf32>
    %c0_7 = arith.constant 0 : index
    %c0_8 = arith.constant 0 : index
    %c1 = arith.constant 1 : index
    %c0_9 = arith.constant 0 : index
    %8 = vector.load %arg1[%c0_7, %c0_8, %c1, %c0_9] : memref<1x4x4x32xbf16, #tpu.memory_space<vmem>>, vector<1x2x2x32xbf16>
    %9 = vector.shape_cast %8 : vector<1x2x2x32xbf16> to vector<2x2x32xbf16>
    %10 = vector.shape_cast %9 : vector<2x2x32xbf16> to vector<4x32xbf16>
    %c1_10 = arith.constant 1 : index
    %c0_11 = arith.constant 0 : index
    %c0_12 = arith.constant 0 : index
    %11 = vector.load %arg2[%c1_10, %c0_11, %c0_12] : memref<9x32x32xbf16, #tpu.memory_space<vmem>>, vector<1x32x32xbf16>
    %12 = vector.shape_cast %11 : vector<1x32x32xbf16> to vector<32x32xbf16>
    %cst_13 = arith.constant dense<0.000000e+00> : vector<4x32xf32>
    %13 = tpu.matmul %10, %12, %cst_13 {dimension_numbers = #tpu.dot_dimension_numbers<[1], [0], [0], [1], [0, 0, 1, 1], [], []>} : vector<4x32xbf16>, vector<32x32xbf16>, vector<4x32xf32> -> vector<4x32xf32>
    %14 = arith.addf %7, %13 : vector<4x32xf32>
    %c0_14 = arith.constant 0 : index
    %c0_15 = arith.constant 0 : index
    %c2 = arith.constant 2 : index
    %c0_16 = arith.constant 0 : index
    %15 = vector.load %arg1[%c0_14, %c0_15, %c2, %c0_16] : memref<1x4x4x32xbf16, #tpu.memory_space<vmem>>, vector<1x2x2x32xbf16>
    %16 = vector.shape_cast %15 : vector<1x2x2x32xbf16> to vector<2x2x32xbf16>
    %17 = vector.shape_cast %16 : vector<2x2x32xbf16> to vector<4x32xbf16>
    %c2_17 = arith.constant 2 : index
    %c0_18 = arith.constant 0 : index
    %c0_19 = arith.constant 0 : index
    %18 = vector.load %arg2[%c2_17, %c0_18, %c0_19] : memref<9x32x32xbf16, #tpu.memory_space<vmem>>, vector<1x32x32xbf16>
    %19 = vector.shape_cast %18 : vector<1x32x32xbf16> to vector<32x32xbf16>
    %cst_20 = arith.constant dense<0.000000e+00> : vector<4x32xf32>
    %20 = tpu.matmul %17, %19, %cst_20 {dimension_numbers = #tpu.dot_dimension_numbers<[1], [0], [0], [1], [0, 0, 1, 1], [], []>} : vector<4x32xbf16>, vector<32x32xbf16>, vector<4x32xf32> -> vector<4x32xf32>
    %21 = arith.addf %14, %20 : vector<4x32xf32>
    %c0_21 = arith.constant 0 : index
    %c1_22 = arith.constant 1 : index
    %c0_23 = arith.constant 0 : index
    %c0_24 = arith.constant 0 : index
    %22 = vector.load %arg1[%c0_21, %c1_22, %c0_23, %c0_24] : memref<1x4x4x32xbf16, #tpu.memory_space<vmem>>, vector<1x2x2x32xbf16>
    %23 = vector.shape_cast %22 : vector<1x2x2x32xbf16> to vector<2x2x32xbf16>
    %24 = vector.shape_cast %23 : vector<2x2x32xbf16> to vector<4x32xbf16>
    %c3 = arith.constant 3 : index
    %c0_25 = arith.constant 0 : index
    %c0_26 = arith.constant 0 : index
    %25 = vector.load %arg2[%c3, %c0_25, %c0_26] : memref<9x32x32xbf16, #tpu.memory_space<vmem>>, vector<1x32x32xbf16>
    %26 = vector.shape_cast %25 : vector<1x32x32xbf16> to vector<32x32xbf16>
    %cst_27 = arith.constant dense<0.000000e+00> : vector<4x32xf32>
    %27 = tpu.matmul %24, %26, %cst_27 {dimension_numbers = #tpu.dot_dimension_numbers<[1], [0], [0], [1], [0, 0, 1, 1], [], []>} : vector<4x32xbf16>, vector<32x32xbf16>, vector<4x32xf32> -> vector<4x32xf32>
    %28 = arith.addf %21, %27 : vector<4x32xf32>
    %c0_28 = arith.constant 0 : index
    %c1_29 = arith.constant 1 : index
    %c1_30 = arith.constant 1 : index
    %c0_31 = arith.constant 0 : index
    %29 = vector.load %arg1[%c0_28, %c1_29, %c1_30, %c0_31] : memref<1x4x4x32xbf16, #tpu.memory_space<vmem>>, vector<1x2x2x32xbf16>
    %30 = vector.shape_cast %29 : vector<1x2x2x32xbf16> to vector<2x2x32xbf16>
    %31 = vector.shape_cast %30 : vector<2x2x32xbf16> to vector<4x32xbf16>
    %c4 = arith.constant 4 : index
    %c0_32 = arith.constant 0 : index
    %c0_33 = arith.constant 0 : index
    %32 = vector.load %arg2[%c4, %c0_32, %c0_33] : memref<9x32x32xbf16, #tpu.memory_space<vmem>>, vector<1x32x32xbf16>
    %33 = vector.shape_cast %32 : vector<1x32x32xbf16> to vector<32x32xbf16>
    %cst_34 = arith.constant dense<0.000000e+00> : vector<4x32xf32>
    %34 = tpu.matmul %31, %33, %cst_34 {dimension_numbers = #tpu.dot_dimension_numbers<[1], [0], [0], [1], [0, 0, 1, 1], [], []>} : vector<4x32xbf16>, vector<32x32xbf16>, vector<4x32xf32> -> vector<4x32xf32>
    %35 = arith.addf %28, %34 : vector<4x32xf32>
    %c0_35 = arith.constant 0 : index
    %c1_36 = arith.constant 1 : index
    %c2_37 = arith.constant 2 : index
    %c0_38 = arith.constant 0 : index
    %36 = vector.load %arg1[%c0_35, %c1_36, %c2_37, %c0_38] : memref<1x4x4x32xbf16, #tpu.memory_space<vmem>>, vector<1x2x2x32xbf16>
    %37 = vector.shape_cast %36 : vector<1x2x2x32xbf16> to vector<2x2x32xbf16>
    %38 = vector.shape_cast %37 : vector<2x2x32xbf16> to vector<4x32xbf16>
    %c5 = arith.constant 5 : index
    %c0_39 = arith.constant 0 : index
    %c0_40 = arith.constant 0 : index
    %39 = vector.load %arg2[%c5, %c0_39, %c0_40] : memref<9x32x32xbf16, #tpu.memory_space<vmem>>, vector<1x32x32xbf16>
    %40 = vector.shape_cast %39 : vector<1x32x32xbf16> to vector<32x32xbf16>
    %cst_41 = arith.constant dense<0.000000e+00> : vector<4x32xf32>
    %41 = tpu.matmul %38, %40, %cst_41 {dimension_numbers = #tpu.dot_dimension_numbers<[1], [0], [0], [1], [0, 0, 1, 1], [], []>} : vector<4x32xbf16>, vector<32x32xbf16>, vector<4x32xf32> -> vector<4x32xf32>
    %42 = arith.addf %35, %41 : vector<4x32xf32>
    %c0_42 = arith.constant 0 : index
    %c2_43 = arith.constant 2 : index
    %c0_44 = arith.constant 0 : index
    %c0_45 = arith.constant 0 : index
    %43 = vector.load %arg1[%c0_42, %c2_43, %c0_44, %c0_45] : memref<1x4x4x32xbf16, #tpu.memory_space<vmem>>, vector<1x2x2x32xbf16>
    %44 = vector.shape_cast %43 : vector<1x2x2x32xbf16> to vector<2x2x32xbf16>
    %45 = vector.shape_cast %44 : vector<2x2x32xbf16> to vector<4x32xbf16>
    %c6 = arith.constant 6 : index
    %c0_46 = arith.constant 0 : index
    %c0_47 = arith.constant 0 : index
    %46 = vector.load %arg2[%c6, %c0_46, %c0_47] : memref<9x32x32xbf16, #tpu.memory_space<vmem>>, vector<1x32x32xbf16>
    %47 = vector.shape_cast %46 : vector<1x32x32xbf16> to vector<32x32xbf16>
    %cst_48 = arith.constant dense<0.000000e+00> : vector<4x32xf32>
    %48 = tpu.matmul %45, %47, %cst_48 {dimension_numbers = #tpu.dot_dimension_numbers<[1], [0], [0], [1], [0, 0, 1, 1], [], []>} : vector<4x32xbf16>, vector<32x32xbf16>, vector<4x32xf32> -> vector<4x32xf32>
    %49 = arith.addf %42, %48 : vector<4x32xf32>
    %c0_49 = arith.constant 0 : index
    %c2_50 = arith.constant 2 : index
    %c1_51 = arith.constant 1 : index
    %c0_52 = arith.constant 0 : index
    %50 = vector.load %arg1[%c0_49, %c2_50, %c1_51, %c0_52] : memref<1x4x4x32xbf16, #tpu.memory_space<vmem>>, vector<1x2x2x32xbf16>
    %51 = vector.shape_cast %50 : vector<1x2x2x32xbf16> to vector<2x2x32xbf16>
    %52 = vector.shape_cast %51 : vector<2x2x32xbf16> to vector<4x32xbf16>
    %c7 = arith.constant 7 : index
    %c0_53 = arith.constant 0 : index
    %c0_54 = arith.constant 0 : index
    %53 = vector.load %arg2[%c7, %c0_53, %c0_54] : memref<9x32x32xbf16, #tpu.memory_space<vmem>>, vector<1x32x32xbf16>
    %54 = vector.shape_cast %53 : vector<1x32x32xbf16> to vector<32x32xbf16>
    %cst_55 = arith.constant dense<0.000000e+00> : vector<4x32xf32>
    %55 = tpu.matmul %52, %54, %cst_55 {dimension_numbers = #tpu.dot_dimension_numbers<[1], [0], [0], [1], [0, 0, 1, 1], [], []>} : vector<4x32xbf16>, vector<32x32xbf16>, vector<4x32xf32> -> vector<4x32xf32>
    %56 = arith.addf %49, %55 : vector<4x32xf32>
    %c0_56 = arith.constant 0 : index
    %c2_57 = arith.constant 2 : index
    %c2_58 = arith.constant 2 : index
    %c0_59 = arith.constant 0 : index
    %57 = vector.load %arg1[%c0_56, %c2_57, %c2_58, %c0_59] : memref<1x4x4x32xbf16, #tpu.memory_space<vmem>>, vector<1x2x2x32xbf16>
    %58 = vector.shape_cast %57 : vector<1x2x2x32xbf16> to vector<2x2x32xbf16>
    %59 = vector.shape_cast %58 : vector<2x2x32xbf16> to vector<4x32xbf16>
    %c8 = arith.constant 8 : index
    %c0_60 = arith.constant 0 : index
    %c0_61 = arith.constant 0 : index
    %60 = vector.load %arg2[%c8, %c0_60, %c0_61] : memref<9x32x32xbf16, #tpu.memory_space<vmem>>, vector<1x32x32xbf16>
    %61 = vector.shape_cast %60 : vector<1x32x32xbf16> to vector<32x32xbf16>
    %cst_62 = arith.constant dense<0.000000e+00> : vector<4x32xf32>
    %62 = tpu.matmul %59, %61, %cst_62 {dimension_numbers = #tpu.dot_dimension_numbers<[1], [0], [0], [1], [0, 0, 1, 1], [], []>} : vector<4x32xbf16>, vector<32x32xbf16>, vector<4x32xf32> -> vector<4x32xf32>
    %63 = arith.addf %56, %62 : vector<4x32xf32>
    %c0_63 = arith.constant 0 : index
    %c0_64 = arith.constant 0 : index
    %64 = vector.load %arg3[%c0_63, %c0_64] : memref<1x32xf32, #tpu.memory_space<vmem>>, vector<1x32xf32>
    %65 = vector.shape_cast %64 : vector<1x32xf32> to vector<32xf32>
    %66 = vector.shape_cast %65 : vector<32xf32> to vector<1x32xf32>
    %67 = vector.broadcast %66 : vector<1x32xf32> to vector<4x32xf32>
    %68 = arith.addf %63, %67 : vector<4x32xf32>
    %cst_65 = arith.constant 0.000000e+00 : f32
    %69 = vector.broadcast %cst_65 : f32 to vector<4x32xf32>
    %70 = arith.cmpf oge, %68, %69 : vector<4x32xf32>
    %c0_66 = arith.constant 0 : index
    %c0_67 = arith.constant 0 : index
    %71 = vector.load %arg4[%c0_66, %c0_67] : memref<1x32xf32, #tpu.memory_space<vmem>>, vector<1x32xf32>
    %72 = vector.shape_cast %71 : vector<1x32xf32> to vector<32xf32>
    %73 = vector.shape_cast %72 : vector<32xf32> to vector<1x32xf32>
    %74 = vector.broadcast %73 : vector<1x32xf32> to vector<4x32xf32>
    %75 = arith.mulf %68, %74 : vector<4x32xf32>
    %76 = arith.select %70, %68, %75 : vector<4x32xi1>, vector<4x32xf32>
    %77 = vector.shape_cast %76 : vector<4x32xf32> to vector<2x2x32xf32>
    %78 = arith.truncf %77 : vector<2x2x32xf32> to vector<2x2x32xbf16>
    %c0_68 = arith.constant 0 : index
    %c0_69 = arith.constant 0 : index
    %c0_70 = arith.constant 0 : index
    %c0_71 = arith.constant 0 : index
    %79 = vector.load %arg5[%c0_68, %c0_69, %c0_70, %c0_71] : memref<1x2x2x32xbf16, #tpu.memory_space<vmem>>, vector<1x2x2x32xbf16>
    %80 = vector.shape_cast %79 : vector<1x2x2x32xbf16> to vector<2x2x32xbf16>
    %81 = vector.shape_cast %78 : vector<2x2x32xbf16> to vector<1x2x2x32xbf16>
    tpu.vector_store %arg5[%c0_68, %c0_69, %c0_70, %c0_71], %81 {strides = array<i32>} : memref<1x2x2x32xbf16, #tpu.memory_space<vmem>>, vector<1x2x2x32xbf16>,
    return
  }
  func.func @transform_0(%arg0: i32) -> (i32, i32, i32, i32) {
    %c0_i32 = arith.constant 0 : i32
    %c0_i32_0 = arith.constant 0 : i32
    %c0_i32_1 = arith.constant 0 : i32
    %c0_i32_2 = arith.constant 0 : i32
    return %arg0, %c0_i32, %c0_i32_0, %c0_i32_1 : i32, i32, i32, i32
  }
  func.func @transform_1(%arg0: i32) -> (i32, i32, i32) {
    %c0_i32 = arith.constant 0 : i32
    %c0_i32_0 = arith.constant 0 : i32
    %c0_i32_1 = arith.constant 0 : i32
    %c0_i32_2 = arith.constant 0 : i32
    return %c0_i32, %c0_i32_0, %c0_i32_1 : i32, i32, i32
  }
  func.func @transform_2(%arg0: i32) -> (i32, i32) {
    %c0_i32 = arith.constant 0 : i32
    %c0_i32_0 = arith.constant 0 : i32
    %c0_i32_1 = arith.constant 0 : i32
    return %c0_i32, %c0_i32_0 : i32, i32
  }
  func.func @transform_3(%arg0: i32) -> (i32, i32) {
    %c0_i32 = arith.constant 0 : i32
    %c0_i32_0 = arith.constant 0 : i32
    %c0_i32_1 = arith.constant 0 : i32
    return %c0_i32, %c0_i32_0 : i32, i32
  }
  func.func @transform_4(%arg0: i32) -> (i32, i32, i32, i32) {
    %c0_i32 = arith.constant 0 : i32
    %c0_i32_0 = arith.constant 0 : i32
    %c0_i32_1 = arith.constant 0 : i32
    %c0_i32_2 = arith.constant 0 : i32
    return %arg0, %c0_i32, %c0_i32_0, %c0_i32_1 : i32, i32, i32, i32
  }
}

module attributes {stable_mosaic.version = 11 : i64} {
  func.func @_conv_band_kernel(%arg0: i32, %arg1: memref<1x3x3x32xbf16, #tpu.memory_space<vmem>>, %arg2: memref<4x32x16xbf16, #tpu.memory_space<vmem>>, %arg3: memref<1x16xf32, #tpu.memory_space<vmem>>, %arg4: memref<1x16xf32, #tpu.memory_space<vmem>>, %arg5: memref<1x2x2x16xbf16, #tpu.memory_space<vmem>>) attributes {dimension_semantics = [#tpu.dimension_semantics<parallel>], iteration_bounds = array<i64: 4>, scalar_prefetch = 0 : i64, scratch_operands = 0 : i64, tpu.core_type = #tpu.core_type<tc>, window_params = [{transform_indices = @transform_0, window_bounds = array<i64: 1, 3, 3, 32>}, {pipeline_mode = #tpu.pipeline_mode<synchronous>, transform_indices = @transform_1, window_bounds = array<i64: 4, 32, 16>}, {pipeline_mode = #tpu.pipeline_mode<synchronous>, transform_indices = @transform_2, window_bounds = array<i64: 1, 16>}, {pipeline_mode = #tpu.pipeline_mode<synchronous>, transform_indices = @transform_3, window_bounds = array<i64: 1, 16>}, {transform_indices = @transform_4, window_bounds = array<i64: 1, 2, 2, 16>}]} {
    %cst = arith.constant 0.000000e+00 : f32
    %0 = vector.broadcast %cst : f32 to vector<4x16xf32>
    %c0 = arith.constant 0 : index
    %c0_0 = arith.constant 0 : index
    %c0_1 = arith.constant 0 : index
    %c0_2 = arith.constant 0 : index
    %1 = vector.load %arg1[%c0, %c0_0, %c0_1, %c0_2] : memref<1x3x3x32xbf16, #tpu.memory_space<vmem>>, vector<1x2x2x32xbf16>
    %2 = vector.shape_cast %1 : vector<1x2x2x32xbf16> to vector<2x2x32xbf16>
    %3 = vector.shape_cast %2 : vector<2x2x32xbf16> to vector<4x32xbf16>
    %c0_3 = arith.constant 0 : index
    %c0_4 = arith.constant 0 : index
    %c0_5 = arith.constant 0 : index
    %4 = vector.load %arg2[%c0_3, %c0_4, %c0_5] : memref<4x32x16xbf16, #tpu.memory_space<vmem>>, vector<1x32x16xbf16>
    %5 = vector.shape_cast %4 : vector<1x32x16xbf16> to vector<32x16xbf16>
    %cst_6 = arith.constant dense<0.000000e+00> : vector<4x16xf32>
    %6 = tpu.matmul %3, %5, %cst_6 {dimension_numbers = #tpu.dot_dimension_numbers<[1], [0], [0], [1], [0, 0, 1, 1], [], []>} : vector<4x32xbf16>, vector<32x16xbf16>, vector<4x16xf32> -> vector<4x16xf32>
    %7 = arith.addf %0, %6 : vector<4x16xf32>
    %c0_7 = arith.constant 0 : index
    %c0_8 = arith.constant 0 : index
    %c1 = arith.constant 1 : index
    %c0_9 = arith.constant 0 : index
    %8 = vector.load %arg1[%c0_7, %c0_8, %c1, %c0_9] : memref<1x3x3x32xbf16, #tpu.memory_space<vmem>>, vector<1x2x2x32xbf16>
    %9 = vector.shape_cast %8 : vector<1x2x2x32xbf16> to vector<2x2x32xbf16>
    %10 = vector.shape_cast %9 : vector<2x2x32xbf16> to vector<4x32xbf16>
    %c1_10 = arith.constant 1 : index
    %c0_11 = arith.constant 0 : index
    %c0_12 = arith.constant 0 : index
    %11 = vector.load %arg2[%c1_10, %c0_11, %c0_12] : memref<4x32x16xbf16, #tpu.memory_space<vmem>>, vector<1x32x16xbf16>
    %12 = vector.shape_cast %11 : vector<1x32x16xbf16> to vector<32x16xbf16>
    %cst_13 = arith.constant dense<0.000000e+00> : vector<4x16xf32>
    %13 = tpu.matmul %10, %12, %cst_13 {dimension_numbers = #tpu.dot_dimension_numbers<[1], [0], [0], [1], [0, 0, 1, 1], [], []>} : vector<4x32xbf16>, vector<32x16xbf16>, vector<4x16xf32> -> vector<4x16xf32>
    %14 = arith.addf %7, %13 : vector<4x16xf32>
    %c0_14 = arith.constant 0 : index
    %c1_15 = arith.constant 1 : index
    %c0_16 = arith.constant 0 : index
    %c0_17 = arith.constant 0 : index
    %15 = vector.load %arg1[%c0_14, %c1_15, %c0_16, %c0_17] : memref<1x3x3x32xbf16, #tpu.memory_space<vmem>>, vector<1x2x2x32xbf16>
    %16 = vector.shape_cast %15 : vector<1x2x2x32xbf16> to vector<2x2x32xbf16>
    %17 = vector.shape_cast %16 : vector<2x2x32xbf16> to vector<4x32xbf16>
    %c2 = arith.constant 2 : index
    %c0_18 = arith.constant 0 : index
    %c0_19 = arith.constant 0 : index
    %18 = vector.load %arg2[%c2, %c0_18, %c0_19] : memref<4x32x16xbf16, #tpu.memory_space<vmem>>, vector<1x32x16xbf16>
    %19 = vector.shape_cast %18 : vector<1x32x16xbf16> to vector<32x16xbf16>
    %cst_20 = arith.constant dense<0.000000e+00> : vector<4x16xf32>
    %20 = tpu.matmul %17, %19, %cst_20 {dimension_numbers = #tpu.dot_dimension_numbers<[1], [0], [0], [1], [0, 0, 1, 1], [], []>} : vector<4x32xbf16>, vector<32x16xbf16>, vector<4x16xf32> -> vector<4x16xf32>
    %21 = arith.addf %14, %20 : vector<4x16xf32>
    %c0_21 = arith.constant 0 : index
    %c1_22 = arith.constant 1 : index
    %c1_23 = arith.constant 1 : index
    %c0_24 = arith.constant 0 : index
    %22 = vector.load %arg1[%c0_21, %c1_22, %c1_23, %c0_24] : memref<1x3x3x32xbf16, #tpu.memory_space<vmem>>, vector<1x2x2x32xbf16>
    %23 = vector.shape_cast %22 : vector<1x2x2x32xbf16> to vector<2x2x32xbf16>
    %24 = vector.shape_cast %23 : vector<2x2x32xbf16> to vector<4x32xbf16>
    %c3 = arith.constant 3 : index
    %c0_25 = arith.constant 0 : index
    %c0_26 = arith.constant 0 : index
    %25 = vector.load %arg2[%c3, %c0_25, %c0_26] : memref<4x32x16xbf16, #tpu.memory_space<vmem>>, vector<1x32x16xbf16>
    %26 = vector.shape_cast %25 : vector<1x32x16xbf16> to vector<32x16xbf16>
    %cst_27 = arith.constant dense<0.000000e+00> : vector<4x16xf32>
    %27 = tpu.matmul %24, %26, %cst_27 {dimension_numbers = #tpu.dot_dimension_numbers<[1], [0], [0], [1], [0, 0, 1, 1], [], []>} : vector<4x32xbf16>, vector<32x16xbf16>, vector<4x16xf32> -> vector<4x16xf32>
    %28 = arith.addf %21, %27 : vector<4x16xf32>
    %c0_28 = arith.constant 0 : index
    %c0_29 = arith.constant 0 : index
    %29 = vector.load %arg3[%c0_28, %c0_29] : memref<1x16xf32, #tpu.memory_space<vmem>>, vector<1x16xf32>
    %30 = vector.shape_cast %29 : vector<1x16xf32> to vector<16xf32>
    %31 = vector.shape_cast %30 : vector<16xf32> to vector<1x16xf32>
    %32 = vector.broadcast %31 : vector<1x16xf32> to vector<4x16xf32>
    %33 = arith.addf %28, %32 : vector<4x16xf32>
    %cst_30 = arith.constant 0.000000e+00 : f32
    %34 = vector.broadcast %cst_30 : f32 to vector<4x16xf32>
    %35 = arith.cmpf oge, %33, %34 : vector<4x16xf32>
    %c0_31 = arith.constant 0 : index
    %c0_32 = arith.constant 0 : index
    %36 = vector.load %arg4[%c0_31, %c0_32] : memref<1x16xf32, #tpu.memory_space<vmem>>, vector<1x16xf32>
    %37 = vector.shape_cast %36 : vector<1x16xf32> to vector<16xf32>
    %38 = vector.shape_cast %37 : vector<16xf32> to vector<1x16xf32>
    %39 = vector.broadcast %38 : vector<1x16xf32> to vector<4x16xf32>
    %40 = arith.mulf %33, %39 : vector<4x16xf32>
    %41 = arith.select %35, %33, %40 : vector<4x16xi1>, vector<4x16xf32>
    %42 = vector.shape_cast %41 : vector<4x16xf32> to vector<2x2x16xf32>
    %43 = arith.truncf %42 : vector<2x2x16xf32> to vector<2x2x16xbf16>
    %c0_33 = arith.constant 0 : index
    %c0_34 = arith.constant 0 : index
    %c0_35 = arith.constant 0 : index
    %c0_36 = arith.constant 0 : index
    %44 = vector.load %arg5[%c0_33, %c0_34, %c0_35, %c0_36] : memref<1x2x2x16xbf16, #tpu.memory_space<vmem>>, vector<1x2x2x16xbf16>
    %45 = vector.shape_cast %44 : vector<1x2x2x16xbf16> to vector<2x2x16xbf16>
    %46 = vector.shape_cast %43 : vector<2x2x16xbf16> to vector<1x2x2x16xbf16>
    tpu.vector_store %arg5[%c0_33, %c0_34, %c0_35, %c0_36], %46 {strides = array<i32>} : memref<1x2x2x16xbf16, #tpu.memory_space<vmem>>, vector<1x2x2x16xbf16>,
    return
  }
  func.func @transform_0(%arg0: i32) -> (i32, i32, i32, i32) {
    %c0_i32 = arith.constant 0 : i32
    %c0_i32_0 = arith.constant 0 : i32
    %c0_i32_1 = arith.constant 0 : i32
    %c0_i32_2 = arith.constant 0 : i32
    return %arg0, %c0_i32, %c0_i32_0, %c0_i32_1 : i32, i32, i32, i32
  }
  func.func @transform_1(%arg0: i32) -> (i32, i32, i32) {
    %c0_i32 = arith.constant 0 : i32
    %c0_i32_0 = arith.constant 0 : i32
    %c0_i32_1 = arith.constant 0 : i32
    %c0_i32_2 = arith.constant 0 : i32
    return %c0_i32, %c0_i32_0, %c0_i32_1 : i32, i32, i32
  }
  func.func @transform_2(%arg0: i32) -> (i32, i32) {
    %c0_i32 = arith.constant 0 : i32
    %c0_i32_0 = arith.constant 0 : i32
    %c0_i32_1 = arith.constant 0 : i32
    return %c0_i32, %c0_i32_0 : i32, i32
  }
  func.func @transform_3(%arg0: i32) -> (i32, i32) {
    %c0_i32 = arith.constant 0 : i32
    %c0_i32_0 = arith.constant 0 : i32
    %c0_i32_1 = arith.constant 0 : i32
    return %c0_i32, %c0_i32_0 : i32, i32
  }
  func.func @transform_4(%arg0: i32) -> (i32, i32, i32, i32) {
    %c0_i32 = arith.constant 0 : i32
    %c0_i32_0 = arith.constant 0 : i32
    %c0_i32_1 = arith.constant 0 : i32
    %c0_i32_2 = arith.constant 0 : i32
    return %arg0, %c0_i32, %c0_i32_0, %c0_i32_1 : i32, i32, i32, i32
  }
}

module attributes {stable_mosaic.version = 11 : i64} {
  func.func @_conv_band_kernel(%arg0: i32, %arg1: memref<1x4x4x16xbf16, #tpu.memory_space<vmem>>, %arg2: memref<9x16x16xbf16, #tpu.memory_space<vmem>>, %arg3: memref<1x16xf32, #tpu.memory_space<vmem>>, %arg4: memref<1x16xf32, #tpu.memory_space<vmem>>, %arg5: memref<1x2x2x16xbf16, #tpu.memory_space<vmem>>) attributes {dimension_semantics = [#tpu.dimension_semantics<parallel>], iteration_bounds = array<i64: 4>, scalar_prefetch = 0 : i64, scratch_operands = 0 : i64, tpu.core_type = #tpu.core_type<tc>, window_params = [{transform_indices = @transform_0, window_bounds = array<i64: 1, 4, 4, 16>}, {pipeline_mode = #tpu.pipeline_mode<synchronous>, transform_indices = @transform_1, window_bounds = array<i64: 9, 16, 16>}, {pipeline_mode = #tpu.pipeline_mode<synchronous>, transform_indices = @transform_2, window_bounds = array<i64: 1, 16>}, {pipeline_mode = #tpu.pipeline_mode<synchronous>, transform_indices = @transform_3, window_bounds = array<i64: 1, 16>}, {transform_indices = @transform_4, window_bounds = array<i64: 1, 2, 2, 16>}]} {
    %cst = arith.constant 0.000000e+00 : f32
    %0 = vector.broadcast %cst : f32 to vector<4x16xf32>
    %c0 = arith.constant 0 : index
    %c0_0 = arith.constant 0 : index
    %c0_1 = arith.constant 0 : index
    %c0_2 = arith.constant 0 : index
    %1 = vector.load %arg1[%c0, %c0_0, %c0_1, %c0_2] : memref<1x4x4x16xbf16, #tpu.memory_space<vmem>>, vector<1x2x2x16xbf16>
    %2 = vector.shape_cast %1 : vector<1x2x2x16xbf16> to vector<2x2x16xbf16>
    %3 = vector.shape_cast %2 : vector<2x2x16xbf16> to vector<4x16xbf16>
    %c0_3 = arith.constant 0 : index
    %c0_4 = arith.constant 0 : index
    %c0_5 = arith.constant 0 : index
    %4 = vector.load %arg2[%c0_3, %c0_4, %c0_5] : memref<9x16x16xbf16, #tpu.memory_space<vmem>>, vector<1x16x16xbf16>
    %5 = vector.shape_cast %4 : vector<1x16x16xbf16> to vector<16x16xbf16>
    %cst_6 = arith.constant dense<0.000000e+00> : vector<4x16xf32>
    %6 = tpu.matmul %3, %5, %cst_6 {dimension_numbers = #tpu.dot_dimension_numbers<[1], [0], [0], [1], [0, 0, 1, 1], [], []>} : vector<4x16xbf16>, vector<16x16xbf16>, vector<4x16xf32> -> vector<4x16xf32>
    %7 = arith.addf %0, %6 : vector<4x16xf32>
    %c0_7 = arith.constant 0 : index
    %c0_8 = arith.constant 0 : index
    %c1 = arith.constant 1 : index
    %c0_9 = arith.constant 0 : index
    %8 = vector.load %arg1[%c0_7, %c0_8, %c1, %c0_9] : memref<1x4x4x16xbf16, #tpu.memory_space<vmem>>, vector<1x2x2x16xbf16>
    %9 = vector.shape_cast %8 : vector<1x2x2x16xbf16> to vector<2x2x16xbf16>
    %10 = vector.shape_cast %9 : vector<2x2x16xbf16> to vector<4x16xbf16>
    %c1_10 = arith.constant 1 : index
    %c0_11 = arith.constant 0 : index
    %c0_12 = arith.constant 0 : index
    %11 = vector.load %arg2[%c1_10, %c0_11, %c0_12] : memref<9x16x16xbf16, #tpu.memory_space<vmem>>, vector<1x16x16xbf16>
    %12 = vector.shape_cast %11 : vector<1x16x16xbf16> to vector<16x16xbf16>
    %cst_13 = arith.constant dense<0.000000e+00> : vector<4x16xf32>
    %13 = tpu.matmul %10, %12, %cst_13 {dimension_numbers = #tpu.dot_dimension_numbers<[1], [0], [0], [1], [0, 0, 1, 1], [], []>} : vector<4x16xbf16>, vector<16x16xbf16>, vector<4x16xf32> -> vector<4x16xf32>
    %14 = arith.addf %7, %13 : vector<4x16xf32>
    %c0_14 = arith.constant 0 : index
    %c0_15 = arith.constant 0 : index
    %c2 = arith.constant 2 : index
    %c0_16 = arith.constant 0 : index
    %15 = vector.load %arg1[%c0_14, %c0_15, %c2, %c0_16] : memref<1x4x4x16xbf16, #tpu.memory_space<vmem>>, vector<1x2x2x16xbf16>
    %16 = vector.shape_cast %15 : vector<1x2x2x16xbf16> to vector<2x2x16xbf16>
    %17 = vector.shape_cast %16 : vector<2x2x16xbf16> to vector<4x16xbf16>
    %c2_17 = arith.constant 2 : index
    %c0_18 = arith.constant 0 : index
    %c0_19 = arith.constant 0 : index
    %18 = vector.load %arg2[%c2_17, %c0_18, %c0_19] : memref<9x16x16xbf16, #tpu.memory_space<vmem>>, vector<1x16x16xbf16>
    %19 = vector.shape_cast %18 : vector<1x16x16xbf16> to vector<16x16xbf16>
    %cst_20 = arith.constant dense<0.000000e+00> : vector<4x16xf32>
    %20 = tpu.matmul %17, %19, %cst_20 {dimension_numbers = #tpu.dot_dimension_numbers<[1], [0], [0], [1], [0, 0, 1, 1], [], []>} : vector<4x16xbf16>, vector<16x16xbf16>, vector<4x16xf32> -> vector<4x16xf32>
    %21 = arith.addf %14, %20 : vector<4x16xf32>
    %c0_21 = arith.constant 0 : index
    %c1_22 = arith.constant 1 : index
    %c0_23 = arith.constant 0 : index
    %c0_24 = arith.constant 0 : index
    %22 = vector.load %arg1[%c0_21, %c1_22, %c0_23, %c0_24] : memref<1x4x4x16xbf16, #tpu.memory_space<vmem>>, vector<1x2x2x16xbf16>
    %23 = vector.shape_cast %22 : vector<1x2x2x16xbf16> to vector<2x2x16xbf16>
    %24 = vector.shape_cast %23 : vector<2x2x16xbf16> to vector<4x16xbf16>
    %c3 = arith.constant 3 : index
    %c0_25 = arith.constant 0 : index
    %c0_26 = arith.constant 0 : index
    %25 = vector.load %arg2[%c3, %c0_25, %c0_26] : memref<9x16x16xbf16, #tpu.memory_space<vmem>>, vector<1x16x16xbf16>
    %26 = vector.shape_cast %25 : vector<1x16x16xbf16> to vector<16x16xbf16>
    %cst_27 = arith.constant dense<0.000000e+00> : vector<4x16xf32>
    %27 = tpu.matmul %24, %26, %cst_27 {dimension_numbers = #tpu.dot_dimension_numbers<[1], [0], [0], [1], [0, 0, 1, 1], [], []>} : vector<4x16xbf16>, vector<16x16xbf16>, vector<4x16xf32> -> vector<4x16xf32>
    %28 = arith.addf %21, %27 : vector<4x16xf32>
    %c0_28 = arith.constant 0 : index
    %c1_29 = arith.constant 1 : index
    %c1_30 = arith.constant 1 : index
    %c0_31 = arith.constant 0 : index
    %29 = vector.load %arg1[%c0_28, %c1_29, %c1_30, %c0_31] : memref<1x4x4x16xbf16, #tpu.memory_space<vmem>>, vector<1x2x2x16xbf16>
    %30 = vector.shape_cast %29 : vector<1x2x2x16xbf16> to vector<2x2x16xbf16>
    %31 = vector.shape_cast %30 : vector<2x2x16xbf16> to vector<4x16xbf16>
    %c4 = arith.constant 4 : index
    %c0_32 = arith.constant 0 : index
    %c0_33 = arith.constant 0 : index
    %32 = vector.load %arg2[%c4, %c0_32, %c0_33] : memref<9x16x16xbf16, #tpu.memory_space<vmem>>, vector<1x16x16xbf16>
    %33 = vector.shape_cast %32 : vector<1x16x16xbf16> to vector<16x16xbf16>
    %cst_34 = arith.constant dense<0.000000e+00> : vector<4x16xf32>
    %34 = tpu.matmul %31, %33, %cst_34 {dimension_numbers = #tpu.dot_dimension_numbers<[1], [0], [0], [1], [0, 0, 1, 1], [], []>} : vector<4x16xbf16>, vector<16x16xbf16>, vector<4x16xf32> -> vector<4x16xf32>
    %35 = arith.addf %28, %34 : vector<4x16xf32>
    %c0_35 = arith.constant 0 : index
    %c1_36 = arith.constant 1 : index
    %c2_37 = arith.constant 2 : index
    %c0_38 = arith.constant 0 : index
    %36 = vector.load %arg1[%c0_35, %c1_36, %c2_37, %c0_38] : memref<1x4x4x16xbf16, #tpu.memory_space<vmem>>, vector<1x2x2x16xbf16>
    %37 = vector.shape_cast %36 : vector<1x2x2x16xbf16> to vector<2x2x16xbf16>
    %38 = vector.shape_cast %37 : vector<2x2x16xbf16> to vector<4x16xbf16>
    %c5 = arith.constant 5 : index
    %c0_39 = arith.constant 0 : index
    %c0_40 = arith.constant 0 : index
    %39 = vector.load %arg2[%c5, %c0_39, %c0_40] : memref<9x16x16xbf16, #tpu.memory_space<vmem>>, vector<1x16x16xbf16>
    %40 = vector.shape_cast %39 : vector<1x16x16xbf16> to vector<16x16xbf16>
    %cst_41 = arith.constant dense<0.000000e+00> : vector<4x16xf32>
    %41 = tpu.matmul %38, %40, %cst_41 {dimension_numbers = #tpu.dot_dimension_numbers<[1], [0], [0], [1], [0, 0, 1, 1], [], []>} : vector<4x16xbf16>, vector<16x16xbf16>, vector<4x16xf32> -> vector<4x16xf32>
    %42 = arith.addf %35, %41 : vector<4x16xf32>
    %c0_42 = arith.constant 0 : index
    %c2_43 = arith.constant 2 : index
    %c0_44 = arith.constant 0 : index
    %c0_45 = arith.constant 0 : index
    %43 = vector.load %arg1[%c0_42, %c2_43, %c0_44, %c0_45] : memref<1x4x4x16xbf16, #tpu.memory_space<vmem>>, vector<1x2x2x16xbf16>
    %44 = vector.shape_cast %43 : vector<1x2x2x16xbf16> to vector<2x2x16xbf16>
    %45 = vector.shape_cast %44 : vector<2x2x16xbf16> to vector<4x16xbf16>
    %c6 = arith.constant 6 : index
    %c0_46 = arith.constant 0 : index
    %c0_47 = arith.constant 0 : index
    %46 = vector.load %arg2[%c6, %c0_46, %c0_47] : memref<9x16x16xbf16, #tpu.memory_space<vmem>>, vector<1x16x16xbf16>
    %47 = vector.shape_cast %46 : vector<1x16x16xbf16> to vector<16x16xbf16>
    %cst_48 = arith.constant dense<0.000000e+00> : vector<4x16xf32>
    %48 = tpu.matmul %45, %47, %cst_48 {dimension_numbers = #tpu.dot_dimension_numbers<[1], [0], [0], [1], [0, 0, 1, 1], [], []>} : vector<4x16xbf16>, vector<16x16xbf16>, vector<4x16xf32> -> vector<4x16xf32>
    %49 = arith.addf %42, %48 : vector<4x16xf32>
    %c0_49 = arith.constant 0 : index
    %c2_50 = arith.constant 2 : index
    %c1_51 = arith.constant 1 : index
    %c0_52 = arith.constant 0 : index
    %50 = vector.load %arg1[%c0_49, %c2_50, %c1_51, %c0_52] : memref<1x4x4x16xbf16, #tpu.memory_space<vmem>>, vector<1x2x2x16xbf16>
    %51 = vector.shape_cast %50 : vector<1x2x2x16xbf16> to vector<2x2x16xbf16>
    %52 = vector.shape_cast %51 : vector<2x2x16xbf16> to vector<4x16xbf16>
    %c7 = arith.constant 7 : index
    %c0_53 = arith.constant 0 : index
    %c0_54 = arith.constant 0 : index
    %53 = vector.load %arg2[%c7, %c0_53, %c0_54] : memref<9x16x16xbf16, #tpu.memory_space<vmem>>, vector<1x16x16xbf16>
    %54 = vector.shape_cast %53 : vector<1x16x16xbf16> to vector<16x16xbf16>
    %cst_55 = arith.constant dense<0.000000e+00> : vector<4x16xf32>
    %55 = tpu.matmul %52, %54, %cst_55 {dimension_numbers = #tpu.dot_dimension_numbers<[1], [0], [0], [1], [0, 0, 1, 1], [], []>} : vector<4x16xbf16>, vector<16x16xbf16>, vector<4x16xf32> -> vector<4x16xf32>
    %56 = arith.addf %49, %55 : vector<4x16xf32>
    %c0_56 = arith.constant 0 : index
    %c2_57 = arith.constant 2 : index
    %c2_58 = arith.constant 2 : index
    %c0_59 = arith.constant 0 : index
    %57 = vector.load %arg1[%c0_56, %c2_57, %c2_58, %c0_59] : memref<1x4x4x16xbf16, #tpu.memory_space<vmem>>, vector<1x2x2x16xbf16>
    %58 = vector.shape_cast %57 : vector<1x2x2x16xbf16> to vector<2x2x16xbf16>
    %59 = vector.shape_cast %58 : vector<2x2x16xbf16> to vector<4x16xbf16>
    %c8 = arith.constant 8 : index
    %c0_60 = arith.constant 0 : index
    %c0_61 = arith.constant 0 : index
    %60 = vector.load %arg2[%c8, %c0_60, %c0_61] : memref<9x16x16xbf16, #tpu.memory_space<vmem>>, vector<1x16x16xbf16>
    %61 = vector.shape_cast %60 : vector<1x16x16xbf16> to vector<16x16xbf16>
    %cst_62 = arith.constant dense<0.000000e+00> : vector<4x16xf32>
    %62 = tpu.matmul %59, %61, %cst_62 {dimension_numbers = #tpu.dot_dimension_numbers<[1], [0], [0], [1], [0, 0, 1, 1], [], []>} : vector<4x16xbf16>, vector<16x16xbf16>, vector<4x16xf32> -> vector<4x16xf32>
    %63 = arith.addf %56, %62 : vector<4x16xf32>
    %c0_63 = arith.constant 0 : index
    %c0_64 = arith.constant 0 : index
    %64 = vector.load %arg3[%c0_63, %c0_64] : memref<1x16xf32, #tpu.memory_space<vmem>>, vector<1x16xf32>
    %65 = vector.shape_cast %64 : vector<1x16xf32> to vector<16xf32>
    %66 = vector.shape_cast %65 : vector<16xf32> to vector<1x16xf32>
    %67 = vector.broadcast %66 : vector<1x16xf32> to vector<4x16xf32>
    %68 = arith.addf %63, %67 : vector<4x16xf32>
    %cst_65 = arith.constant 0.000000e+00 : f32
    %69 = vector.broadcast %cst_65 : f32 to vector<4x16xf32>
    %70 = arith.cmpf oge, %68, %69 : vector<4x16xf32>
    %c0_66 = arith.constant 0 : index
    %c0_67 = arith.constant 0 : index
    %71 = vector.load %arg4[%c0_66, %c0_67] : memref<1x16xf32, #tpu.memory_space<vmem>>, vector<1x16xf32>
    %72 = vector.shape_cast %71 : vector<1x16xf32> to vector<16xf32>
    %73 = vector.shape_cast %72 : vector<16xf32> to vector<1x16xf32>
    %74 = vector.broadcast %73 : vector<1x16xf32> to vector<4x16xf32>
    %75 = arith.mulf %68, %74 : vector<4x16xf32>
    %76 = arith.select %70, %68, %75 : vector<4x16xi1>, vector<4x16xf32>
    %77 = vector.shape_cast %76 : vector<4x16xf32> to vector<2x2x16xf32>
    %78 = arith.truncf %77 : vector<2x2x16xf32> to vector<2x2x16xbf16>
    %c0_68 = arith.constant 0 : index
    %c0_69 = arith.constant 0 : index
    %c0_70 = arith.constant 0 : index
    %c0_71 = arith.constant 0 : index
    %79 = vector.load %arg5[%c0_68, %c0_69, %c0_70, %c0_71] : memref<1x2x2x16xbf16, #tpu.memory_space<vmem>>, vector<1x2x2x16xbf16>
    %80 = vector.shape_cast %79 : vector<1x2x2x16xbf16> to vector<2x2x16xbf16>
    %81 = vector.shape_cast %78 : vector<2x2x16xbf16> to vector<1x2x2x16xbf16>
    tpu.vector_store %arg5[%c0_68, %c0_69, %c0_70, %c0_71], %81 {strides = array<i32>} : memref<1x2x2x16xbf16, #tpu.memory_space<vmem>>, vector<1x2x2x16xbf16>,
    return
  }
  func.func @transform_0(%arg0: i32) -> (i32, i32, i32, i32) {
    %c0_i32 = arith.constant 0 : i32
    %c0_i32_0 = arith.constant 0 : i32
    %c0_i32_1 = arith.constant 0 : i32
    %c0_i32_2 = arith.constant 0 : i32
    return %arg0, %c0_i32, %c0_i32_0, %c0_i32_1 : i32, i32, i32, i32
  }
  func.func @transform_1(%arg0: i32) -> (i32, i32, i32) {
    %c0_i32 = arith.constant 0 : i32
    %c0_i32_0 = arith.constant 0 : i32
    %c0_i32_1 = arith.constant 0 : i32
    %c0_i32_2 = arith.constant 0 : i32
    return %c0_i32, %c0_i32_0, %c0_i32_1 : i32, i32, i32
  }
  func.func @transform_2(%arg0: i32) -> (i32, i32) {
    %c0_i32 = arith.constant 0 : i32
    %c0_i32_0 = arith.constant 0 : i32
    %c0_i32_1 = arith.constant 0 : i32
    return %c0_i32, %c0_i32_0 : i32, i32
  }
  func.func @transform_3(%arg0: i32) -> (i32, i32) {
    %c0_i32 = arith.constant 0 : i32
    %c0_i32_0 = arith.constant 0 : i32
    %c0_i32_1 = arith.constant 0 : i32
    return %c0_i32, %c0_i32_0 : i32, i32
  }
  func.func @transform_4(%arg0: i32) -> (i32, i32, i32, i32) {
    %c0_i32 = arith.constant 0 : i32
    %c0_i32_0 = arith.constant 0 : i32
    %c0_i32_1 = arith.constant 0 : i32
    %c0_i32_2 = arith.constant 0 : i32
    return %arg0, %c0_i32, %c0_i32_0, %c0_i32_1 : i32, i32, i32, i32
  }
}

module attributes {stable_mosaic.version = 11 : i64} {
  func.func @_conv_band_kernel(%arg0: i32, %arg1: memref<1x2x2x64xbf16, #tpu.memory_space<vmem>>, %arg2: memref<4x64x32xbf16, #tpu.memory_space<vmem>>, %arg3: memref<1x32xf32, #tpu.memory_space<vmem>>, %arg4: memref<1x32xf32, #tpu.memory_space<vmem>>, %arg5: memref<1x1x1x32xbf16, #tpu.memory_space<vmem>>) attributes {dimension_semantics = [#tpu.dimension_semantics<parallel>], iteration_bounds = array<i64: 4>, scalar_prefetch = 0 : i64, scratch_operands = 0 : i64, tpu.core_type = #tpu.core_type<tc>, window_params = [{transform_indices = @transform_0, window_bounds = array<i64: 1, 2, 2, 64>}, {pipeline_mode = #tpu.pipeline_mode<synchronous>, transform_indices = @transform_1, window_bounds = array<i64: 4, 64, 32>}, {pipeline_mode = #tpu.pipeline_mode<synchronous>, transform_indices = @transform_2, window_bounds = array<i64: 1, 32>}, {pipeline_mode = #tpu.pipeline_mode<synchronous>, transform_indices = @transform_3, window_bounds = array<i64: 1, 32>}, {transform_indices = @transform_4, window_bounds = array<i64: 1, 1, 1, 32>}]} {
    %cst = arith.constant 0.000000e+00 : f32
    %0 = vector.broadcast %cst : f32 to vector<1x32xf32>
    %c0 = arith.constant 0 : index
    %c0_0 = arith.constant 0 : index
    %c0_1 = arith.constant 0 : index
    %c0_2 = arith.constant 0 : index
    %1 = vector.load %arg1[%c0, %c0_0, %c0_1, %c0_2] : memref<1x2x2x64xbf16, #tpu.memory_space<vmem>>, vector<1x1x1x64xbf16>
    %2 = vector.shape_cast %1 : vector<1x1x1x64xbf16> to vector<1x1x64xbf16>
    %3 = vector.shape_cast %2 : vector<1x1x64xbf16> to vector<1x64xbf16>
    %c0_3 = arith.constant 0 : index
    %c0_4 = arith.constant 0 : index
    %c0_5 = arith.constant 0 : index
    %4 = vector.load %arg2[%c0_3, %c0_4, %c0_5] : memref<4x64x32xbf16, #tpu.memory_space<vmem>>, vector<1x64x32xbf16>
    %5 = vector.shape_cast %4 : vector<1x64x32xbf16> to vector<64x32xbf16>
    %cst_6 = arith.constant dense<0.000000e+00> : vector<1x32xf32>
    %6 = tpu.matmul %3, %5, %cst_6 {dimension_numbers = #tpu.dot_dimension_numbers<[1], [0], [0], [1], [0, 0, 1, 1], [], []>} : vector<1x64xbf16>, vector<64x32xbf16>, vector<1x32xf32> -> vector<1x32xf32>
    %7 = arith.addf %0, %6 : vector<1x32xf32>
    %c0_7 = arith.constant 0 : index
    %c0_8 = arith.constant 0 : index
    %c1 = arith.constant 1 : index
    %c0_9 = arith.constant 0 : index
    %8 = vector.load %arg1[%c0_7, %c0_8, %c1, %c0_9] : memref<1x2x2x64xbf16, #tpu.memory_space<vmem>>, vector<1x1x1x64xbf16>
    %9 = vector.shape_cast %8 : vector<1x1x1x64xbf16> to vector<1x1x64xbf16>
    %10 = vector.shape_cast %9 : vector<1x1x64xbf16> to vector<1x64xbf16>
    %c1_10 = arith.constant 1 : index
    %c0_11 = arith.constant 0 : index
    %c0_12 = arith.constant 0 : index
    %11 = vector.load %arg2[%c1_10, %c0_11, %c0_12] : memref<4x64x32xbf16, #tpu.memory_space<vmem>>, vector<1x64x32xbf16>
    %12 = vector.shape_cast %11 : vector<1x64x32xbf16> to vector<64x32xbf16>
    %cst_13 = arith.constant dense<0.000000e+00> : vector<1x32xf32>
    %13 = tpu.matmul %10, %12, %cst_13 {dimension_numbers = #tpu.dot_dimension_numbers<[1], [0], [0], [1], [0, 0, 1, 1], [], []>} : vector<1x64xbf16>, vector<64x32xbf16>, vector<1x32xf32> -> vector<1x32xf32>
    %14 = arith.addf %7, %13 : vector<1x32xf32>
    %c0_14 = arith.constant 0 : index
    %c1_15 = arith.constant 1 : index
    %c0_16 = arith.constant 0 : index
    %c0_17 = arith.constant 0 : index
    %15 = vector.load %arg1[%c0_14, %c1_15, %c0_16, %c0_17] : memref<1x2x2x64xbf16, #tpu.memory_space<vmem>>, vector<1x1x1x64xbf16>
    %16 = vector.shape_cast %15 : vector<1x1x1x64xbf16> to vector<1x1x64xbf16>
    %17 = vector.shape_cast %16 : vector<1x1x64xbf16> to vector<1x64xbf16>
    %c2 = arith.constant 2 : index
    %c0_18 = arith.constant 0 : index
    %c0_19 = arith.constant 0 : index
    %18 = vector.load %arg2[%c2, %c0_18, %c0_19] : memref<4x64x32xbf16, #tpu.memory_space<vmem>>, vector<1x64x32xbf16>
    %19 = vector.shape_cast %18 : vector<1x64x32xbf16> to vector<64x32xbf16>
    %cst_20 = arith.constant dense<0.000000e+00> : vector<1x32xf32>
    %20 = tpu.matmul %17, %19, %cst_20 {dimension_numbers = #tpu.dot_dimension_numbers<[1], [0], [0], [1], [0, 0, 1, 1], [], []>} : vector<1x64xbf16>, vector<64x32xbf16>, vector<1x32xf32> -> vector<1x32xf32>
    %21 = arith.addf %14, %20 : vector<1x32xf32>
    %c0_21 = arith.constant 0 : index
    %c1_22 = arith.constant 1 : index
    %c1_23 = arith.constant 1 : index
    %c0_24 = arith.constant 0 : index
    %22 = vector.load %arg1[%c0_21, %c1_22, %c1_23, %c0_24] : memref<1x2x2x64xbf16, #tpu.memory_space<vmem>>, vector<1x1x1x64xbf16>
    %23 = vector.shape_cast %22 : vector<1x1x1x64xbf16> to vector<1x1x64xbf16>
    %24 = vector.shape_cast %23 : vector<1x1x64xbf16> to vector<1x64xbf16>
    %c3 = arith.constant 3 : index
    %c0_25 = arith.constant 0 : index
    %c0_26 = arith.constant 0 : index
    %25 = vector.load %arg2[%c3, %c0_25, %c0_26] : memref<4x64x32xbf16, #tpu.memory_space<vmem>>, vector<1x64x32xbf16>
    %26 = vector.shape_cast %25 : vector<1x64x32xbf16> to vector<64x32xbf16>
    %cst_27 = arith.constant dense<0.000000e+00> : vector<1x32xf32>
    %27 = tpu.matmul %24, %26, %cst_27 {dimension_numbers = #tpu.dot_dimension_numbers<[1], [0], [0], [1], [0, 0, 1, 1], [], []>} : vector<1x64xbf16>, vector<64x32xbf16>, vector<1x32xf32> -> vector<1x32xf32>
    %28 = arith.addf %21, %27 : vector<1x32xf32>
    %c0_28 = arith.constant 0 : index
    %c0_29 = arith.constant 0 : index
    %29 = vector.load %arg3[%c0_28, %c0_29] : memref<1x32xf32, #tpu.memory_space<vmem>>, vector<1x32xf32>
    %30 = vector.shape_cast %29 : vector<1x32xf32> to vector<32xf32>
    %31 = vector.shape_cast %30 : vector<32xf32> to vector<1x32xf32>
    %32 = arith.addf %28, %31 : vector<1x32xf32>
    %cst_30 = arith.constant 0.000000e+00 : f32
    %33 = vector.broadcast %cst_30 : f32 to vector<1x32xf32>
    %34 = arith.cmpf oge, %32, %33 : vector<1x32xf32>
    %c0_31 = arith.constant 0 : index
    %c0_32 = arith.constant 0 : index
    %35 = vector.load %arg4[%c0_31, %c0_32] : memref<1x32xf32, #tpu.memory_space<vmem>>, vector<1x32xf32>
    %36 = vector.shape_cast %35 : vector<1x32xf32> to vector<32xf32>
    %37 = vector.shape_cast %36 : vector<32xf32> to vector<1x32xf32>
    %38 = arith.mulf %32, %37 : vector<1x32xf32>
    %39 = arith.select %34, %32, %38 : vector<1x32xi1>, vector<1x32xf32>
    %40 = vector.shape_cast %39 : vector<1x32xf32> to vector<1x1x32xf32>
    %41 = arith.truncf %40 : vector<1x1x32xf32> to vector<1x1x32xbf16>
    %c0_33 = arith.constant 0 : index
    %c0_34 = arith.constant 0 : index
    %c0_35 = arith.constant 0 : index
    %c0_36 = arith.constant 0 : index
    %42 = vector.load %arg5[%c0_33, %c0_34, %c0_35, %c0_36] : memref<1x1x1x32xbf16, #tpu.memory_space<vmem>>, vector<1x1x1x32xbf16>
    %43 = vector.shape_cast %42 : vector<1x1x1x32xbf16> to vector<1x1x32xbf16>
    %44 = vector.shape_cast %41 : vector<1x1x32xbf16> to vector<1x1x1x32xbf16>
    tpu.vector_store %arg5[%c0_33, %c0_34, %c0_35, %c0_36], %44 {strides = array<i32>} : memref<1x1x1x32xbf16, #tpu.memory_space<vmem>>, vector<1x1x1x32xbf16>,
    return
  }
  func.func @transform_0(%arg0: i32) -> (i32, i32, i32, i32) {
    %c0_i32 = arith.constant 0 : i32
    %c0_i32_0 = arith.constant 0 : i32
    %c0_i32_1 = arith.constant 0 : i32
    %c0_i32_2 = arith.constant 0 : i32
    return %arg0, %c0_i32, %c0_i32_0, %c0_i32_1 : i32, i32, i32, i32
  }
  func.func @transform_1(%arg0: i32) -> (i32, i32, i32) {
    %c0_i32 = arith.constant 0 : i32
    %c0_i32_0 = arith.constant 0 : i32
    %c0_i32_1 = arith.constant 0 : i32
    %c0_i32_2 = arith.constant 0 : i32
    return %c0_i32, %c0_i32_0, %c0_i32_1 : i32, i32, i32
  }
  func.func @transform_2(%arg0: i32) -> (i32, i32) {
    %c0_i32 = arith.constant 0 : i32
    %c0_i32_0 = arith.constant 0 : i32
    %c0_i32_1 = arith.constant 0 : i32
    return %c0_i32, %c0_i32_0 : i32, i32
  }
  func.func @transform_3(%arg0: i32) -> (i32, i32) {
    %c0_i32 = arith.constant 0 : i32
    %c0_i32_0 = arith.constant 0 : i32
    %c0_i32_1 = arith.constant 0 : i32
    return %c0_i32, %c0_i32_0 : i32, i32
  }
  func.func @transform_4(%arg0: i32) -> (i32, i32, i32, i32) {
    %c0_i32 = arith.constant 0 : i32
    %c0_i32_0 = arith.constant 0 : i32
    %c0_i32_1 = arith.constant 0 : i32
    %c0_i32_2 = arith.constant 0 : i32
    return %arg0, %c0_i32, %c0_i32_0, %c0_i32_1 : i32, i32, i32, i32
  }
}

module attributes {stable_mosaic.version = 11 : i64} {
  func.func @_conv_band_kernel(%arg0: i32, %arg1: memref<1x3x3x32xbf16, #tpu.memory_space<vmem>>, %arg2: memref<9x32x32xbf16, #tpu.memory_space<vmem>>, %arg3: memref<1x32xf32, #tpu.memory_space<vmem>>, %arg4: memref<1x32xf32, #tpu.memory_space<vmem>>, %arg5: memref<1x1x1x32xbf16, #tpu.memory_space<vmem>>) attributes {dimension_semantics = [#tpu.dimension_semantics<parallel>], iteration_bounds = array<i64: 4>, scalar_prefetch = 0 : i64, scratch_operands = 0 : i64, tpu.core_type = #tpu.core_type<tc>, window_params = [{transform_indices = @transform_0, window_bounds = array<i64: 1, 3, 3, 32>}, {pipeline_mode = #tpu.pipeline_mode<synchronous>, transform_indices = @transform_1, window_bounds = array<i64: 9, 32, 32>}, {pipeline_mode = #tpu.pipeline_mode<synchronous>, transform_indices = @transform_2, window_bounds = array<i64: 1, 32>}, {pipeline_mode = #tpu.pipeline_mode<synchronous>, transform_indices = @transform_3, window_bounds = array<i64: 1, 32>}, {transform_indices = @transform_4, window_bounds = array<i64: 1, 1, 1, 32>}]} {
    %cst = arith.constant 0.000000e+00 : f32
    %0 = vector.broadcast %cst : f32 to vector<1x32xf32>
    %c0 = arith.constant 0 : index
    %c0_0 = arith.constant 0 : index
    %c0_1 = arith.constant 0 : index
    %c0_2 = arith.constant 0 : index
    %1 = vector.load %arg1[%c0, %c0_0, %c0_1, %c0_2] : memref<1x3x3x32xbf16, #tpu.memory_space<vmem>>, vector<1x1x1x32xbf16>
    %2 = vector.shape_cast %1 : vector<1x1x1x32xbf16> to vector<1x1x32xbf16>
    %3 = vector.shape_cast %2 : vector<1x1x32xbf16> to vector<1x32xbf16>
    %c0_3 = arith.constant 0 : index
    %c0_4 = arith.constant 0 : index
    %c0_5 = arith.constant 0 : index
    %4 = vector.load %arg2[%c0_3, %c0_4, %c0_5] : memref<9x32x32xbf16, #tpu.memory_space<vmem>>, vector<1x32x32xbf16>
    %5 = vector.shape_cast %4 : vector<1x32x32xbf16> to vector<32x32xbf16>
    %cst_6 = arith.constant dense<0.000000e+00> : vector<1x32xf32>
    %6 = tpu.matmul %3, %5, %cst_6 {dimension_numbers = #tpu.dot_dimension_numbers<[1], [0], [0], [1], [0, 0, 1, 1], [], []>} : vector<1x32xbf16>, vector<32x32xbf16>, vector<1x32xf32> -> vector<1x32xf32>
    %7 = arith.addf %0, %6 : vector<1x32xf32>
    %c0_7 = arith.constant 0 : index
    %c0_8 = arith.constant 0 : index
    %c1 = arith.constant 1 : index
    %c0_9 = arith.constant 0 : index
    %8 = vector.load %arg1[%c0_7, %c0_8, %c1, %c0_9] : memref<1x3x3x32xbf16, #tpu.memory_space<vmem>>, vector<1x1x1x32xbf16>
    %9 = vector.shape_cast %8 : vector<1x1x1x32xbf16> to vector<1x1x32xbf16>
    %10 = vector.shape_cast %9 : vector<1x1x32xbf16> to vector<1x32xbf16>
    %c1_10 = arith.constant 1 : index
    %c0_11 = arith.constant 0 : index
    %c0_12 = arith.constant 0 : index
    %11 = vector.load %arg2[%c1_10, %c0_11, %c0_12] : memref<9x32x32xbf16, #tpu.memory_space<vmem>>, vector<1x32x32xbf16>
    %12 = vector.shape_cast %11 : vector<1x32x32xbf16> to vector<32x32xbf16>
    %cst_13 = arith.constant dense<0.000000e+00> : vector<1x32xf32>
    %13 = tpu.matmul %10, %12, %cst_13 {dimension_numbers = #tpu.dot_dimension_numbers<[1], [0], [0], [1], [0, 0, 1, 1], [], []>} : vector<1x32xbf16>, vector<32x32xbf16>, vector<1x32xf32> -> vector<1x32xf32>
    %14 = arith.addf %7, %13 : vector<1x32xf32>
    %c0_14 = arith.constant 0 : index
    %c0_15 = arith.constant 0 : index
    %c2 = arith.constant 2 : index
    %c0_16 = arith.constant 0 : index
    %15 = vector.load %arg1[%c0_14, %c0_15, %c2, %c0_16] : memref<1x3x3x32xbf16, #tpu.memory_space<vmem>>, vector<1x1x1x32xbf16>
    %16 = vector.shape_cast %15 : vector<1x1x1x32xbf16> to vector<1x1x32xbf16>
    %17 = vector.shape_cast %16 : vector<1x1x32xbf16> to vector<1x32xbf16>
    %c2_17 = arith.constant 2 : index
    %c0_18 = arith.constant 0 : index
    %c0_19 = arith.constant 0 : index
    %18 = vector.load %arg2[%c2_17, %c0_18, %c0_19] : memref<9x32x32xbf16, #tpu.memory_space<vmem>>, vector<1x32x32xbf16>
    %19 = vector.shape_cast %18 : vector<1x32x32xbf16> to vector<32x32xbf16>
    %cst_20 = arith.constant dense<0.000000e+00> : vector<1x32xf32>
    %20 = tpu.matmul %17, %19, %cst_20 {dimension_numbers = #tpu.dot_dimension_numbers<[1], [0], [0], [1], [0, 0, 1, 1], [], []>} : vector<1x32xbf16>, vector<32x32xbf16>, vector<1x32xf32> -> vector<1x32xf32>
    %21 = arith.addf %14, %20 : vector<1x32xf32>
    %c0_21 = arith.constant 0 : index
    %c1_22 = arith.constant 1 : index
    %c0_23 = arith.constant 0 : index
    %c0_24 = arith.constant 0 : index
    %22 = vector.load %arg1[%c0_21, %c1_22, %c0_23, %c0_24] : memref<1x3x3x32xbf16, #tpu.memory_space<vmem>>, vector<1x1x1x32xbf16>
    %23 = vector.shape_cast %22 : vector<1x1x1x32xbf16> to vector<1x1x32xbf16>
    %24 = vector.shape_cast %23 : vector<1x1x32xbf16> to vector<1x32xbf16>
    %c3 = arith.constant 3 : index
    %c0_25 = arith.constant 0 : index
    %c0_26 = arith.constant 0 : index
    %25 = vector.load %arg2[%c3, %c0_25, %c0_26] : memref<9x32x32xbf16, #tpu.memory_space<vmem>>, vector<1x32x32xbf16>
    %26 = vector.shape_cast %25 : vector<1x32x32xbf16> to vector<32x32xbf16>
    %cst_27 = arith.constant dense<0.000000e+00> : vector<1x32xf32>
    %27 = tpu.matmul %24, %26, %cst_27 {dimension_numbers = #tpu.dot_dimension_numbers<[1], [0], [0], [1], [0, 0, 1, 1], [], []>} : vector<1x32xbf16>, vector<32x32xbf16>, vector<1x32xf32> -> vector<1x32xf32>
    %28 = arith.addf %21, %27 : vector<1x32xf32>
    %c0_28 = arith.constant 0 : index
    %c1_29 = arith.constant 1 : index
    %c1_30 = arith.constant 1 : index
    %c0_31 = arith.constant 0 : index
    %29 = vector.load %arg1[%c0_28, %c1_29, %c1_30, %c0_31] : memref<1x3x3x32xbf16, #tpu.memory_space<vmem>>, vector<1x1x1x32xbf16>
    %30 = vector.shape_cast %29 : vector<1x1x1x32xbf16> to vector<1x1x32xbf16>
    %31 = vector.shape_cast %30 : vector<1x1x32xbf16> to vector<1x32xbf16>
    %c4 = arith.constant 4 : index
    %c0_32 = arith.constant 0 : index
    %c0_33 = arith.constant 0 : index
    %32 = vector.load %arg2[%c4, %c0_32, %c0_33] : memref<9x32x32xbf16, #tpu.memory_space<vmem>>, vector<1x32x32xbf16>
    %33 = vector.shape_cast %32 : vector<1x32x32xbf16> to vector<32x32xbf16>
    %cst_34 = arith.constant dense<0.000000e+00> : vector<1x32xf32>
    %34 = tpu.matmul %31, %33, %cst_34 {dimension_numbers = #tpu.dot_dimension_numbers<[1], [0], [0], [1], [0, 0, 1, 1], [], []>} : vector<1x32xbf16>, vector<32x32xbf16>, vector<1x32xf32> -> vector<1x32xf32>
    %35 = arith.addf %28, %34 : vector<1x32xf32>
    %c0_35 = arith.constant 0 : index
    %c1_36 = arith.constant 1 : index
    %c2_37 = arith.constant 2 : index
    %c0_38 = arith.constant 0 : index
    %36 = vector.load %arg1[%c0_35, %c1_36, %c2_37, %c0_38] : memref<1x3x3x32xbf16, #tpu.memory_space<vmem>>, vector<1x1x1x32xbf16>
    %37 = vector.shape_cast %36 : vector<1x1x1x32xbf16> to vector<1x1x32xbf16>
    %38 = vector.shape_cast %37 : vector<1x1x32xbf16> to vector<1x32xbf16>
    %c5 = arith.constant 5 : index
    %c0_39 = arith.constant 0 : index
    %c0_40 = arith.constant 0 : index
    %39 = vector.load %arg2[%c5, %c0_39, %c0_40] : memref<9x32x32xbf16, #tpu.memory_space<vmem>>, vector<1x32x32xbf16>
    %40 = vector.shape_cast %39 : vector<1x32x32xbf16> to vector<32x32xbf16>
    %cst_41 = arith.constant dense<0.000000e+00> : vector<1x32xf32>
    %41 = tpu.matmul %38, %40, %cst_41 {dimension_numbers = #tpu.dot_dimension_numbers<[1], [0], [0], [1], [0, 0, 1, 1], [], []>} : vector<1x32xbf16>, vector<32x32xbf16>, vector<1x32xf32> -> vector<1x32xf32>
    %42 = arith.addf %35, %41 : vector<1x32xf32>
    %c0_42 = arith.constant 0 : index
    %c2_43 = arith.constant 2 : index
    %c0_44 = arith.constant 0 : index
    %c0_45 = arith.constant 0 : index
    %43 = vector.load %arg1[%c0_42, %c2_43, %c0_44, %c0_45] : memref<1x3x3x32xbf16, #tpu.memory_space<vmem>>, vector<1x1x1x32xbf16>
    %44 = vector.shape_cast %43 : vector<1x1x1x32xbf16> to vector<1x1x32xbf16>
    %45 = vector.shape_cast %44 : vector<1x1x32xbf16> to vector<1x32xbf16>
    %c6 = arith.constant 6 : index
    %c0_46 = arith.constant 0 : index
    %c0_47 = arith.constant 0 : index
    %46 = vector.load %arg2[%c6, %c0_46, %c0_47] : memref<9x32x32xbf16, #tpu.memory_space<vmem>>, vector<1x32x32xbf16>
    %47 = vector.shape_cast %46 : vector<1x32x32xbf16> to vector<32x32xbf16>
    %cst_48 = arith.constant dense<0.000000e+00> : vector<1x32xf32>
    %48 = tpu.matmul %45, %47, %cst_48 {dimension_numbers = #tpu.dot_dimension_numbers<[1], [0], [0], [1], [0, 0, 1, 1], [], []>} : vector<1x32xbf16>, vector<32x32xbf16>, vector<1x32xf32> -> vector<1x32xf32>
    %49 = arith.addf %42, %48 : vector<1x32xf32>
    %c0_49 = arith.constant 0 : index
    %c2_50 = arith.constant 2 : index
    %c1_51 = arith.constant 1 : index
    %c0_52 = arith.constant 0 : index
    %50 = vector.load %arg1[%c0_49, %c2_50, %c1_51, %c0_52] : memref<1x3x3x32xbf16, #tpu.memory_space<vmem>>, vector<1x1x1x32xbf16>
    %51 = vector.shape_cast %50 : vector<1x1x1x32xbf16> to vector<1x1x32xbf16>
    %52 = vector.shape_cast %51 : vector<1x1x32xbf16> to vector<1x32xbf16>
    %c7 = arith.constant 7 : index
    %c0_53 = arith.constant 0 : index
    %c0_54 = arith.constant 0 : index
    %53 = vector.load %arg2[%c7, %c0_53, %c0_54] : memref<9x32x32xbf16, #tpu.memory_space<vmem>>, vector<1x32x32xbf16>
    %54 = vector.shape_cast %53 : vector<1x32x32xbf16> to vector<32x32xbf16>
    %cst_55 = arith.constant dense<0.000000e+00> : vector<1x32xf32>
    %55 = tpu.matmul %52, %54, %cst_55 {dimension_numbers = #tpu.dot_dimension_numbers<[1], [0], [0], [1], [0, 0, 1, 1], [], []>} : vector<1x32xbf16>, vector<32x32xbf16>, vector<1x32xf32> -> vector<1x32xf32>
    %56 = arith.addf %49, %55 : vector<1x32xf32>
    %c0_56 = arith.constant 0 : index
    %c2_57 = arith.constant 2 : index
    %c2_58 = arith.constant 2 : index
    %c0_59 = arith.constant 0 : index
    %57 = vector.load %arg1[%c0_56, %c2_57, %c2_58, %c0_59] : memref<1x3x3x32xbf16, #tpu.memory_space<vmem>>, vector<1x1x1x32xbf16>
    %58 = vector.shape_cast %57 : vector<1x1x1x32xbf16> to vector<1x1x32xbf16>
    %59 = vector.shape_cast %58 : vector<1x1x32xbf16> to vector<1x32xbf16>
    %c8 = arith.constant 8 : index
    %c0_60 = arith.constant 0 : index
    %c0_61 = arith.constant 0 : index
    %60 = vector.load %arg2[%c8, %c0_60, %c0_61] : memref<9x32x32xbf16, #tpu.memory_space<vmem>>, vector<1x32x32xbf16>
    %61 = vector.shape_cast %60 : vector<1x32x32xbf16> to vector<32x32xbf16>
    %cst_62 = arith.constant dense<0.000000e+00> : vector<1x32xf32>
    %62 = tpu.matmul %59, %61, %cst_62 {dimension_numbers = #tpu.dot_dimension_numbers<[1], [0], [0], [1], [0, 0, 1, 1], [], []>} : vector<1x32xbf16>, vector<32x32xbf16>, vector<1x32xf32> -> vector<1x32xf32>
    %63 = arith.addf %56, %62 : vector<1x32xf32>
    %c0_63 = arith.constant 0 : index
    %c0_64 = arith.constant 0 : index
    %64 = vector.load %arg3[%c0_63, %c0_64] : memref<1x32xf32, #tpu.memory_space<vmem>>, vector<1x32xf32>
    %65 = vector.shape_cast %64 : vector<1x32xf32> to vector<32xf32>
    %66 = vector.shape_cast %65 : vector<32xf32> to vector<1x32xf32>
    %67 = arith.addf %63, %66 : vector<1x32xf32>
    %cst_65 = arith.constant 0.000000e+00 : f32
    %68 = vector.broadcast %cst_65 : f32 to vector<1x32xf32>
    %69 = arith.cmpf oge, %67, %68 : vector<1x32xf32>
    %c0_66 = arith.constant 0 : index
    %c0_67 = arith.constant 0 : index
    %70 = vector.load %arg4[%c0_66, %c0_67] : memref<1x32xf32, #tpu.memory_space<vmem>>, vector<1x32xf32>
    %71 = vector.shape_cast %70 : vector<1x32xf32> to vector<32xf32>
    %72 = vector.shape_cast %71 : vector<32xf32> to vector<1x32xf32>
    %73 = arith.mulf %67, %72 : vector<1x32xf32>
    %74 = arith.select %69, %67, %73 : vector<1x32xi1>, vector<1x32xf32>
    %75 = vector.shape_cast %74 : vector<1x32xf32> to vector<1x1x32xf32>
    %76 = arith.truncf %75 : vector<1x1x32xf32> to vector<1x1x32xbf16>
    %c0_68 = arith.constant 0 : index
    %c0_69 = arith.constant 0 : index
    %c0_70 = arith.constant 0 : index
    %c0_71 = arith.constant 0 : index
    %77 = vector.load %arg5[%c0_68, %c0_69, %c0_70, %c0_71] : memref<1x1x1x32xbf16, #tpu.memory_space<vmem>>, vector<1x1x1x32xbf16>
    %78 = vector.shape_cast %77 : vector<1x1x1x32xbf16> to vector<1x1x32xbf16>
    %79 = vector.shape_cast %76 : vector<1x1x32xbf16> to vector<1x1x1x32xbf16>
    tpu.vector_store %arg5[%c0_68, %c0_69, %c0_70, %c0_71], %79 {strides = array<i32>} : memref<1x1x1x32xbf16, #tpu.memory_space<vmem>>, vector<1x1x1x32xbf16>,
    return
  }
  func.func @transform_0(%arg0: i32) -> (i32, i32, i32, i32) {
    %c0_i32 = arith.constant 0 : i32
    %c0_i32_0 = arith.constant 0 : i32
    %c0_i32_1 = arith.constant 0 : i32
    %c0_i32_2 = arith.constant 0 : i32
    return %arg0, %c0_i32, %c0_i32_0, %c0_i32_1 : i32, i32, i32, i32
  }
  func.func @transform_1(%arg0: i32) -> (i32, i32, i32) {
    %c0_i32 = arith.constant 0 : i32
    %c0_i32_0 = arith.constant 0 : i32
    %c0_i32_1 = arith.constant 0 : i32
    %c0_i32_2 = arith.constant 0 : i32
    return %c0_i32, %c0_i32_0, %c0_i32_1 : i32, i32, i32
  }
  func.func @transform_2(%arg0: i32) -> (i32, i32) {
    %c0_i32 = arith.constant 0 : i32
    %c0_i32_0 = arith.constant 0 : i32
    %c0_i32_1 = arith.constant 0 : i32
    return %c0_i32, %c0_i32_0 : i32, i32
  }
  func.func @transform_3(%arg0: i32) -> (i32, i32) {
    %c0_i32 = arith.constant 0 : i32
    %c0_i32_0 = arith.constant 0 : i32
    %c0_i32_1 = arith.constant 0 : i32
    return %c0_i32, %c0_i32_0 : i32, i32
  }
  func.func @transform_4(%arg0: i32) -> (i32, i32, i32, i32) {
    %c0_i32 = arith.constant 0 : i32
    %c0_i32_0 = arith.constant 0 : i32
    %c0_i32_1 = arith.constant 0 : i32
    %c0_i32_2 = arith.constant 0 : i32
    return %arg0, %c0_i32, %c0_i32_0, %c0_i32_1 : i32, i32, i32, i32
  }
}

module attributes {stable_mosaic.version = 11 : i64} {
  func.func @_conv_band_kernel(%arg0: i32, %arg1: memref<1x2x2x256xbf16, #tpu.memory_space<vmem>>, %arg2: memref<4x256x64xbf16, #tpu.memory_space<vmem>>, %arg3: memref<1x64xf32, #tpu.memory_space<vmem>>, %arg4: memref<1x64xf32, #tpu.memory_space<vmem>>, %arg5: memref<1x1x1x64xbf16, #tpu.memory_space<vmem>>) attributes {dimension_semantics = [#tpu.dimension_semantics<parallel>], iteration_bounds = array<i64: 2>, scalar_prefetch = 0 : i64, scratch_operands = 0 : i64, tpu.core_type = #tpu.core_type<tc>, window_params = [{transform_indices = @transform_0, window_bounds = array<i64: 1, 2, 2, 256>}, {pipeline_mode = #tpu.pipeline_mode<synchronous>, transform_indices = @transform_1, window_bounds = array<i64: 4, 256, 64>}, {pipeline_mode = #tpu.pipeline_mode<synchronous>, transform_indices = @transform_2, window_bounds = array<i64: 1, 64>}, {pipeline_mode = #tpu.pipeline_mode<synchronous>, transform_indices = @transform_3, window_bounds = array<i64: 1, 64>}, {transform_indices = @transform_4, window_bounds = array<i64: 1, 1, 1, 64>}]} {
    %cst = arith.constant 0.000000e+00 : f32
    %0 = vector.broadcast %cst : f32 to vector<1x64xf32>
    %c0 = arith.constant 0 : index
    %c0_0 = arith.constant 0 : index
    %c0_1 = arith.constant 0 : index
    %c0_2 = arith.constant 0 : index
    %1 = vector.load %arg1[%c0, %c0_0, %c0_1, %c0_2] : memref<1x2x2x256xbf16, #tpu.memory_space<vmem>>, vector<1x1x1x256xbf16>
    %2 = vector.shape_cast %1 : vector<1x1x1x256xbf16> to vector<1x1x256xbf16>
    %3 = vector.shape_cast %2 : vector<1x1x256xbf16> to vector<1x256xbf16>
    %c0_3 = arith.constant 0 : index
    %c0_4 = arith.constant 0 : index
    %c0_5 = arith.constant 0 : index
    %4 = vector.load %arg2[%c0_3, %c0_4, %c0_5] : memref<4x256x64xbf16, #tpu.memory_space<vmem>>, vector<1x256x64xbf16>
    %5 = vector.shape_cast %4 : vector<1x256x64xbf16> to vector<256x64xbf16>
    %cst_6 = arith.constant dense<0.000000e+00> : vector<1x64xf32>
    %6 = tpu.matmul %3, %5, %cst_6 {dimension_numbers = #tpu.dot_dimension_numbers<[1], [0], [0], [1], [0, 0, 1, 1], [], []>} : vector<1x256xbf16>, vector<256x64xbf16>, vector<1x64xf32> -> vector<1x64xf32>
    %7 = arith.addf %0, %6 : vector<1x64xf32>
    %c0_7 = arith.constant 0 : index
    %c0_8 = arith.constant 0 : index
    %c1 = arith.constant 1 : index
    %c0_9 = arith.constant 0 : index
    %8 = vector.load %arg1[%c0_7, %c0_8, %c1, %c0_9] : memref<1x2x2x256xbf16, #tpu.memory_space<vmem>>, vector<1x1x1x256xbf16>
    %9 = vector.shape_cast %8 : vector<1x1x1x256xbf16> to vector<1x1x256xbf16>
    %10 = vector.shape_cast %9 : vector<1x1x256xbf16> to vector<1x256xbf16>
    %c1_10 = arith.constant 1 : index
    %c0_11 = arith.constant 0 : index
    %c0_12 = arith.constant 0 : index
    %11 = vector.load %arg2[%c1_10, %c0_11, %c0_12] : memref<4x256x64xbf16, #tpu.memory_space<vmem>>, vector<1x256x64xbf16>
    %12 = vector.shape_cast %11 : vector<1x256x64xbf16> to vector<256x64xbf16>
    %cst_13 = arith.constant dense<0.000000e+00> : vector<1x64xf32>
    %13 = tpu.matmul %10, %12, %cst_13 {dimension_numbers = #tpu.dot_dimension_numbers<[1], [0], [0], [1], [0, 0, 1, 1], [], []>} : vector<1x256xbf16>, vector<256x64xbf16>, vector<1x64xf32> -> vector<1x64xf32>
    %14 = arith.addf %7, %13 : vector<1x64xf32>
    %c0_14 = arith.constant 0 : index
    %c1_15 = arith.constant 1 : index
    %c0_16 = arith.constant 0 : index
    %c0_17 = arith.constant 0 : index
    %15 = vector.load %arg1[%c0_14, %c1_15, %c0_16, %c0_17] : memref<1x2x2x256xbf16, #tpu.memory_space<vmem>>, vector<1x1x1x256xbf16>
    %16 = vector.shape_cast %15 : vector<1x1x1x256xbf16> to vector<1x1x256xbf16>
    %17 = vector.shape_cast %16 : vector<1x1x256xbf16> to vector<1x256xbf16>
    %c2 = arith.constant 2 : index
    %c0_18 = arith.constant 0 : index
    %c0_19 = arith.constant 0 : index
    %18 = vector.load %arg2[%c2, %c0_18, %c0_19] : memref<4x256x64xbf16, #tpu.memory_space<vmem>>, vector<1x256x64xbf16>
    %19 = vector.shape_cast %18 : vector<1x256x64xbf16> to vector<256x64xbf16>
    %cst_20 = arith.constant dense<0.000000e+00> : vector<1x64xf32>
    %20 = tpu.matmul %17, %19, %cst_20 {dimension_numbers = #tpu.dot_dimension_numbers<[1], [0], [0], [1], [0, 0, 1, 1], [], []>} : vector<1x256xbf16>, vector<256x64xbf16>, vector<1x64xf32> -> vector<1x64xf32>
    %21 = arith.addf %14, %20 : vector<1x64xf32>
    %c0_21 = arith.constant 0 : index
    %c1_22 = arith.constant 1 : index
    %c1_23 = arith.constant 1 : index
    %c0_24 = arith.constant 0 : index
    %22 = vector.load %arg1[%c0_21, %c1_22, %c1_23, %c0_24] : memref<1x2x2x256xbf16, #tpu.memory_space<vmem>>, vector<1x1x1x256xbf16>
    %23 = vector.shape_cast %22 : vector<1x1x1x256xbf16> to vector<1x1x256xbf16>
    %24 = vector.shape_cast %23 : vector<1x1x256xbf16> to vector<1x256xbf16>
    %c3 = arith.constant 3 : index
    %c0_25 = arith.constant 0 : index
    %c0_26 = arith.constant 0 : index
    %25 = vector.load %arg2[%c3, %c0_25, %c0_26] : memref<4x256x64xbf16, #tpu.memory_space<vmem>>, vector<1x256x64xbf16>
    %26 = vector.shape_cast %25 : vector<1x256x64xbf16> to vector<256x64xbf16>
    %cst_27 = arith.constant dense<0.000000e+00> : vector<1x64xf32>
    %27 = tpu.matmul %24, %26, %cst_27 {dimension_numbers = #tpu.dot_dimension_numbers<[1], [0], [0], [1], [0, 0, 1, 1], [], []>} : vector<1x256xbf16>, vector<256x64xbf16>, vector<1x64xf32> -> vector<1x64xf32>
    %28 = arith.addf %21, %27 : vector<1x64xf32>
    %c0_28 = arith.constant 0 : index
    %c0_29 = arith.constant 0 : index
    %29 = vector.load %arg3[%c0_28, %c0_29] : memref<1x64xf32, #tpu.memory_space<vmem>>, vector<1x64xf32>
    %30 = vector.shape_cast %29 : vector<1x64xf32> to vector<64xf32>
    %31 = vector.shape_cast %30 : vector<64xf32> to vector<1x64xf32>
    %32 = arith.addf %28, %31 : vector<1x64xf32>
    %cst_30 = arith.constant 0.000000e+00 : f32
    %33 = vector.broadcast %cst_30 : f32 to vector<1x64xf32>
    %34 = arith.cmpf oge, %32, %33 : vector<1x64xf32>
    %c0_31 = arith.constant 0 : index
    %c0_32 = arith.constant 0 : index
    %35 = vector.load %arg4[%c0_31, %c0_32] : memref<1x64xf32, #tpu.memory_space<vmem>>, vector<1x64xf32>
    %36 = vector.shape_cast %35 : vector<1x64xf32> to vector<64xf32>
    %37 = vector.shape_cast %36 : vector<64xf32> to vector<1x64xf32>
    %38 = arith.mulf %32, %37 : vector<1x64xf32>
    %39 = arith.select %34, %32, %38 : vector<1x64xi1>, vector<1x64xf32>
    %40 = vector.shape_cast %39 : vector<1x64xf32> to vector<1x1x64xf32>
    %41 = arith.truncf %40 : vector<1x1x64xf32> to vector<1x1x64xbf16>
    %c0_33 = arith.constant 0 : index
    %c0_34 = arith.constant 0 : index
    %c0_35 = arith.constant 0 : index
    %c0_36 = arith.constant 0 : index
    %42 = vector.load %arg5[%c0_33, %c0_34, %c0_35, %c0_36] : memref<1x1x1x64xbf16, #tpu.memory_space<vmem>>, vector<1x1x1x64xbf16>
    %43 = vector.shape_cast %42 : vector<1x1x1x64xbf16> to vector<1x1x64xbf16>
    %44 = vector.shape_cast %41 : vector<1x1x64xbf16> to vector<1x1x1x64xbf16>
    tpu.vector_store %arg5[%c0_33, %c0_34, %c0_35, %c0_36], %44 {strides = array<i32>} : memref<1x1x1x64xbf16, #tpu.memory_space<vmem>>, vector<1x1x1x64xbf16>,
    return
  }
  func.func @transform_0(%arg0: i32) -> (i32, i32, i32, i32) {
    %c0_i32 = arith.constant 0 : i32
    %c0_i32_0 = arith.constant 0 : i32
    %c0_i32_1 = arith.constant 0 : i32
    %c0_i32_2 = arith.constant 0 : i32
    return %arg0, %c0_i32, %c0_i32_0, %c0_i32_1 : i32, i32, i32, i32
  }
  func.func @transform_1(%arg0: i32) -> (i32, i32, i32) {
    %c0_i32 = arith.constant 0 : i32
    %c0_i32_0 = arith.constant 0 : i32
    %c0_i32_1 = arith.constant 0 : i32
    %c0_i32_2 = arith.constant 0 : i32
    return %c0_i32, %c0_i32_0, %c0_i32_1 : i32, i32, i32
  }
  func.func @transform_2(%arg0: i32) -> (i32, i32) {
    %c0_i32 = arith.constant 0 : i32
    %c0_i32_0 = arith.constant 0 : i32
    %c0_i32_1 = arith.constant 0 : i32
    return %c0_i32, %c0_i32_0 : i32, i32
  }
  func.func @transform_3(%arg0: i32) -> (i32, i32) {
    %c0_i32 = arith.constant 0 : i32
    %c0_i32_0 = arith.constant 0 : i32
    %c0_i32_1 = arith.constant 0 : i32
    return %c0_i32, %c0_i32_0 : i32, i32
  }
  func.func @transform_4(%arg0: i32) -> (i32, i32, i32, i32) {
    %c0_i32 = arith.constant 0 : i32
    %c0_i32_0 = arith.constant 0 : i32
    %c0_i32_1 = arith.constant 0 : i32
    %c0_i32_2 = arith.constant 0 : i32
    return %arg0, %c0_i32, %c0_i32_0, %c0_i32_1 : i32, i32, i32, i32
  }
}

module attributes {stable_mosaic.version = 11 : i64} {
  func.func @_conv_band_kernel(%arg0: i32, %arg1: memref<1x3x3x64xbf16, #tpu.memory_space<vmem>>, %arg2: memref<9x64x64xbf16, #tpu.memory_space<vmem>>, %arg3: memref<1x64xf32, #tpu.memory_space<vmem>>, %arg4: memref<1x64xf32, #tpu.memory_space<vmem>>, %arg5: memref<1x1x1x64xbf16, #tpu.memory_space<vmem>>) attributes {dimension_semantics = [#tpu.dimension_semantics<parallel>], iteration_bounds = array<i64: 2>, scalar_prefetch = 0 : i64, scratch_operands = 0 : i64, tpu.core_type = #tpu.core_type<tc>, window_params = [{transform_indices = @transform_0, window_bounds = array<i64: 1, 3, 3, 64>}, {pipeline_mode = #tpu.pipeline_mode<synchronous>, transform_indices = @transform_1, window_bounds = array<i64: 9, 64, 64>}, {pipeline_mode = #tpu.pipeline_mode<synchronous>, transform_indices = @transform_2, window_bounds = array<i64: 1, 64>}, {pipeline_mode = #tpu.pipeline_mode<synchronous>, transform_indices = @transform_3, window_bounds = array<i64: 1, 64>}, {transform_indices = @transform_4, window_bounds = array<i64: 1, 1, 1, 64>}]} {
    %cst = arith.constant 0.000000e+00 : f32
    %0 = vector.broadcast %cst : f32 to vector<1x64xf32>
    %c0 = arith.constant 0 : index
    %c0_0 = arith.constant 0 : index
    %c0_1 = arith.constant 0 : index
    %c0_2 = arith.constant 0 : index
    %1 = vector.load %arg1[%c0, %c0_0, %c0_1, %c0_2] : memref<1x3x3x64xbf16, #tpu.memory_space<vmem>>, vector<1x1x1x64xbf16>
    %2 = vector.shape_cast %1 : vector<1x1x1x64xbf16> to vector<1x1x64xbf16>
    %3 = vector.shape_cast %2 : vector<1x1x64xbf16> to vector<1x64xbf16>
    %c0_3 = arith.constant 0 : index
    %c0_4 = arith.constant 0 : index
    %c0_5 = arith.constant 0 : index
    %4 = vector.load %arg2[%c0_3, %c0_4, %c0_5] : memref<9x64x64xbf16, #tpu.memory_space<vmem>>, vector<1x64x64xbf16>
    %5 = vector.shape_cast %4 : vector<1x64x64xbf16> to vector<64x64xbf16>
    %cst_6 = arith.constant dense<0.000000e+00> : vector<1x64xf32>
    %6 = tpu.matmul %3, %5, %cst_6 {dimension_numbers = #tpu.dot_dimension_numbers<[1], [0], [0], [1], [0, 0, 1, 1], [], []>} : vector<1x64xbf16>, vector<64x64xbf16>, vector<1x64xf32> -> vector<1x64xf32>
    %7 = arith.addf %0, %6 : vector<1x64xf32>
    %c0_7 = arith.constant 0 : index
    %c0_8 = arith.constant 0 : index
    %c1 = arith.constant 1 : index
    %c0_9 = arith.constant 0 : index
    %8 = vector.load %arg1[%c0_7, %c0_8, %c1, %c0_9] : memref<1x3x3x64xbf16, #tpu.memory_space<vmem>>, vector<1x1x1x64xbf16>
    %9 = vector.shape_cast %8 : vector<1x1x1x64xbf16> to vector<1x1x64xbf16>
    %10 = vector.shape_cast %9 : vector<1x1x64xbf16> to vector<1x64xbf16>
    %c1_10 = arith.constant 1 : index
    %c0_11 = arith.constant 0 : index
    %c0_12 = arith.constant 0 : index
    %11 = vector.load %arg2[%c1_10, %c0_11, %c0_12] : memref<9x64x64xbf16, #tpu.memory_space<vmem>>, vector<1x64x64xbf16>
    %12 = vector.shape_cast %11 : vector<1x64x64xbf16> to vector<64x64xbf16>
    %cst_13 = arith.constant dense<0.000000e+00> : vector<1x64xf32>
    %13 = tpu.matmul %10, %12, %cst_13 {dimension_numbers = #tpu.dot_dimension_numbers<[1], [0], [0], [1], [0, 0, 1, 1], [], []>} : vector<1x64xbf16>, vector<64x64xbf16>, vector<1x64xf32> -> vector<1x64xf32>
    %14 = arith.addf %7, %13 : vector<1x64xf32>
    %c0_14 = arith.constant 0 : index
    %c0_15 = arith.constant 0 : index
    %c2 = arith.constant 2 : index
    %c0_16 = arith.constant 0 : index
    %15 = vector.load %arg1[%c0_14, %c0_15, %c2, %c0_16] : memref<1x3x3x64xbf16, #tpu.memory_space<vmem>>, vector<1x1x1x64xbf16>
    %16 = vector.shape_cast %15 : vector<1x1x1x64xbf16> to vector<1x1x64xbf16>
    %17 = vector.shape_cast %16 : vector<1x1x64xbf16> to vector<1x64xbf16>
    %c2_17 = arith.constant 2 : index
    %c0_18 = arith.constant 0 : index
    %c0_19 = arith.constant 0 : index
    %18 = vector.load %arg2[%c2_17, %c0_18, %c0_19] : memref<9x64x64xbf16, #tpu.memory_space<vmem>>, vector<1x64x64xbf16>
    %19 = vector.shape_cast %18 : vector<1x64x64xbf16> to vector<64x64xbf16>
    %cst_20 = arith.constant dense<0.000000e+00> : vector<1x64xf32>
    %20 = tpu.matmul %17, %19, %cst_20 {dimension_numbers = #tpu.dot_dimension_numbers<[1], [0], [0], [1], [0, 0, 1, 1], [], []>} : vector<1x64xbf16>, vector<64x64xbf16>, vector<1x64xf32> -> vector<1x64xf32>
    %21 = arith.addf %14, %20 : vector<1x64xf32>
    %c0_21 = arith.constant 0 : index
    %c1_22 = arith.constant 1 : index
    %c0_23 = arith.constant 0 : index
    %c0_24 = arith.constant 0 : index
    %22 = vector.load %arg1[%c0_21, %c1_22, %c0_23, %c0_24] : memref<1x3x3x64xbf16, #tpu.memory_space<vmem>>, vector<1x1x1x64xbf16>
    %23 = vector.shape_cast %22 : vector<1x1x1x64xbf16> to vector<1x1x64xbf16>
    %24 = vector.shape_cast %23 : vector<1x1x64xbf16> to vector<1x64xbf16>
    %c3 = arith.constant 3 : index
    %c0_25 = arith.constant 0 : index
    %c0_26 = arith.constant 0 : index
    %25 = vector.load %arg2[%c3, %c0_25, %c0_26] : memref<9x64x64xbf16, #tpu.memory_space<vmem>>, vector<1x64x64xbf16>
    %26 = vector.shape_cast %25 : vector<1x64x64xbf16> to vector<64x64xbf16>
    %cst_27 = arith.constant dense<0.000000e+00> : vector<1x64xf32>
    %27 = tpu.matmul %24, %26, %cst_27 {dimension_numbers = #tpu.dot_dimension_numbers<[1], [0], [0], [1], [0, 0, 1, 1], [], []>} : vector<1x64xbf16>, vector<64x64xbf16>, vector<1x64xf32> -> vector<1x64xf32>
    %28 = arith.addf %21, %27 : vector<1x64xf32>
    %c0_28 = arith.constant 0 : index
    %c1_29 = arith.constant 1 : index
    %c1_30 = arith.constant 1 : index
    %c0_31 = arith.constant 0 : index
    %29 = vector.load %arg1[%c0_28, %c1_29, %c1_30, %c0_31] : memref<1x3x3x64xbf16, #tpu.memory_space<vmem>>, vector<1x1x1x64xbf16>
    %30 = vector.shape_cast %29 : vector<1x1x1x64xbf16> to vector<1x1x64xbf16>
    %31 = vector.shape_cast %30 : vector<1x1x64xbf16> to vector<1x64xbf16>
    %c4 = arith.constant 4 : index
    %c0_32 = arith.constant 0 : index
    %c0_33 = arith.constant 0 : index
    %32 = vector.load %arg2[%c4, %c0_32, %c0_33] : memref<9x64x64xbf16, #tpu.memory_space<vmem>>, vector<1x64x64xbf16>
    %33 = vector.shape_cast %32 : vector<1x64x64xbf16> to vector<64x64xbf16>
    %cst_34 = arith.constant dense<0.000000e+00> : vector<1x64xf32>
    %34 = tpu.matmul %31, %33, %cst_34 {dimension_numbers = #tpu.dot_dimension_numbers<[1], [0], [0], [1], [0, 0, 1, 1], [], []>} : vector<1x64xbf16>, vector<64x64xbf16>, vector<1x64xf32> -> vector<1x64xf32>
    %35 = arith.addf %28, %34 : vector<1x64xf32>
    %c0_35 = arith.constant 0 : index
    %c1_36 = arith.constant 1 : index
    %c2_37 = arith.constant 2 : index
    %c0_38 = arith.constant 0 : index
    %36 = vector.load %arg1[%c0_35, %c1_36, %c2_37, %c0_38] : memref<1x3x3x64xbf16, #tpu.memory_space<vmem>>, vector<1x1x1x64xbf16>
    %37 = vector.shape_cast %36 : vector<1x1x1x64xbf16> to vector<1x1x64xbf16>
    %38 = vector.shape_cast %37 : vector<1x1x64xbf16> to vector<1x64xbf16>
    %c5 = arith.constant 5 : index
    %c0_39 = arith.constant 0 : index
    %c0_40 = arith.constant 0 : index
    %39 = vector.load %arg2[%c5, %c0_39, %c0_40] : memref<9x64x64xbf16, #tpu.memory_space<vmem>>, vector<1x64x64xbf16>
    %40 = vector.shape_cast %39 : vector<1x64x64xbf16> to vector<64x64xbf16>
    %cst_41 = arith.constant dense<0.000000e+00> : vector<1x64xf32>
    %41 = tpu.matmul %38, %40, %cst_41 {dimension_numbers = #tpu.dot_dimension_numbers<[1], [0], [0], [1], [0, 0, 1, 1], [], []>} : vector<1x64xbf16>, vector<64x64xbf16>, vector<1x64xf32> -> vector<1x64xf32>
    %42 = arith.addf %35, %41 : vector<1x64xf32>
    %c0_42 = arith.constant 0 : index
    %c2_43 = arith.constant 2 : index
    %c0_44 = arith.constant 0 : index
    %c0_45 = arith.constant 0 : index
    %43 = vector.load %arg1[%c0_42, %c2_43, %c0_44, %c0_45] : memref<1x3x3x64xbf16, #tpu.memory_space<vmem>>, vector<1x1x1x64xbf16>
    %44 = vector.shape_cast %43 : vector<1x1x1x64xbf16> to vector<1x1x64xbf16>
    %45 = vector.shape_cast %44 : vector<1x1x64xbf16> to vector<1x64xbf16>
    %c6 = arith.constant 6 : index
    %c0_46 = arith.constant 0 : index
    %c0_47 = arith.constant 0 : index
    %46 = vector.load %arg2[%c6, %c0_46, %c0_47] : memref<9x64x64xbf16, #tpu.memory_space<vmem>>, vector<1x64x64xbf16>
    %47 = vector.shape_cast %46 : vector<1x64x64xbf16> to vector<64x64xbf16>
    %cst_48 = arith.constant dense<0.000000e+00> : vector<1x64xf32>
    %48 = tpu.matmul %45, %47, %cst_48 {dimension_numbers = #tpu.dot_dimension_numbers<[1], [0], [0], [1], [0, 0, 1, 1], [], []>} : vector<1x64xbf16>, vector<64x64xbf16>, vector<1x64xf32> -> vector<1x64xf32>
    %49 = arith.addf %42, %48 : vector<1x64xf32>
    %c0_49 = arith.constant 0 : index
    %c2_50 = arith.constant 2 : index
    %c1_51 = arith.constant 1 : index
    %c0_52 = arith.constant 0 : index
    %50 = vector.load %arg1[%c0_49, %c2_50, %c1_51, %c0_52] : memref<1x3x3x64xbf16, #tpu.memory_space<vmem>>, vector<1x1x1x64xbf16>
    %51 = vector.shape_cast %50 : vector<1x1x1x64xbf16> to vector<1x1x64xbf16>
    %52 = vector.shape_cast %51 : vector<1x1x64xbf16> to vector<1x64xbf16>
    %c7 = arith.constant 7 : index
    %c0_53 = arith.constant 0 : index
    %c0_54 = arith.constant 0 : index
    %53 = vector.load %arg2[%c7, %c0_53, %c0_54] : memref<9x64x64xbf16, #tpu.memory_space<vmem>>, vector<1x64x64xbf16>
    %54 = vector.shape_cast %53 : vector<1x64x64xbf16> to vector<64x64xbf16>
    %cst_55 = arith.constant dense<0.000000e+00> : vector<1x64xf32>
    %55 = tpu.matmul %52, %54, %cst_55 {dimension_numbers = #tpu.dot_dimension_numbers<[1], [0], [0], [1], [0, 0, 1, 1], [], []>} : vector<1x64xbf16>, vector<64x64xbf16>, vector<1x64xf32> -> vector<1x64xf32>
    %56 = arith.addf %49, %55 : vector<1x64xf32>
    %c0_56 = arith.constant 0 : index
    %c2_57 = arith.constant 2 : index
    %c2_58 = arith.constant 2 : index
    %c0_59 = arith.constant 0 : index
    %57 = vector.load %arg1[%c0_56, %c2_57, %c2_58, %c0_59] : memref<1x3x3x64xbf16, #tpu.memory_space<vmem>>, vector<1x1x1x64xbf16>
    %58 = vector.shape_cast %57 : vector<1x1x1x64xbf16> to vector<1x1x64xbf16>
    %59 = vector.shape_cast %58 : vector<1x1x64xbf16> to vector<1x64xbf16>
    %c8 = arith.constant 8 : index
    %c0_60 = arith.constant 0 : index
    %c0_61 = arith.constant 0 : index
    %60 = vector.load %arg2[%c8, %c0_60, %c0_61] : memref<9x64x64xbf16, #tpu.memory_space<vmem>>, vector<1x64x64xbf16>
    %61 = vector.shape_cast %60 : vector<1x64x64xbf16> to vector<64x64xbf16>
    %cst_62 = arith.constant dense<0.000000e+00> : vector<1x64xf32>
    %62 = tpu.matmul %59, %61, %cst_62 {dimension_numbers = #tpu.dot_dimension_numbers<[1], [0], [0], [1], [0, 0, 1, 1], [], []>} : vector<1x64xbf16>, vector<64x64xbf16>, vector<1x64xf32> -> vector<1x64xf32>
    %63 = arith.addf %56, %62 : vector<1x64xf32>
    %c0_63 = arith.constant 0 : index
    %c0_64 = arith.constant 0 : index
    %64 = vector.load %arg3[%c0_63, %c0_64] : memref<1x64xf32, #tpu.memory_space<vmem>>, vector<1x64xf32>
    %65 = vector.shape_cast %64 : vector<1x64xf32> to vector<64xf32>
    %66 = vector.shape_cast %65 : vector<64xf32> to vector<1x64xf32>
    %67 = arith.addf %63, %66 : vector<1x64xf32>
    %cst_65 = arith.constant 0.000000e+00 : f32
    %68 = vector.broadcast %cst_65 : f32 to vector<1x64xf32>
    %69 = arith.cmpf oge, %67, %68 : vector<1x64xf32>
    %c0_66 = arith.constant 0 : index
    %c0_67 = arith.constant 0 : index
    %70 = vector.load %arg4[%c0_66, %c0_67] : memref<1x64xf32, #tpu.memory_space<vmem>>, vector<1x64xf32>
    %71 = vector.shape_cast %70 : vector<1x64xf32> to vector<64xf32>
    %72 = vector.shape_cast %71 : vector<64xf32> to vector<1x64xf32>
    %73 = arith.mulf %67, %72 : vector<1x64xf32>
    %74 = arith.select %69, %67, %73 : vector<1x64xi1>, vector<1x64xf32>
    %75 = vector.shape_cast %74 : vector<1x64xf32> to vector<1x1x64xf32>
    %76 = arith.truncf %75 : vector<1x1x64xf32> to vector<1x1x64xbf16>
    %c0_68 = arith.constant 0 : index
    %c0_69 = arith.constant 0 : index
    %c0_70 = arith.constant 0 : index
    %c0_71 = arith.constant 0 : index
    %77 = vector.load %arg5[%c0_68, %c0_69, %c0_70, %c0_71] : memref<1x1x1x64xbf16, #tpu.memory_space<vmem>>, vector<1x1x1x64xbf16>
    %78 = vector.shape_cast %77 : vector<1x1x1x64xbf16> to vector<1x1x64xbf16>
    %79 = vector.shape_cast %76 : vector<1x1x64xbf16> to vector<1x1x1x64xbf16>
    tpu.vector_store %arg5[%c0_68, %c0_69, %c0_70, %c0_71], %79 {strides = array<i32>} : memref<1x1x1x64xbf16, #tpu.memory_space<vmem>>, vector<1x1x1x64xbf16>,
    return
  }
  func.func @transform_0(%arg0: i32) -> (i32, i32, i32, i32) {
    %c0_i32 = arith.constant 0 : i32
    %c0_i32_0 = arith.constant 0 : i32
    %c0_i32_1 = arith.constant 0 : i32
    %c0_i32_2 = arith.constant 0 : i32
    return %arg0, %c0_i32, %c0_i32_0, %c0_i32_1 : i32, i32, i32, i32
  }
  func.func @transform_1(%arg0: i32) -> (i32, i32, i32) {
    %c0_i32 = arith.constant 0 : i32
    %c0_i32_0 = arith.constant 0 : i32
    %c0_i32_1 = arith.constant 0 : i32
    %c0_i32_2 = arith.constant 0 : i32
    return %c0_i32, %c0_i32_0, %c0_i32_1 : i32, i32, i32
  }
  func.func @transform_2(%arg0: i32) -> (i32, i32) {
    %c0_i32 = arith.constant 0 : i32
    %c0_i32_0 = arith.constant 0 : i32
    %c0_i32_1 = arith.constant 0 : i32
    return %c0_i32, %c0_i32_0 : i32, i32
  }
  func.func @transform_3(%arg0: i32) -> (i32, i32) {
    %c0_i32 = arith.constant 0 : i32
    %c0_i32_0 = arith.constant 0 : i32
    %c0_i32_1 = arith.constant 0 : i32
    return %c0_i32, %c0_i32_0 : i32, i32
  }
  func.func @transform_4(%arg0: i32) -> (i32, i32, i32, i32) {
    %c0_i32 = arith.constant 0 : i32
    %c0_i32_0 = arith.constant 0 : i32
    %c0_i32_1 = arith.constant 0 : i32
    %c0_i32_2 = arith.constant 0 : i32
    return %arg0, %c0_i32, %c0_i32_0, %c0_i32_1 : i32, i32, i32, i32
  }
}

module attributes {stable_mosaic.version = 11 : i64} {
  func.func @_deconv_band_kernel(%arg0: i32, %arg1: memref<1x3x3x128xbf16, #tpu.memory_space<vmem>>, %arg2: memref<12x128x64xbf16, #tpu.memory_space<vmem>>, %arg3: memref<1x64xf32, #tpu.memory_space<vmem>>, %arg4: memref<1x64xf32, #tpu.memory_space<vmem>>, %arg5: memref<1x1x2x1x64xbf16, #tpu.memory_space<vmem>>) attributes {dimension_semantics = [#tpu.dimension_semantics<parallel>], iteration_bounds = array<i64: 2>, scalar_prefetch = 0 : i64, scratch_operands = 0 : i64, tpu.core_type = #tpu.core_type<tc>, window_params = [{transform_indices = @transform_0, window_bounds = array<i64: 1, 3, 3, 128>}, {pipeline_mode = #tpu.pipeline_mode<synchronous>, transform_indices = @transform_1, window_bounds = array<i64: 12, 128, 64>}, {pipeline_mode = #tpu.pipeline_mode<synchronous>, transform_indices = @transform_2, window_bounds = array<i64: 1, 64>}, {pipeline_mode = #tpu.pipeline_mode<synchronous>, transform_indices = @transform_3, window_bounds = array<i64: 1, 64>}, {transform_indices = @transform_4, window_bounds = array<i64: 1, 1, 2, 1, 64>}]} {
    %cst = arith.constant 0.000000e+00 : f32
    %0 = vector.broadcast %cst : f32 to vector<1x64xf32>
    %c0 = arith.constant 0 : index
    %c0_0 = arith.constant 0 : index
    %c0_1 = arith.constant 0 : index
    %c0_2 = arith.constant 0 : index
    %1 = vector.load %arg1[%c0, %c0_0, %c0_1, %c0_2] : memref<1x3x3x128xbf16, #tpu.memory_space<vmem>>, vector<1x1x1x128xbf16>
    %2 = vector.shape_cast %1 : vector<1x1x1x128xbf16> to vector<1x1x128xbf16>
    %3 = vector.shape_cast %2 : vector<1x1x128xbf16> to vector<1x128xbf16>
    %c0_3 = arith.constant 0 : index
    %c0_4 = arith.constant 0 : index
    %c0_5 = arith.constant 0 : index
    %4 = vector.load %arg2[%c0_3, %c0_4, %c0_5] : memref<12x128x64xbf16, #tpu.memory_space<vmem>>, vector<1x128x64xbf16>
    %5 = vector.shape_cast %4 : vector<1x128x64xbf16> to vector<128x64xbf16>
    %cst_6 = arith.constant dense<0.000000e+00> : vector<1x64xf32>
    %6 = tpu.matmul %3, %5, %cst_6 {dimension_numbers = #tpu.dot_dimension_numbers<[1], [0], [0], [1], [0, 0, 1, 1], [], []>} : vector<1x128xbf16>, vector<128x64xbf16>, vector<1x64xf32> -> vector<1x64xf32>
    %7 = arith.addf %0, %6 : vector<1x64xf32>
    %c0_7 = arith.constant 0 : index
    %c0_8 = arith.constant 0 : index
    %c1 = arith.constant 1 : index
    %c0_9 = arith.constant 0 : index
    %8 = vector.load %arg1[%c0_7, %c0_8, %c1, %c0_9] : memref<1x3x3x128xbf16, #tpu.memory_space<vmem>>, vector<1x1x1x128xbf16>
    %9 = vector.shape_cast %8 : vector<1x1x1x128xbf16> to vector<1x1x128xbf16>
    %10 = vector.shape_cast %9 : vector<1x1x128xbf16> to vector<1x128xbf16>
    %c1_10 = arith.constant 1 : index
    %c0_11 = arith.constant 0 : index
    %c0_12 = arith.constant 0 : index
    %11 = vector.load %arg2[%c1_10, %c0_11, %c0_12] : memref<12x128x64xbf16, #tpu.memory_space<vmem>>, vector<1x128x64xbf16>
    %12 = vector.shape_cast %11 : vector<1x128x64xbf16> to vector<128x64xbf16>
    %cst_13 = arith.constant dense<0.000000e+00> : vector<1x64xf32>
    %13 = tpu.matmul %10, %12, %cst_13 {dimension_numbers = #tpu.dot_dimension_numbers<[1], [0], [0], [1], [0, 0, 1, 1], [], []>} : vector<1x128xbf16>, vector<128x64xbf16>, vector<1x64xf32> -> vector<1x64xf32>
    %14 = arith.addf %7, %13 : vector<1x64xf32>
    %c0_14 = arith.constant 0 : index
    %c0_15 = arith.constant 0 : index
    %c2 = arith.constant 2 : index
    %c0_16 = arith.constant 0 : index
    %15 = vector.load %arg1[%c0_14, %c0_15, %c2, %c0_16] : memref<1x3x3x128xbf16, #tpu.memory_space<vmem>>, vector<1x1x1x128xbf16>
    %16 = vector.shape_cast %15 : vector<1x1x1x128xbf16> to vector<1x1x128xbf16>
    %17 = vector.shape_cast %16 : vector<1x1x128xbf16> to vector<1x128xbf16>
    %c2_17 = arith.constant 2 : index
    %c0_18 = arith.constant 0 : index
    %c0_19 = arith.constant 0 : index
    %18 = vector.load %arg2[%c2_17, %c0_18, %c0_19] : memref<12x128x64xbf16, #tpu.memory_space<vmem>>, vector<1x128x64xbf16>
    %19 = vector.shape_cast %18 : vector<1x128x64xbf16> to vector<128x64xbf16>
    %cst_20 = arith.constant dense<0.000000e+00> : vector<1x64xf32>
    %20 = tpu.matmul %17, %19, %cst_20 {dimension_numbers = #tpu.dot_dimension_numbers<[1], [0], [0], [1], [0, 0, 1, 1], [], []>} : vector<1x128xbf16>, vector<128x64xbf16>, vector<1x64xf32> -> vector<1x64xf32>
    %21 = arith.addf %14, %20 : vector<1x64xf32>
    %c0_21 = arith.constant 0 : index
    %c1_22 = arith.constant 1 : index
    %c0_23 = arith.constant 0 : index
    %c0_24 = arith.constant 0 : index
    %22 = vector.load %arg1[%c0_21, %c1_22, %c0_23, %c0_24] : memref<1x3x3x128xbf16, #tpu.memory_space<vmem>>, vector<1x1x1x128xbf16>
    %23 = vector.shape_cast %22 : vector<1x1x1x128xbf16> to vector<1x1x128xbf16>
    %24 = vector.shape_cast %23 : vector<1x1x128xbf16> to vector<1x128xbf16>
    %c3 = arith.constant 3 : index
    %c0_25 = arith.constant 0 : index
    %c0_26 = arith.constant 0 : index
    %25 = vector.load %arg2[%c3, %c0_25, %c0_26] : memref<12x128x64xbf16, #tpu.memory_space<vmem>>, vector<1x128x64xbf16>
    %26 = vector.shape_cast %25 : vector<1x128x64xbf16> to vector<128x64xbf16>
    %cst_27 = arith.constant dense<0.000000e+00> : vector<1x64xf32>
    %27 = tpu.matmul %24, %26, %cst_27 {dimension_numbers = #tpu.dot_dimension_numbers<[1], [0], [0], [1], [0, 0, 1, 1], [], []>} : vector<1x128xbf16>, vector<128x64xbf16>, vector<1x64xf32> -> vector<1x64xf32>
    %28 = arith.addf %21, %27 : vector<1x64xf32>
    %c0_28 = arith.constant 0 : index
    %c1_29 = arith.constant 1 : index
    %c1_30 = arith.constant 1 : index
    %c0_31 = arith.constant 0 : index
    %29 = vector.load %arg1[%c0_28, %c1_29, %c1_30, %c0_31] : memref<1x3x3x128xbf16, #tpu.memory_space<vmem>>, vector<1x1x1x128xbf16>
    %30 = vector.shape_cast %29 : vector<1x1x1x128xbf16> to vector<1x1x128xbf16>
    %31 = vector.shape_cast %30 : vector<1x1x128xbf16> to vector<1x128xbf16>
    %c4 = arith.constant 4 : index
    %c0_32 = arith.constant 0 : index
    %c0_33 = arith.constant 0 : index
    %32 = vector.load %arg2[%c4, %c0_32, %c0_33] : memref<12x128x64xbf16, #tpu.memory_space<vmem>>, vector<1x128x64xbf16>
    %33 = vector.shape_cast %32 : vector<1x128x64xbf16> to vector<128x64xbf16>
    %cst_34 = arith.constant dense<0.000000e+00> : vector<1x64xf32>
    %34 = tpu.matmul %31, %33, %cst_34 {dimension_numbers = #tpu.dot_dimension_numbers<[1], [0], [0], [1], [0, 0, 1, 1], [], []>} : vector<1x128xbf16>, vector<128x64xbf16>, vector<1x64xf32> -> vector<1x64xf32>
    %35 = arith.addf %28, %34 : vector<1x64xf32>
    %c0_35 = arith.constant 0 : index
    %c1_36 = arith.constant 1 : index
    %c2_37 = arith.constant 2 : index
    %c0_38 = arith.constant 0 : index
    %36 = vector.load %arg1[%c0_35, %c1_36, %c2_37, %c0_38] : memref<1x3x3x128xbf16, #tpu.memory_space<vmem>>, vector<1x1x1x128xbf16>
    %37 = vector.shape_cast %36 : vector<1x1x1x128xbf16> to vector<1x1x128xbf16>
    %38 = vector.shape_cast %37 : vector<1x1x128xbf16> to vector<1x128xbf16>
    %c5 = arith.constant 5 : index
    %c0_39 = arith.constant 0 : index
    %c0_40 = arith.constant 0 : index
    %39 = vector.load %arg2[%c5, %c0_39, %c0_40] : memref<12x128x64xbf16, #tpu.memory_space<vmem>>, vector<1x128x64xbf16>
    %40 = vector.shape_cast %39 : vector<1x128x64xbf16> to vector<128x64xbf16>
    %cst_41 = arith.constant dense<0.000000e+00> : vector<1x64xf32>
    %41 = tpu.matmul %38, %40, %cst_41 {dimension_numbers = #tpu.dot_dimension_numbers<[1], [0], [0], [1], [0, 0, 1, 1], [], []>} : vector<1x128xbf16>, vector<128x64xbf16>, vector<1x64xf32> -> vector<1x64xf32>
    %42 = arith.addf %35, %41 : vector<1x64xf32>
    %c0_42 = arith.constant 0 : index
    %c0_43 = arith.constant 0 : index
    %43 = vector.load %arg3[%c0_42, %c0_43] : memref<1x64xf32, #tpu.memory_space<vmem>>, vector<1x64xf32>
    %44 = vector.shape_cast %43 : vector<1x64xf32> to vector<64xf32>
    %45 = vector.shape_cast %44 : vector<64xf32> to vector<1x64xf32>
    %46 = arith.addf %42, %45 : vector<1x64xf32>
    %cst_44 = arith.constant 0.000000e+00 : f32
    %47 = vector.broadcast %cst_44 : f32 to vector<1x64xf32>
    %48 = arith.cmpf oge, %46, %47 : vector<1x64xf32>
    %c0_45 = arith.constant 0 : index
    %c0_46 = arith.constant 0 : index
    %49 = vector.load %arg4[%c0_45, %c0_46] : memref<1x64xf32, #tpu.memory_space<vmem>>, vector<1x64xf32>
    %50 = vector.shape_cast %49 : vector<1x64xf32> to vector<64xf32>
    %51 = vector.shape_cast %50 : vector<64xf32> to vector<1x64xf32>
    %52 = arith.mulf %46, %51 : vector<1x64xf32>
    %53 = arith.select %48, %46, %52 : vector<1x64xi1>, vector<1x64xf32>
    %54 = vector.shape_cast %53 : vector<1x64xf32> to vector<1x1x64xf32>
    %55 = arith.truncf %54 : vector<1x1x64xf32> to vector<1x1x64xbf16>
    %c0_47 = arith.constant 0 : index
    %c0_48 = arith.constant 0 : index
    %c0_49 = arith.constant 0 : index
    %c0_50 = arith.constant 0 : index
    %c0_51 = arith.constant 0 : index
    %56 = vector.load %arg5[%c0_47, %c0_48, %c0_49, %c0_50, %c0_51] : memref<1x1x2x1x64xbf16, #tpu.memory_space<vmem>>, vector<1x1x1x1x64xbf16>
    %57 = vector.shape_cast %56 : vector<1x1x1x1x64xbf16> to vector<1x1x64xbf16>
    %58 = vector.shape_cast %55 : vector<1x1x64xbf16> to vector<1x1x1x1x64xbf16>
    tpu.vector_store %arg5[%c0_47, %c0_48, %c0_49, %c0_50, %c0_51], %58 {strides = array<i32>} : memref<1x1x2x1x64xbf16, #tpu.memory_space<vmem>>, vector<1x1x1x1x64xbf16>,
    %cst_52 = arith.constant 0.000000e+00 : f32
    %59 = vector.broadcast %cst_52 : f32 to vector<1x64xf32>
    %c0_53 = arith.constant 0 : index
    %c1_54 = arith.constant 1 : index
    %c0_55 = arith.constant 0 : index
    %c0_56 = arith.constant 0 : index
    %60 = vector.load %arg1[%c0_53, %c1_54, %c0_55, %c0_56] : memref<1x3x3x128xbf16, #tpu.memory_space<vmem>>, vector<1x1x1x128xbf16>
    %61 = vector.shape_cast %60 : vector<1x1x1x128xbf16> to vector<1x1x128xbf16>
    %62 = vector.shape_cast %61 : vector<1x1x128xbf16> to vector<1x128xbf16>
    %c6 = arith.constant 6 : index
    %c0_57 = arith.constant 0 : index
    %c0_58 = arith.constant 0 : index
    %63 = vector.load %arg2[%c6, %c0_57, %c0_58] : memref<12x128x64xbf16, #tpu.memory_space<vmem>>, vector<1x128x64xbf16>
    %64 = vector.shape_cast %63 : vector<1x128x64xbf16> to vector<128x64xbf16>
    %cst_59 = arith.constant dense<0.000000e+00> : vector<1x64xf32>
    %65 = tpu.matmul %62, %64, %cst_59 {dimension_numbers = #tpu.dot_dimension_numbers<[1], [0], [0], [1], [0, 0, 1, 1], [], []>} : vector<1x128xbf16>, vector<128x64xbf16>, vector<1x64xf32> -> vector<1x64xf32>
    %66 = arith.addf %59, %65 : vector<1x64xf32>
    %c0_60 = arith.constant 0 : index
    %c1_61 = arith.constant 1 : index
    %c1_62 = arith.constant 1 : index
    %c0_63 = arith.constant 0 : index
    %67 = vector.load %arg1[%c0_60, %c1_61, %c1_62, %c0_63] : memref<1x3x3x128xbf16, #tpu.memory_space<vmem>>, vector<1x1x1x128xbf16>
    %68 = vector.shape_cast %67 : vector<1x1x1x128xbf16> to vector<1x1x128xbf16>
    %69 = vector.shape_cast %68 : vector<1x1x128xbf16> to vector<1x128xbf16>
    %c7 = arith.constant 7 : index
    %c0_64 = arith.constant 0 : index
    %c0_65 = arith.constant 0 : index
    %70 = vector.load %arg2[%c7, %c0_64, %c0_65] : memref<12x128x64xbf16, #tpu.memory_space<vmem>>, vector<1x128x64xbf16>
    %71 = vector.shape_cast %70 : vector<1x128x64xbf16> to vector<128x64xbf16>
    %cst_66 = arith.constant dense<0.000000e+00> : vector<1x64xf32>
    %72 = tpu.matmul %69, %71, %cst_66 {dimension_numbers = #tpu.dot_dimension_numbers<[1], [0], [0], [1], [0, 0, 1, 1], [], []>} : vector<1x128xbf16>, vector<128x64xbf16>, vector<1x64xf32> -> vector<1x64xf32>
    %73 = arith.addf %66, %72 : vector<1x64xf32>
    %c0_67 = arith.constant 0 : index
    %c1_68 = arith.constant 1 : index
    %c2_69 = arith.constant 2 : index
    %c0_70 = arith.constant 0 : index
    %74 = vector.load %arg1[%c0_67, %c1_68, %c2_69, %c0_70] : memref<1x3x3x128xbf16, #tpu.memory_space<vmem>>, vector<1x1x1x128xbf16>
    %75 = vector.shape_cast %74 : vector<1x1x1x128xbf16> to vector<1x1x128xbf16>
    %76 = vector.shape_cast %75 : vector<1x1x128xbf16> to vector<1x128xbf16>
    %c8 = arith.constant 8 : index
    %c0_71 = arith.constant 0 : index
    %c0_72 = arith.constant 0 : index
    %77 = vector.load %arg2[%c8, %c0_71, %c0_72] : memref<12x128x64xbf16, #tpu.memory_space<vmem>>, vector<1x128x64xbf16>
    %78 = vector.shape_cast %77 : vector<1x128x64xbf16> to vector<128x64xbf16>
    %cst_73 = arith.constant dense<0.000000e+00> : vector<1x64xf32>
    %79 = tpu.matmul %76, %78, %cst_73 {dimension_numbers = #tpu.dot_dimension_numbers<[1], [0], [0], [1], [0, 0, 1, 1], [], []>} : vector<1x128xbf16>, vector<128x64xbf16>, vector<1x64xf32> -> vector<1x64xf32>
    %80 = arith.addf %73, %79 : vector<1x64xf32>
    %c0_74 = arith.constant 0 : index
    %c2_75 = arith.constant 2 : index
    %c0_76 = arith.constant 0 : index
    %c0_77 = arith.constant 0 : index
    %81 = vector.load %arg1[%c0_74, %c2_75, %c0_76, %c0_77] : memref<1x3x3x128xbf16, #tpu.memory_space<vmem>>, vector<1x1x1x128xbf16>
    %82 = vector.shape_cast %81 : vector<1x1x1x128xbf16> to vector<1x1x128xbf16>
    %83 = vector.shape_cast %82 : vector<1x1x128xbf16> to vector<1x128xbf16>
    %c9 = arith.constant 9 : index
    %c0_78 = arith.constant 0 : index
    %c0_79 = arith.constant 0 : index
    %84 = vector.load %arg2[%c9, %c0_78, %c0_79] : memref<12x128x64xbf16, #tpu.memory_space<vmem>>, vector<1x128x64xbf16>
    %85 = vector.shape_cast %84 : vector<1x128x64xbf16> to vector<128x64xbf16>
    %cst_80 = arith.constant dense<0.000000e+00> : vector<1x64xf32>
    %86 = tpu.matmul %83, %85, %cst_80 {dimension_numbers = #tpu.dot_dimension_numbers<[1], [0], [0], [1], [0, 0, 1, 1], [], []>} : vector<1x128xbf16>, vector<128x64xbf16>, vector<1x64xf32> -> vector<1x64xf32>
    %87 = arith.addf %80, %86 : vector<1x64xf32>
    %c0_81 = arith.constant 0 : index
    %c2_82 = arith.constant 2 : index
    %c1_83 = arith.constant 1 : index
    %c0_84 = arith.constant 0 : index
    %88 = vector.load %arg1[%c0_81, %c2_82, %c1_83, %c0_84] : memref<1x3x3x128xbf16, #tpu.memory_space<vmem>>, vector<1x1x1x128xbf16>
    %89 = vector.shape_cast %88 : vector<1x1x1x128xbf16> to vector<1x1x128xbf16>
    %90 = vector.shape_cast %89 : vector<1x1x128xbf16> to vector<1x128xbf16>
    %c10 = arith.constant 10 : index
    %c0_85 = arith.constant 0 : index
    %c0_86 = arith.constant 0 : index
    %91 = vector.load %arg2[%c10, %c0_85, %c0_86] : memref<12x128x64xbf16, #tpu.memory_space<vmem>>, vector<1x128x64xbf16>
    %92 = vector.shape_cast %91 : vector<1x128x64xbf16> to vector<128x64xbf16>
    %cst_87 = arith.constant dense<0.000000e+00> : vector<1x64xf32>
    %93 = tpu.matmul %90, %92, %cst_87 {dimension_numbers = #tpu.dot_dimension_numbers<[1], [0], [0], [1], [0, 0, 1, 1], [], []>} : vector<1x128xbf16>, vector<128x64xbf16>, vector<1x64xf32> -> vector<1x64xf32>
    %94 = arith.addf %87, %93 : vector<1x64xf32>
    %c0_88 = arith.constant 0 : index
    %c2_89 = arith.constant 2 : index
    %c2_90 = arith.constant 2 : index
    %c0_91 = arith.constant 0 : index
    %95 = vector.load %arg1[%c0_88, %c2_89, %c2_90, %c0_91] : memref<1x3x3x128xbf16, #tpu.memory_space<vmem>>, vector<1x1x1x128xbf16>
    %96 = vector.shape_cast %95 : vector<1x1x1x128xbf16> to vector<1x1x128xbf16>
    %97 = vector.shape_cast %96 : vector<1x1x128xbf16> to vector<1x128xbf16>
    %c11 = arith.constant 11 : index
    %c0_92 = arith.constant 0 : index
    %c0_93 = arith.constant 0 : index
    %98 = vector.load %arg2[%c11, %c0_92, %c0_93] : memref<12x128x64xbf16, #tpu.memory_space<vmem>>, vector<1x128x64xbf16>
    %99 = vector.shape_cast %98 : vector<1x128x64xbf16> to vector<128x64xbf16>
    %cst_94 = arith.constant dense<0.000000e+00> : vector<1x64xf32>
    %100 = tpu.matmul %97, %99, %cst_94 {dimension_numbers = #tpu.dot_dimension_numbers<[1], [0], [0], [1], [0, 0, 1, 1], [], []>} : vector<1x128xbf16>, vector<128x64xbf16>, vector<1x64xf32> -> vector<1x64xf32>
    %101 = arith.addf %94, %100 : vector<1x64xf32>
    %c0_95 = arith.constant 0 : index
    %c0_96 = arith.constant 0 : index
    %102 = vector.load %arg3[%c0_95, %c0_96] : memref<1x64xf32, #tpu.memory_space<vmem>>, vector<1x64xf32>
    %103 = vector.shape_cast %102 : vector<1x64xf32> to vector<64xf32>
    %104 = vector.shape_cast %103 : vector<64xf32> to vector<1x64xf32>
    %105 = arith.addf %101, %104 : vector<1x64xf32>
    %cst_97 = arith.constant 0.000000e+00 : f32
    %106 = vector.broadcast %cst_97 : f32 to vector<1x64xf32>
    %107 = arith.cmpf oge, %105, %106 : vector<1x64xf32>
    %c0_98 = arith.constant 0 : index
    %c0_99 = arith.constant 0 : index
    %108 = vector.load %arg4[%c0_98, %c0_99] : memref<1x64xf32, #tpu.memory_space<vmem>>, vector<1x64xf32>
    %109 = vector.shape_cast %108 : vector<1x64xf32> to vector<64xf32>
    %110 = vector.shape_cast %109 : vector<64xf32> to vector<1x64xf32>
    %111 = arith.mulf %105, %110 : vector<1x64xf32>
    %112 = arith.select %107, %105, %111 : vector<1x64xi1>, vector<1x64xf32>
    %113 = vector.shape_cast %112 : vector<1x64xf32> to vector<1x1x64xf32>
    %114 = arith.truncf %113 : vector<1x1x64xf32> to vector<1x1x64xbf16>
    %c0_100 = arith.constant 0 : index
    %c0_101 = arith.constant 0 : index
    %c1_102 = arith.constant 1 : index
    %c0_103 = arith.constant 0 : index
    %c0_104 = arith.constant 0 : index
    %115 = vector.load %arg5[%c0_100, %c0_101, %c1_102, %c0_103, %c0_104] : memref<1x1x2x1x64xbf16, #tpu.memory_space<vmem>>, vector<1x1x1x1x64xbf16>
    %116 = vector.shape_cast %115 : vector<1x1x1x1x64xbf16> to vector<1x1x64xbf16>
    %117 = vector.shape_cast %114 : vector<1x1x64xbf16> to vector<1x1x1x1x64xbf16>
    tpu.vector_store %arg5[%c0_100, %c0_101, %c1_102, %c0_103, %c0_104], %117 {strides = array<i32>} : memref<1x1x2x1x64xbf16, #tpu.memory_space<vmem>>, vector<1x1x1x1x64xbf16>,
    return
  }
  func.func @transform_0(%arg0: i32) -> (i32, i32, i32, i32) {
    %c0_i32 = arith.constant 0 : i32
    %c0_i32_0 = arith.constant 0 : i32
    %c0_i32_1 = arith.constant 0 : i32
    %c0_i32_2 = arith.constant 0 : i32
    return %arg0, %c0_i32, %c0_i32_0, %c0_i32_1 : i32, i32, i32, i32
  }
  func.func @transform_1(%arg0: i32) -> (i32, i32, i32) {
    %c0_i32 = arith.constant 0 : i32
    %c0_i32_0 = arith.constant 0 : i32
    %c0_i32_1 = arith.constant 0 : i32
    %c0_i32_2 = arith.constant 0 : i32
    return %c0_i32, %c0_i32_0, %c0_i32_1 : i32, i32, i32
  }
  func.func @transform_2(%arg0: i32) -> (i32, i32) {
    %c0_i32 = arith.constant 0 : i32
    %c0_i32_0 = arith.constant 0 : i32
    %c0_i32_1 = arith.constant 0 : i32
    return %c0_i32, %c0_i32_0 : i32, i32
  }
  func.func @transform_3(%arg0: i32) -> (i32, i32) {
    %c0_i32 = arith.constant 0 : i32
    %c0_i32_0 = arith.constant 0 : i32
    %c0_i32_1 = arith.constant 0 : i32
    return %c0_i32, %c0_i32_0 : i32, i32
  }
  func.func @transform_4(%arg0: i32) -> (i32, i32, i32, i32, i32) {
    %c0_i32 = arith.constant 0 : i32
    %c0_i32_0 = arith.constant 0 : i32
    %c0_i32_1 = arith.constant 0 : i32
    %c0_i32_2 = arith.constant 0 : i32
    %c0_i32_3 = arith.constant 0 : i32
    return %arg0, %c0_i32, %c0_i32_0, %c0_i32_1, %c0_i32_2 : i32, i32, i32, i32, i32
  }
}

module attributes {stable_mosaic.version = 11 : i64} {
  func.func @_deconv_band_kernel(%arg0: i32, %arg1: memref<1x4x4x64xbf16, #tpu.memory_space<vmem>>, %arg2: memref<12x64x32xbf16, #tpu.memory_space<vmem>>, %arg3: memref<1x32xf32, #tpu.memory_space<vmem>>, %arg4: memref<1x32xf32, #tpu.memory_space<vmem>>, %arg5: memref<1x2x2x2x32xbf16, #tpu.memory_space<vmem>>) attributes {dimension_semantics = [#tpu.dimension_semantics<parallel>], iteration_bounds = array<i64: 2>, scalar_prefetch = 0 : i64, scratch_operands = 0 : i64, tpu.core_type = #tpu.core_type<tc>, window_params = [{transform_indices = @transform_0, window_bounds = array<i64: 1, 4, 4, 64>}, {pipeline_mode = #tpu.pipeline_mode<synchronous>, transform_indices = @transform_1, window_bounds = array<i64: 12, 64, 32>}, {pipeline_mode = #tpu.pipeline_mode<synchronous>, transform_indices = @transform_2, window_bounds = array<i64: 1, 32>}, {pipeline_mode = #tpu.pipeline_mode<synchronous>, transform_indices = @transform_3, window_bounds = array<i64: 1, 32>}, {transform_indices = @transform_4, window_bounds = array<i64: 1, 2, 2, 2, 32>}]} {
    %cst = arith.constant 0.000000e+00 : f32
    %0 = vector.broadcast %cst : f32 to vector<4x32xf32>
    %c0 = arith.constant 0 : index
    %c0_0 = arith.constant 0 : index
    %c0_1 = arith.constant 0 : index
    %c0_2 = arith.constant 0 : index
    %1 = vector.load %arg1[%c0, %c0_0, %c0_1, %c0_2] : memref<1x4x4x64xbf16, #tpu.memory_space<vmem>>, vector<1x2x2x64xbf16>
    %2 = vector.shape_cast %1 : vector<1x2x2x64xbf16> to vector<2x2x64xbf16>
    %3 = vector.shape_cast %2 : vector<2x2x64xbf16> to vector<4x64xbf16>
    %c0_3 = arith.constant 0 : index
    %c0_4 = arith.constant 0 : index
    %c0_5 = arith.constant 0 : index
    %4 = vector.load %arg2[%c0_3, %c0_4, %c0_5] : memref<12x64x32xbf16, #tpu.memory_space<vmem>>, vector<1x64x32xbf16>
    %5 = vector.shape_cast %4 : vector<1x64x32xbf16> to vector<64x32xbf16>
    %cst_6 = arith.constant dense<0.000000e+00> : vector<4x32xf32>
    %6 = tpu.matmul %3, %5, %cst_6 {dimension_numbers = #tpu.dot_dimension_numbers<[1], [0], [0], [1], [0, 0, 1, 1], [], []>} : vector<4x64xbf16>, vector<64x32xbf16>, vector<4x32xf32> -> vector<4x32xf32>
    %7 = arith.addf %0, %6 : vector<4x32xf32>
    %c0_7 = arith.constant 0 : index
    %c0_8 = arith.constant 0 : index
    %c1 = arith.constant 1 : index
    %c0_9 = arith.constant 0 : index
    %8 = vector.load %arg1[%c0_7, %c0_8, %c1, %c0_9] : memref<1x4x4x64xbf16, #tpu.memory_space<vmem>>, vector<1x2x2x64xbf16>
    %9 = vector.shape_cast %8 : vector<1x2x2x64xbf16> to vector<2x2x64xbf16>
    %10 = vector.shape_cast %9 : vector<2x2x64xbf16> to vector<4x64xbf16>
    %c1_10 = arith.constant 1 : index
    %c0_11 = arith.constant 0 : index
    %c0_12 = arith.constant 0 : index
    %11 = vector.load %arg2[%c1_10, %c0_11, %c0_12] : memref<12x64x32xbf16, #tpu.memory_space<vmem>>, vector<1x64x32xbf16>
    %12 = vector.shape_cast %11 : vector<1x64x32xbf16> to vector<64x32xbf16>
    %cst_13 = arith.constant dense<0.000000e+00> : vector<4x32xf32>
    %13 = tpu.matmul %10, %12, %cst_13 {dimension_numbers = #tpu.dot_dimension_numbers<[1], [0], [0], [1], [0, 0, 1, 1], [], []>} : vector<4x64xbf16>, vector<64x32xbf16>, vector<4x32xf32> -> vector<4x32xf32>
    %14 = arith.addf %7, %13 : vector<4x32xf32>
    %c0_14 = arith.constant 0 : index
    %c0_15 = arith.constant 0 : index
    %c2 = arith.constant 2 : index
    %c0_16 = arith.constant 0 : index
    %15 = vector.load %arg1[%c0_14, %c0_15, %c2, %c0_16] : memref<1x4x4x64xbf16, #tpu.memory_space<vmem>>, vector<1x2x2x64xbf16>
    %16 = vector.shape_cast %15 : vector<1x2x2x64xbf16> to vector<2x2x64xbf16>
    %17 = vector.shape_cast %16 : vector<2x2x64xbf16> to vector<4x64xbf16>
    %c2_17 = arith.constant 2 : index
    %c0_18 = arith.constant 0 : index
    %c0_19 = arith.constant 0 : index
    %18 = vector.load %arg2[%c2_17, %c0_18, %c0_19] : memref<12x64x32xbf16, #tpu.memory_space<vmem>>, vector<1x64x32xbf16>
    %19 = vector.shape_cast %18 : vector<1x64x32xbf16> to vector<64x32xbf16>
    %cst_20 = arith.constant dense<0.000000e+00> : vector<4x32xf32>
    %20 = tpu.matmul %17, %19, %cst_20 {dimension_numbers = #tpu.dot_dimension_numbers<[1], [0], [0], [1], [0, 0, 1, 1], [], []>} : vector<4x64xbf16>, vector<64x32xbf16>, vector<4x32xf32> -> vector<4x32xf32>
    %21 = arith.addf %14, %20 : vector<4x32xf32>
    %c0_21 = arith.constant 0 : index
    %c1_22 = arith.constant 1 : index
    %c0_23 = arith.constant 0 : index
    %c0_24 = arith.constant 0 : index
    %22 = vector.load %arg1[%c0_21, %c1_22, %c0_23, %c0_24] : memref<1x4x4x64xbf16, #tpu.memory_space<vmem>>, vector<1x2x2x64xbf16>
    %23 = vector.shape_cast %22 : vector<1x2x2x64xbf16> to vector<2x2x64xbf16>
    %24 = vector.shape_cast %23 : vector<2x2x64xbf16> to vector<4x64xbf16>
    %c3 = arith.constant 3 : index
    %c0_25 = arith.constant 0 : index
    %c0_26 = arith.constant 0 : index
    %25 = vector.load %arg2[%c3, %c0_25, %c0_26] : memref<12x64x32xbf16, #tpu.memory_space<vmem>>, vector<1x64x32xbf16>
    %26 = vector.shape_cast %25 : vector<1x64x32xbf16> to vector<64x32xbf16>
    %cst_27 = arith.constant dense<0.000000e+00> : vector<4x32xf32>
    %27 = tpu.matmul %24, %26, %cst_27 {dimension_numbers = #tpu.dot_dimension_numbers<[1], [0], [0], [1], [0, 0, 1, 1], [], []>} : vector<4x64xbf16>, vector<64x32xbf16>, vector<4x32xf32> -> vector<4x32xf32>
    %28 = arith.addf %21, %27 : vector<4x32xf32>
    %c0_28 = arith.constant 0 : index
    %c1_29 = arith.constant 1 : index
    %c1_30 = arith.constant 1 : index
    %c0_31 = arith.constant 0 : index
    %29 = vector.load %arg1[%c0_28, %c1_29, %c1_30, %c0_31] : memref<1x4x4x64xbf16, #tpu.memory_space<vmem>>, vector<1x2x2x64xbf16>
    %30 = vector.shape_cast %29 : vector<1x2x2x64xbf16> to vector<2x2x64xbf16>
    %31 = vector.shape_cast %30 : vector<2x2x64xbf16> to vector<4x64xbf16>
    %c4 = arith.constant 4 : index
    %c0_32 = arith.constant 0 : index
    %c0_33 = arith.constant 0 : index
    %32 = vector.load %arg2[%c4, %c0_32, %c0_33] : memref<12x64x32xbf16, #tpu.memory_space<vmem>>, vector<1x64x32xbf16>
    %33 = vector.shape_cast %32 : vector<1x64x32xbf16> to vector<64x32xbf16>
    %cst_34 = arith.constant dense<0.000000e+00> : vector<4x32xf32>
    %34 = tpu.matmul %31, %33, %cst_34 {dimension_numbers = #tpu.dot_dimension_numbers<[1], [0], [0], [1], [0, 0, 1, 1], [], []>} : vector<4x64xbf16>, vector<64x32xbf16>, vector<4x32xf32> -> vector<4x32xf32>
    %35 = arith.addf %28, %34 : vector<4x32xf32>
    %c0_35 = arith.constant 0 : index
    %c1_36 = arith.constant 1 : index
    %c2_37 = arith.constant 2 : index
    %c0_38 = arith.constant 0 : index
    %36 = vector.load %arg1[%c0_35, %c1_36, %c2_37, %c0_38] : memref<1x4x4x64xbf16, #tpu.memory_space<vmem>>, vector<1x2x2x64xbf16>
    %37 = vector.shape_cast %36 : vector<1x2x2x64xbf16> to vector<2x2x64xbf16>
    %38 = vector.shape_cast %37 : vector<2x2x64xbf16> to vector<4x64xbf16>
    %c5 = arith.constant 5 : index
    %c0_39 = arith.constant 0 : index
    %c0_40 = arith.constant 0 : index
    %39 = vector.load %arg2[%c5, %c0_39, %c0_40] : memref<12x64x32xbf16, #tpu.memory_space<vmem>>, vector<1x64x32xbf16>
    %40 = vector.shape_cast %39 : vector<1x64x32xbf16> to vector<64x32xbf16>
    %cst_41 = arith.constant dense<0.000000e+00> : vector<4x32xf32>
    %41 = tpu.matmul %38, %40, %cst_41 {dimension_numbers = #tpu.dot_dimension_numbers<[1], [0], [0], [1], [0, 0, 1, 1], [], []>} : vector<4x64xbf16>, vector<64x32xbf16>, vector<4x32xf32> -> vector<4x32xf32>
    %42 = arith.addf %35, %41 : vector<4x32xf32>
    %c0_42 = arith.constant 0 : index
    %c0_43 = arith.constant 0 : index
    %43 = vector.load %arg3[%c0_42, %c0_43] : memref<1x32xf32, #tpu.memory_space<vmem>>, vector<1x32xf32>
    %44 = vector.shape_cast %43 : vector<1x32xf32> to vector<32xf32>
    %45 = vector.shape_cast %44 : vector<32xf32> to vector<1x32xf32>
    %46 = vector.broadcast %45 : vector<1x32xf32> to vector<4x32xf32>
    %47 = arith.addf %42, %46 : vector<4x32xf32>
    %cst_44 = arith.constant 0.000000e+00 : f32
    %48 = vector.broadcast %cst_44 : f32 to vector<4x32xf32>
    %49 = arith.cmpf oge, %47, %48 : vector<4x32xf32>
    %c0_45 = arith.constant 0 : index
    %c0_46 = arith.constant 0 : index
    %50 = vector.load %arg4[%c0_45, %c0_46] : memref<1x32xf32, #tpu.memory_space<vmem>>, vector<1x32xf32>
    %51 = vector.shape_cast %50 : vector<1x32xf32> to vector<32xf32>
    %52 = vector.shape_cast %51 : vector<32xf32> to vector<1x32xf32>
    %53 = vector.broadcast %52 : vector<1x32xf32> to vector<4x32xf32>
    %54 = arith.mulf %47, %53 : vector<4x32xf32>
    %55 = arith.select %49, %47, %54 : vector<4x32xi1>, vector<4x32xf32>
    %56 = vector.shape_cast %55 : vector<4x32xf32> to vector<2x2x32xf32>
    %57 = arith.truncf %56 : vector<2x2x32xf32> to vector<2x2x32xbf16>
    %c0_47 = arith.constant 0 : index
    %c0_48 = arith.constant 0 : index
    %c0_49 = arith.constant 0 : index
    %c0_50 = arith.constant 0 : index
    %c0_51 = arith.constant 0 : index
    %58 = vector.load %arg5[%c0_47, %c0_48, %c0_49, %c0_50, %c0_51] : memref<1x2x2x2x32xbf16, #tpu.memory_space<vmem>>, vector<1x2x1x2x32xbf16>
    %59 = vector.shape_cast %58 : vector<1x2x1x2x32xbf16> to vector<2x2x32xbf16>
    %60 = vector.shape_cast %57 : vector<2x2x32xbf16> to vector<1x2x1x2x32xbf16>
    tpu.vector_store %arg5[%c0_47, %c0_48, %c0_49, %c0_50, %c0_51], %60 {strides = array<i32>} : memref<1x2x2x2x32xbf16, #tpu.memory_space<vmem>>, vector<1x2x1x2x32xbf16>,
    %cst_52 = arith.constant 0.000000e+00 : f32
    %61 = vector.broadcast %cst_52 : f32 to vector<4x32xf32>
    %c0_53 = arith.constant 0 : index
    %c1_54 = arith.constant 1 : index
    %c0_55 = arith.constant 0 : index
    %c0_56 = arith.constant 0 : index
    %62 = vector.load %arg1[%c0_53, %c1_54, %c0_55, %c0_56] : memref<1x4x4x64xbf16, #tpu.memory_space<vmem>>, vector<1x2x2x64xbf16>
    %63 = vector.shape_cast %62 : vector<1x2x2x64xbf16> to vector<2x2x64xbf16>
    %64 = vector.shape_cast %63 : vector<2x2x64xbf16> to vector<4x64xbf16>
    %c6 = arith.constant 6 : index
    %c0_57 = arith.constant 0 : index
    %c0_58 = arith.constant 0 : index
    %65 = vector.load %arg2[%c6, %c0_57, %c0_58] : memref<12x64x32xbf16, #tpu.memory_space<vmem>>, vector<1x64x32xbf16>
    %66 = vector.shape_cast %65 : vector<1x64x32xbf16> to vector<64x32xbf16>
    %cst_59 = arith.constant dense<0.000000e+00> : vector<4x32xf32>
    %67 = tpu.matmul %64, %66, %cst_59 {dimension_numbers = #tpu.dot_dimension_numbers<[1], [0], [0], [1], [0, 0, 1, 1], [], []>} : vector<4x64xbf16>, vector<64x32xbf16>, vector<4x32xf32> -> vector<4x32xf32>
    %68 = arith.addf %61, %67 : vector<4x32xf32>
    %c0_60 = arith.constant 0 : index
    %c1_61 = arith.constant 1 : index
    %c1_62 = arith.constant 1 : index
    %c0_63 = arith.constant 0 : index
    %69 = vector.load %arg1[%c0_60, %c1_61, %c1_62, %c0_63] : memref<1x4x4x64xbf16, #tpu.memory_space<vmem>>, vector<1x2x2x64xbf16>
    %70 = vector.shape_cast %69 : vector<1x2x2x64xbf16> to vector<2x2x64xbf16>
    %71 = vector.shape_cast %70 : vector<2x2x64xbf16> to vector<4x64xbf16>
    %c7 = arith.constant 7 : index
    %c0_64 = arith.constant 0 : index
    %c0_65 = arith.constant 0 : index
    %72 = vector.load %arg2[%c7, %c0_64, %c0_65] : memref<12x64x32xbf16, #tpu.memory_space<vmem>>, vector<1x64x32xbf16>
    %73 = vector.shape_cast %72 : vector<1x64x32xbf16> to vector<64x32xbf16>
    %cst_66 = arith.constant dense<0.000000e+00> : vector<4x32xf32>
    %74 = tpu.matmul %71, %73, %cst_66 {dimension_numbers = #tpu.dot_dimension_numbers<[1], [0], [0], [1], [0, 0, 1, 1], [], []>} : vector<4x64xbf16>, vector<64x32xbf16>, vector<4x32xf32> -> vector<4x32xf32>
    %75 = arith.addf %68, %74 : vector<4x32xf32>
    %c0_67 = arith.constant 0 : index
    %c1_68 = arith.constant 1 : index
    %c2_69 = arith.constant 2 : index
    %c0_70 = arith.constant 0 : index
    %76 = vector.load %arg1[%c0_67, %c1_68, %c2_69, %c0_70] : memref<1x4x4x64xbf16, #tpu.memory_space<vmem>>, vector<1x2x2x64xbf16>
    %77 = vector.shape_cast %76 : vector<1x2x2x64xbf16> to vector<2x2x64xbf16>
    %78 = vector.shape_cast %77 : vector<2x2x64xbf16> to vector<4x64xbf16>
    %c8 = arith.constant 8 : index
    %c0_71 = arith.constant 0 : index
    %c0_72 = arith.constant 0 : index
    %79 = vector.load %arg2[%c8, %c0_71, %c0_72] : memref<12x64x32xbf16, #tpu.memory_space<vmem>>, vector<1x64x32xbf16>
    %80 = vector.shape_cast %79 : vector<1x64x32xbf16> to vector<64x32xbf16>
    %cst_73 = arith.constant dense<0.000000e+00> : vector<4x32xf32>
    %81 = tpu.matmul %78, %80, %cst_73 {dimension_numbers = #tpu.dot_dimension_numbers<[1], [0], [0], [1], [0, 0, 1, 1], [], []>} : vector<4x64xbf16>, vector<64x32xbf16>, vector<4x32xf32> -> vector<4x32xf32>
    %82 = arith.addf %75, %81 : vector<4x32xf32>
    %c0_74 = arith.constant 0 : index
    %c2_75 = arith.constant 2 : index
    %c0_76 = arith.constant 0 : index
    %c0_77 = arith.constant 0 : index
    %83 = vector.load %arg1[%c0_74, %c2_75, %c0_76, %c0_77] : memref<1x4x4x64xbf16, #tpu.memory_space<vmem>>, vector<1x2x2x64xbf16>
    %84 = vector.shape_cast %83 : vector<1x2x2x64xbf16> to vector<2x2x64xbf16>
    %85 = vector.shape_cast %84 : vector<2x2x64xbf16> to vector<4x64xbf16>
    %c9 = arith.constant 9 : index
    %c0_78 = arith.constant 0 : index
    %c0_79 = arith.constant 0 : index
    %86 = vector.load %arg2[%c9, %c0_78, %c0_79] : memref<12x64x32xbf16, #tpu.memory_space<vmem>>, vector<1x64x32xbf16>
    %87 = vector.shape_cast %86 : vector<1x64x32xbf16> to vector<64x32xbf16>
    %cst_80 = arith.constant dense<0.000000e+00> : vector<4x32xf32>
    %88 = tpu.matmul %85, %87, %cst_80 {dimension_numbers = #tpu.dot_dimension_numbers<[1], [0], [0], [1], [0, 0, 1, 1], [], []>} : vector<4x64xbf16>, vector<64x32xbf16>, vector<4x32xf32> -> vector<4x32xf32>
    %89 = arith.addf %82, %88 : vector<4x32xf32>
    %c0_81 = arith.constant 0 : index
    %c2_82 = arith.constant 2 : index
    %c1_83 = arith.constant 1 : index
    %c0_84 = arith.constant 0 : index
    %90 = vector.load %arg1[%c0_81, %c2_82, %c1_83, %c0_84] : memref<1x4x4x64xbf16, #tpu.memory_space<vmem>>, vector<1x2x2x64xbf16>
    %91 = vector.shape_cast %90 : vector<1x2x2x64xbf16> to vector<2x2x64xbf16>
    %92 = vector.shape_cast %91 : vector<2x2x64xbf16> to vector<4x64xbf16>
    %c10 = arith.constant 10 : index
    %c0_85 = arith.constant 0 : index
    %c0_86 = arith.constant 0 : index
    %93 = vector.load %arg2[%c10, %c0_85, %c0_86] : memref<12x64x32xbf16, #tpu.memory_space<vmem>>, vector<1x64x32xbf16>
    %94 = vector.shape_cast %93 : vector<1x64x32xbf16> to vector<64x32xbf16>
    %cst_87 = arith.constant dense<0.000000e+00> : vector<4x32xf32>
    %95 = tpu.matmul %92, %94, %cst_87 {dimension_numbers = #tpu.dot_dimension_numbers<[1], [0], [0], [1], [0, 0, 1, 1], [], []>} : vector<4x64xbf16>, vector<64x32xbf16>, vector<4x32xf32> -> vector<4x32xf32>
    %96 = arith.addf %89, %95 : vector<4x32xf32>
    %c0_88 = arith.constant 0 : index
    %c2_89 = arith.constant 2 : index
    %c2_90 = arith.constant 2 : index
    %c0_91 = arith.constant 0 : index
    %97 = vector.load %arg1[%c0_88, %c2_89, %c2_90, %c0_91] : memref<1x4x4x64xbf16, #tpu.memory_space<vmem>>, vector<1x2x2x64xbf16>
    %98 = vector.shape_cast %97 : vector<1x2x2x64xbf16> to vector<2x2x64xbf16>
    %99 = vector.shape_cast %98 : vector<2x2x64xbf16> to vector<4x64xbf16>
    %c11 = arith.constant 11 : index
    %c0_92 = arith.constant 0 : index
    %c0_93 = arith.constant 0 : index
    %100 = vector.load %arg2[%c11, %c0_92, %c0_93] : memref<12x64x32xbf16, #tpu.memory_space<vmem>>, vector<1x64x32xbf16>
    %101 = vector.shape_cast %100 : vector<1x64x32xbf16> to vector<64x32xbf16>
    %cst_94 = arith.constant dense<0.000000e+00> : vector<4x32xf32>
    %102 = tpu.matmul %99, %101, %cst_94 {dimension_numbers = #tpu.dot_dimension_numbers<[1], [0], [0], [1], [0, 0, 1, 1], [], []>} : vector<4x64xbf16>, vector<64x32xbf16>, vector<4x32xf32> -> vector<4x32xf32>
    %103 = arith.addf %96, %102 : vector<4x32xf32>
    %c0_95 = arith.constant 0 : index
    %c0_96 = arith.constant 0 : index
    %104 = vector.load %arg3[%c0_95, %c0_96] : memref<1x32xf32, #tpu.memory_space<vmem>>, vector<1x32xf32>
    %105 = vector.shape_cast %104 : vector<1x32xf32> to vector<32xf32>
    %106 = vector.shape_cast %105 : vector<32xf32> to vector<1x32xf32>
    %107 = vector.broadcast %106 : vector<1x32xf32> to vector<4x32xf32>
    %108 = arith.addf %103, %107 : vector<4x32xf32>
    %cst_97 = arith.constant 0.000000e+00 : f32
    %109 = vector.broadcast %cst_97 : f32 to vector<4x32xf32>
    %110 = arith.cmpf oge, %108, %109 : vector<4x32xf32>
    %c0_98 = arith.constant 0 : index
    %c0_99 = arith.constant 0 : index
    %111 = vector.load %arg4[%c0_98, %c0_99] : memref<1x32xf32, #tpu.memory_space<vmem>>, vector<1x32xf32>
    %112 = vector.shape_cast %111 : vector<1x32xf32> to vector<32xf32>
    %113 = vector.shape_cast %112 : vector<32xf32> to vector<1x32xf32>
    %114 = vector.broadcast %113 : vector<1x32xf32> to vector<4x32xf32>
    %115 = arith.mulf %108, %114 : vector<4x32xf32>
    %116 = arith.select %110, %108, %115 : vector<4x32xi1>, vector<4x32xf32>
    %117 = vector.shape_cast %116 : vector<4x32xf32> to vector<2x2x32xf32>
    %118 = arith.truncf %117 : vector<2x2x32xf32> to vector<2x2x32xbf16>
    %c0_100 = arith.constant 0 : index
    %c0_101 = arith.constant 0 : index
    %c1_102 = arith.constant 1 : index
    %c0_103 = arith.constant 0 : index
    %c0_104 = arith.constant 0 : index
    %119 = vector.load %arg5[%c0_100, %c0_101, %c1_102, %c0_103, %c0_104] : memref<1x2x2x2x32xbf16, #tpu.memory_space<vmem>>, vector<1x2x1x2x32xbf16>
    %120 = vector.shape_cast %119 : vector<1x2x1x2x32xbf16> to vector<2x2x32xbf16>
    %121 = vector.shape_cast %118 : vector<2x2x32xbf16> to vector<1x2x1x2x32xbf16>
    tpu.vector_store %arg5[%c0_100, %c0_101, %c1_102, %c0_103, %c0_104], %121 {strides = array<i32>} : memref<1x2x2x2x32xbf16, #tpu.memory_space<vmem>>, vector<1x2x1x2x32xbf16>,
    return
  }
  func.func @transform_0(%arg0: i32) -> (i32, i32, i32, i32) {
    %c0_i32 = arith.constant 0 : i32
    %c0_i32_0 = arith.constant 0 : i32
    %c0_i32_1 = arith.constant 0 : i32
    %c0_i32_2 = arith.constant 0 : i32
    return %arg0, %c0_i32, %c0_i32_0, %c0_i32_1 : i32, i32, i32, i32
  }
  func.func @transform_1(%arg0: i32) -> (i32, i32, i32) {
    %c0_i32 = arith.constant 0 : i32
    %c0_i32_0 = arith.constant 0 : i32
    %c0_i32_1 = arith.constant 0 : i32
    %c0_i32_2 = arith.constant 0 : i32
    return %c0_i32, %c0_i32_0, %c0_i32_1 : i32, i32, i32
  }
  func.func @transform_2(%arg0: i32) -> (i32, i32) {
    %c0_i32 = arith.constant 0 : i32
    %c0_i32_0 = arith.constant 0 : i32
    %c0_i32_1 = arith.constant 0 : i32
    return %c0_i32, %c0_i32_0 : i32, i32
  }
  func.func @transform_3(%arg0: i32) -> (i32, i32) {
    %c0_i32 = arith.constant 0 : i32
    %c0_i32_0 = arith.constant 0 : i32
    %c0_i32_1 = arith.constant 0 : i32
    return %c0_i32, %c0_i32_0 : i32, i32
  }
  func.func @transform_4(%arg0: i32) -> (i32, i32, i32, i32, i32) {
    %c0_i32 = arith.constant 0 : i32
    %c0_i32_0 = arith.constant 0 : i32
    %c0_i32_1 = arith.constant 0 : i32
    %c0_i32_2 = arith.constant 0 : i32
    %c0_i32_3 = arith.constant 0 : i32
    return %arg0, %c0_i32, %c0_i32_0, %c0_i32_1, %c0_i32_2 : i32, i32, i32, i32, i32
  }
}

module attributes {stable_mosaic.version = 11 : i64} {
  func.func @_deconv_band_kernel(%arg0: i32, %arg1: memref<1x6x6x32xbf16, #tpu.memory_space<vmem>>, %arg2: memref<12x32x16xbf16, #tpu.memory_space<vmem>>, %arg3: memref<1x16xf32, #tpu.memory_space<vmem>>, %arg4: memref<1x16xf32, #tpu.memory_space<vmem>>, %arg5: memref<1x4x2x4x16xbf16, #tpu.memory_space<vmem>>) attributes {dimension_semantics = [#tpu.dimension_semantics<parallel>], iteration_bounds = array<i64: 2>, scalar_prefetch = 0 : i64, scratch_operands = 0 : i64, tpu.core_type = #tpu.core_type<tc>, window_params = [{transform_indices = @transform_0, window_bounds = array<i64: 1, 6, 6, 32>}, {pipeline_mode = #tpu.pipeline_mode<synchronous>, transform_indices = @transform_1, window_bounds = array<i64: 12, 32, 16>}, {pipeline_mode = #tpu.pipeline_mode<synchronous>, transform_indices = @transform_2, window_bounds = array<i64: 1, 16>}, {pipeline_mode = #tpu.pipeline_mode<synchronous>, transform_indices = @transform_3, window_bounds = array<i64: 1, 16>}, {transform_indices = @transform_4, window_bounds = array<i64: 1, 4, 2, 4, 16>}]} {
    %cst = arith.constant 0.000000e+00 : f32
    %0 = vector.broadcast %cst : f32 to vector<16x16xf32>
    %c0 = arith.constant 0 : index
    %c0_0 = arith.constant 0 : index
    %c0_1 = arith.constant 0 : index
    %c0_2 = arith.constant 0 : index
    %1 = vector.load %arg1[%c0, %c0_0, %c0_1, %c0_2] : memref<1x6x6x32xbf16, #tpu.memory_space<vmem>>, vector<1x4x4x32xbf16>
    %2 = vector.shape_cast %1 : vector<1x4x4x32xbf16> to vector<4x4x32xbf16>
    %3 = vector.shape_cast %2 : vector<4x4x32xbf16> to vector<16x32xbf16>
    %c0_3 = arith.constant 0 : index
    %c0_4 = arith.constant 0 : index
    %c0_5 = arith.constant 0 : index
    %4 = vector.load %arg2[%c0_3, %c0_4, %c0_5] : memref<12x32x16xbf16, #tpu.memory_space<vmem>>, vector<1x32x16xbf16>
    %5 = vector.shape_cast %4 : vector<1x32x16xbf16> to vector<32x16xbf16>
    %cst_6 = arith.constant dense<0.000000e+00> : vector<16x16xf32>
    %6 = tpu.matmul %3, %5, %cst_6 {dimension_numbers = #tpu.dot_dimension_numbers<[1], [0], [0], [1], [0, 0, 1, 1], [], []>} : vector<16x32xbf16>, vector<32x16xbf16>, vector<16x16xf32> -> vector<16x16xf32>
    %7 = arith.addf %0, %6 : vector<16x16xf32>
    %c0_7 = arith.constant 0 : index
    %c0_8 = arith.constant 0 : index
    %c1 = arith.constant 1 : index
    %c0_9 = arith.constant 0 : index
    %8 = vector.load %arg1[%c0_7, %c0_8, %c1, %c0_9] : memref<1x6x6x32xbf16, #tpu.memory_space<vmem>>, vector<1x4x4x32xbf16>
    %9 = vector.shape_cast %8 : vector<1x4x4x32xbf16> to vector<4x4x32xbf16>
    %10 = vector.shape_cast %9 : vector<4x4x32xbf16> to vector<16x32xbf16>
    %c1_10 = arith.constant 1 : index
    %c0_11 = arith.constant 0 : index
    %c0_12 = arith.constant 0 : index
    %11 = vector.load %arg2[%c1_10, %c0_11, %c0_12] : memref<12x32x16xbf16, #tpu.memory_space<vmem>>, vector<1x32x16xbf16>
    %12 = vector.shape_cast %11 : vector<1x32x16xbf16> to vector<32x16xbf16>
    %cst_13 = arith.constant dense<0.000000e+00> : vector<16x16xf32>
    %13 = tpu.matmul %10, %12, %cst_13 {dimension_numbers = #tpu.dot_dimension_numbers<[1], [0], [0], [1], [0, 0, 1, 1], [], []>} : vector<16x32xbf16>, vector<32x16xbf16>, vector<16x16xf32> -> vector<16x16xf32>
    %14 = arith.addf %7, %13 : vector<16x16xf32>
    %c0_14 = arith.constant 0 : index
    %c0_15 = arith.constant 0 : index
    %c2 = arith.constant 2 : index
    %c0_16 = arith.constant 0 : index
    %15 = vector.load %arg1[%c0_14, %c0_15, %c2, %c0_16] : memref<1x6x6x32xbf16, #tpu.memory_space<vmem>>, vector<1x4x4x32xbf16>
    %16 = vector.shape_cast %15 : vector<1x4x4x32xbf16> to vector<4x4x32xbf16>
    %17 = vector.shape_cast %16 : vector<4x4x32xbf16> to vector<16x32xbf16>
    %c2_17 = arith.constant 2 : index
    %c0_18 = arith.constant 0 : index
    %c0_19 = arith.constant 0 : index
    %18 = vector.load %arg2[%c2_17, %c0_18, %c0_19] : memref<12x32x16xbf16, #tpu.memory_space<vmem>>, vector<1x32x16xbf16>
    %19 = vector.shape_cast %18 : vector<1x32x16xbf16> to vector<32x16xbf16>
    %cst_20 = arith.constant dense<0.000000e+00> : vector<16x16xf32>
    %20 = tpu.matmul %17, %19, %cst_20 {dimension_numbers = #tpu.dot_dimension_numbers<[1], [0], [0], [1], [0, 0, 1, 1], [], []>} : vector<16x32xbf16>, vector<32x16xbf16>, vector<16x16xf32> -> vector<16x16xf32>
    %21 = arith.addf %14, %20 : vector<16x16xf32>
    %c0_21 = arith.constant 0 : index
    %c1_22 = arith.constant 1 : index
    %c0_23 = arith.constant 0 : index
    %c0_24 = arith.constant 0 : index
    %22 = vector.load %arg1[%c0_21, %c1_22, %c0_23, %c0_24] : memref<1x6x6x32xbf16, #tpu.memory_space<vmem>>, vector<1x4x4x32xbf16>
    %23 = vector.shape_cast %22 : vector<1x4x4x32xbf16> to vector<4x4x32xbf16>
    %24 = vector.shape_cast %23 : vector<4x4x32xbf16> to vector<16x32xbf16>
    %c3 = arith.constant 3 : index
    %c0_25 = arith.constant 0 : index
    %c0_26 = arith.constant 0 : index
    %25 = vector.load %arg2[%c3, %c0_25, %c0_26] : memref<12x32x16xbf16, #tpu.memory_space<vmem>>, vector<1x32x16xbf16>
    %26 = vector.shape_cast %25 : vector<1x32x16xbf16> to vector<32x16xbf16>
    %cst_27 = arith.constant dense<0.000000e+00> : vector<16x16xf32>
    %27 = tpu.matmul %24, %26, %cst_27 {dimension_numbers = #tpu.dot_dimension_numbers<[1], [0], [0], [1], [0, 0, 1, 1], [], []>} : vector<16x32xbf16>, vector<32x16xbf16>, vector<16x16xf32> -> vector<16x16xf32>
    %28 = arith.addf %21, %27 : vector<16x16xf32>
    %c0_28 = arith.constant 0 : index
    %c1_29 = arith.constant 1 : index
    %c1_30 = arith.constant 1 : index
    %c0_31 = arith.constant 0 : index
    %29 = vector.load %arg1[%c0_28, %c1_29, %c1_30, %c0_31] : memref<1x6x6x32xbf16, #tpu.memory_space<vmem>>, vector<1x4x4x32xbf16>
    %30 = vector.shape_cast %29 : vector<1x4x4x32xbf16> to vector<4x4x32xbf16>
    %31 = vector.shape_cast %30 : vector<4x4x32xbf16> to vector<16x32xbf16>
    %c4 = arith.constant 4 : index
    %c0_32 = arith.constant 0 : index
    %c0_33 = arith.constant 0 : index
    %32 = vector.load %arg2[%c4, %c0_32, %c0_33] : memref<12x32x16xbf16, #tpu.memory_space<vmem>>, vector<1x32x16xbf16>
    %33 = vector.shape_cast %32 : vector<1x32x16xbf16> to vector<32x16xbf16>
    %cst_34 = arith.constant dense<0.000000e+00> : vector<16x16xf32>
    %34 = tpu.matmul %31, %33, %cst_34 {dimension_numbers = #tpu.dot_dimension_numbers<[1], [0], [0], [1], [0, 0, 1, 1], [], []>} : vector<16x32xbf16>, vector<32x16xbf16>, vector<16x16xf32> -> vector<16x16xf32>
    %35 = arith.addf %28, %34 : vector<16x16xf32>
    %c0_35 = arith.constant 0 : index
    %c1_36 = arith.constant 1 : index
    %c2_37 = arith.constant 2 : index
    %c0_38 = arith.constant 0 : index
    %36 = vector.load %arg1[%c0_35, %c1_36, %c2_37, %c0_38] : memref<1x6x6x32xbf16, #tpu.memory_space<vmem>>, vector<1x4x4x32xbf16>
    %37 = vector.shape_cast %36 : vector<1x4x4x32xbf16> to vector<4x4x32xbf16>
    %38 = vector.shape_cast %37 : vector<4x4x32xbf16> to vector<16x32xbf16>
    %c5 = arith.constant 5 : index
    %c0_39 = arith.constant 0 : index
    %c0_40 = arith.constant 0 : index
    %39 = vector.load %arg2[%c5, %c0_39, %c0_40] : memref<12x32x16xbf16, #tpu.memory_space<vmem>>, vector<1x32x16xbf16>
    %40 = vector.shape_cast %39 : vector<1x32x16xbf16> to vector<32x16xbf16>
    %cst_41 = arith.constant dense<0.000000e+00> : vector<16x16xf32>
    %41 = tpu.matmul %38, %40, %cst_41 {dimension_numbers = #tpu.dot_dimension_numbers<[1], [0], [0], [1], [0, 0, 1, 1], [], []>} : vector<16x32xbf16>, vector<32x16xbf16>, vector<16x16xf32> -> vector<16x16xf32>
    %42 = arith.addf %35, %41 : vector<16x16xf32>
    %c0_42 = arith.constant 0 : index
    %c0_43 = arith.constant 0 : index
    %43 = vector.load %arg3[%c0_42, %c0_43] : memref<1x16xf32, #tpu.memory_space<vmem>>, vector<1x16xf32>
    %44 = vector.shape_cast %43 : vector<1x16xf32> to vector<16xf32>
    %45 = vector.shape_cast %44 : vector<16xf32> to vector<1x16xf32>
    %46 = vector.broadcast %45 : vector<1x16xf32> to vector<16x16xf32>
    %47 = arith.addf %42, %46 : vector<16x16xf32>
    %cst_44 = arith.constant 0.000000e+00 : f32
    %48 = vector.broadcast %cst_44 : f32 to vector<16x16xf32>
    %49 = arith.cmpf oge, %47, %48 : vector<16x16xf32>
    %c0_45 = arith.constant 0 : index
    %c0_46 = arith.constant 0 : index
    %50 = vector.load %arg4[%c0_45, %c0_46] : memref<1x16xf32, #tpu.memory_space<vmem>>, vector<1x16xf32>
    %51 = vector.shape_cast %50 : vector<1x16xf32> to vector<16xf32>
    %52 = vector.shape_cast %51 : vector<16xf32> to vector<1x16xf32>
    %53 = vector.broadcast %52 : vector<1x16xf32> to vector<16x16xf32>
    %54 = arith.mulf %47, %53 : vector<16x16xf32>
    %55 = arith.select %49, %47, %54 : vector<16x16xi1>, vector<16x16xf32>
    %56 = vector.shape_cast %55 : vector<16x16xf32> to vector<4x4x16xf32>
    %57 = arith.truncf %56 : vector<4x4x16xf32> to vector<4x4x16xbf16>
    %c0_47 = arith.constant 0 : index
    %c0_48 = arith.constant 0 : index
    %c0_49 = arith.constant 0 : index
    %c0_50 = arith.constant 0 : index
    %c0_51 = arith.constant 0 : index
    %58 = vector.load %arg5[%c0_47, %c0_48, %c0_49, %c0_50, %c0_51] : memref<1x4x2x4x16xbf16, #tpu.memory_space<vmem>>, vector<1x4x1x4x16xbf16>
    %59 = vector.shape_cast %58 : vector<1x4x1x4x16xbf16> to vector<4x4x16xbf16>
    %60 = vector.shape_cast %57 : vector<4x4x16xbf16> to vector<1x4x1x4x16xbf16>
    tpu.vector_store %arg5[%c0_47, %c0_48, %c0_49, %c0_50, %c0_51], %60 {strides = array<i32>} : memref<1x4x2x4x16xbf16, #tpu.memory_space<vmem>>, vector<1x4x1x4x16xbf16>,
    %cst_52 = arith.constant 0.000000e+00 : f32
    %61 = vector.broadcast %cst_52 : f32 to vector<16x16xf32>
    %c0_53 = arith.constant 0 : index
    %c1_54 = arith.constant 1 : index
    %c0_55 = arith.constant 0 : index
    %c0_56 = arith.constant 0 : index
    %62 = vector.load %arg1[%c0_53, %c1_54, %c0_55, %c0_56] : memref<1x6x6x32xbf16, #tpu.memory_space<vmem>>, vector<1x4x4x32xbf16>
    %63 = vector.shape_cast %62 : vector<1x4x4x32xbf16> to vector<4x4x32xbf16>
    %64 = vector.shape_cast %63 : vector<4x4x32xbf16> to vector<16x32xbf16>
    %c6 = arith.constant 6 : index
    %c0_57 = arith.constant 0 : index
    %c0_58 = arith.constant 0 : index
    %65 = vector.load %arg2[%c6, %c0_57, %c0_58] : memref<12x32x16xbf16, #tpu.memory_space<vmem>>, vector<1x32x16xbf16>
    %66 = vector.shape_cast %65 : vector<1x32x16xbf16> to vector<32x16xbf16>
    %cst_59 = arith.constant dense<0.000000e+00> : vector<16x16xf32>
    %67 = tpu.matmul %64, %66, %cst_59 {dimension_numbers = #tpu.dot_dimension_numbers<[1], [0], [0], [1], [0, 0, 1, 1], [], []>} : vector<16x32xbf16>, vector<32x16xbf16>, vector<16x16xf32> -> vector<16x16xf32>
    %68 = arith.addf %61, %67 : vector<16x16xf32>
    %c0_60 = arith.constant 0 : index
    %c1_61 = arith.constant 1 : index
    %c1_62 = arith.constant 1 : index
    %c0_63 = arith.constant 0 : index
    %69 = vector.load %arg1[%c0_60, %c1_61, %c1_62, %c0_63] : memref<1x6x6x32xbf16, #tpu.memory_space<vmem>>, vector<1x4x4x32xbf16>
    %70 = vector.shape_cast %69 : vector<1x4x4x32xbf16> to vector<4x4x32xbf16>
    %71 = vector.shape_cast %70 : vector<4x4x32xbf16> to vector<16x32xbf16>
    %c7 = arith.constant 7 : index
    %c0_64 = arith.constant 0 : index
    %c0_65 = arith.constant 0 : index
    %72 = vector.load %arg2[%c7, %c0_64, %c0_65] : memref<12x32x16xbf16, #tpu.memory_space<vmem>>, vector<1x32x16xbf16>
    %73 = vector.shape_cast %72 : vector<1x32x16xbf16> to vector<32x16xbf16>
    %cst_66 = arith.constant dense<0.000000e+00> : vector<16x16xf32>
    %74 = tpu.matmul %71, %73, %cst_66 {dimension_numbers = #tpu.dot_dimension_numbers<[1], [0], [0], [1], [0, 0, 1, 1], [], []>} : vector<16x32xbf16>, vector<32x16xbf16>, vector<16x16xf32> -> vector<16x16xf32>
    %75 = arith.addf %68, %74 : vector<16x16xf32>
    %c0_67 = arith.constant 0 : index
    %c1_68 = arith.constant 1 : index
    %c2_69 = arith.constant 2 : index
    %c0_70 = arith.constant 0 : index
    %76 = vector.load %arg1[%c0_67, %c1_68, %c2_69, %c0_70] : memref<1x6x6x32xbf16, #tpu.memory_space<vmem>>, vector<1x4x4x32xbf16>
    %77 = vector.shape_cast %76 : vector<1x4x4x32xbf16> to vector<4x4x32xbf16>
    %78 = vector.shape_cast %77 : vector<4x4x32xbf16> to vector<16x32xbf16>
    %c8 = arith.constant 8 : index
    %c0_71 = arith.constant 0 : index
    %c0_72 = arith.constant 0 : index
    %79 = vector.load %arg2[%c8, %c0_71, %c0_72] : memref<12x32x16xbf16, #tpu.memory_space<vmem>>, vector<1x32x16xbf16>
    %80 = vector.shape_cast %79 : vector<1x32x16xbf16> to vector<32x16xbf16>
    %cst_73 = arith.constant dense<0.000000e+00> : vector<16x16xf32>
    %81 = tpu.matmul %78, %80, %cst_73 {dimension_numbers = #tpu.dot_dimension_numbers<[1], [0], [0], [1], [0, 0, 1, 1], [], []>} : vector<16x32xbf16>, vector<32x16xbf16>, vector<16x16xf32> -> vector<16x16xf32>
    %82 = arith.addf %75, %81 : vector<16x16xf32>
    %c0_74 = arith.constant 0 : index
    %c2_75 = arith.constant 2 : index
    %c0_76 = arith.constant 0 : index
    %c0_77 = arith.constant 0 : index
    %83 = vector.load %arg1[%c0_74, %c2_75, %c0_76, %c0_77] : memref<1x6x6x32xbf16, #tpu.memory_space<vmem>>, vector<1x4x4x32xbf16>
    %84 = vector.shape_cast %83 : vector<1x4x4x32xbf16> to vector<4x4x32xbf16>
    %85 = vector.shape_cast %84 : vector<4x4x32xbf16> to vector<16x32xbf16>
    %c9 = arith.constant 9 : index
    %c0_78 = arith.constant 0 : index
    %c0_79 = arith.constant 0 : index
    %86 = vector.load %arg2[%c9, %c0_78, %c0_79] : memref<12x32x16xbf16, #tpu.memory_space<vmem>>, vector<1x32x16xbf16>
    %87 = vector.shape_cast %86 : vector<1x32x16xbf16> to vector<32x16xbf16>
    %cst_80 = arith.constant dense<0.000000e+00> : vector<16x16xf32>
    %88 = tpu.matmul %85, %87, %cst_80 {dimension_numbers = #tpu.dot_dimension_numbers<[1], [0], [0], [1], [0, 0, 1, 1], [], []>} : vector<16x32xbf16>, vector<32x16xbf16>, vector<16x16xf32> -> vector<16x16xf32>
    %89 = arith.addf %82, %88 : vector<16x16xf32>
    %c0_81 = arith.constant 0 : index
    %c2_82 = arith.constant 2 : index
    %c1_83 = arith.constant 1 : index
    %c0_84 = arith.constant 0 : index
    %90 = vector.load %arg1[%c0_81, %c2_82, %c1_83, %c0_84] : memref<1x6x6x32xbf16, #tpu.memory_space<vmem>>, vector<1x4x4x32xbf16>
    %91 = vector.shape_cast %90 : vector<1x4x4x32xbf16> to vector<4x4x32xbf16>
    %92 = vector.shape_cast %91 : vector<4x4x32xbf16> to vector<16x32xbf16>
    %c10 = arith.constant 10 : index
    %c0_85 = arith.constant 0 : index
    %c0_86 = arith.constant 0 : index
    %93 = vector.load %arg2[%c10, %c0_85, %c0_86] : memref<12x32x16xbf16, #tpu.memory_space<vmem>>, vector<1x32x16xbf16>
    %94 = vector.shape_cast %93 : vector<1x32x16xbf16> to vector<32x16xbf16>
    %cst_87 = arith.constant dense<0.000000e+00> : vector<16x16xf32>
    %95 = tpu.matmul %92, %94, %cst_87 {dimension_numbers = #tpu.dot_dimension_numbers<[1], [0], [0], [1], [0, 0, 1, 1], [], []>} : vector<16x32xbf16>, vector<32x16xbf16>, vector<16x16xf32> -> vector<16x16xf32>
    %96 = arith.addf %89, %95 : vector<16x16xf32>
    %c0_88 = arith.constant 0 : index
    %c2_89 = arith.constant 2 : index
    %c2_90 = arith.constant 2 : index
    %c0_91 = arith.constant 0 : index
    %97 = vector.load %arg1[%c0_88, %c2_89, %c2_90, %c0_91] : memref<1x6x6x32xbf16, #tpu.memory_space<vmem>>, vector<1x4x4x32xbf16>
    %98 = vector.shape_cast %97 : vector<1x4x4x32xbf16> to vector<4x4x32xbf16>
    %99 = vector.shape_cast %98 : vector<4x4x32xbf16> to vector<16x32xbf16>
    %c11 = arith.constant 11 : index
    %c0_92 = arith.constant 0 : index
    %c0_93 = arith.constant 0 : index
    %100 = vector.load %arg2[%c11, %c0_92, %c0_93] : memref<12x32x16xbf16, #tpu.memory_space<vmem>>, vector<1x32x16xbf16>
    %101 = vector.shape_cast %100 : vector<1x32x16xbf16> to vector<32x16xbf16>
    %cst_94 = arith.constant dense<0.000000e+00> : vector<16x16xf32>
    %102 = tpu.matmul %99, %101, %cst_94 {dimension_numbers = #tpu.dot_dimension_numbers<[1], [0], [0], [1], [0, 0, 1, 1], [], []>} : vector<16x32xbf16>, vector<32x16xbf16>, vector<16x16xf32> -> vector<16x16xf32>
    %103 = arith.addf %96, %102 : vector<16x16xf32>
    %c0_95 = arith.constant 0 : index
    %c0_96 = arith.constant 0 : index
    %104 = vector.load %arg3[%c0_95, %c0_96] : memref<1x16xf32, #tpu.memory_space<vmem>>, vector<1x16xf32>
    %105 = vector.shape_cast %104 : vector<1x16xf32> to vector<16xf32>
    %106 = vector.shape_cast %105 : vector<16xf32> to vector<1x16xf32>
    %107 = vector.broadcast %106 : vector<1x16xf32> to vector<16x16xf32>
    %108 = arith.addf %103, %107 : vector<16x16xf32>
    %cst_97 = arith.constant 0.000000e+00 : f32
    %109 = vector.broadcast %cst_97 : f32 to vector<16x16xf32>
    %110 = arith.cmpf oge, %108, %109 : vector<16x16xf32>
    %c0_98 = arith.constant 0 : index
    %c0_99 = arith.constant 0 : index
    %111 = vector.load %arg4[%c0_98, %c0_99] : memref<1x16xf32, #tpu.memory_space<vmem>>, vector<1x16xf32>
    %112 = vector.shape_cast %111 : vector<1x16xf32> to vector<16xf32>
    %113 = vector.shape_cast %112 : vector<16xf32> to vector<1x16xf32>
    %114 = vector.broadcast %113 : vector<1x16xf32> to vector<16x16xf32>
    %115 = arith.mulf %108, %114 : vector<16x16xf32>
    %116 = arith.select %110, %108, %115 : vector<16x16xi1>, vector<16x16xf32>
    %117 = vector.shape_cast %116 : vector<16x16xf32> to vector<4x4x16xf32>
    %118 = arith.truncf %117 : vector<4x4x16xf32> to vector<4x4x16xbf16>
    %c0_100 = arith.constant 0 : index
    %c0_101 = arith.constant 0 : index
    %c1_102 = arith.constant 1 : index
    %c0_103 = arith.constant 0 : index
    %c0_104 = arith.constant 0 : index
    %119 = vector.load %arg5[%c0_100, %c0_101, %c1_102, %c0_103, %c0_104] : memref<1x4x2x4x16xbf16, #tpu.memory_space<vmem>>, vector<1x4x1x4x16xbf16>
    %120 = vector.shape_cast %119 : vector<1x4x1x4x16xbf16> to vector<4x4x16xbf16>
    %121 = vector.shape_cast %118 : vector<4x4x16xbf16> to vector<1x4x1x4x16xbf16>
    tpu.vector_store %arg5[%c0_100, %c0_101, %c1_102, %c0_103, %c0_104], %121 {strides = array<i32>} : memref<1x4x2x4x16xbf16, #tpu.memory_space<vmem>>, vector<1x4x1x4x16xbf16>,
    return
  }
  func.func @transform_0(%arg0: i32) -> (i32, i32, i32, i32) {
    %c0_i32 = arith.constant 0 : i32
    %c0_i32_0 = arith.constant 0 : i32
    %c0_i32_1 = arith.constant 0 : i32
    %c0_i32_2 = arith.constant 0 : i32
    return %arg0, %c0_i32, %c0_i32_0, %c0_i32_1 : i32, i32, i32, i32
  }
  func.func @transform_1(%arg0: i32) -> (i32, i32, i32) {
    %c0_i32 = arith.constant 0 : i32
    %c0_i32_0 = arith.constant 0 : i32
    %c0_i32_1 = arith.constant 0 : i32
    %c0_i32_2 = arith.constant 0 : i32
    return %c0_i32, %c0_i32_0, %c0_i32_1 : i32, i32, i32
  }
  func.func @transform_2(%arg0: i32) -> (i32, i32) {
    %c0_i32 = arith.constant 0 : i32
    %c0_i32_0 = arith.constant 0 : i32
    %c0_i32_1 = arith.constant 0 : i32
    return %c0_i32, %c0_i32_0 : i32, i32
  }
  func.func @transform_3(%arg0: i32) -> (i32, i32) {
    %c0_i32 = arith.constant 0 : i32
    %c0_i32_0 = arith.constant 0 : i32
    %c0_i32_1 = arith.constant 0 : i32
    return %c0_i32, %c0_i32_0 : i32, i32
  }
  func.func @transform_4(%arg0: i32) -> (i32, i32, i32, i32, i32) {
    %c0_i32 = arith.constant 0 : i32
    %c0_i32_0 = arith.constant 0 : i32
    %c0_i32_1 = arith.constant 0 : i32
    %c0_i32_2 = arith.constant 0 : i32
    %c0_i32_3 = arith.constant 0 : i32
    return %arg0, %c0_i32, %c0_i32_0, %c0_i32_1, %c0_i32_2 : i32, i32, i32, i32, i32
  }
}

module attributes {stable_mosaic.version = 11 : i64} {
  func.func @_refine_band_kernel(%arg0: i32, %arg1: memref<1x18x18x4xbf16, #tpu.memory_space<vmem>>, %arg2: memref<9x4x4xbf16, #tpu.memory_space<vmem>>, %arg3: memref<1x4xf32, #tpu.memory_space<vmem>>, %arg4: memref<1x16x16x3xf32, #tpu.memory_space<vmem>>, %arg5: memref<1x16x16x3xf32, #tpu.memory_space<vmem>>) attributes {dimension_semantics = [#tpu.dimension_semantics<parallel>], iteration_bounds = array<i64: 2>, scalar_prefetch = 0 : i64, scratch_operands = 0 : i64, tpu.core_type = #tpu.core_type<tc>, window_params = [{transform_indices = @transform_0, window_bounds = array<i64: 1, 18, 18, 4>}, {pipeline_mode = #tpu.pipeline_mode<synchronous>, transform_indices = @transform_1, window_bounds = array<i64: 9, 4, 4>}, {pipeline_mode = #tpu.pipeline_mode<synchronous>, transform_indices = @transform_2, window_bounds = array<i64: 1, 4>}, {transform_indices = @transform_3, window_bounds = array<i64: 1, 16, 16, 3>}, {transform_indices = @transform_4, window_bounds = array<i64: 1, 16, 16, 3>}]} {
    %cst = arith.constant 0.000000e+00 : f32
    %0 = vector.broadcast %cst : f32 to vector<256x4xf32>
    %c0 = arith.constant 0 : index
    %c0_0 = arith.constant 0 : index
    %c0_1 = arith.constant 0 : index
    %c0_2 = arith.constant 0 : index
    %1 = vector.load %arg1[%c0, %c0_0, %c0_1, %c0_2] : memref<1x18x18x4xbf16, #tpu.memory_space<vmem>>, vector<1x16x16x4xbf16>
    %2 = vector.shape_cast %1 : vector<1x16x16x4xbf16> to vector<16x16x4xbf16>
    %3 = vector.shape_cast %2 : vector<16x16x4xbf16> to vector<256x4xbf16>
    %c0_3 = arith.constant 0 : index
    %c0_4 = arith.constant 0 : index
    %c0_5 = arith.constant 0 : index
    %4 = vector.load %arg2[%c0_3, %c0_4, %c0_5] : memref<9x4x4xbf16, #tpu.memory_space<vmem>>, vector<1x4x4xbf16>
    %5 = vector.shape_cast %4 : vector<1x4x4xbf16> to vector<4x4xbf16>
    %cst_6 = arith.constant dense<0.000000e+00> : vector<256x4xf32>
    %6 = tpu.matmul %3, %5, %cst_6 {dimension_numbers = #tpu.dot_dimension_numbers<[1], [0], [0], [1], [0, 0, 1, 1], [], []>} : vector<256x4xbf16>, vector<4x4xbf16>, vector<256x4xf32> -> vector<256x4xf32>
    %7 = arith.addf %0, %6 : vector<256x4xf32>
    %c0_7 = arith.constant 0 : index
    %c0_8 = arith.constant 0 : index
    %c1 = arith.constant 1 : index
    %c0_9 = arith.constant 0 : index
    %8 = vector.load %arg1[%c0_7, %c0_8, %c1, %c0_9] : memref<1x18x18x4xbf16, #tpu.memory_space<vmem>>, vector<1x16x16x4xbf16>
    %9 = vector.shape_cast %8 : vector<1x16x16x4xbf16> to vector<16x16x4xbf16>
    %10 = vector.shape_cast %9 : vector<16x16x4xbf16> to vector<256x4xbf16>
    %c1_10 = arith.constant 1 : index
    %c0_11 = arith.constant 0 : index
    %c0_12 = arith.constant 0 : index
    %11 = vector.load %arg2[%c1_10, %c0_11, %c0_12] : memref<9x4x4xbf16, #tpu.memory_space<vmem>>, vector<1x4x4xbf16>
    %12 = vector.shape_cast %11 : vector<1x4x4xbf16> to vector<4x4xbf16>
    %cst_13 = arith.constant dense<0.000000e+00> : vector<256x4xf32>
    %13 = tpu.matmul %10, %12, %cst_13 {dimension_numbers = #tpu.dot_dimension_numbers<[1], [0], [0], [1], [0, 0, 1, 1], [], []>} : vector<256x4xbf16>, vector<4x4xbf16>, vector<256x4xf32> -> vector<256x4xf32>
    %14 = arith.addf %7, %13 : vector<256x4xf32>
    %c0_14 = arith.constant 0 : index
    %c0_15 = arith.constant 0 : index
    %c2 = arith.constant 2 : index
    %c0_16 = arith.constant 0 : index
    %15 = vector.load %arg1[%c0_14, %c0_15, %c2, %c0_16] : memref<1x18x18x4xbf16, #tpu.memory_space<vmem>>, vector<1x16x16x4xbf16>
    %16 = vector.shape_cast %15 : vector<1x16x16x4xbf16> to vector<16x16x4xbf16>
    %17 = vector.shape_cast %16 : vector<16x16x4xbf16> to vector<256x4xbf16>
    %c2_17 = arith.constant 2 : index
    %c0_18 = arith.constant 0 : index
    %c0_19 = arith.constant 0 : index
    %18 = vector.load %arg2[%c2_17, %c0_18, %c0_19] : memref<9x4x4xbf16, #tpu.memory_space<vmem>>, vector<1x4x4xbf16>
    %19 = vector.shape_cast %18 : vector<1x4x4xbf16> to vector<4x4xbf16>
    %cst_20 = arith.constant dense<0.000000e+00> : vector<256x4xf32>
    %20 = tpu.matmul %17, %19, %cst_20 {dimension_numbers = #tpu.dot_dimension_numbers<[1], [0], [0], [1], [0, 0, 1, 1], [], []>} : vector<256x4xbf16>, vector<4x4xbf16>, vector<256x4xf32> -> vector<256x4xf32>
    %21 = arith.addf %14, %20 : vector<256x4xf32>
    %c0_21 = arith.constant 0 : index
    %c1_22 = arith.constant 1 : index
    %c0_23 = arith.constant 0 : index
    %c0_24 = arith.constant 0 : index
    %22 = vector.load %arg1[%c0_21, %c1_22, %c0_23, %c0_24] : memref<1x18x18x4xbf16, #tpu.memory_space<vmem>>, vector<1x16x16x4xbf16>
    %23 = vector.shape_cast %22 : vector<1x16x16x4xbf16> to vector<16x16x4xbf16>
    %24 = vector.shape_cast %23 : vector<16x16x4xbf16> to vector<256x4xbf16>
    %c3 = arith.constant 3 : index
    %c0_25 = arith.constant 0 : index
    %c0_26 = arith.constant 0 : index
    %25 = vector.load %arg2[%c3, %c0_25, %c0_26] : memref<9x4x4xbf16, #tpu.memory_space<vmem>>, vector<1x4x4xbf16>
    %26 = vector.shape_cast %25 : vector<1x4x4xbf16> to vector<4x4xbf16>
    %cst_27 = arith.constant dense<0.000000e+00> : vector<256x4xf32>
    %27 = tpu.matmul %24, %26, %cst_27 {dimension_numbers = #tpu.dot_dimension_numbers<[1], [0], [0], [1], [0, 0, 1, 1], [], []>} : vector<256x4xbf16>, vector<4x4xbf16>, vector<256x4xf32> -> vector<256x4xf32>
    %28 = arith.addf %21, %27 : vector<256x4xf32>
    %c0_28 = arith.constant 0 : index
    %c1_29 = arith.constant 1 : index
    %c1_30 = arith.constant 1 : index
    %c0_31 = arith.constant 0 : index
    %29 = vector.load %arg1[%c0_28, %c1_29, %c1_30, %c0_31] : memref<1x18x18x4xbf16, #tpu.memory_space<vmem>>, vector<1x16x16x4xbf16>
    %30 = vector.shape_cast %29 : vector<1x16x16x4xbf16> to vector<16x16x4xbf16>
    %31 = vector.shape_cast %30 : vector<16x16x4xbf16> to vector<256x4xbf16>
    %c4 = arith.constant 4 : index
    %c0_32 = arith.constant 0 : index
    %c0_33 = arith.constant 0 : index
    %32 = vector.load %arg2[%c4, %c0_32, %c0_33] : memref<9x4x4xbf16, #tpu.memory_space<vmem>>, vector<1x4x4xbf16>
    %33 = vector.shape_cast %32 : vector<1x4x4xbf16> to vector<4x4xbf16>
    %cst_34 = arith.constant dense<0.000000e+00> : vector<256x4xf32>
    %34 = tpu.matmul %31, %33, %cst_34 {dimension_numbers = #tpu.dot_dimension_numbers<[1], [0], [0], [1], [0, 0, 1, 1], [], []>} : vector<256x4xbf16>, vector<4x4xbf16>, vector<256x4xf32> -> vector<256x4xf32>
    %35 = arith.addf %28, %34 : vector<256x4xf32>
    %c0_35 = arith.constant 0 : index
    %c1_36 = arith.constant 1 : index
    %c2_37 = arith.constant 2 : index
    %c0_38 = arith.constant 0 : index
    %36 = vector.load %arg1[%c0_35, %c1_36, %c2_37, %c0_38] : memref<1x18x18x4xbf16, #tpu.memory_space<vmem>>, vector<1x16x16x4xbf16>
    %37 = vector.shape_cast %36 : vector<1x16x16x4xbf16> to vector<16x16x4xbf16>
    %38 = vector.shape_cast %37 : vector<16x16x4xbf16> to vector<256x4xbf16>
    %c5 = arith.constant 5 : index
    %c0_39 = arith.constant 0 : index
    %c0_40 = arith.constant 0 : index
    %39 = vector.load %arg2[%c5, %c0_39, %c0_40] : memref<9x4x4xbf16, #tpu.memory_space<vmem>>, vector<1x4x4xbf16>
    %40 = vector.shape_cast %39 : vector<1x4x4xbf16> to vector<4x4xbf16>
    %cst_41 = arith.constant dense<0.000000e+00> : vector<256x4xf32>
    %41 = tpu.matmul %38, %40, %cst_41 {dimension_numbers = #tpu.dot_dimension_numbers<[1], [0], [0], [1], [0, 0, 1, 1], [], []>} : vector<256x4xbf16>, vector<4x4xbf16>, vector<256x4xf32> -> vector<256x4xf32>
    %42 = arith.addf %35, %41 : vector<256x4xf32>
    %c0_42 = arith.constant 0 : index
    %c2_43 = arith.constant 2 : index
    %c0_44 = arith.constant 0 : index
    %c0_45 = arith.constant 0 : index
    %43 = vector.load %arg1[%c0_42, %c2_43, %c0_44, %c0_45] : memref<1x18x18x4xbf16, #tpu.memory_space<vmem>>, vector<1x16x16x4xbf16>
    %44 = vector.shape_cast %43 : vector<1x16x16x4xbf16> to vector<16x16x4xbf16>
    %45 = vector.shape_cast %44 : vector<16x16x4xbf16> to vector<256x4xbf16>
    %c6 = arith.constant 6 : index
    %c0_46 = arith.constant 0 : index
    %c0_47 = arith.constant 0 : index
    %46 = vector.load %arg2[%c6, %c0_46, %c0_47] : memref<9x4x4xbf16, #tpu.memory_space<vmem>>, vector<1x4x4xbf16>
    %47 = vector.shape_cast %46 : vector<1x4x4xbf16> to vector<4x4xbf16>
    %cst_48 = arith.constant dense<0.000000e+00> : vector<256x4xf32>
    %48 = tpu.matmul %45, %47, %cst_48 {dimension_numbers = #tpu.dot_dimension_numbers<[1], [0], [0], [1], [0, 0, 1, 1], [], []>} : vector<256x4xbf16>, vector<4x4xbf16>, vector<256x4xf32> -> vector<256x4xf32>
    %49 = arith.addf %42, %48 : vector<256x4xf32>
    %c0_49 = arith.constant 0 : index
    %c2_50 = arith.constant 2 : index
    %c1_51 = arith.constant 1 : index
    %c0_52 = arith.constant 0 : index
    %50 = vector.load %arg1[%c0_49, %c2_50, %c1_51, %c0_52] : memref<1x18x18x4xbf16, #tpu.memory_space<vmem>>, vector<1x16x16x4xbf16>
    %51 = vector.shape_cast %50 : vector<1x16x16x4xbf16> to vector<16x16x4xbf16>
    %52 = vector.shape_cast %51 : vector<16x16x4xbf16> to vector<256x4xbf16>
    %c7 = arith.constant 7 : index
    %c0_53 = arith.constant 0 : index
    %c0_54 = arith.constant 0 : index
    %53 = vector.load %arg2[%c7, %c0_53, %c0_54] : memref<9x4x4xbf16, #tpu.memory_space<vmem>>, vector<1x4x4xbf16>
    %54 = vector.shape_cast %53 : vector<1x4x4xbf16> to vector<4x4xbf16>
    %cst_55 = arith.constant dense<0.000000e+00> : vector<256x4xf32>
    %55 = tpu.matmul %52, %54, %cst_55 {dimension_numbers = #tpu.dot_dimension_numbers<[1], [0], [0], [1], [0, 0, 1, 1], [], []>} : vector<256x4xbf16>, vector<4x4xbf16>, vector<256x4xf32> -> vector<256x4xf32>
    %56 = arith.addf %49, %55 : vector<256x4xf32>
    %c0_56 = arith.constant 0 : index
    %c2_57 = arith.constant 2 : index
    %c2_58 = arith.constant 2 : index
    %c0_59 = arith.constant 0 : index
    %57 = vector.load %arg1[%c0_56, %c2_57, %c2_58, %c0_59] : memref<1x18x18x4xbf16, #tpu.memory_space<vmem>>, vector<1x16x16x4xbf16>
    %58 = vector.shape_cast %57 : vector<1x16x16x4xbf16> to vector<16x16x4xbf16>
    %59 = vector.shape_cast %58 : vector<16x16x4xbf16> to vector<256x4xbf16>
    %c8 = arith.constant 8 : index
    %c0_60 = arith.constant 0 : index
    %c0_61 = arith.constant 0 : index
    %60 = vector.load %arg2[%c8, %c0_60, %c0_61] : memref<9x4x4xbf16, #tpu.memory_space<vmem>>, vector<1x4x4xbf16>
    %61 = vector.shape_cast %60 : vector<1x4x4xbf16> to vector<4x4xbf16>
    %cst_62 = arith.constant dense<0.000000e+00> : vector<256x4xf32>
    %62 = tpu.matmul %59, %61, %cst_62 {dimension_numbers = #tpu.dot_dimension_numbers<[1], [0], [0], [1], [0, 0, 1, 1], [], []>} : vector<256x4xbf16>, vector<4x4xbf16>, vector<256x4xf32> -> vector<256x4xf32>
    %63 = arith.addf %56, %62 : vector<256x4xf32>
    %c0_63 = arith.constant 0 : index
    %c0_64 = arith.constant 0 : index
    %64 = vector.load %arg3[%c0_63, %c0_64] : memref<1x4xf32, #tpu.memory_space<vmem>>, vector<1x4xf32>
    %65 = vector.shape_cast %64 : vector<1x4xf32> to vector<4xf32>
    %66 = vector.shape_cast %65 : vector<4xf32> to vector<1x4xf32>
    %67 = vector.broadcast %66 : vector<1x4xf32> to vector<256x4xf32>
    %68 = arith.addf %63, %67 : vector<256x4xf32>
    %69 = vector.extract_strided_slice %68 {offsets = [0, 0], sizes = [256, 3], strides = [1, 1]} : vector<256x4xf32> to vector<256x3xf32>
    %70 = arith.negf %69 : vector<256x3xf32>
    %71 = math.exp %70 : vector<256x3xf32>
    %cst_65 = arith.constant 1.000000e+00 : f32
    %72 = vector.broadcast %cst_65 : f32 to vector<256x3xf32>
    %73 = arith.addf %72, %71 : vector<256x3xf32>
    %74 = arith.divf %72, %73 : vector<256x3xf32>
    %cst_66 = arith.constant 2.000000e+00 : f32
    %75 = vector.broadcast %cst_66 : f32 to vector<256x3xf32>
    %76 = arith.mulf %74, %75 : vector<256x3xf32>
    %cst_67 = arith.constant 1.000000e+00 : f32
    %77 = vector.broadcast %cst_67 : f32 to vector<256x3xf32>
    %78 = arith.subf %76, %77 : vector<256x3xf32>
    %79 = vector.extract_strided_slice %68 {offsets = [0, 3], sizes = [256, 1], strides = [1, 1]} : vector<256x4xf32> to vector<256x1xf32>
    %80 = arith.negf %79 : vector<256x1xf32>
    %81 = math.exp %80 : vector<256x1xf32>
    %cst_68 = arith.constant 1.000000e+00 : f32
    %82 = vector.broadcast %cst_68 : f32 to vector<256x1xf32>
    %83 = arith.addf %82, %81 : vector<256x1xf32>
    %84 = arith.divf %82, %83 : vector<256x1xf32>
    %c0_69 = arith.constant 0 : index
    %c0_70 = arith.constant 0 : index
    %c0_71 = arith.constant 0 : index
    %c0_72 = arith.constant 0 : index
    %85 = vector.load %arg4[%c0_69, %c0_70, %c0_71, %c0_72] : memref<1x16x16x3xf32, #tpu.memory_space<vmem>>, vector<1x16x16x3xf32>
    %86 = vector.shape_cast %85 : vector<1x16x16x3xf32> to vector<16x16x3xf32>
    %87 = vector.shape_cast %86 : vector<16x16x3xf32> to vector<256x3xf32>
    %88 = vector.broadcast %84 : vector<256x1xf32> to vector<256x3xf32>
    %89 = arith.mulf %87, %88 : vector<256x3xf32>
    %cst_73 = arith.constant 1.000000e+00 : f32
    %90 = vector.broadcast %cst_73 : f32 to vector<256x1xf32>
    %91 = arith.subf %90, %84 : vector<256x1xf32>
    %92 = vector.broadcast %91 : vector<256x1xf32> to vector<256x3xf32>
    %93 = arith.mulf %78, %92 : vector<256x3xf32>
    %94 = arith.addf %89, %93 : vector<256x3xf32>
    %95 = vector.shape_cast %94 : vector<256x3xf32> to vector<16x16x3xf32>
    %c0_74 = arith.constant 0 : index
    %c0_75 = arith.constant 0 : index
    %c0_76 = arith.constant 0 : index
    %c0_77 = arith.constant 0 : index
    %96 = vector.load %arg5[%c0_74, %c0_75, %c0_76, %c0_77] : memref<1x16x16x3xf32, #tpu.memory_space<vmem>>, vector<1x16x16x3xf32>
    %97 = vector.shape_cast %96 : vector<1x16x16x3xf32> to vector<16x16x3xf32>
    %98 = vector.shape_cast %95 : vector<16x16x3xf32> to vector<1x16x16x3xf32>
    tpu.vector_store %arg5[%c0_74, %c0_75, %c0_76, %c0_77], %98 {strides = array<i32>} : memref<1x16x16x3xf32, #tpu.memory_space<vmem>>, vector<1x16x16x3xf32>,
    return
  }
  func.func @transform_0(%arg0: i32) -> (i32, i32, i32, i32) {
    %c0_i32 = arith.constant 0 : i32
    %c0_i32_0 = arith.constant 0 : i32
    %c0_i32_1 = arith.constant 0 : i32
    %c0_i32_2 = arith.constant 0 : i32
    return %arg0, %c0_i32, %c0_i32_0, %c0_i32_1 : i32, i32, i32, i32
  }
  func.func @transform_1(%arg0: i32) -> (i32, i32, i32) {
    %c0_i32 = arith.constant 0 : i32
    %c0_i32_0 = arith.constant 0 : i32
    %c0_i32_1 = arith.constant 0 : i32
    %c0_i32_2 = arith.constant 0 : i32
    return %c0_i32, %c0_i32_0, %c0_i32_1 : i32, i32, i32
  }
  func.func @transform_2(%arg0: i32) -> (i32, i32) {
    %c0_i32 = arith.constant 0 : i32
    %c0_i32_0 = arith.constant 0 : i32
    %c0_i32_1 = arith.constant 0 : i32
    return %c0_i32, %c0_i32_0 : i32, i32
  }
  func.func @transform_3(%arg0: i32) -> (i32, i32, i32, i32) {
    %c0_i32 = arith.constant 0 : i32
    %c0_i32_0 = arith.constant 0 : i32
    %c0_i32_1 = arith.constant 0 : i32
    %c0_i32_2 = arith.constant 0 : i32
    return %arg0, %c0_i32, %c0_i32_0, %c0_i32_1 : i32, i32, i32, i32
  }
  func.func @transform_4(%arg0: i32) -> (i32, i32, i32, i32) {
    %c0_i32 = arith.constant 0 : i32
    %c0_i32_0 = arith.constant 0 : i32
    %c0_i32_1 = arith.constant 0 : i32
    %c0_i32_2 = arith.constant 0 : i32
    return %arg0, %c0_i32, %c0_i32_0, %c0_i32_1 : i32, i32, i32, i32
  }
}

module attributes {stable_mosaic.version = 11 : i64} {
  func.func @_deconv_band_kernel(%arg0: i32, %arg1: memref<1x10x10x16xbf16, #tpu.memory_space<vmem>>, %arg2: memref<12x16x8xbf16, #tpu.memory_space<vmem>>, %arg3: memref<1x8xf32, #tpu.memory_space<vmem>>, %arg4: memref<1x8xf32, #tpu.memory_space<vmem>>, %arg5: memref<1x8x2x8x8xbf16, #tpu.memory_space<vmem>>) attributes {dimension_semantics = [#tpu.dimension_semantics<parallel>], iteration_bounds = array<i64: 2>, scalar_prefetch = 0 : i64, scratch_operands = 0 : i64, tpu.core_type = #tpu.core_type<tc>, window_params = [{transform_indices = @transform_0, window_bounds = array<i64: 1, 10, 10, 16>}, {pipeline_mode = #tpu.pipeline_mode<synchronous>, transform_indices = @transform_1, window_bounds = array<i64: 12, 16, 8>}, {pipeline_mode = #tpu.pipeline_mode<synchronous>, transform_indices = @transform_2, window_bounds = array<i64: 1, 8>}, {pipeline_mode = #tpu.pipeline_mode<synchronous>, transform_indices = @transform_3, window_bounds = array<i64: 1, 8>}, {transform_indices = @transform_4, window_bounds = array<i64: 1, 8, 2, 8, 8>}]} {
    %cst = arith.constant 0.000000e+00 : f32
    %0 = vector.broadcast %cst : f32 to vector<64x8xf32>
    %c0 = arith.constant 0 : index
    %c0_0 = arith.constant 0 : index
    %c0_1 = arith.constant 0 : index
    %c0_2 = arith.constant 0 : index
    %1 = vector.load %arg1[%c0, %c0_0, %c0_1, %c0_2] : memref<1x10x10x16xbf16, #tpu.memory_space<vmem>>, vector<1x8x8x16xbf16>
    %2 = vector.shape_cast %1 : vector<1x8x8x16xbf16> to vector<8x8x16xbf16>
    %3 = vector.shape_cast %2 : vector<8x8x16xbf16> to vector<64x16xbf16>
    %c0_3 = arith.constant 0 : index
    %c0_4 = arith.constant 0 : index
    %c0_5 = arith.constant 0 : index
    %4 = vector.load %arg2[%c0_3, %c0_4, %c0_5] : memref<12x16x8xbf16, #tpu.memory_space<vmem>>, vector<1x16x8xbf16>
    %5 = vector.shape_cast %4 : vector<1x16x8xbf16> to vector<16x8xbf16>
    %cst_6 = arith.constant dense<0.000000e+00> : vector<64x8xf32>
    %6 = tpu.matmul %3, %5, %cst_6 {dimension_numbers = #tpu.dot_dimension_numbers<[1], [0], [0], [1], [0, 0, 1, 1], [], []>} : vector<64x16xbf16>, vector<16x8xbf16>, vector<64x8xf32> -> vector<64x8xf32>
    %7 = arith.addf %0, %6 : vector<64x8xf32>
    %c0_7 = arith.constant 0 : index
    %c0_8 = arith.constant 0 : index
    %c1 = arith.constant 1 : index
    %c0_9 = arith.constant 0 : index
    %8 = vector.load %arg1[%c0_7, %c0_8, %c1, %c0_9] : memref<1x10x10x16xbf16, #tpu.memory_space<vmem>>, vector<1x8x8x16xbf16>
    %9 = vector.shape_cast %8 : vector<1x8x8x16xbf16> to vector<8x8x16xbf16>
    %10 = vector.shape_cast %9 : vector<8x8x16xbf16> to vector<64x16xbf16>
    %c1_10 = arith.constant 1 : index
    %c0_11 = arith.constant 0 : index
    %c0_12 = arith.constant 0 : index
    %11 = vector.load %arg2[%c1_10, %c0_11, %c0_12] : memref<12x16x8xbf16, #tpu.memory_space<vmem>>, vector<1x16x8xbf16>
    %12 = vector.shape_cast %11 : vector<1x16x8xbf16> to vector<16x8xbf16>
    %cst_13 = arith.constant dense<0.000000e+00> : vector<64x8xf32>
    %13 = tpu.matmul %10, %12, %cst_13 {dimension_numbers = #tpu.dot_dimension_numbers<[1], [0], [0], [1], [0, 0, 1, 1], [], []>} : vector<64x16xbf16>, vector<16x8xbf16>, vector<64x8xf32> -> vector<64x8xf32>
    %14 = arith.addf %7, %13 : vector<64x8xf32>
    %c0_14 = arith.constant 0 : index
    %c0_15 = arith.constant 0 : index
    %c2 = arith.constant 2 : index
    %c0_16 = arith.constant 0 : index
    %15 = vector.load %arg1[%c0_14, %c0_15, %c2, %c0_16] : memref<1x10x10x16xbf16, #tpu.memory_space<vmem>>, vector<1x8x8x16xbf16>
    %16 = vector.shape_cast %15 : vector<1x8x8x16xbf16> to vector<8x8x16xbf16>
    %17 = vector.shape_cast %16 : vector<8x8x16xbf16> to vector<64x16xbf16>
    %c2_17 = arith.constant 2 : index
    %c0_18 = arith.constant 0 : index
    %c0_19 = arith.constant 0 : index
    %18 = vector.load %arg2[%c2_17, %c0_18, %c0_19] : memref<12x16x8xbf16, #tpu.memory_space<vmem>>, vector<1x16x8xbf16>
    %19 = vector.shape_cast %18 : vector<1x16x8xbf16> to vector<16x8xbf16>
    %cst_20 = arith.constant dense<0.000000e+00> : vector<64x8xf32>
    %20 = tpu.matmul %17, %19, %cst_20 {dimension_numbers = #tpu.dot_dimension_numbers<[1], [0], [0], [1], [0, 0, 1, 1], [], []>} : vector<64x16xbf16>, vector<16x8xbf16>, vector<64x8xf32> -> vector<64x8xf32>
    %21 = arith.addf %14, %20 : vector<64x8xf32>
    %c0_21 = arith.constant 0 : index
    %c1_22 = arith.constant 1 : index
    %c0_23 = arith.constant 0 : index
    %c0_24 = arith.constant 0 : index
    %22 = vector.load %arg1[%c0_21, %c1_22, %c0_23, %c0_24] : memref<1x10x10x16xbf16, #tpu.memory_space<vmem>>, vector<1x8x8x16xbf16>
    %23 = vector.shape_cast %22 : vector<1x8x8x16xbf16> to vector<8x8x16xbf16>
    %24 = vector.shape_cast %23 : vector<8x8x16xbf16> to vector<64x16xbf16>
    %c3 = arith.constant 3 : index
    %c0_25 = arith.constant 0 : index
    %c0_26 = arith.constant 0 : index
    %25 = vector.load %arg2[%c3, %c0_25, %c0_26] : memref<12x16x8xbf16, #tpu.memory_space<vmem>>, vector<1x16x8xbf16>
    %26 = vector.shape_cast %25 : vector<1x16x8xbf16> to vector<16x8xbf16>
    %cst_27 = arith.constant dense<0.000000e+00> : vector<64x8xf32>
    %27 = tpu.matmul %24, %26, %cst_27 {dimension_numbers = #tpu.dot_dimension_numbers<[1], [0], [0], [1], [0, 0, 1, 1], [], []>} : vector<64x16xbf16>, vector<16x8xbf16>, vector<64x8xf32> -> vector<64x8xf32>
    %28 = arith.addf %21, %27 : vector<64x8xf32>
    %c0_28 = arith.constant 0 : index
    %c1_29 = arith.constant 1 : index
    %c1_30 = arith.constant 1 : index
    %c0_31 = arith.constant 0 : index
    %29 = vector.load %arg1[%c0_28, %c1_29, %c1_30, %c0_31] : memref<1x10x10x16xbf16, #tpu.memory_space<vmem>>, vector<1x8x8x16xbf16>
    %30 = vector.shape_cast %29 : vector<1x8x8x16xbf16> to vector<8x8x16xbf16>
    %31 = vector.shape_cast %30 : vector<8x8x16xbf16> to vector<64x16xbf16>
    %c4 = arith.constant 4 : index
    %c0_32 = arith.constant 0 : index
    %c0_33 = arith.constant 0 : index
    %32 = vector.load %arg2[%c4, %c0_32, %c0_33] : memref<12x16x8xbf16, #tpu.memory_space<vmem>>, vector<1x16x8xbf16>
    %33 = vector.shape_cast %32 : vector<1x16x8xbf16> to vector<16x8xbf16>
    %cst_34 = arith.constant dense<0.000000e+00> : vector<64x8xf32>
    %34 = tpu.matmul %31, %33, %cst_34 {dimension_numbers = #tpu.dot_dimension_numbers<[1], [0], [0], [1], [0, 0, 1, 1], [], []>} : vector<64x16xbf16>, vector<16x8xbf16>, vector<64x8xf32> -> vector<64x8xf32>
    %35 = arith.addf %28, %34 : vector<64x8xf32>
    %c0_35 = arith.constant 0 : index
    %c1_36 = arith.constant 1 : index
    %c2_37 = arith.constant 2 : index
    %c0_38 = arith.constant 0 : index
    %36 = vector.load %arg1[%c0_35, %c1_36, %c2_37, %c0_38] : memref<1x10x10x16xbf16, #tpu.memory_space<vmem>>, vector<1x8x8x16xbf16>
    %37 = vector.shape_cast %36 : vector<1x8x8x16xbf16> to vector<8x8x16xbf16>
    %38 = vector.shape_cast %37 : vector<8x8x16xbf16> to vector<64x16xbf16>
    %c5 = arith.constant 5 : index
    %c0_39 = arith.constant 0 : index
    %c0_40 = arith.constant 0 : index
    %39 = vector.load %arg2[%c5, %c0_39, %c0_40] : memref<12x16x8xbf16, #tpu.memory_space<vmem>>, vector<1x16x8xbf16>
    %40 = vector.shape_cast %39 : vector<1x16x8xbf16> to vector<16x8xbf16>
    %cst_41 = arith.constant dense<0.000000e+00> : vector<64x8xf32>
    %41 = tpu.matmul %38, %40, %cst_41 {dimension_numbers = #tpu.dot_dimension_numbers<[1], [0], [0], [1], [0, 0, 1, 1], [], []>} : vector<64x16xbf16>, vector<16x8xbf16>, vector<64x8xf32> -> vector<64x8xf32>
    %42 = arith.addf %35, %41 : vector<64x8xf32>
    %c0_42 = arith.constant 0 : index
    %c0_43 = arith.constant 0 : index
    %43 = vector.load %arg3[%c0_42, %c0_43] : memref<1x8xf32, #tpu.memory_space<vmem>>, vector<1x8xf32>
    %44 = vector.shape_cast %43 : vector<1x8xf32> to vector<8xf32>
    %45 = vector.shape_cast %44 : vector<8xf32> to vector<1x8xf32>
    %46 = vector.broadcast %45 : vector<1x8xf32> to vector<64x8xf32>
    %47 = arith.addf %42, %46 : vector<64x8xf32>
    %cst_44 = arith.constant 0.000000e+00 : f32
    %48 = vector.broadcast %cst_44 : f32 to vector<64x8xf32>
    %49 = arith.cmpf oge, %47, %48 : vector<64x8xf32>
    %c0_45 = arith.constant 0 : index
    %c0_46 = arith.constant 0 : index
    %50 = vector.load %arg4[%c0_45, %c0_46] : memref<1x8xf32, #tpu.memory_space<vmem>>, vector<1x8xf32>
    %51 = vector.shape_cast %50 : vector<1x8xf32> to vector<8xf32>
    %52 = vector.shape_cast %51 : vector<8xf32> to vector<1x8xf32>
    %53 = vector.broadcast %52 : vector<1x8xf32> to vector<64x8xf32>
    %54 = arith.mulf %47, %53 : vector<64x8xf32>
    %55 = arith.select %49, %47, %54 : vector<64x8xi1>, vector<64x8xf32>
    %56 = vector.shape_cast %55 : vector<64x8xf32> to vector<8x8x8xf32>
    %57 = arith.truncf %56 : vector<8x8x8xf32> to vector<8x8x8xbf16>
    %c0_47 = arith.constant 0 : index
    %c0_48 = arith.constant 0 : index
    %c0_49 = arith.constant 0 : index
    %c0_50 = arith.constant 0 : index
    %c0_51 = arith.constant 0 : index
    %58 = vector.load %arg5[%c0_47, %c0_48, %c0_49, %c0_50, %c0_51] : memref<1x8x2x8x8xbf16, #tpu.memory_space<vmem>>, vector<1x8x1x8x8xbf16>
    %59 = vector.shape_cast %58 : vector<1x8x1x8x8xbf16> to vector<8x8x8xbf16>
    %60 = vector.shape_cast %57 : vector<8x8x8xbf16> to vector<1x8x1x8x8xbf16>
    tpu.vector_store %arg5[%c0_47, %c0_48, %c0_49, %c0_50, %c0_51], %60 {strides = array<i32>} : memref<1x8x2x8x8xbf16, #tpu.memory_space<vmem>>, vector<1x8x1x8x8xbf16>,
    %cst_52 = arith.constant 0.000000e+00 : f32
    %61 = vector.broadcast %cst_52 : f32 to vector<64x8xf32>
    %c0_53 = arith.constant 0 : index
    %c1_54 = arith.constant 1 : index
    %c0_55 = arith.constant 0 : index
    %c0_56 = arith.constant 0 : index
    %62 = vector.load %arg1[%c0_53, %c1_54, %c0_55, %c0_56] : memref<1x10x10x16xbf16, #tpu.memory_space<vmem>>, vector<1x8x8x16xbf16>
    %63 = vector.shape_cast %62 : vector<1x8x8x16xbf16> to vector<8x8x16xbf16>
    %64 = vector.shape_cast %63 : vector<8x8x16xbf16> to vector<64x16xbf16>
    %c6 = arith.constant 6 : index
    %c0_57 = arith.constant 0 : index
    %c0_58 = arith.constant 0 : index
    %65 = vector.load %arg2[%c6, %c0_57, %c0_58] : memref<12x16x8xbf16, #tpu.memory_space<vmem>>, vector<1x16x8xbf16>
    %66 = vector.shape_cast %65 : vector<1x16x8xbf16> to vector<16x8xbf16>
    %cst_59 = arith.constant dense<0.000000e+00> : vector<64x8xf32>
    %67 = tpu.matmul %64, %66, %cst_59 {dimension_numbers = #tpu.dot_dimension_numbers<[1], [0], [0], [1], [0, 0, 1, 1], [], []>} : vector<64x16xbf16>, vector<16x8xbf16>, vector<64x8xf32> -> vector<64x8xf32>
    %68 = arith.addf %61, %67 : vector<64x8xf32>
    %c0_60 = arith.constant 0 : index
    %c1_61 = arith.constant 1 : index
    %c1_62 = arith.constant 1 : index
    %c0_63 = arith.constant 0 : index
    %69 = vector.load %arg1[%c0_60, %c1_61, %c1_62, %c0_63] : memref<1x10x10x16xbf16, #tpu.memory_space<vmem>>, vector<1x8x8x16xbf16>
    %70 = vector.shape_cast %69 : vector<1x8x8x16xbf16> to vector<8x8x16xbf16>
    %71 = vector.shape_cast %70 : vector<8x8x16xbf16> to vector<64x16xbf16>
    %c7 = arith.constant 7 : index
    %c0_64 = arith.constant 0 : index
    %c0_65 = arith.constant 0 : index
    %72 = vector.load %arg2[%c7, %c0_64, %c0_65] : memref<12x16x8xbf16, #tpu.memory_space<vmem>>, vector<1x16x8xbf16>
    %73 = vector.shape_cast %72 : vector<1x16x8xbf16> to vector<16x8xbf16>
    %cst_66 = arith.constant dense<0.000000e+00> : vector<64x8xf32>
    %74 = tpu.matmul %71, %73, %cst_66 {dimension_numbers = #tpu.dot_dimension_numbers<[1], [0], [0], [1], [0, 0, 1, 1], [], []>} : vector<64x16xbf16>, vector<16x8xbf16>, vector<64x8xf32> -> vector<64x8xf32>
    %75 = arith.addf %68, %74 : vector<64x8xf32>
    %c0_67 = arith.constant 0 : index
    %c1_68 = arith.constant 1 : index
    %c2_69 = arith.constant 2 : index
    %c0_70 = arith.constant 0 : index
    %76 = vector.load %arg1[%c0_67, %c1_68, %c2_69, %c0_70] : memref<1x10x10x16xbf16, #tpu.memory_space<vmem>>, vector<1x8x8x16xbf16>
    %77 = vector.shape_cast %76 : vector<1x8x8x16xbf16> to vector<8x8x16xbf16>
    %78 = vector.shape_cast %77 : vector<8x8x16xbf16> to vector<64x16xbf16>
    %c8 = arith.constant 8 : index
    %c0_71 = arith.constant 0 : index
    %c0_72 = arith.constant 0 : index
    %79 = vector.load %arg2[%c8, %c0_71, %c0_72] : memref<12x16x8xbf16, #tpu.memory_space<vmem>>, vector<1x16x8xbf16>
    %80 = vector.shape_cast %79 : vector<1x16x8xbf16> to vector<16x8xbf16>
    %cst_73 = arith.constant dense<0.000000e+00> : vector<64x8xf32>
    %81 = tpu.matmul %78, %80, %cst_73 {dimension_numbers = #tpu.dot_dimension_numbers<[1], [0], [0], [1], [0, 0, 1, 1], [], []>} : vector<64x16xbf16>, vector<16x8xbf16>, vector<64x8xf32> -> vector<64x8xf32>
    %82 = arith.addf %75, %81 : vector<64x8xf32>
    %c0_74 = arith.constant 0 : index
    %c2_75 = arith.constant 2 : index
    %c0_76 = arith.constant 0 : index
    %c0_77 = arith.constant 0 : index
    %83 = vector.load %arg1[%c0_74, %c2_75, %c0_76, %c0_77] : memref<1x10x10x16xbf16, #tpu.memory_space<vmem>>, vector<1x8x8x16xbf16>
    %84 = vector.shape_cast %83 : vector<1x8x8x16xbf16> to vector<8x8x16xbf16>
    %85 = vector.shape_cast %84 : vector<8x8x16xbf16> to vector<64x16xbf16>
    %c9 = arith.constant 9 : index
    %c0_78 = arith.constant 0 : index
    %c0_79 = arith.constant 0 : index
    %86 = vector.load %arg2[%c9, %c0_78, %c0_79] : memref<12x16x8xbf16, #tpu.memory_space<vmem>>, vector<1x16x8xbf16>
    %87 = vector.shape_cast %86 : vector<1x16x8xbf16> to vector<16x8xbf16>
    %cst_80 = arith.constant dense<0.000000e+00> : vector<64x8xf32>
    %88 = tpu.matmul %85, %87, %cst_80 {dimension_numbers = #tpu.dot_dimension_numbers<[1], [0], [0], [1], [0, 0, 1, 1], [], []>} : vector<64x16xbf16>, vector<16x8xbf16>, vector<64x8xf32> -> vector<64x8xf32>
    %89 = arith.addf %82, %88 : vector<64x8xf32>
    %c0_81 = arith.constant 0 : index
    %c2_82 = arith.constant 2 : index
    %c1_83 = arith.constant 1 : index
    %c0_84 = arith.constant 0 : index
    %90 = vector.load %arg1[%c0_81, %c2_82, %c1_83, %c0_84] : memref<1x10x10x16xbf16, #tpu.memory_space<vmem>>, vector<1x8x8x16xbf16>
    %91 = vector.shape_cast %90 : vector<1x8x8x16xbf16> to vector<8x8x16xbf16>
    %92 = vector.shape_cast %91 : vector<8x8x16xbf16> to vector<64x16xbf16>
    %c10 = arith.constant 10 : index
    %c0_85 = arith.constant 0 : index
    %c0_86 = arith.constant 0 : index
    %93 = vector.load %arg2[%c10, %c0_85, %c0_86] : memref<12x16x8xbf16, #tpu.memory_space<vmem>>, vector<1x16x8xbf16>
    %94 = vector.shape_cast %93 : vector<1x16x8xbf16> to vector<16x8xbf16>
    %cst_87 = arith.constant dense<0.000000e+00> : vector<64x8xf32>
    %95 = tpu.matmul %92, %94, %cst_87 {dimension_numbers = #tpu.dot_dimension_numbers<[1], [0], [0], [1], [0, 0, 1, 1], [], []>} : vector<64x16xbf16>, vector<16x8xbf16>, vector<64x8xf32> -> vector<64x8xf32>
    %96 = arith.addf %89, %95 : vector<64x8xf32>
    %c0_88 = arith.constant 0 : index
    %c2_89 = arith.constant 2 : index
    %c2_90 = arith.constant 2 : index
    %c0_91 = arith.constant 0 : index
    %97 = vector.load %arg1[%c0_88, %c2_89, %c2_90, %c0_91] : memref<1x10x10x16xbf16, #tpu.memory_space<vmem>>, vector<1x8x8x16xbf16>
    %98 = vector.shape_cast %97 : vector<1x8x8x16xbf16> to vector<8x8x16xbf16>
    %99 = vector.shape_cast %98 : vector<8x8x16xbf16> to vector<64x16xbf16>
    %c11 = arith.constant 11 : index
    %c0_92 = arith.constant 0 : index
    %c0_93 = arith.constant 0 : index
    %100 = vector.load %arg2[%c11, %c0_92, %c0_93] : memref<12x16x8xbf16, #tpu.memory_space<vmem>>, vector<1x16x8xbf16>
    %101 = vector.shape_cast %100 : vector<1x16x8xbf16> to vector<16x8xbf16>
    %cst_94 = arith.constant dense<0.000000e+00> : vector<64x8xf32>
    %102 = tpu.matmul %99, %101, %cst_94 {dimension_numbers = #tpu.dot_dimension_numbers<[1], [0], [0], [1], [0, 0, 1, 1], [], []>} : vector<64x16xbf16>, vector<16x8xbf16>, vector<64x8xf32> -> vector<64x8xf32>
    %103 = arith.addf %96, %102 : vector<64x8xf32>
    %c0_95 = arith.constant 0 : index
    %c0_96 = arith.constant 0 : index
    %104 = vector.load %arg3[%c0_95, %c0_96] : memref<1x8xf32, #tpu.memory_space<vmem>>, vector<1x8xf32>
    %105 = vector.shape_cast %104 : vector<1x8xf32> to vector<8xf32>
    %106 = vector.shape_cast %105 : vector<8xf32> to vector<1x8xf32>
    %107 = vector.broadcast %106 : vector<1x8xf32> to vector<64x8xf32>
    %108 = arith.addf %103, %107 : vector<64x8xf32>
    %cst_97 = arith.constant 0.000000e+00 : f32
    %109 = vector.broadcast %cst_97 : f32 to vector<64x8xf32>
    %110 = arith.cmpf oge, %108, %109 : vector<64x8xf32>
    %c0_98 = arith.constant 0 : index
    %c0_99 = arith.constant 0 : index
    %111 = vector.load %arg4[%c0_98, %c0_99] : memref<1x8xf32, #tpu.memory_space<vmem>>, vector<1x8xf32>
    %112 = vector.shape_cast %111 : vector<1x8xf32> to vector<8xf32>
    %113 = vector.shape_cast %112 : vector<8xf32> to vector<1x8xf32>
    %114 = vector.broadcast %113 : vector<1x8xf32> to vector<64x8xf32>
    %115 = arith.mulf %108, %114 : vector<64x8xf32>
    %116 = arith.select %110, %108, %115 : vector<64x8xi1>, vector<64x8xf32>
    %117 = vector.shape_cast %116 : vector<64x8xf32> to vector<8x8x8xf32>
    %118 = arith.truncf %117 : vector<8x8x8xf32> to vector<8x8x8xbf16>
    %c0_100 = arith.constant 0 : index
    %c0_101 = arith.constant 0 : index
    %c1_102 = arith.constant 1 : index
    %c0_103 = arith.constant 0 : index
    %c0_104 = arith.constant 0 : index
    %119 = vector.load %arg5[%c0_100, %c0_101, %c1_102, %c0_103, %c0_104] : memref<1x8x2x8x8xbf16, #tpu.memory_space<vmem>>, vector<1x8x1x8x8xbf16>
    %120 = vector.shape_cast %119 : vector<1x8x1x8x8xbf16> to vector<8x8x8xbf16>
    %121 = vector.shape_cast %118 : vector<8x8x8xbf16> to vector<1x8x1x8x8xbf16>
    tpu.vector_store %arg5[%c0_100, %c0_101, %c1_102, %c0_103, %c0_104], %121 {strides = array<i32>} : memref<1x8x2x8x8xbf16, #tpu.memory_space<vmem>>, vector<1x8x1x8x8xbf16>,
    return
  }
  func.func @transform_0(%arg0: i32) -> (i32, i32, i32, i32) {
    %c0_i32 = arith.constant 0 : i32
    %c0_i32_0 = arith.constant 0 : i32
    %c0_i32_1 = arith.constant 0 : i32
    %c0_i32_2 = arith.constant 0 : i32
    return %arg0, %c0_i32, %c0_i32_0, %c0_i32_1 : i32, i32, i32, i32
  }
  func.func @transform_1(%arg0: i32) -> (i32, i32, i32) {
    %c0_i32 = arith.constant 0 : i32
    %c0_i32_0 = arith.constant 0 : i32
    %c0_i32_1 = arith.constant 0 : i32
    %c0_i32_2 = arith.constant 0 : i32
    return %c0_i32, %c0_i32_0, %c0_i32_1 : i32, i32, i32
  }
  func.func @transform_2(%arg0: i32) -> (i32, i32) {
    %c0_i32 = arith.constant 0 : i32
    %c0_i32_0 = arith.constant 0 : i32
    %c0_i32_1 = arith.constant 0 : i32
    return %c0_i32, %c0_i32_0 : i32, i32
  }
  func.func @transform_3(%arg0: i32) -> (i32, i32) {
    %c0_i32 = arith.constant 0 : i32
    %c0_i32_0 = arith.constant 0 : i32
    %c0_i32_1 = arith.constant 0 : i32
    return %c0_i32, %c0_i32_0 : i32, i32
  }
  func.func @transform_4(%arg0: i32) -> (i32, i32, i32, i32, i32) {
    %c0_i32 = arith.constant 0 : i32
    %c0_i32_0 = arith.constant 0 : i32
    %c0_i32_1 = arith.constant 0 : i32
    %c0_i32_2 = arith.constant 0 : i32
    %c0_i32_3 = arith.constant 0 : i32
    return %arg0, %c0_i32, %c0_i32_0, %c0_i32_1, %c0_i32_2 : i32, i32, i32, i32, i32
  }
}

</mosaic_0001>

<bundles_post_ra>
// kernel: tile.43
= control target key start
LH: loop header
LB: loop body
LE: loop exit
PB: predicated region body
PF: predicated region fallthrough
CT: control target
= control target key end

     0   :  { %s22_s0 = inlined_call_operand.vmem [shape: f32[32], index: 0, kind: input, shape index: {}]   ;;  %s23_s1 = inlined_call_operand.vmem [shape: f32[2,32], index: 1, kind: output, shape index: {}]  }
   0x1   :  { %v4_v0 = vld [vmem:[%s22_s0] ss:$0 sm:$0xff] }
   0x2   :  { %5 = vst [vmem:[%s23_s1] sm:$0x3] %v4_v0 }

// kernel: tile.48
= control target key start
LH: loop header
LB: loop body
LE: loop exit
PB: predicated region body
PF: predicated region fallthrough
CT: control target
= control target key end

     0   :  { %vm7_vm0 = vcmask 261120   ;;  %vm13_vm1 = vcmask 523520   ;;  %s39_s0 = inlined_call_operand.vmem [shape: f32[2,32], index: 0, kind: input, shape index: {}]   ;;  %s40_s1 = inlined_call_operand.vmem [shape: f32[1,64], index: 1, kind: output, shape index: {}]  }
   0x1   :  { %v4_v0 = vld [vmem:[%s39_s0] sm:$0x3]  ;;  %s22_s0 = smov 32  }
   0x2   :  { %5 = vst [vmem:[#allocation1] sm:$0x3] %v4_v0 }
   0x9   :  { %v10_v1 = vld [vmem:[#allocation1 + $0x1] sm:$0x1]   ;;  %v6_v2 = vld [vmem:[#allocation1] sm:$0x1]  }
   0xa   :  { %11 = vrot.lane.b32.xlu0 %v10_v1, %s22_s0  ;;  %8 = vst.msk [vmem:[#allocation0] sm:$0x1] %vm7_vm0, %v6_v2  }
  0x7c   :  { %v12_v3 = vpop.permute.xlu0 %11  }
  0x7d   :  { %14 = vst.msk [vmem:[#allocation0] sm:$0x1] %vm13_vm1, %v12_v3  }
  0x84   :  { %v18_v4 = vld [vmem:[#allocation0] sm:$0x1] }
  0x85   :  { %20 = vst [vmem:[%s40_s1] sm:$0x1] %v18_v4 }

// kernel: tile.53
= control target key start
LH: loop header
LB: loop body
LE: loop exit
PB: predicated region body
PF: predicated region fallthrough
CT: control target
= control target key end

     0   :  { %s22_s0 = inlined_call_operand.vmem [shape: f32[16], index: 0, kind: input, shape index: {}]   ;;  %s23_s1 = inlined_call_operand.vmem [shape: f32[2,16], index: 1, kind: output, shape index: {}]  }
   0x1   :  { %v4_v0 = vld [vmem:[%s22_s0] ss:$0 sm:$0xff] }
   0x2   :  { %5 = vst [vmem:[%s23_s1] sm:$0x3] %v4_v0 }

// kernel: tile.58
= control target key start
LH: loop header
LB: loop body
LE: loop exit
PB: predicated region body
PF: predicated region fallthrough
CT: control target
= control target key end

     0   :  { %vm7_vm0 = vcmask 130048   ;;  %vm13_vm1 = vcmask 261248   ;;  %s39_s0 = inlined_call_operand.vmem [shape: f32[2,16], index: 0, kind: input, shape index: {}]   ;;  %s40_s1 = inlined_call_operand.vmem [shape: f32[1,32], index: 1, kind: output, shape index: {}]  }
   0x1   :  { %v4_v0 = vld [vmem:[%s39_s0] sm:$0x3]  ;;  %s22_s0 = smov 16  }
   0x2   :  { %5 = vst [vmem:[#allocation1] sm:$0x3] %v4_v0 }
   0x9   :  { %v10_v1 = vld [vmem:[#allocation1 + $0x1] sm:$0x1]   ;;  %v6_v2 = vld [vmem:[#allocation1] sm:$0x1]  }
   0xa   :  { %11 = vrot.lane.b32.xlu0 %v10_v1, %s22_s0  ;;  %8 = vst.msk [vmem:[#allocation0] sm:$0x1] %vm7_vm0, %v6_v2  }
  0x7c   :  { %v12_v3 = vpop.permute.xlu0 %11  }
  0x7d   :  { %14 = vst.msk [vmem:[#allocation0] sm:$0x1] %vm13_vm1, %v12_v3  }
  0x84   :  { %v18_v4 = vld [vmem:[#allocation0] sm:$0x1] }
  0x85   :  { %20 = vst [vmem:[%s40_s1] sm:$0x1] %v18_v4 }

// kernel: tile.63
= control target key start
LH: loop header
LB: loop body
LE: loop exit
PB: predicated region body
PF: predicated region fallthrough
CT: control target
= control target key end

     0   :  { %s22_s0 = inlined_call_operand.vmem [shape: f32[8], index: 0, kind: input, shape index: {}]   ;;  %s23_s1 = inlined_call_operand.vmem [shape: f32[2,8], index: 1, kind: output, shape index: {}]  }
   0x1   :  { %v4_v0 = vld [vmem:[%s22_s0] ss:$0 sm:$0xff] }
   0x2   :  { %5 = vst [vmem:[%s23_s1] sm:$0x3] %v4_v0 }

// kernel: tile.68
= control target key start
LH: loop header
LB: loop body
LE: loop exit
PB: predicated region body
PF: predicated region fallthrough
CT: control target
= control target key end

     0   :  { %vm7_vm0 = vcmask 64512   ;;  %vm13_vm1 = vcmask 130112   ;;  %s39_s0 = inlined_call_operand.vmem [shape: f32[2,8], index: 0, kind: input, shape index: {}]   ;;  %s40_s1 = inlined_call_operand.vmem [shape: f32[1,16], index: 1, kind: output, shape index: {}]  }
   0x1   :  { %v4_v0 = vld [vmem:[%s39_s0] sm:$0x3]  ;;  %s22_s0 = smov 8  }
   0x2   :  { %5 = vst [vmem:[#allocation1] sm:$0x3] %v4_v0 }
   0x9   :  { %v10_v1 = vld [vmem:[#allocation1 + $0x1] sm:$0x1]   ;;  %v6_v2 = vld [vmem:[#allocation1] sm:$0x1]  }
   0xa   :  { %11 = vrot.lane.b32.xlu0 %v10_v1, %s22_s0  ;;  %8 = vst.msk [vmem:[#allocation0] sm:$0x1] %vm7_vm0, %v6_v2  }
  0x7c   :  { %v12_v3 = vpop.permute.xlu0 %11  }
  0x7d   :  { %14 = vst.msk [vmem:[#allocation0] sm:$0x1] %vm13_vm1, %v12_v3  }
  0x84   :  { %v18_v4 = vld [vmem:[#allocation0] sm:$0x1] }
  0x85   :  { %20 = vst [vmem:[%s40_s1] sm:$0x1] %v18_v4 }

// kernel: tile.73
= control target key start
LH: loop header
LB: loop body
LE: loop exit
PB: predicated region body
PF: predicated region fallthrough
CT: control target
= control target key end

     0   :  { %s22_s0 = inlined_call_operand.vmem [shape: f32[4], index: 0, kind: input, shape index: {}]   ;;  %s23_s1 = inlined_call_operand.vmem [shape: f32[2,4], index: 1, kind: output, shape index: {}]  }
   0x1   :  { %v4_v0 = vld [vmem:[%s22_s0] ss:$0 sm:$0xff] }
   0x2   :  { %5 = vst [vmem:[%s23_s1] sm:$0x3] %v4_v0 }

// kernel: tile.78
= control target key start
LH: loop header
LB: loop body
LE: loop exit
PB: predicated region body
PF: predicated region fallthrough
CT: control target
= control target key end

     0   :  { %vm7_vm0 = vcmask 31744   ;;  %vm13_vm1 = vcmask 64544   ;;  %s39_s0 = inlined_call_operand.vmem [shape: f32[2,4], index: 0, kind: input, shape index: {}]   ;;  %s40_s1 = inlined_call_operand.vmem [shape: f32[1,8], index: 1, kind: output, shape index: {}]  }
   0x1   :  { %v4_v0 = vld [vmem:[%s39_s0] sm:$0x3]  ;;  %s22_s0 = smov 4  }
   0x2   :  { %5 = vst [vmem:[#allocation1] sm:$0x3] %v4_v0 }
   0x9   :  { %v10_v1 = vld [vmem:[#allocation1 + $0x1] sm:$0x1]   ;;  %v6_v2 = vld [vmem:[#allocation1] sm:$0x1]  }
   0xa   :  { %11 = vrot.lane.b32.xlu0 %v10_v1, %s22_s0  ;;  %8 = vst.msk [vmem:[#allocation0] sm:$0x1] %vm7_vm0, %v6_v2  }
  0x7c   :  { %v12_v3 = vpop.permute.xlu0 %11  }
  0x7d   :  { %14 = vst.msk [vmem:[#allocation0] sm:$0x1] %vm13_vm1, %v12_v3  }
  0x84   :  { %v18_v4 = vld [vmem:[#allocation0] sm:$0x1] }
  0x85   :  { %20 = vst [vmem:[%s40_s1] sm:$0x1] %v18_v4 }

</bundles_post_ra>
